<compile_context>
chip_gen: v7x
topology: tpu7x:2x2x1
jax: 0.10.0
libtpu: 0.0.40
codegen_flags: <defaults>
</compile_context>

<pallas_src>
import math

import jax
import jax.numpy as jnp
from jax.experimental import pallas as pl
from jax.experimental.pallas import tpu as pltpu

NEG_SLOPE = 0.01           # PyTorch F.leaky_relu default negative_slope
PW = 14                    # width of every flattened activation row (84 / (3*2))

# Valid flat lengths (valid_rows * PW) of each conv output, and padded scratch
# lengths so that every shift-trick slice stays in bounds (max shift + length).
M1, M2, M3, M4 = 13 * PW, 11 * PW, 9 * PW, 7 * PW      # 182, 154, 126, 98
L0, L1, L2, L3 = 15 * PW, 14 * PW, 12 * PW, 10 * PW    # 210, 196, 168, 140

K1 = 49 * 8                # conv1: 7x7 taps, cin 4 zero-padded to 8 (aligned stores)
K2 = 25 * 16               # conv2: 5x5 taps, cin 16
K3 = 9 * 32                # conv3: 3x3 taps, cin 32
K4 = 9 * 32                # conv4: 3x3 taps, cin 32


# ------------------------------ fused kernel --------------------------------

def _embedding_net_kernel(xp_ref, w1_ref, b1_ref, w2_ref, b2_ref, w3_ref, b3_ref,
                          w4_ref, b4_ref, fw1_ref, fb1_ref, fwmu_ref, fbmu_ref,
                          fw2_ref, fb2_ref,
                          mu_ref, r_ref,
                          x1s, o1s, x2s, o2s, x3s, o3s, x4s, o4s):
    f32 = jnp.float32

    def leaky(v):
        return jnp.where(v > 0, v, NEG_SLOPE * v)

    # The trailing "spill" columns of the conv-output scratches are read (for
    # garbage output columns only, which never reach valid results) before they
    # are written; keep them finite so 0-weights can mask them in the head.
    o1s[...] = jnp.zeros((2, 2, 16, L1), f32)
    o2s[...] = jnp.zeros((32, L2), f32)
    o3s[...] = jnp.zeros((32, L3), f32)

    # ---- conv1: 7x7 stride 3, 4->16, emitted per stride-2 output phase --------
    # Input is the stride-6 phase decomposition: xp[u, v*8+c, r*14+s] = x[c,6r+u,6s+v].
    for al in range(2):                 # output-row phase (for conv2's stride 2)
        for be in range(2):             # output-col phase
            for i in range(7):
                ta = 3 * al + i
                u, a = ta % 6, ta // 6
                j = 0
                while j < 7:            # group taps sharing the same column shift
                    tb = 3 * be + j
                    v, b = tb % 6, tb // 6
                    nv = min(7 - j, 6 - v)
                    d = a * PW + b
                    x1s[pl.ds((i * 7 + j) * 8, nv * 8), :] = (
                        xp_ref[0, u, pl.ds(v * 8, nv * 8), pl.ds(d, M1)])
                    j += nv
            y = jnp.dot(w1_ref[...], x1s[...], preferred_element_type=f32)
            o1s[al, be, :, 0:M1] = leaky(y + b1_ref[...])

    # ---- conv2: 5x5 stride 2, 16->32 -------------------------------------------
    for k in range(5):
        for l in range(5):
            d = (k // 2) * PW + (l // 2)
            x2s[pl.ds((k * 5 + l) * 16, 16), :] = o1s[k % 2, l % 2, :, pl.ds(d, M2)]
    y = jnp.dot(w2_ref[...], x2s[...], preferred_element_type=f32)
    o2s[:, 0:M2] = leaky(y + b2_ref[...])

    # ---- conv3: 3x3 stride 1, 32->32 -------------------------------------------
    for i in range(3):
        for j in range(3):
            x3s[pl.ds((i * 3 + j) * 32, 32), :] = o2s[:, pl.ds(i * PW + j, M3)]
    y = jnp.dot(w3_ref[...], x3s[...], preferred_element_type=f32)
    o3s[:, 0:M3] = leaky(y + b3_ref[...])

    # ---- conv4: 3x3 stride 1, 32->16 -------------------------------------------
    for i in range(3):
        for j in range(3):
            x4s[pl.ds((i * 3 + j) * 32, 32), :] = o3s[:, pl.ds(i * PW + j, M4)]
    y = jnp.dot(w4_ref[...], x4s[...], preferred_element_type=f32)
    o4s[...] = leaky(y + b4_ref[...])

    # ---- head: fc1 -> leaky -> fc_mu -> fc2 (VPU reduction) --------------------
    # fc1 is applied per conv4-channel; garbage columns of o4s hit zero weights.
    h = fb1_ref[...]                                            # [1, inter]
    for c in range(16):
        h = h + jnp.dot(o4s[c:c + 1, :], fw1_ref[c], preferred_element_type=f32)
    h = leaky(h)
    mu = jnp.dot(h, fwmu_ref[...], preferred_element_type=f32) + fbmu_ref[...]
    r = jnp.sum(mu * fw2_ref[...], axis=1, keepdims=True) + fb2_ref[...]
    mu_ref[...] = mu.reshape(1, 1, -1)
    r_ref[...] = r.reshape(1, 1, 1)


# ------------------------------ wrappers -------------------------------------

def _prep_phases(frames):
    """[N, 84, 84, 4] -> [N, 6, 48, L0] f32 stride-6 phase decomposition (1x data).

    Layout: [frame, row-phase u, col-phase v * 8 + channel, 14*14 flat spatial],
    channels zero-padded 4->8 so every in-kernel patch-row store is 8-aligned.
    """
    n = frames.shape[0]
    x = jnp.transpose(frames, (0, 3, 1, 2)).astype(jnp.float32)   # [N, 4, 84, 84]
    x = x.reshape(n, 4, 14, 6, 14, 6)                             # y = 6r+u, z = 6s+v
    x = jnp.transpose(x, (0, 3, 5, 1, 2, 4))                      # [N, u, v, c, r, s]
    x = jnp.pad(x, ((0, 0), (0, 0), (0, 0), (0, 4), (0, 0), (0, 0)))
    x = x.reshape(n, 6, 48, 196)
    return jnp.pad(x, ((0, 0), (0, 0), (0, 0), (0, L0 - 196)))


def embed_frames(params, frames):
    """Fused network on a batch of frames: -> (mu [N, D], per-frame reward [N])."""
    n = frames.shape[0]
    xp = _prep_phases(frames)
    inter = params["fc1_w"].shape[2]
    dims = params["fc_mu_w"].shape[1]

    def full_spec(shape):
        zeros = (0,) * len(shape)
        return pl.BlockSpec(shape, lambda f: zeros)

    flops_per_frame = 2 * (4 * 16 * K1 * M1 + 32 * K2 * M2 + 32 * K3 * M3
                           + 16 * K4 * M4 + 16 * M4 * inter + inter * dims)
    weight_bytes = 4 * (16 * K1 + 32 * K2 + 32 * K3 + 16 * K4 + 16 * M4 * inter
                        + inter * dims + 2 * inter + 3 * dims + 100)
    cost = pl.CostEstimate(flops=int(n * flops_per_frame), transcendentals=0,
                           bytes_accessed=int(xp.size * 4 + weight_bytes
                                              + n * (dims + 1) * 4))

    mu, r = pl.pallas_call(
        _embedding_net_kernel,
        out_shape=(jax.ShapeDtypeStruct((n, 1, dims), jnp.float32),
                   jax.ShapeDtypeStruct((n, 1, 1), jnp.float32)),
        grid=(n,),
        in_specs=[
            pl.BlockSpec((1, 6, 48, L0), lambda f: (f, 0, 0, 0)),   # per-frame input
            full_spec((16, K1)), full_spec((16, 1)),                # conv1
            full_spec((32, K2)), full_spec((32, 1)),                # conv2
            full_spec((32, K3)), full_spec((32, 1)),                # conv3
            full_spec((16, K4)), full_spec((16, 1)),                # conv4
            full_spec((16, M4, inter)), full_spec((1, inter)),      # fc1
            full_spec((inter, dims)), full_spec((1, dims)),         # fc_mu
            full_spec((1, dims)), full_spec((1, 1)),                # fc2
        ],
        out_specs=(pl.BlockSpec((1, 1, dims), lambda f: (f, 0, 0)),
                   pl.BlockSpec((1, 1, 1), lambda f: (f, 0, 0))),
        scratch_shapes=[
            pltpu.VMEM((K1, M1), jnp.float32),         # conv1 patch matrix
            pltpu.VMEM((2, 2, 16, L1), jnp.float32),   # conv1 output, 4 phases
            pltpu.VMEM((K2, M2), jnp.float32),         # conv2 patch matrix
            pltpu.VMEM((32, L2), jnp.float32),         # conv2 output
            pltpu.VMEM((K3, M3), jnp.float32),         # conv3 patch matrix
            pltpu.VMEM((32, L3), jnp.float32),         # conv3 output
            pltpu.VMEM((K4, M4), jnp.float32),         # conv4 patch matrix
            pltpu.VMEM((16, M4), jnp.float32),         # conv4 output
        ],
        compiler_params=pltpu.CompilerParams(dimension_semantics=("parallel",)),
        cost_estimate=cost,
    )(xp,
      params["conv1_w"], params["conv1_b"], params["conv2_w"], params["conv2_b"],
      params["conv3_w"], params["conv3_b"], params["conv4_w"], params["conv4_b"],
      params["fc1_w"], params["fc1_b"], params["fc_mu_w"], params["fc_mu_b"],
      params["fc2_w"], params["fc2_b"])
    return mu[:, 0, :], r[:, 0, 0]


def cum_return(params, traj):
    mu, r = embed_frames(params, traj)
    # TODO(synk): the reference cum_return returns only sum_rewards although
    # forward() unpacks three values; we return the evident intent.
    return jnp.sum(r), jnp.sum(jnp.abs(r)), mu


def forward(params, traj_i, traj_j):
    ni = traj_i.shape[0]
    frames = jnp.concatenate([traj_i, traj_j], axis=0)   # batch both trajectories
    mu, r = embed_frames(params, frames)
    cum_i, cum_j = jnp.sum(r[:ni]), jnp.sum(r[ni:])
    abs_sum = jnp.sum(jnp.abs(r[:ni])) + jnp.sum(jnp.abs(r[ni:]))
    logits = jnp.stack([cum_i, cum_j], axis=0)
    return logits, abs_sum, mu[:ni], mu[ni:]


# ------------------------------ parameters ----------------------------------

def init_logical_params(key, encoding_dims):
    """PyTorch-layout f32 parameters (Conv2d: [cout,cin,kh,kw], Linear: [out,in])."""
    inter = min(784, max(64, encoding_dims * 2))

    def conv_init(k, cout, cin, kh, kw):
        k1, k2 = jax.random.split(k)
        bound = 1.0 / math.sqrt(cin * kh * kw)
        w = jax.random.uniform(k1, (cout, cin, kh, kw), jnp.float32, -bound, bound)
        b = jax.random.uniform(k2, (cout,), jnp.float32, -bound, bound)
        return w, b

    def lin_init(k, fout, fin):
        k1, k2 = jax.random.split(k)
        bound = 1.0 / math.sqrt(fin)
        w = jax.random.uniform(k1, (fout, fin), jnp.float32, -bound, bound)
        b = jax.random.uniform(k2, (fout,), jnp.float32, -bound, bound)
        return w, b

    ks = jax.random.split(key, 7)
    return {
        "conv1": conv_init(ks[0], 16, 4, 7, 7),
        "conv2": conv_init(ks[1], 32, 16, 5, 5),
        "conv3": conv_init(ks[2], 32, 32, 3, 3),
        "conv4": conv_init(ks[3], 16, 32, 3, 3),
        "fc1": lin_init(ks[4], inter, 784),
        "fc_mu": lin_init(ks[5], encoding_dims, inter),
        "fc2": lin_init(ks[6], 1, encoding_dims),
    }


def pack_params(logical):
    """Repack logical weights into the kernel's matmul layouts (all f32)."""
    def pack_conv(w, b, pad_cin_to=None):
        cout, cin, kh, kw = w.shape
        wt = jnp.transpose(w, (0, 2, 3, 1))                 # [cout, kh, kw, cin]
        if pad_cin_to is not None and pad_cin_to > cin:
            wt = jnp.pad(wt, ((0, 0), (0, 0), (0, 0), (0, pad_cin_to - cin)))
            cin = pad_cin_to
        return wt.reshape(cout, kh * kw * cin), b.reshape(cout, 1)

    p = {}
    p["conv1_w"], p["conv1_b"] = pack_conv(*logical["conv1"], pad_cin_to=8)
    p["conv2_w"], p["conv2_b"] = pack_conv(*logical["conv2"])
    p["conv3_w"], p["conv3_b"] = pack_conv(*logical["conv3"])
    p["conv4_w"], p["conv4_b"] = pack_conv(*logical["conv4"])

    w1, b1 = logical["fc1"]                                  # [inter, 784], [inter]
    inter = w1.shape[0]
    wt = w1.T.reshape(16, 7, 7, inter)                       # [c, oy, ox, inter]
    wt = jnp.pad(wt, ((0, 0), (0, 0), (0, PW - 7), (0, 0))) # zero cols mask garbage
    p["fc1_w"] = wt.reshape(16, M4, inter)
    p["fc1_b"] = b1.reshape(1, inter)

    wmu, bmu = logical["fc_mu"]
    p["fc_mu_w"] = wmu.T                                     # [inter, D]
    p["fc_mu_b"] = bmu.reshape(1, -1)

    w2, b2 = logical["fc2"]
    p["fc2_w"] = w2.reshape(1, -1)                           # [1, D]
    p["fc2_b"] = b2.reshape(1, 1)
    return p


# ------------------------------ pure-JAX reference ---------------------------

def _reference_forward(logical, traj_i, traj_j):
    hp = jax.lax.Precision.HIGHEST

    def leaky(v):
        return jnp.where(v > 0, v, NEG_SLOPE * v)

    def conv(x, w, b, s):
        y = jax.lax.conv_general_dilated(
            x, w, (s, s), "VALID",
            dimension_numbers=("NCHW", "OIHW", "NCHW"), precision=hp)
        return y + b.reshape(1, -1, 1, 1)

    def cum(traj):
        x = jnp.transpose(traj, (0, 3, 1, 2))
        x = leaky(conv(x, *logical["conv1"], 3))
        x = leaky(conv(x, *logical["conv2"], 2))
        x = leaky(conv(x, *logical["conv3"], 1))
        x = leaky(conv(x, *logical["conv4"], 1))
        x = x.reshape(-1, 784)
        w, b = logical["fc1"]
        h = leaky(jnp.dot(x, w.T, precision=hp) + b)
        w, b = logical["fc_mu"]
        mu = jnp.dot(h, w.T, precision=hp) + b
        w, b = logical["fc2"]
        r = jnp.dot(mu, w.T, precision=hp) + b
        return jnp.sum(r), jnp.sum(jnp.abs(r)), mu

    si, ai, m1 = cum(traj_i)
    sj, aj, m2 = cum(traj_j)
    return jnp.stack([si, sj]), ai + aj, m1, m2


# ------------------------------ demo -----------------------------------------

if __name__ == "__main__":
    ENCODING_DIMS = 32
    key = jax.random.PRNGKey(0)
    kp, ki, kj = jax.random.split(key, 3)
    logical = init_logical_params(kp, ENCODING_DIMS)
    params = pack_params(logical)

    # 2 frames per trajectory; 84x84x4 frames (spatial forced by the 784 flatten).
    traj_i = jax.random.uniform(ki, (2, 84, 84, 4), jnp.float32)
    traj_j = jax.random.uniform(kj, (2, 84, 84, 4), jnp.float32)

    out = jax.block_until_ready(jax.jit(forward)(params, traj_i, traj_j))
    logits, abs_sum, mu1, mu2 = out

    assert logits.shape == (2,)
    assert abs_sum.shape == ()
    assert mu1.shape == (2, ENCODING_DIMS)
    assert mu2.shape == (2, ENCODING_DIMS)
    assert bool(jnp.all(jnp.isfinite(logits)))

    # Validate the fused kernel against an f32 pure-JAX reference.
    ref = jax.block_until_ready(jax.jit(_reference_forward)(logical, traj_i, traj_j))
    for got, want in zip(out, ref):
        assert bool(jnp.allclose(got, want, rtol=2e-3, atol=2e-3)), (got, want)

    print("KERNEL_OK")
</pallas_src>

<mosaic_0001>
module attributes {stable_mosaic.version = 11 : i64} {
  func.func @_embedding_net_kernel(%arg0: i32, %arg1: memref<1x6x48x210xf32, #tpu.memory_space<vmem>>, %arg2: memref<16x392xf32, #tpu.memory_space<vmem>>, %arg3: memref<16x1xf32, #tpu.memory_space<vmem>>, %arg4: memref<32x400xf32, #tpu.memory_space<vmem>>, %arg5: memref<32x1xf32, #tpu.memory_space<vmem>>, %arg6: memref<32x288xf32, #tpu.memory_space<vmem>>, %arg7: memref<32x1xf32, #tpu.memory_space<vmem>>, %arg8: memref<16x288xf32, #tpu.memory_space<vmem>>, %arg9: memref<16x1xf32, #tpu.memory_space<vmem>>, %arg10: memref<16x98x64xf32, #tpu.memory_space<vmem>>, %arg11: memref<1x64xf32, #tpu.memory_space<vmem>>, %arg12: memref<64x32xf32, #tpu.memory_space<vmem>>, %arg13: memref<1x32xf32, #tpu.memory_space<vmem>>, %arg14: memref<1x32xf32, #tpu.memory_space<vmem>>, %arg15: memref<1x1xf32, #tpu.memory_space<vmem>>, %arg16: memref<1x1x32xf32, #tpu.memory_space<vmem>>, %arg17: memref<1x1x1xf32, #tpu.memory_space<vmem>>, %arg18: memref<392x182xf32, #tpu.memory_space<vmem>>, %arg19: memref<2x2x16x196xf32, #tpu.memory_space<vmem>>, %arg20: memref<400x154xf32, #tpu.memory_space<vmem>>, %arg21: memref<32x168xf32, #tpu.memory_space<vmem>>, %arg22: memref<288x126xf32, #tpu.memory_space<vmem>>, %arg23: memref<32x140xf32, #tpu.memory_space<vmem>>, %arg24: memref<288x98xf32, #tpu.memory_space<vmem>>, %arg25: memref<16x98xf32, #tpu.memory_space<vmem>>) attributes {dimension_semantics = [#tpu.dimension_semantics<parallel>], iteration_bounds = array<i64: 4>, scalar_prefetch = 0 : i64, scratch_operands = 8 : i64, tpu.core_type = #tpu.core_type<tc>, window_params = [{transform_indices = @transform_0, window_bounds = array<i64: 1, 6, 48, 210>}, {pipeline_mode = #tpu.pipeline_mode<synchronous>, transform_indices = @transform_1, window_bounds = array<i64: 16, 392>}, {pipeline_mode = #tpu.pipeline_mode<synchronous>, transform_indices = @transform_2, window_bounds = array<i64: 16, 1>}, {pipeline_mode = #tpu.pipeline_mode<synchronous>, transform_indices = @transform_3, window_bounds = array<i64: 32, 400>}, {pipeline_mode = #tpu.pipeline_mode<synchronous>, transform_indices = @transform_4, window_bounds = array<i64: 32, 1>}, {pipeline_mode = #tpu.pipeline_mode<synchronous>, transform_indices = @transform_5, window_bounds = array<i64: 32, 288>}, {pipeline_mode = #tpu.pipeline_mode<synchronous>, transform_indices = @transform_6, window_bounds = array<i64: 32, 1>}, {pipeline_mode = #tpu.pipeline_mode<synchronous>, transform_indices = @transform_7, window_bounds = array<i64: 16, 288>}, {pipeline_mode = #tpu.pipeline_mode<synchronous>, transform_indices = @transform_8, window_bounds = array<i64: 16, 1>}, {pipeline_mode = #tpu.pipeline_mode<synchronous>, transform_indices = @transform_9, window_bounds = array<i64: 16, 98, 64>}, {pipeline_mode = #tpu.pipeline_mode<synchronous>, transform_indices = @transform_10, window_bounds = array<i64: 1, 64>}, {pipeline_mode = #tpu.pipeline_mode<synchronous>, transform_indices = @transform_11, window_bounds = array<i64: 64, 32>}, {pipeline_mode = #tpu.pipeline_mode<synchronous>, transform_indices = @transform_12, window_bounds = array<i64: 1, 32>}, {pipeline_mode = #tpu.pipeline_mode<synchronous>, transform_indices = @transform_13, window_bounds = array<i64: 1, 32>}, {pipeline_mode = #tpu.pipeline_mode<synchronous>, transform_indices = @transform_14, window_bounds = array<i64: 1, 1>}, {transform_indices = @transform_15, window_bounds = array<i64: 1, 1, 32>}, {transform_indices = @transform_16, window_bounds = array<i64: 1, 1, 1>}]} {
    %cst = arith.constant 0.000000e+00 : f32
    %0 = vector.broadcast %cst : f32 to vector<2x2x16x196xf32>
    %c0 = arith.constant 0 : index
    %c0_0 = arith.constant 0 : index
    %c0_1 = arith.constant 0 : index
    %c0_2 = arith.constant 0 : index
    %1 = vector.load %arg19[%c0, %c0_0, %c0_1, %c0_2] : memref<2x2x16x196xf32, #tpu.memory_space<vmem>>, vector<2x2x16x196xf32>
    tpu.vector_store %arg19[%c0, %c0_0, %c0_1, %c0_2], %0 {strides = array<i32>} : memref<2x2x16x196xf32, #tpu.memory_space<vmem>>, vector<2x2x16x196xf32>,
    %cst_3 = arith.constant 0.000000e+00 : f32
    %2 = vector.broadcast %cst_3 : f32 to vector<32x168xf32>
    %c0_4 = arith.constant 0 : index
    %c0_5 = arith.constant 0 : index
    %3 = vector.load %arg21[%c0_4, %c0_5] : memref<32x168xf32, #tpu.memory_space<vmem>>, vector<32x168xf32>
    tpu.vector_store %arg21[%c0_4, %c0_5], %2 {strides = array<i32>} : memref<32x168xf32, #tpu.memory_space<vmem>>, vector<32x168xf32>,
    %cst_6 = arith.constant 0.000000e+00 : f32
    %4 = vector.broadcast %cst_6 : f32 to vector<32x140xf32>
    %c0_7 = arith.constant 0 : index
    %c0_8 = arith.constant 0 : index
    %5 = vector.load %arg23[%c0_7, %c0_8] : memref<32x140xf32, #tpu.memory_space<vmem>>, vector<32x140xf32>
    tpu.vector_store %arg23[%c0_7, %c0_8], %4 {strides = array<i32>} : memref<32x140xf32, #tpu.memory_space<vmem>>, vector<32x140xf32>,
    %c0_9 = arith.constant 0 : index
    %c0_10 = arith.constant 0 : index
    %c0_11 = arith.constant 0 : index
    %c0_12 = arith.constant 0 : index
    %6 = vector.load %arg1[%c0_9, %c0_10, %c0_11, %c0_12] : memref<1x6x48x210xf32, #tpu.memory_space<vmem>>, vector<1x1x48x182xf32>
    %7 = vector.shape_cast %6 : vector<1x1x48x182xf32> to vector<48x182xf32>
    %c0_13 = arith.constant 0 : index
    %c0_14 = arith.constant 0 : index
    %8 = vector.load %arg18[%c0_13, %c0_14] : memref<392x182xf32, #tpu.memory_space<vmem>>, vector<48x182xf32>
    tpu.vector_store %arg18[%c0_13, %c0_14], %7 {strides = array<i32>} : memref<392x182xf32, #tpu.memory_space<vmem>>, vector<48x182xf32>,
    %c0_15 = arith.constant 0 : index
    %c0_16 = arith.constant 0 : index
    %c0_17 = arith.constant 0 : index
    %c1 = arith.constant 1 : index
    %9 = vector.load %arg1[%c0_15, %c0_16, %c0_17, %c1] : memref<1x6x48x210xf32, #tpu.memory_space<vmem>>, vector<1x1x8x182xf32>
    %10 = vector.shape_cast %9 : vector<1x1x8x182xf32> to vector<8x182xf32>
    %c48 = arith.constant 48 : index
    %c0_18 = arith.constant 0 : index
    %11 = vector.load %arg18[%c48, %c0_18] : memref<392x182xf32, #tpu.memory_space<vmem>>, vector<8x182xf32>
    tpu.vector_store %arg18[%c48, %c0_18], %10 {strides = array<i32>} : memref<392x182xf32, #tpu.memory_space<vmem>>, vector<8x182xf32>,
    %c0_19 = arith.constant 0 : index
    %c1_20 = arith.constant 1 : index
    %c0_21 = arith.constant 0 : index
    %c0_22 = arith.constant 0 : index
    %12 = vector.load %arg1[%c0_19, %c1_20, %c0_21, %c0_22] : memref<1x6x48x210xf32, #tpu.memory_space<vmem>>, vector<1x1x48x182xf32>
    %13 = vector.shape_cast %12 : vector<1x1x48x182xf32> to vector<48x182xf32>
    %c56 = arith.constant 56 : index
    %c0_23 = arith.constant 0 : index
    %14 = vector.load %arg18[%c56, %c0_23] : memref<392x182xf32, #tpu.memory_space<vmem>>, vector<48x182xf32>
    tpu.vector_store %arg18[%c56, %c0_23], %13 {strides = array<i32>} : memref<392x182xf32, #tpu.memory_space<vmem>>, vector<48x182xf32>,
    %c0_24 = arith.constant 0 : index
    %c1_25 = arith.constant 1 : index
    %c0_26 = arith.constant 0 : index
    %c1_27 = arith.constant 1 : index
    %15 = vector.load %arg1[%c0_24, %c1_25, %c0_26, %c1_27] : memref<1x6x48x210xf32, #tpu.memory_space<vmem>>, vector<1x1x8x182xf32>
    %16 = vector.shape_cast %15 : vector<1x1x8x182xf32> to vector<8x182xf32>
    %c104 = arith.constant 104 : index
    %c0_28 = arith.constant 0 : index
    %17 = vector.load %arg18[%c104, %c0_28] : memref<392x182xf32, #tpu.memory_space<vmem>>, vector<8x182xf32>
    tpu.vector_store %arg18[%c104, %c0_28], %16 {strides = array<i32>} : memref<392x182xf32, #tpu.memory_space<vmem>>, vector<8x182xf32>,
    %c0_29 = arith.constant 0 : index
    %c2 = arith.constant 2 : index
    %c0_30 = arith.constant 0 : index
    %c0_31 = arith.constant 0 : index
    %18 = vector.load %arg1[%c0_29, %c2, %c0_30, %c0_31] : memref<1x6x48x210xf32, #tpu.memory_space<vmem>>, vector<1x1x48x182xf32>
    %19 = vector.shape_cast %18 : vector<1x1x48x182xf32> to vector<48x182xf32>
    %c112 = arith.constant 112 : index
    %c0_32 = arith.constant 0 : index
    %20 = vector.load %arg18[%c112, %c0_32] : memref<392x182xf32, #tpu.memory_space<vmem>>, vector<48x182xf32>
    tpu.vector_store %arg18[%c112, %c0_32], %19 {strides = array<i32>} : memref<392x182xf32, #tpu.memory_space<vmem>>, vector<48x182xf32>,
    %c0_33 = arith.constant 0 : index
    %c2_34 = arith.constant 2 : index
    %c0_35 = arith.constant 0 : index
    %c1_36 = arith.constant 1 : index
    %21 = vector.load %arg1[%c0_33, %c2_34, %c0_35, %c1_36] : memref<1x6x48x210xf32, #tpu.memory_space<vmem>>, vector<1x1x8x182xf32>
    %22 = vector.shape_cast %21 : vector<1x1x8x182xf32> to vector<8x182xf32>
    %c160 = arith.constant 160 : index
    %c0_37 = arith.constant 0 : index
    %23 = vector.load %arg18[%c160, %c0_37] : memref<392x182xf32, #tpu.memory_space<vmem>>, vector<8x182xf32>
    tpu.vector_store %arg18[%c160, %c0_37], %22 {strides = array<i32>} : memref<392x182xf32, #tpu.memory_space<vmem>>, vector<8x182xf32>,
    %c0_38 = arith.constant 0 : index
    %c3 = arith.constant 3 : index
    %c0_39 = arith.constant 0 : index
    %c0_40 = arith.constant 0 : index
    %24 = vector.load %arg1[%c0_38, %c3, %c0_39, %c0_40] : memref<1x6x48x210xf32, #tpu.memory_space<vmem>>, vector<1x1x48x182xf32>
    %25 = vector.shape_cast %24 : vector<1x1x48x182xf32> to vector<48x182xf32>
    %c168 = arith.constant 168 : index
    %c0_41 = arith.constant 0 : index
    %26 = vector.load %arg18[%c168, %c0_41] : memref<392x182xf32, #tpu.memory_space<vmem>>, vector<48x182xf32>
    tpu.vector_store %arg18[%c168, %c0_41], %25 {strides = array<i32>} : memref<392x182xf32, #tpu.memory_space<vmem>>, vector<48x182xf32>,
    %c0_42 = arith.constant 0 : index
    %c3_43 = arith.constant 3 : index
    %c0_44 = arith.constant 0 : index
    %c1_45 = arith.constant 1 : index
    %27 = vector.load %arg1[%c0_42, %c3_43, %c0_44, %c1_45] : memref<1x6x48x210xf32, #tpu.memory_space<vmem>>, vector<1x1x8x182xf32>
    %28 = vector.shape_cast %27 : vector<1x1x8x182xf32> to vector<8x182xf32>
    %c216 = arith.constant 216 : index
    %c0_46 = arith.constant 0 : index
    %29 = vector.load %arg18[%c216, %c0_46] : memref<392x182xf32, #tpu.memory_space<vmem>>, vector<8x182xf32>
    tpu.vector_store %arg18[%c216, %c0_46], %28 {strides = array<i32>} : memref<392x182xf32, #tpu.memory_space<vmem>>, vector<8x182xf32>,
    %c0_47 = arith.constant 0 : index
    %c4 = arith.constant 4 : index
    %c0_48 = arith.constant 0 : index
    %c0_49 = arith.constant 0 : index
    %30 = vector.load %arg1[%c0_47, %c4, %c0_48, %c0_49] : memref<1x6x48x210xf32, #tpu.memory_space<vmem>>, vector<1x1x48x182xf32>
    %31 = vector.shape_cast %30 : vector<1x1x48x182xf32> to vector<48x182xf32>
    %c224 = arith.constant 224 : index
    %c0_50 = arith.constant 0 : index
    %32 = vector.load %arg18[%c224, %c0_50] : memref<392x182xf32, #tpu.memory_space<vmem>>, vector<48x182xf32>
    tpu.vector_store %arg18[%c224, %c0_50], %31 {strides = array<i32>} : memref<392x182xf32, #tpu.memory_space<vmem>>, vector<48x182xf32>,
    %c0_51 = arith.constant 0 : index
    %c4_52 = arith.constant 4 : index
    %c0_53 = arith.constant 0 : index
    %c1_54 = arith.constant 1 : index
    %33 = vector.load %arg1[%c0_51, %c4_52, %c0_53, %c1_54] : memref<1x6x48x210xf32, #tpu.memory_space<vmem>>, vector<1x1x8x182xf32>
    %34 = vector.shape_cast %33 : vector<1x1x8x182xf32> to vector<8x182xf32>
    %c272 = arith.constant 272 : index
    %c0_55 = arith.constant 0 : index
    %35 = vector.load %arg18[%c272, %c0_55] : memref<392x182xf32, #tpu.memory_space<vmem>>, vector<8x182xf32>
    tpu.vector_store %arg18[%c272, %c0_55], %34 {strides = array<i32>} : memref<392x182xf32, #tpu.memory_space<vmem>>, vector<8x182xf32>,
    %c0_56 = arith.constant 0 : index
    %c5 = arith.constant 5 : index
    %c0_57 = arith.constant 0 : index
    %c0_58 = arith.constant 0 : index
    %36 = vector.load %arg1[%c0_56, %c5, %c0_57, %c0_58] : memref<1x6x48x210xf32, #tpu.memory_space<vmem>>, vector<1x1x48x182xf32>
    %37 = vector.shape_cast %36 : vector<1x1x48x182xf32> to vector<48x182xf32>
    %c280 = arith.constant 280 : index
    %c0_59 = arith.constant 0 : index
    %38 = vector.load %arg18[%c280, %c0_59] : memref<392x182xf32, #tpu.memory_space<vmem>>, vector<48x182xf32>
    tpu.vector_store %arg18[%c280, %c0_59], %37 {strides = array<i32>} : memref<392x182xf32, #tpu.memory_space<vmem>>, vector<48x182xf32>,
    %c0_60 = arith.constant 0 : index
    %c5_61 = arith.constant 5 : index
    %c0_62 = arith.constant 0 : index
    %c1_63 = arith.constant 1 : index
    %39 = vector.load %arg1[%c0_60, %c5_61, %c0_62, %c1_63] : memref<1x6x48x210xf32, #tpu.memory_space<vmem>>, vector<1x1x8x182xf32>
    %40 = vector.shape_cast %39 : vector<1x1x8x182xf32> to vector<8x182xf32>
    %c328 = arith.constant 328 : index
    %c0_64 = arith.constant 0 : index
    %41 = vector.load %arg18[%c328, %c0_64] : memref<392x182xf32, #tpu.memory_space<vmem>>, vector<8x182xf32>
    tpu.vector_store %arg18[%c328, %c0_64], %40 {strides = array<i32>} : memref<392x182xf32, #tpu.memory_space<vmem>>, vector<8x182xf32>,
    %c0_65 = arith.constant 0 : index
    %c0_66 = arith.constant 0 : index
    %c0_67 = arith.constant 0 : index
    %c14 = arith.constant 14 : index
    %42 = vector.load %arg1[%c0_65, %c0_66, %c0_67, %c14] : memref<1x6x48x210xf32, #tpu.memory_space<vmem>>, vector<1x1x48x182xf32>
    %43 = vector.shape_cast %42 : vector<1x1x48x182xf32> to vector<48x182xf32>
    %c336 = arith.constant 336 : index
    %c0_68 = arith.constant 0 : index
    %44 = vector.load %arg18[%c336, %c0_68] : memref<392x182xf32, #tpu.memory_space<vmem>>, vector<48x182xf32>
    tpu.vector_store %arg18[%c336, %c0_68], %43 {strides = array<i32>} : memref<392x182xf32, #tpu.memory_space<vmem>>, vector<48x182xf32>,
    %c0_69 = arith.constant 0 : index
    %c0_70 = arith.constant 0 : index
    %c0_71 = arith.constant 0 : index
    %c15 = arith.constant 15 : index
    %45 = vector.load %arg1[%c0_69, %c0_70, %c0_71, %c15] : memref<1x6x48x210xf32, #tpu.memory_space<vmem>>, vector<1x1x8x182xf32>
    %46 = vector.shape_cast %45 : vector<1x1x8x182xf32> to vector<8x182xf32>
    %c384 = arith.constant 384 : index
    %c0_72 = arith.constant 0 : index
    %47 = vector.load %arg18[%c384, %c0_72] : memref<392x182xf32, #tpu.memory_space<vmem>>, vector<8x182xf32>
    tpu.vector_store %arg18[%c384, %c0_72], %46 {strides = array<i32>} : memref<392x182xf32, #tpu.memory_space<vmem>>, vector<8x182xf32>,
    %c0_73 = arith.constant 0 : index
    %c0_74 = arith.constant 0 : index
    %48 = vector.load %arg2[%c0_73, %c0_74] : memref<16x392xf32, #tpu.memory_space<vmem>>, vector<16x392xf32>
    %c0_75 = arith.constant 0 : index
    %c0_76 = arith.constant 0 : index
    %49 = vector.load %arg18[%c0_75, %c0_76] : memref<392x182xf32, #tpu.memory_space<vmem>>, vector<392x182xf32>
    %cst_77 = arith.constant dense<0.000000e+00> : vector<16x182xf32>
    %50 = tpu.matmul %48, %49, %cst_77 {dimension_numbers = #tpu.dot_dimension_numbers<[1], [0], [0], [1], [0, 0, 1, 1], [], []>} : vector<16x392xf32>, vector<392x182xf32>, vector<16x182xf32> -> vector<16x182xf32>
    %c0_78 = arith.constant 0 : index
    %c0_79 = arith.constant 0 : index
    %51 = vector.load %arg3[%c0_78, %c0_79] : memref<16x1xf32, #tpu.memory_space<vmem>>, vector<16x1xf32>
    %52 = vector.broadcast %51 : vector<16x1xf32> to vector<16x182xf32>
    %53 = arith.addf %50, %52 : vector<16x182xf32>
    %cst_80 = arith.constant 0.000000e+00 : f32
    %54 = vector.broadcast %cst_80 : f32 to vector<16x182xf32>
    %55 = arith.cmpf ogt, %53, %54 : vector<16x182xf32>
    %cst_81 = arith.constant 0.00999999977 : f32
    %56 = vector.broadcast %cst_81 : f32 to vector<16x182xf32>
    %57 = arith.mulf %56, %53 : vector<16x182xf32>
    %58 = arith.select %55, %53, %57 : vector<16x182xi1>, vector<16x182xf32>
    %c0_82 = arith.constant 0 : index
    %c0_83 = arith.constant 0 : index
    %c0_84 = arith.constant 0 : index
    %c0_85 = arith.constant 0 : index
    %59 = vector.load %arg19[%c0_82, %c0_83, %c0_84, %c0_85] : memref<2x2x16x196xf32, #tpu.memory_space<vmem>>, vector<1x1x16x182xf32>
    %60 = vector.shape_cast %59 : vector<1x1x16x182xf32> to vector<16x182xf32>
    %61 = vector.shape_cast %58 : vector<16x182xf32> to vector<1x1x16x182xf32>
    tpu.vector_store %arg19[%c0_82, %c0_83, %c0_84, %c0_85], %61 {strides = array<i32>} : memref<2x2x16x196xf32, #tpu.memory_space<vmem>>, vector<1x1x16x182xf32>,
    %c0_86 = arith.constant 0 : index
    %c0_87 = arith.constant 0 : index
    %c24 = arith.constant 24 : index
    %c0_88 = arith.constant 0 : index
    %62 = vector.load %arg1[%c0_86, %c0_87, %c24, %c0_88] : memref<1x6x48x210xf32, #tpu.memory_space<vmem>>, vector<1x1x24x182xf32>
    %63 = vector.shape_cast %62 : vector<1x1x24x182xf32> to vector<24x182xf32>
    %c0_89 = arith.constant 0 : index
    %c0_90 = arith.constant 0 : index
    %64 = vector.load %arg18[%c0_89, %c0_90] : memref<392x182xf32, #tpu.memory_space<vmem>>, vector<24x182xf32>
    tpu.vector_store %arg18[%c0_89, %c0_90], %63 {strides = array<i32>} : memref<392x182xf32, #tpu.memory_space<vmem>>, vector<24x182xf32>,
    %c0_91 = arith.constant 0 : index
    %c0_92 = arith.constant 0 : index
    %c0_93 = arith.constant 0 : index
    %c1_94 = arith.constant 1 : index
    %65 = vector.load %arg1[%c0_91, %c0_92, %c0_93, %c1_94] : memref<1x6x48x210xf32, #tpu.memory_space<vmem>>, vector<1x1x32x182xf32>
    %66 = vector.shape_cast %65 : vector<1x1x32x182xf32> to vector<32x182xf32>
    %c24_95 = arith.constant 24 : index
    %c0_96 = arith.constant 0 : index
    %67 = vector.load %arg18[%c24_95, %c0_96] : memref<392x182xf32, #tpu.memory_space<vmem>>, vector<32x182xf32>
    tpu.vector_store %arg18[%c24_95, %c0_96], %66 {strides = array<i32>} : memref<392x182xf32, #tpu.memory_space<vmem>>, vector<32x182xf32>,
    %c0_97 = arith.constant 0 : index
    %c1_98 = arith.constant 1 : index
    %c24_99 = arith.constant 24 : index
    %c0_100 = arith.constant 0 : index
    %68 = vector.load %arg1[%c0_97, %c1_98, %c24_99, %c0_100] : memref<1x6x48x210xf32, #tpu.memory_space<vmem>>, vector<1x1x24x182xf32>
    %69 = vector.shape_cast %68 : vector<1x1x24x182xf32> to vector<24x182xf32>
    %c56_101 = arith.constant 56 : index
    %c0_102 = arith.constant 0 : index
    %70 = vector.load %arg18[%c56_101, %c0_102] : memref<392x182xf32, #tpu.memory_space<vmem>>, vector<24x182xf32>
    tpu.vector_store %arg18[%c56_101, %c0_102], %69 {strides = array<i32>} : memref<392x182xf32, #tpu.memory_space<vmem>>, vector<24x182xf32>,
    %c0_103 = arith.constant 0 : index
    %c1_104 = arith.constant 1 : index
    %c0_105 = arith.constant 0 : index
    %c1_106 = arith.constant 1 : index
    %71 = vector.load %arg1[%c0_103, %c1_104, %c0_105, %c1_106] : memref<1x6x48x210xf32, #tpu.memory_space<vmem>>, vector<1x1x32x182xf32>
    %72 = vector.shape_cast %71 : vector<1x1x32x182xf32> to vector<32x182xf32>
    %c80 = arith.constant 80 : index
    %c0_107 = arith.constant 0 : index
    %73 = vector.load %arg18[%c80, %c0_107] : memref<392x182xf32, #tpu.memory_space<vmem>>, vector<32x182xf32>
    tpu.vector_store %arg18[%c80, %c0_107], %72 {strides = array<i32>} : memref<392x182xf32, #tpu.memory_space<vmem>>, vector<32x182xf32>,
    %c0_108 = arith.constant 0 : index
    %c2_109 = arith.constant 2 : index
    %c24_110 = arith.constant 24 : index
    %c0_111 = arith.constant 0 : index
    %74 = vector.load %arg1[%c0_108, %c2_109, %c24_110, %c0_111] : memref<1x6x48x210xf32, #tpu.memory_space<vmem>>, vector<1x1x24x182xf32>
    %75 = vector.shape_cast %74 : vector<1x1x24x182xf32> to vector<24x182xf32>
    %c112_112 = arith.constant 112 : index
    %c0_113 = arith.constant 0 : index
    %76 = vector.load %arg18[%c112_112, %c0_113] : memref<392x182xf32, #tpu.memory_space<vmem>>, vector<24x182xf32>
    tpu.vector_store %arg18[%c112_112, %c0_113], %75 {strides = array<i32>} : memref<392x182xf32, #tpu.memory_space<vmem>>, vector<24x182xf32>,
    %c0_114 = arith.constant 0 : index
    %c2_115 = arith.constant 2 : index
    %c0_116 = arith.constant 0 : index
    %c1_117 = arith.constant 1 : index
    %77 = vector.load %arg1[%c0_114, %c2_115, %c0_116, %c1_117] : memref<1x6x48x210xf32, #tpu.memory_space<vmem>>, vector<1x1x32x182xf32>
    %78 = vector.shape_cast %77 : vector<1x1x32x182xf32> to vector<32x182xf32>
    %c136 = arith.constant 136 : index
    %c0_118 = arith.constant 0 : index
    %79 = vector.load %arg18[%c136, %c0_118] : memref<392x182xf32, #tpu.memory_space<vmem>>, vector<32x182xf32>
    tpu.vector_store %arg18[%c136, %c0_118], %78 {strides = array<i32>} : memref<392x182xf32, #tpu.memory_space<vmem>>, vector<32x182xf32>,
    %c0_119 = arith.constant 0 : index
    %c3_120 = arith.constant 3 : index
    %c24_121 = arith.constant 24 : index
    %c0_122 = arith.constant 0 : index
    %80 = vector.load %arg1[%c0_119, %c3_120, %c24_121, %c0_122] : memref<1x6x48x210xf32, #tpu.memory_space<vmem>>, vector<1x1x24x182xf32>
    %81 = vector.shape_cast %80 : vector<1x1x24x182xf32> to vector<24x182xf32>
    %c168_123 = arith.constant 168 : index
    %c0_124 = arith.constant 0 : index
    %82 = vector.load %arg18[%c168_123, %c0_124] : memref<392x182xf32, #tpu.memory_space<vmem>>, vector<24x182xf32>
    tpu.vector_store %arg18[%c168_123, %c0_124], %81 {strides = array<i32>} : memref<392x182xf32, #tpu.memory_space<vmem>>, vector<24x182xf32>,
    %c0_125 = arith.constant 0 : index
    %c3_126 = arith.constant 3 : index
    %c0_127 = arith.constant 0 : index
    %c1_128 = arith.constant 1 : index
    %83 = vector.load %arg1[%c0_125, %c3_126, %c0_127, %c1_128] : memref<1x6x48x210xf32, #tpu.memory_space<vmem>>, vector<1x1x32x182xf32>
    %84 = vector.shape_cast %83 : vector<1x1x32x182xf32> to vector<32x182xf32>
    %c192 = arith.constant 192 : index
    %c0_129 = arith.constant 0 : index
    %85 = vector.load %arg18[%c192, %c0_129] : memref<392x182xf32, #tpu.memory_space<vmem>>, vector<32x182xf32>
    tpu.vector_store %arg18[%c192, %c0_129], %84 {strides = array<i32>} : memref<392x182xf32, #tpu.memory_space<vmem>>, vector<32x182xf32>,
    %c0_130 = arith.constant 0 : index
    %c4_131 = arith.constant 4 : index
    %c24_132 = arith.constant 24 : index
    %c0_133 = arith.constant 0 : index
    %86 = vector.load %arg1[%c0_130, %c4_131, %c24_132, %c0_133] : memref<1x6x48x210xf32, #tpu.memory_space<vmem>>, vector<1x1x24x182xf32>
    %87 = vector.shape_cast %86 : vector<1x1x24x182xf32> to vector<24x182xf32>
    %c224_134 = arith.constant 224 : index
    %c0_135 = arith.constant 0 : index
    %88 = vector.load %arg18[%c224_134, %c0_135] : memref<392x182xf32, #tpu.memory_space<vmem>>, vector<24x182xf32>
    tpu.vector_store %arg18[%c224_134, %c0_135], %87 {strides = array<i32>} : memref<392x182xf32, #tpu.memory_space<vmem>>, vector<24x182xf32>,
    %c0_136 = arith.constant 0 : index
    %c4_137 = arith.constant 4 : index
    %c0_138 = arith.constant 0 : index
    %c1_139 = arith.constant 1 : index
    %89 = vector.load %arg1[%c0_136, %c4_137, %c0_138, %c1_139] : memref<1x6x48x210xf32, #tpu.memory_space<vmem>>, vector<1x1x32x182xf32>
    %90 = vector.shape_cast %89 : vector<1x1x32x182xf32> to vector<32x182xf32>
    %c248 = arith.constant 248 : index
    %c0_140 = arith.constant 0 : index
    %91 = vector.load %arg18[%c248, %c0_140] : memref<392x182xf32, #tpu.memory_space<vmem>>, vector<32x182xf32>
    tpu.vector_store %arg18[%c248, %c0_140], %90 {strides = array<i32>} : memref<392x182xf32, #tpu.memory_space<vmem>>, vector<32x182xf32>,
    %c0_141 = arith.constant 0 : index
    %c5_142 = arith.constant 5 : index
    %c24_143 = arith.constant 24 : index
    %c0_144 = arith.constant 0 : index
    %92 = vector.load %arg1[%c0_141, %c5_142, %c24_143, %c0_144] : memref<1x6x48x210xf32, #tpu.memory_space<vmem>>, vector<1x1x24x182xf32>
    %93 = vector.shape_cast %92 : vector<1x1x24x182xf32> to vector<24x182xf32>
    %c280_145 = arith.constant 280 : index
    %c0_146 = arith.constant 0 : index
    %94 = vector.load %arg18[%c280_145, %c0_146] : memref<392x182xf32, #tpu.memory_space<vmem>>, vector<24x182xf32>
    tpu.vector_store %arg18[%c280_145, %c0_146], %93 {strides = array<i32>} : memref<392x182xf32, #tpu.memory_space<vmem>>, vector<24x182xf32>,
    %c0_147 = arith.constant 0 : index
    %c5_148 = arith.constant 5 : index
    %c0_149 = arith.constant 0 : index
    %c1_150 = arith.constant 1 : index
    %95 = vector.load %arg1[%c0_147, %c5_148, %c0_149, %c1_150] : memref<1x6x48x210xf32, #tpu.memory_space<vmem>>, vector<1x1x32x182xf32>
    %96 = vector.shape_cast %95 : vector<1x1x32x182xf32> to vector<32x182xf32>
    %c304 = arith.constant 304 : index
    %c0_151 = arith.constant 0 : index
    %97 = vector.load %arg18[%c304, %c0_151] : memref<392x182xf32, #tpu.memory_space<vmem>>, vector<32x182xf32>
    tpu.vector_store %arg18[%c304, %c0_151], %96 {strides = array<i32>} : memref<392x182xf32, #tpu.memory_space<vmem>>, vector<32x182xf32>,
    %c0_152 = arith.constant 0 : index
    %c0_153 = arith.constant 0 : index
    %c24_154 = arith.constant 24 : index
    %c14_155 = arith.constant 14 : index
    %98 = vector.load %arg1[%c0_152, %c0_153, %c24_154, %c14_155] : memref<1x6x48x210xf32, #tpu.memory_space<vmem>>, vector<1x1x24x182xf32>
    %99 = vector.shape_cast %98 : vector<1x1x24x182xf32> to vector<24x182xf32>
    %c336_156 = arith.constant 336 : index
    %c0_157 = arith.constant 0 : index
    %100 = vector.load %arg18[%c336_156, %c0_157] : memref<392x182xf32, #tpu.memory_space<vmem>>, vector<24x182xf32>
    tpu.vector_store %arg18[%c336_156, %c0_157], %99 {strides = array<i32>} : memref<392x182xf32, #tpu.memory_space<vmem>>, vector<24x182xf32>,
    %c0_158 = arith.constant 0 : index
    %c0_159 = arith.constant 0 : index
    %c0_160 = arith.constant 0 : index
    %c15_161 = arith.constant 15 : index
    %101 = vector.load %arg1[%c0_158, %c0_159, %c0_160, %c15_161] : memref<1x6x48x210xf32, #tpu.memory_space<vmem>>, vector<1x1x32x182xf32>
    %102 = vector.shape_cast %101 : vector<1x1x32x182xf32> to vector<32x182xf32>
    %c360 = arith.constant 360 : index
    %c0_162 = arith.constant 0 : index
    %103 = vector.load %arg18[%c360, %c0_162] : memref<392x182xf32, #tpu.memory_space<vmem>>, vector<32x182xf32>
    tpu.vector_store %arg18[%c360, %c0_162], %102 {strides = array<i32>} : memref<392x182xf32, #tpu.memory_space<vmem>>, vector<32x182xf32>,
    %c0_163 = arith.constant 0 : index
    %c0_164 = arith.constant 0 : index
    %104 = vector.load %arg2[%c0_163, %c0_164] : memref<16x392xf32, #tpu.memory_space<vmem>>, vector<16x392xf32>
    %c0_165 = arith.constant 0 : index
    %c0_166 = arith.constant 0 : index
    %105 = vector.load %arg18[%c0_165, %c0_166] : memref<392x182xf32, #tpu.memory_space<vmem>>, vector<392x182xf32>
    %cst_167 = arith.constant dense<0.000000e+00> : vector<16x182xf32>
    %106 = tpu.matmul %104, %105, %cst_167 {dimension_numbers = #tpu.dot_dimension_numbers<[1], [0], [0], [1], [0, 0, 1, 1], [], []>} : vector<16x392xf32>, vector<392x182xf32>, vector<16x182xf32> -> vector<16x182xf32>
    %c0_168 = arith.constant 0 : index
    %c0_169 = arith.constant 0 : index
    %107 = vector.load %arg3[%c0_168, %c0_169] : memref<16x1xf32, #tpu.memory_space<vmem>>, vector<16x1xf32>
    %108 = vector.broadcast %107 : vector<16x1xf32> to vector<16x182xf32>
    %109 = arith.addf %106, %108 : vector<16x182xf32>
    %cst_170 = arith.constant 0.000000e+00 : f32
    %110 = vector.broadcast %cst_170 : f32 to vector<16x182xf32>
    %111 = arith.cmpf ogt, %109, %110 : vector<16x182xf32>
    %cst_171 = arith.constant 0.00999999977 : f32
    %112 = vector.broadcast %cst_171 : f32 to vector<16x182xf32>
    %113 = arith.mulf %112, %109 : vector<16x182xf32>
    %114 = arith.select %111, %109, %113 : vector<16x182xi1>, vector<16x182xf32>
    %c0_172 = arith.constant 0 : index
    %c1_173 = arith.constant 1 : index
    %c0_174 = arith.constant 0 : index
    %c0_175 = arith.constant 0 : index
    %115 = vector.load %arg19[%c0_172, %c1_173, %c0_174, %c0_175] : memref<2x2x16x196xf32, #tpu.memory_space<vmem>>, vector<1x1x16x182xf32>
    %116 = vector.shape_cast %115 : vector<1x1x16x182xf32> to vector<16x182xf32>
    %117 = vector.shape_cast %114 : vector<16x182xf32> to vector<1x1x16x182xf32>
    tpu.vector_store %arg19[%c0_172, %c1_173, %c0_174, %c0_175], %117 {strides = array<i32>} : memref<2x2x16x196xf32, #tpu.memory_space<vmem>>, vector<1x1x16x182xf32>,
    %c0_176 = arith.constant 0 : index
    %c3_177 = arith.constant 3 : index
    %c0_178 = arith.constant 0 : index
    %c0_179 = arith.constant 0 : index
    %118 = vector.load %arg1[%c0_176, %c3_177, %c0_178, %c0_179] : memref<1x6x48x210xf32, #tpu.memory_space<vmem>>, vector<1x1x48x182xf32>
    %119 = vector.shape_cast %118 : vector<1x1x48x182xf32> to vector<48x182xf32>
    %c0_180 = arith.constant 0 : index
    %c0_181 = arith.constant 0 : index
    %120 = vector.load %arg18[%c0_180, %c0_181] : memref<392x182xf32, #tpu.memory_space<vmem>>, vector<48x182xf32>
    tpu.vector_store %arg18[%c0_180, %c0_181], %119 {strides = array<i32>} : memref<392x182xf32, #tpu.memory_space<vmem>>, vector<48x182xf32>,
    %c0_182 = arith.constant 0 : index
    %c3_183 = arith.constant 3 : index
    %c0_184 = arith.constant 0 : index
    %c1_185 = arith.constant 1 : index
    %121 = vector.load %arg1[%c0_182, %c3_183, %c0_184, %c1_185] : memref<1x6x48x210xf32, #tpu.memory_space<vmem>>, vector<1x1x8x182xf32>
    %122 = vector.shape_cast %121 : vector<1x1x8x182xf32> to vector<8x182xf32>
    %c48_186 = arith.constant 48 : index
    %c0_187 = arith.constant 0 : index
    %123 = vector.load %arg18[%c48_186, %c0_187] : memref<392x182xf32, #tpu.memory_space<vmem>>, vector<8x182xf32>
    tpu.vector_store %arg18[%c48_186, %c0_187], %122 {strides = array<i32>} : memref<392x182xf32, #tpu.memory_space<vmem>>, vector<8x182xf32>,
    %c0_188 = arith.constant 0 : index
    %c4_189 = arith.constant 4 : index
    %c0_190 = arith.constant 0 : index
    %c0_191 = arith.constant 0 : index
    %124 = vector.load %arg1[%c0_188, %c4_189, %c0_190, %c0_191] : memref<1x6x48x210xf32, #tpu.memory_space<vmem>>, vector<1x1x48x182xf32>
    %125 = vector.shape_cast %124 : vector<1x1x48x182xf32> to vector<48x182xf32>
    %c56_192 = arith.constant 56 : index
    %c0_193 = arith.constant 0 : index
    %126 = vector.load %arg18[%c56_192, %c0_193] : memref<392x182xf32, #tpu.memory_space<vmem>>, vector<48x182xf32>
    tpu.vector_store %arg18[%c56_192, %c0_193], %125 {strides = array<i32>} : memref<392x182xf32, #tpu.memory_space<vmem>>, vector<48x182xf32>,
    %c0_194 = arith.constant 0 : index
    %c4_195 = arith.constant 4 : index
    %c0_196 = arith.constant 0 : index
    %c1_197 = arith.constant 1 : index
    %127 = vector.load %arg1[%c0_194, %c4_195, %c0_196, %c1_197] : memref<1x6x48x210xf32, #tpu.memory_space<vmem>>, vector<1x1x8x182xf32>
    %128 = vector.shape_cast %127 : vector<1x1x8x182xf32> to vector<8x182xf32>
    %c104_198 = arith.constant 104 : index
    %c0_199 = arith.constant 0 : index
    %129 = vector.load %arg18[%c104_198, %c0_199] : memref<392x182xf32, #tpu.memory_space<vmem>>, vector<8x182xf32>
    tpu.vector_store %arg18[%c104_198, %c0_199], %128 {strides = array<i32>} : memref<392x182xf32, #tpu.memory_space<vmem>>, vector<8x182xf32>,
    %c0_200 = arith.constant 0 : index
    %c5_201 = arith.constant 5 : index
    %c0_202 = arith.constant 0 : index
    %c0_203 = arith.constant 0 : index
    %130 = vector.load %arg1[%c0_200, %c5_201, %c0_202, %c0_203] : memref<1x6x48x210xf32, #tpu.memory_space<vmem>>, vector<1x1x48x182xf32>
    %131 = vector.shape_cast %130 : vector<1x1x48x182xf32> to vector<48x182xf32>
    %c112_204 = arith.constant 112 : index
    %c0_205 = arith.constant 0 : index
    %132 = vector.load %arg18[%c112_204, %c0_205] : memref<392x182xf32, #tpu.memory_space<vmem>>, vector<48x182xf32>
    tpu.vector_store %arg18[%c112_204, %c0_205], %131 {strides = array<i32>} : memref<392x182xf32, #tpu.memory_space<vmem>>, vector<48x182xf32>,
    %c0_206 = arith.constant 0 : index
    %c5_207 = arith.constant 5 : index
    %c0_208 = arith.constant 0 : index
    %c1_209 = arith.constant 1 : index
    %133 = vector.load %arg1[%c0_206, %c5_207, %c0_208, %c1_209] : memref<1x6x48x210xf32, #tpu.memory_space<vmem>>, vector<1x1x8x182xf32>
    %134 = vector.shape_cast %133 : vector<1x1x8x182xf32> to vector<8x182xf32>
    %c160_210 = arith.constant 160 : index
    %c0_211 = arith.constant 0 : index
    %135 = vector.load %arg18[%c160_210, %c0_211] : memref<392x182xf32, #tpu.memory_space<vmem>>, vector<8x182xf32>
    tpu.vector_store %arg18[%c160_210, %c0_211], %134 {strides = array<i32>} : memref<392x182xf32, #tpu.memory_space<vmem>>, vector<8x182xf32>,
    %c0_212 = arith.constant 0 : index
    %c0_213 = arith.constant 0 : index
    %c0_214 = arith.constant 0 : index
    %c14_215 = arith.constant 14 : index
    %136 = vector.load %arg1[%c0_212, %c0_213, %c0_214, %c14_215] : memref<1x6x48x210xf32, #tpu.memory_space<vmem>>, vector<1x1x48x182xf32>
    %137 = vector.shape_cast %136 : vector<1x1x48x182xf32> to vector<48x182xf32>
    %c168_216 = arith.constant 168 : index
    %c0_217 = arith.constant 0 : index
    %138 = vector.load %arg18[%c168_216, %c0_217] : memref<392x182xf32, #tpu.memory_space<vmem>>, vector<48x182xf32>
    tpu.vector_store %arg18[%c168_216, %c0_217], %137 {strides = array<i32>} : memref<392x182xf32, #tpu.memory_space<vmem>>, vector<48x182xf32>,
    %c0_218 = arith.constant 0 : index
    %c0_219 = arith.constant 0 : index
    %c0_220 = arith.constant 0 : index
    %c15_221 = arith.constant 15 : index
    %139 = vector.load %arg1[%c0_218, %c0_219, %c0_220, %c15_221] : memref<1x6x48x210xf32, #tpu.memory_space<vmem>>, vector<1x1x8x182xf32>
    %140 = vector.shape_cast %139 : vector<1x1x8x182xf32> to vector<8x182xf32>
    %c216_222 = arith.constant 216 : index
    %c0_223 = arith.constant 0 : index
    %141 = vector.load %arg18[%c216_222, %c0_223] : memref<392x182xf32, #tpu.memory_space<vmem>>, vector<8x182xf32>
    tpu.vector_store %arg18[%c216_222, %c0_223], %140 {strides = array<i32>} : memref<392x182xf32, #tpu.memory_space<vmem>>, vector<8x182xf32>,
    %c0_224 = arith.constant 0 : index
    %c1_225 = arith.constant 1 : index
    %c0_226 = arith.constant 0 : index
    %c14_227 = arith.constant 14 : index
    %142 = vector.load %arg1[%c0_224, %c1_225, %c0_226, %c14_227] : memref<1x6x48x210xf32, #tpu.memory_space<vmem>>, vector<1x1x48x182xf32>
    %143 = vector.shape_cast %142 : vector<1x1x48x182xf32> to vector<48x182xf32>
    %c224_228 = arith.constant 224 : index
    %c0_229 = arith.constant 0 : index
    %144 = vector.load %arg18[%c224_228, %c0_229] : memref<392x182xf32, #tpu.memory_space<vmem>>, vector<48x182xf32>
    tpu.vector_store %arg18[%c224_228, %c0_229], %143 {strides = array<i32>} : memref<392x182xf32, #tpu.memory_space<vmem>>, vector<48x182xf32>,
    %c0_230 = arith.constant 0 : index
    %c1_231 = arith.constant 1 : index
    %c0_232 = arith.constant 0 : index
    %c15_233 = arith.constant 15 : index
    %145 = vector.load %arg1[%c0_230, %c1_231, %c0_232, %c15_233] : memref<1x6x48x210xf32, #tpu.memory_space<vmem>>, vector<1x1x8x182xf32>
    %146 = vector.shape_cast %145 : vector<1x1x8x182xf32> to vector<8x182xf32>
    %c272_234 = arith.constant 272 : index
    %c0_235 = arith.constant 0 : index
    %147 = vector.load %arg18[%c272_234, %c0_235] : memref<392x182xf32, #tpu.memory_space<vmem>>, vector<8x182xf32>
    tpu.vector_store %arg18[%c272_234, %c0_235], %146 {strides = array<i32>} : memref<392x182xf32, #tpu.memory_space<vmem>>, vector<8x182xf32>,
    %c0_236 = arith.constant 0 : index
    %c2_237 = arith.constant 2 : index
    %c0_238 = arith.constant 0 : index
    %c14_239 = arith.constant 14 : index
    %148 = vector.load %arg1[%c0_236, %c2_237, %c0_238, %c14_239] : memref<1x6x48x210xf32, #tpu.memory_space<vmem>>, vector<1x1x48x182xf32>
    %149 = vector.shape_cast %148 : vector<1x1x48x182xf32> to vector<48x182xf32>
    %c280_240 = arith.constant 280 : index
    %c0_241 = arith.constant 0 : index
    %150 = vector.load %arg18[%c280_240, %c0_241] : memref<392x182xf32, #tpu.memory_space<vmem>>, vector<48x182xf32>
    tpu.vector_store %arg18[%c280_240, %c0_241], %149 {strides = array<i32>} : memref<392x182xf32, #tpu.memory_space<vmem>>, vector<48x182xf32>,
    %c0_242 = arith.constant 0 : index
    %c2_243 = arith.constant 2 : index
    %c0_244 = arith.constant 0 : index
    %c15_245 = arith.constant 15 : index
    %151 = vector.load %arg1[%c0_242, %c2_243, %c0_244, %c15_245] : memref<1x6x48x210xf32, #tpu.memory_space<vmem>>, vector<1x1x8x182xf32>
    %152 = vector.shape_cast %151 : vector<1x1x8x182xf32> to vector<8x182xf32>
    %c328_246 = arith.constant 328 : index
    %c0_247 = arith.constant 0 : index
    %153 = vector.load %arg18[%c328_246, %c0_247] : memref<392x182xf32, #tpu.memory_space<vmem>>, vector<8x182xf32>
    tpu.vector_store %arg18[%c328_246, %c0_247], %152 {strides = array<i32>} : memref<392x182xf32, #tpu.memory_space<vmem>>, vector<8x182xf32>,
    %c0_248 = arith.constant 0 : index
    %c3_249 = arith.constant 3 : index
    %c0_250 = arith.constant 0 : index
    %c14_251 = arith.constant 14 : index
    %154 = vector.load %arg1[%c0_248, %c3_249, %c0_250, %c14_251] : memref<1x6x48x210xf32, #tpu.memory_space<vmem>>, vector<1x1x48x182xf32>
    %155 = vector.shape_cast %154 : vector<1x1x48x182xf32> to vector<48x182xf32>
    %c336_252 = arith.constant 336 : index
    %c0_253 = arith.constant 0 : index
    %156 = vector.load %arg18[%c336_252, %c0_253] : memref<392x182xf32, #tpu.memory_space<vmem>>, vector<48x182xf32>
    tpu.vector_store %arg18[%c336_252, %c0_253], %155 {strides = array<i32>} : memref<392x182xf32, #tpu.memory_space<vmem>>, vector<48x182xf32>,
    %c0_254 = arith.constant 0 : index
    %c3_255 = arith.constant 3 : index
    %c0_256 = arith.constant 0 : index
    %c15_257 = arith.constant 15 : index
    %157 = vector.load %arg1[%c0_254, %c3_255, %c0_256, %c15_257] : memref<1x6x48x210xf32, #tpu.memory_space<vmem>>, vector<1x1x8x182xf32>
    %158 = vector.shape_cast %157 : vector<1x1x8x182xf32> to vector<8x182xf32>
    %c384_258 = arith.constant 384 : index
    %c0_259 = arith.constant 0 : index
    %159 = vector.load %arg18[%c384_258, %c0_259] : memref<392x182xf32, #tpu.memory_space<vmem>>, vector<8x182xf32>
    tpu.vector_store %arg18[%c384_258, %c0_259], %158 {strides = array<i32>} : memref<392x182xf32, #tpu.memory_space<vmem>>, vector<8x182xf32>,
    %c0_260 = arith.constant 0 : index
    %c0_261 = arith.constant 0 : index
    %160 = vector.load %arg2[%c0_260, %c0_261] : memref<16x392xf32, #tpu.memory_space<vmem>>, vector<16x392xf32>
    %c0_262 = arith.constant 0 : index
    %c0_263 = arith.constant 0 : index
    %161 = vector.load %arg18[%c0_262, %c0_263] : memref<392x182xf32, #tpu.memory_space<vmem>>, vector<392x182xf32>
    %cst_264 = arith.constant dense<0.000000e+00> : vector<16x182xf32>
    %162 = tpu.matmul %160, %161, %cst_264 {dimension_numbers = #tpu.dot_dimension_numbers<[1], [0], [0], [1], [0, 0, 1, 1], [], []>} : vector<16x392xf32>, vector<392x182xf32>, vector<16x182xf32> -> vector<16x182xf32>
    %c0_265 = arith.constant 0 : index
    %c0_266 = arith.constant 0 : index
    %163 = vector.load %arg3[%c0_265, %c0_266] : memref<16x1xf32, #tpu.memory_space<vmem>>, vector<16x1xf32>
    %164 = vector.broadcast %163 : vector<16x1xf32> to vector<16x182xf32>
    %165 = arith.addf %162, %164 : vector<16x182xf32>
    %cst_267 = arith.constant 0.000000e+00 : f32
    %166 = vector.broadcast %cst_267 : f32 to vector<16x182xf32>
    %167 = arith.cmpf ogt, %165, %166 : vector<16x182xf32>
    %cst_268 = arith.constant 0.00999999977 : f32
    %168 = vector.broadcast %cst_268 : f32 to vector<16x182xf32>
    %169 = arith.mulf %168, %165 : vector<16x182xf32>
    %170 = arith.select %167, %165, %169 : vector<16x182xi1>, vector<16x182xf32>
    %c1_269 = arith.constant 1 : index
    %c0_270 = arith.constant 0 : index
    %c0_271 = arith.constant 0 : index
    %c0_272 = arith.constant 0 : index
    %171 = vector.load %arg19[%c1_269, %c0_270, %c0_271, %c0_272] : memref<2x2x16x196xf32, #tpu.memory_space<vmem>>, vector<1x1x16x182xf32>
    %172 = vector.shape_cast %171 : vector<1x1x16x182xf32> to vector<16x182xf32>
    %173 = vector.shape_cast %170 : vector<16x182xf32> to vector<1x1x16x182xf32>
    tpu.vector_store %arg19[%c1_269, %c0_270, %c0_271, %c0_272], %173 {strides = array<i32>} : memref<2x2x16x196xf32, #tpu.memory_space<vmem>>, vector<1x1x16x182xf32>,
    %c0_273 = arith.constant 0 : index
    %c3_274 = arith.constant 3 : index
    %c24_275 = arith.constant 24 : index
    %c0_276 = arith.constant 0 : index
    %174 = vector.load %arg1[%c0_273, %c3_274, %c24_275, %c0_276] : memref<1x6x48x210xf32, #tpu.memory_space<vmem>>, vector<1x1x24x182xf32>
    %175 = vector.shape_cast %174 : vector<1x1x24x182xf32> to vector<24x182xf32>
    %c0_277 = arith.constant 0 : index
    %c0_278 = arith.constant 0 : index
    %176 = vector.load %arg18[%c0_277, %c0_278] : memref<392x182xf32, #tpu.memory_space<vmem>>, vector<24x182xf32>
    tpu.vector_store %arg18[%c0_277, %c0_278], %175 {strides = array<i32>} : memref<392x182xf32, #tpu.memory_space<vmem>>, vector<24x182xf32>,
    %c0_279 = arith.constant 0 : index
    %c3_280 = arith.constant 3 : index
    %c0_281 = arith.constant 0 : index
    %c1_282 = arith.constant 1 : index
    %177 = vector.load %arg1[%c0_279, %c3_280, %c0_281, %c1_282] : memref<1x6x48x210xf32, #tpu.memory_space<vmem>>, vector<1x1x32x182xf32>
    %178 = vector.shape_cast %177 : vector<1x1x32x182xf32> to vector<32x182xf32>
    %c24_283 = arith.constant 24 : index
    %c0_284 = arith.constant 0 : index
    %179 = vector.load %arg18[%c24_283, %c0_284] : memref<392x182xf32, #tpu.memory_space<vmem>>, vector<32x182xf32>
    tpu.vector_store %arg18[%c24_283, %c0_284], %178 {strides = array<i32>} : memref<392x182xf32, #tpu.memory_space<vmem>>, vector<32x182xf32>,
    %c0_285 = arith.constant 0 : index
    %c4_286 = arith.constant 4 : index
    %c24_287 = arith.constant 24 : index
    %c0_288 = arith.constant 0 : index
    %180 = vector.load %arg1[%c0_285, %c4_286, %c24_287, %c0_288] : memref<1x6x48x210xf32, #tpu.memory_space<vmem>>, vector<1x1x24x182xf32>
    %181 = vector.shape_cast %180 : vector<1x1x24x182xf32> to vector<24x182xf32>
    %c56_289 = arith.constant 56 : index
    %c0_290 = arith.constant 0 : index
    %182 = vector.load %arg18[%c56_289, %c0_290] : memref<392x182xf32, #tpu.memory_space<vmem>>, vector<24x182xf32>
    tpu.vector_store %arg18[%c56_289, %c0_290], %181 {strides = array<i32>} : memref<392x182xf32, #tpu.memory_space<vmem>>, vector<24x182xf32>,
    %c0_291 = arith.constant 0 : index
    %c4_292 = arith.constant 4 : index
    %c0_293 = arith.constant 0 : index
    %c1_294 = arith.constant 1 : index
    %183 = vector.load %arg1[%c0_291, %c4_292, %c0_293, %c1_294] : memref<1x6x48x210xf32, #tpu.memory_space<vmem>>, vector<1x1x32x182xf32>
    %184 = vector.shape_cast %183 : vector<1x1x32x182xf32> to vector<32x182xf32>
    %c80_295 = arith.constant 80 : index
    %c0_296 = arith.constant 0 : index
    %185 = vector.load %arg18[%c80_295, %c0_296] : memref<392x182xf32, #tpu.memory_space<vmem>>, vector<32x182xf32>
    tpu.vector_store %arg18[%c80_295, %c0_296], %184 {strides = array<i32>} : memref<392x182xf32, #tpu.memory_space<vmem>>, vector<32x182xf32>,
    %c0_297 = arith.constant 0 : index
    %c5_298 = arith.constant 5 : index
    %c24_299 = arith.constant 24 : index
    %c0_300 = arith.constant 0 : index
    %186 = vector.load %arg1[%c0_297, %c5_298, %c24_299, %c0_300] : memref<1x6x48x210xf32, #tpu.memory_space<vmem>>, vector<1x1x24x182xf32>
    %187 = vector.shape_cast %186 : vector<1x1x24x182xf32> to vector<24x182xf32>
    %c112_301 = arith.constant 112 : index
    %c0_302 = arith.constant 0 : index
    %188 = vector.load %arg18[%c112_301, %c0_302] : memref<392x182xf32, #tpu.memory_space<vmem>>, vector<24x182xf32>
    tpu.vector_store %arg18[%c112_301, %c0_302], %187 {strides = array<i32>} : memref<392x182xf32, #tpu.memory_space<vmem>>, vector<24x182xf32>,
    %c0_303 = arith.constant 0 : index
    %c5_304 = arith.constant 5 : index
    %c0_305 = arith.constant 0 : index
    %c1_306 = arith.constant 1 : index
    %189 = vector.load %arg1[%c0_303, %c5_304, %c0_305, %c1_306] : memref<1x6x48x210xf32, #tpu.memory_space<vmem>>, vector<1x1x32x182xf32>
    %190 = vector.shape_cast %189 : vector<1x1x32x182xf32> to vector<32x182xf32>
    %c136_307 = arith.constant 136 : index
    %c0_308 = arith.constant 0 : index
    %191 = vector.load %arg18[%c136_307, %c0_308] : memref<392x182xf32, #tpu.memory_space<vmem>>, vector<32x182xf32>
    tpu.vector_store %arg18[%c136_307, %c0_308], %190 {strides = array<i32>} : memref<392x182xf32, #tpu.memory_space<vmem>>, vector<32x182xf32>,
    %c0_309 = arith.constant 0 : index
    %c0_310 = arith.constant 0 : index
    %c24_311 = arith.constant 24 : index
    %c14_312 = arith.constant 14 : index
    %192 = vector.load %arg1[%c0_309, %c0_310, %c24_311, %c14_312] : memref<1x6x48x210xf32, #tpu.memory_space<vmem>>, vector<1x1x24x182xf32>
    %193 = vector.shape_cast %192 : vector<1x1x24x182xf32> to vector<24x182xf32>
    %c168_313 = arith.constant 168 : index
    %c0_314 = arith.constant 0 : index
    %194 = vector.load %arg18[%c168_313, %c0_314] : memref<392x182xf32, #tpu.memory_space<vmem>>, vector<24x182xf32>
    tpu.vector_store %arg18[%c168_313, %c0_314], %193 {strides = array<i32>} : memref<392x182xf32, #tpu.memory_space<vmem>>, vector<24x182xf32>,
    %c0_315 = arith.constant 0 : index
    %c0_316 = arith.constant 0 : index
    %c0_317 = arith.constant 0 : index
    %c15_318 = arith.constant 15 : index
    %195 = vector.load %arg1[%c0_315, %c0_316, %c0_317, %c15_318] : memref<1x6x48x210xf32, #tpu.memory_space<vmem>>, vector<1x1x32x182xf32>
    %196 = vector.shape_cast %195 : vector<1x1x32x182xf32> to vector<32x182xf32>
    %c192_319 = arith.constant 192 : index
    %c0_320 = arith.constant 0 : index
    %197 = vector.load %arg18[%c192_319, %c0_320] : memref<392x182xf32, #tpu.memory_space<vmem>>, vector<32x182xf32>
    tpu.vector_store %arg18[%c192_319, %c0_320], %196 {strides = array<i32>} : memref<392x182xf32, #tpu.memory_space<vmem>>, vector<32x182xf32>,
    %c0_321 = arith.constant 0 : index
    %c1_322 = arith.constant 1 : index
    %c24_323 = arith.constant 24 : index
    %c14_324 = arith.constant 14 : index
    %198 = vector.load %arg1[%c0_321, %c1_322, %c24_323, %c14_324] : memref<1x6x48x210xf32, #tpu.memory_space<vmem>>, vector<1x1x24x182xf32>
    %199 = vector.shape_cast %198 : vector<1x1x24x182xf32> to vector<24x182xf32>
    %c224_325 = arith.constant 224 : index
    %c0_326 = arith.constant 0 : index
    %200 = vector.load %arg18[%c224_325, %c0_326] : memref<392x182xf32, #tpu.memory_space<vmem>>, vector<24x182xf32>
    tpu.vector_store %arg18[%c224_325, %c0_326], %199 {strides = array<i32>} : memref<392x182xf32, #tpu.memory_space<vmem>>, vector<24x182xf32>,
    %c0_327 = arith.constant 0 : index
    %c1_328 = arith.constant 1 : index
    %c0_329 = arith.constant 0 : index
    %c15_330 = arith.constant 15 : index
    %201 = vector.load %arg1[%c0_327, %c1_328, %c0_329, %c15_330] : memref<1x6x48x210xf32, #tpu.memory_space<vmem>>, vector<1x1x32x182xf32>
    %202 = vector.shape_cast %201 : vector<1x1x32x182xf32> to vector<32x182xf32>
    %c248_331 = arith.constant 248 : index
    %c0_332 = arith.constant 0 : index
    %203 = vector.load %arg18[%c248_331, %c0_332] : memref<392x182xf32, #tpu.memory_space<vmem>>, vector<32x182xf32>
    tpu.vector_store %arg18[%c248_331, %c0_332], %202 {strides = array<i32>} : memref<392x182xf32, #tpu.memory_space<vmem>>, vector<32x182xf32>,
    %c0_333 = arith.constant 0 : index
    %c2_334 = arith.constant 2 : index
    %c24_335 = arith.constant 24 : index
    %c14_336 = arith.constant 14 : index
    %204 = vector.load %arg1[%c0_333, %c2_334, %c24_335, %c14_336] : memref<1x6x48x210xf32, #tpu.memory_space<vmem>>, vector<1x1x24x182xf32>
    %205 = vector.shape_cast %204 : vector<1x1x24x182xf32> to vector<24x182xf32>
    %c280_337 = arith.constant 280 : index
    %c0_338 = arith.constant 0 : index
    %206 = vector.load %arg18[%c280_337, %c0_338] : memref<392x182xf32, #tpu.memory_space<vmem>>, vector<24x182xf32>
    tpu.vector_store %arg18[%c280_337, %c0_338], %205 {strides = array<i32>} : memref<392x182xf32, #tpu.memory_space<vmem>>, vector<24x182xf32>,
    %c0_339 = arith.constant 0 : index
    %c2_340 = arith.constant 2 : index
    %c0_341 = arith.constant 0 : index
    %c15_342 = arith.constant 15 : index
    %207 = vector.load %arg1[%c0_339, %c2_340, %c0_341, %c15_342] : memref<1x6x48x210xf32, #tpu.memory_space<vmem>>, vector<1x1x32x182xf32>
    %208 = vector.shape_cast %207 : vector<1x1x32x182xf32> to vector<32x182xf32>
    %c304_343 = arith.constant 304 : index
    %c0_344 = arith.constant 0 : index
    %209 = vector.load %arg18[%c304_343, %c0_344] : memref<392x182xf32, #tpu.memory_space<vmem>>, vector<32x182xf32>
    tpu.vector_store %arg18[%c304_343, %c0_344], %208 {strides = array<i32>} : memref<392x182xf32, #tpu.memory_space<vmem>>, vector<32x182xf32>,
    %c0_345 = arith.constant 0 : index
    %c3_346 = arith.constant 3 : index
    %c24_347 = arith.constant 24 : index
    %c14_348 = arith.constant 14 : index
    %210 = vector.load %arg1[%c0_345, %c3_346, %c24_347, %c14_348] : memref<1x6x48x210xf32, #tpu.memory_space<vmem>>, vector<1x1x24x182xf32>
    %211 = vector.shape_cast %210 : vector<1x1x24x182xf32> to vector<24x182xf32>
    %c336_349 = arith.constant 336 : index
    %c0_350 = arith.constant 0 : index
    %212 = vector.load %arg18[%c336_349, %c0_350] : memref<392x182xf32, #tpu.memory_space<vmem>>, vector<24x182xf32>
    tpu.vector_store %arg18[%c336_349, %c0_350], %211 {strides = array<i32>} : memref<392x182xf32, #tpu.memory_space<vmem>>, vector<24x182xf32>,
    %c0_351 = arith.constant 0 : index
    %c3_352 = arith.constant 3 : index
    %c0_353 = arith.constant 0 : index
    %c15_354 = arith.constant 15 : index
    %213 = vector.load %arg1[%c0_351, %c3_352, %c0_353, %c15_354] : memref<1x6x48x210xf32, #tpu.memory_space<vmem>>, vector<1x1x32x182xf32>
    %214 = vector.shape_cast %213 : vector<1x1x32x182xf32> to vector<32x182xf32>
    %c360_355 = arith.constant 360 : index
    %c0_356 = arith.constant 0 : index
    %215 = vector.load %arg18[%c360_355, %c0_356] : memref<392x182xf32, #tpu.memory_space<vmem>>, vector<32x182xf32>
    tpu.vector_store %arg18[%c360_355, %c0_356], %214 {strides = array<i32>} : memref<392x182xf32, #tpu.memory_space<vmem>>, vector<32x182xf32>,
    %c0_357 = arith.constant 0 : index
    %c0_358 = arith.constant 0 : index
    %216 = vector.load %arg2[%c0_357, %c0_358] : memref<16x392xf32, #tpu.memory_space<vmem>>, vector<16x392xf32>
    %c0_359 = arith.constant 0 : index
    %c0_360 = arith.constant 0 : index
    %217 = vector.load %arg18[%c0_359, %c0_360] : memref<392x182xf32, #tpu.memory_space<vmem>>, vector<392x182xf32>
    %cst_361 = arith.constant dense<0.000000e+00> : vector<16x182xf32>
    %218 = tpu.matmul %216, %217, %cst_361 {dimension_numbers = #tpu.dot_dimension_numbers<[1], [0], [0], [1], [0, 0, 1, 1], [], []>} : vector<16x392xf32>, vector<392x182xf32>, vector<16x182xf32> -> vector<16x182xf32>
    %c0_362 = arith.constant 0 : index
    %c0_363 = arith.constant 0 : index
    %219 = vector.load %arg3[%c0_362, %c0_363] : memref<16x1xf32, #tpu.memory_space<vmem>>, vector<16x1xf32>
    %220 = vector.broadcast %219 : vector<16x1xf32> to vector<16x182xf32>
    %221 = arith.addf %218, %220 : vector<16x182xf32>
    %cst_364 = arith.constant 0.000000e+00 : f32
    %222 = vector.broadcast %cst_364 : f32 to vector<16x182xf32>
    %223 = arith.cmpf ogt, %221, %222 : vector<16x182xf32>
    %cst_365 = arith.constant 0.00999999977 : f32
    %224 = vector.broadcast %cst_365 : f32 to vector<16x182xf32>
    %225 = arith.mulf %224, %221 : vector<16x182xf32>
    %226 = arith.select %223, %221, %225 : vector<16x182xi1>, vector<16x182xf32>
    %c1_366 = arith.constant 1 : index
    %c1_367 = arith.constant 1 : index
    %c0_368 = arith.constant 0 : index
    %c0_369 = arith.constant 0 : index
    %227 = vector.load %arg19[%c1_366, %c1_367, %c0_368, %c0_369] : memref<2x2x16x196xf32, #tpu.memory_space<vmem>>, vector<1x1x16x182xf32>
    %228 = vector.shape_cast %227 : vector<1x1x16x182xf32> to vector<16x182xf32>
    %229 = vector.shape_cast %226 : vector<16x182xf32> to vector<1x1x16x182xf32>
    tpu.vector_store %arg19[%c1_366, %c1_367, %c0_368, %c0_369], %229 {strides = array<i32>} : memref<2x2x16x196xf32, #tpu.memory_space<vmem>>, vector<1x1x16x182xf32>,
    %c0_370 = arith.constant 0 : index
    %c0_371 = arith.constant 0 : index
    %c0_372 = arith.constant 0 : index
    %c0_373 = arith.constant 0 : index
    %230 = vector.load %arg19[%c0_370, %c0_371, %c0_372, %c0_373] : memref<2x2x16x196xf32, #tpu.memory_space<vmem>>, vector<1x1x16x154xf32>
    %231 = vector.shape_cast %230 : vector<1x1x16x154xf32> to vector<16x154xf32>
    %c0_374 = arith.constant 0 : index
    %c0_375 = arith.constant 0 : index
    %232 = vector.load %arg20[%c0_374, %c0_375] : memref<400x154xf32, #tpu.memory_space<vmem>>, vector<16x154xf32>
    tpu.vector_store %arg20[%c0_374, %c0_375], %231 {strides = array<i32>} : memref<400x154xf32, #tpu.memory_space<vmem>>, vector<16x154xf32>,
    %c0_376 = arith.constant 0 : index
    %c1_377 = arith.constant 1 : index
    %c0_378 = arith.constant 0 : index
    %c0_379 = arith.constant 0 : index
    %233 = vector.load %arg19[%c0_376, %c1_377, %c0_378, %c0_379] : memref<2x2x16x196xf32, #tpu.memory_space<vmem>>, vector<1x1x16x154xf32>
    %234 = vector.shape_cast %233 : vector<1x1x16x154xf32> to vector<16x154xf32>
    %c16 = arith.constant 16 : index
    %c0_380 = arith.constant 0 : index
    %235 = vector.load %arg20[%c16, %c0_380] : memref<400x154xf32, #tpu.memory_space<vmem>>, vector<16x154xf32>
    tpu.vector_store %arg20[%c16, %c0_380], %234 {strides = array<i32>} : memref<400x154xf32, #tpu.memory_space<vmem>>, vector<16x154xf32>,
    %c0_381 = arith.constant 0 : index
    %c0_382 = arith.constant 0 : index
    %c0_383 = arith.constant 0 : index
    %c1_384 = arith.constant 1 : index
    %236 = vector.load %arg19[%c0_381, %c0_382, %c0_383, %c1_384] : memref<2x2x16x196xf32, #tpu.memory_space<vmem>>, vector<1x1x16x154xf32>
    %237 = vector.shape_cast %236 : vector<1x1x16x154xf32> to vector<16x154xf32>
    %c32 = arith.constant 32 : index
    %c0_385 = arith.constant 0 : index
    %238 = vector.load %arg20[%c32, %c0_385] : memref<400x154xf32, #tpu.memory_space<vmem>>, vector<16x154xf32>
    tpu.vector_store %arg20[%c32, %c0_385], %237 {strides = array<i32>} : memref<400x154xf32, #tpu.memory_space<vmem>>, vector<16x154xf32>,
    %c0_386 = arith.constant 0 : index
    %c1_387 = arith.constant 1 : index
    %c0_388 = arith.constant 0 : index
    %c1_389 = arith.constant 1 : index
    %239 = vector.load %arg19[%c0_386, %c1_387, %c0_388, %c1_389] : memref<2x2x16x196xf32, #tpu.memory_space<vmem>>, vector<1x1x16x154xf32>
    %240 = vector.shape_cast %239 : vector<1x1x16x154xf32> to vector<16x154xf32>
    %c48_390 = arith.constant 48 : index
    %c0_391 = arith.constant 0 : index
    %241 = vector.load %arg20[%c48_390, %c0_391] : memref<400x154xf32, #tpu.memory_space<vmem>>, vector<16x154xf32>
    tpu.vector_store %arg20[%c48_390, %c0_391], %240 {strides = array<i32>} : memref<400x154xf32, #tpu.memory_space<vmem>>, vector<16x154xf32>,
    %c0_392 = arith.constant 0 : index
    %c0_393 = arith.constant 0 : index
    %c0_394 = arith.constant 0 : index
    %c2_395 = arith.constant 2 : index
    %242 = vector.load %arg19[%c0_392, %c0_393, %c0_394, %c2_395] : memref<2x2x16x196xf32, #tpu.memory_space<vmem>>, vector<1x1x16x154xf32>
    %243 = vector.shape_cast %242 : vector<1x1x16x154xf32> to vector<16x154xf32>
    %c64 = arith.constant 64 : index
    %c0_396 = arith.constant 0 : index
    %244 = vector.load %arg20[%c64, %c0_396] : memref<400x154xf32, #tpu.memory_space<vmem>>, vector<16x154xf32>
    tpu.vector_store %arg20[%c64, %c0_396], %243 {strides = array<i32>} : memref<400x154xf32, #tpu.memory_space<vmem>>, vector<16x154xf32>,
    %c1_397 = arith.constant 1 : index
    %c0_398 = arith.constant 0 : index
    %c0_399 = arith.constant 0 : index
    %c0_400 = arith.constant 0 : index
    %245 = vector.load %arg19[%c1_397, %c0_398, %c0_399, %c0_400] : memref<2x2x16x196xf32, #tpu.memory_space<vmem>>, vector<1x1x16x154xf32>
    %246 = vector.shape_cast %245 : vector<1x1x16x154xf32> to vector<16x154xf32>
    %c80_401 = arith.constant 80 : index
    %c0_402 = arith.constant 0 : index
    %247 = vector.load %arg20[%c80_401, %c0_402] : memref<400x154xf32, #tpu.memory_space<vmem>>, vector<16x154xf32>
    tpu.vector_store %arg20[%c80_401, %c0_402], %246 {strides = array<i32>} : memref<400x154xf32, #tpu.memory_space<vmem>>, vector<16x154xf32>,
    %c1_403 = arith.constant 1 : index
    %c1_404 = arith.constant 1 : index
    %c0_405 = arith.constant 0 : index
    %c0_406 = arith.constant 0 : index
    %248 = vector.load %arg19[%c1_403, %c1_404, %c0_405, %c0_406] : memref<2x2x16x196xf32, #tpu.memory_space<vmem>>, vector<1x1x16x154xf32>
    %249 = vector.shape_cast %248 : vector<1x1x16x154xf32> to vector<16x154xf32>
    %c96 = arith.constant 96 : index
    %c0_407 = arith.constant 0 : index
    %250 = vector.load %arg20[%c96, %c0_407] : memref<400x154xf32, #tpu.memory_space<vmem>>, vector<16x154xf32>
    tpu.vector_store %arg20[%c96, %c0_407], %249 {strides = array<i32>} : memref<400x154xf32, #tpu.memory_space<vmem>>, vector<16x154xf32>,
    %c1_408 = arith.constant 1 : index
    %c0_409 = arith.constant 0 : index
    %c0_410 = arith.constant 0 : index
    %c1_411 = arith.constant 1 : index
    %251 = vector.load %arg19[%c1_408, %c0_409, %c0_410, %c1_411] : memref<2x2x16x196xf32, #tpu.memory_space<vmem>>, vector<1x1x16x154xf32>
    %252 = vector.shape_cast %251 : vector<1x1x16x154xf32> to vector<16x154xf32>
    %c112_412 = arith.constant 112 : index
    %c0_413 = arith.constant 0 : index
    %253 = vector.load %arg20[%c112_412, %c0_413] : memref<400x154xf32, #tpu.memory_space<vmem>>, vector<16x154xf32>
    tpu.vector_store %arg20[%c112_412, %c0_413], %252 {strides = array<i32>} : memref<400x154xf32, #tpu.memory_space<vmem>>, vector<16x154xf32>,
    %c1_414 = arith.constant 1 : index
    %c1_415 = arith.constant 1 : index
    %c0_416 = arith.constant 0 : index
    %c1_417 = arith.constant 1 : index
    %254 = vector.load %arg19[%c1_414, %c1_415, %c0_416, %c1_417] : memref<2x2x16x196xf32, #tpu.memory_space<vmem>>, vector<1x1x16x154xf32>
    %255 = vector.shape_cast %254 : vector<1x1x16x154xf32> to vector<16x154xf32>
    %c128 = arith.constant 128 : index
    %c0_418 = arith.constant 0 : index
    %256 = vector.load %arg20[%c128, %c0_418] : memref<400x154xf32, #tpu.memory_space<vmem>>, vector<16x154xf32>
    tpu.vector_store %arg20[%c128, %c0_418], %255 {strides = array<i32>} : memref<400x154xf32, #tpu.memory_space<vmem>>, vector<16x154xf32>,
    %c1_419 = arith.constant 1 : index
    %c0_420 = arith.constant 0 : index
    %c0_421 = arith.constant 0 : index
    %c2_422 = arith.constant 2 : index
    %257 = vector.load %arg19[%c1_419, %c0_420, %c0_421, %c2_422] : memref<2x2x16x196xf32, #tpu.memory_space<vmem>>, vector<1x1x16x154xf32>
    %258 = vector.shape_cast %257 : vector<1x1x16x154xf32> to vector<16x154xf32>
    %c144 = arith.constant 144 : index
    %c0_423 = arith.constant 0 : index
    %259 = vector.load %arg20[%c144, %c0_423] : memref<400x154xf32, #tpu.memory_space<vmem>>, vector<16x154xf32>
    tpu.vector_store %arg20[%c144, %c0_423], %258 {strides = array<i32>} : memref<400x154xf32, #tpu.memory_space<vmem>>, vector<16x154xf32>,
    %c0_424 = arith.constant 0 : index
    %c0_425 = arith.constant 0 : index
    %c0_426 = arith.constant 0 : index
    %c14_427 = arith.constant 14 : index
    %260 = vector.load %arg19[%c0_424, %c0_425, %c0_426, %c14_427] : memref<2x2x16x196xf32, #tpu.memory_space<vmem>>, vector<1x1x16x154xf32>
    %261 = vector.shape_cast %260 : vector<1x1x16x154xf32> to vector<16x154xf32>
    %c160_428 = arith.constant 160 : index
    %c0_429 = arith.constant 0 : index
    %262 = vector.load %arg20[%c160_428, %c0_429] : memref<400x154xf32, #tpu.memory_space<vmem>>, vector<16x154xf32>
    tpu.vector_store %arg20[%c160_428, %c0_429], %261 {strides = array<i32>} : memref<400x154xf32, #tpu.memory_space<vmem>>, vector<16x154xf32>,
    %c0_430 = arith.constant 0 : index
    %c1_431 = arith.constant 1 : index
    %c0_432 = arith.constant 0 : index
    %c14_433 = arith.constant 14 : index
    %263 = vector.load %arg19[%c0_430, %c1_431, %c0_432, %c14_433] : memref<2x2x16x196xf32, #tpu.memory_space<vmem>>, vector<1x1x16x154xf32>
    %264 = vector.shape_cast %263 : vector<1x1x16x154xf32> to vector<16x154xf32>
    %c176 = arith.constant 176 : index
    %c0_434 = arith.constant 0 : index
    %265 = vector.load %arg20[%c176, %c0_434] : memref<400x154xf32, #tpu.memory_space<vmem>>, vector<16x154xf32>
    tpu.vector_store %arg20[%c176, %c0_434], %264 {strides = array<i32>} : memref<400x154xf32, #tpu.memory_space<vmem>>, vector<16x154xf32>,
    %c0_435 = arith.constant 0 : index
    %c0_436 = arith.constant 0 : index
    %c0_437 = arith.constant 0 : index
    %c15_438 = arith.constant 15 : index
    %266 = vector.load %arg19[%c0_435, %c0_436, %c0_437, %c15_438] : memref<2x2x16x196xf32, #tpu.memory_space<vmem>>, vector<1x1x16x154xf32>
    %267 = vector.shape_cast %266 : vector<1x1x16x154xf32> to vector<16x154xf32>
    %c192_439 = arith.constant 192 : index
    %c0_440 = arith.constant 0 : index
    %268 = vector.load %arg20[%c192_439, %c0_440] : memref<400x154xf32, #tpu.memory_space<vmem>>, vector<16x154xf32>
    tpu.vector_store %arg20[%c192_439, %c0_440], %267 {strides = array<i32>} : memref<400x154xf32, #tpu.memory_space<vmem>>, vector<16x154xf32>,
    %c0_441 = arith.constant 0 : index
    %c1_442 = arith.constant 1 : index
    %c0_443 = arith.constant 0 : index
    %c15_444 = arith.constant 15 : index
    %269 = vector.load %arg19[%c0_441, %c1_442, %c0_443, %c15_444] : memref<2x2x16x196xf32, #tpu.memory_space<vmem>>, vector<1x1x16x154xf32>
    %270 = vector.shape_cast %269 : vector<1x1x16x154xf32> to vector<16x154xf32>
    %c208 = arith.constant 208 : index
    %c0_445 = arith.constant 0 : index
    %271 = vector.load %arg20[%c208, %c0_445] : memref<400x154xf32, #tpu.memory_space<vmem>>, vector<16x154xf32>
    tpu.vector_store %arg20[%c208, %c0_445], %270 {strides = array<i32>} : memref<400x154xf32, #tpu.memory_space<vmem>>, vector<16x154xf32>,
    %c0_446 = arith.constant 0 : index
    %c0_447 = arith.constant 0 : index
    %c0_448 = arith.constant 0 : index
    %c16_449 = arith.constant 16 : index
    %272 = vector.load %arg19[%c0_446, %c0_447, %c0_448, %c16_449] : memref<2x2x16x196xf32, #tpu.memory_space<vmem>>, vector<1x1x16x154xf32>
    %273 = vector.shape_cast %272 : vector<1x1x16x154xf32> to vector<16x154xf32>
    %c224_450 = arith.constant 224 : index
    %c0_451 = arith.constant 0 : index
    %274 = vector.load %arg20[%c224_450, %c0_451] : memref<400x154xf32, #tpu.memory_space<vmem>>, vector<16x154xf32>
    tpu.vector_store %arg20[%c224_450, %c0_451], %273 {strides = array<i32>} : memref<400x154xf32, #tpu.memory_space<vmem>>, vector<16x154xf32>,
    %c1_452 = arith.constant 1 : index
    %c0_453 = arith.constant 0 : index
    %c0_454 = arith.constant 0 : index
    %c14_455 = arith.constant 14 : index
    %275 = vector.load %arg19[%c1_452, %c0_453, %c0_454, %c14_455] : memref<2x2x16x196xf32, #tpu.memory_space<vmem>>, vector<1x1x16x154xf32>
    %276 = vector.shape_cast %275 : vector<1x1x16x154xf32> to vector<16x154xf32>
    %c240 = arith.constant 240 : index
    %c0_456 = arith.constant 0 : index
    %277 = vector.load %arg20[%c240, %c0_456] : memref<400x154xf32, #tpu.memory_space<vmem>>, vector<16x154xf32>
    tpu.vector_store %arg20[%c240, %c0_456], %276 {strides = array<i32>} : memref<400x154xf32, #tpu.memory_space<vmem>>, vector<16x154xf32>,
    %c1_457 = arith.constant 1 : index
    %c1_458 = arith.constant 1 : index
    %c0_459 = arith.constant 0 : index
    %c14_460 = arith.constant 14 : index
    %278 = vector.load %arg19[%c1_457, %c1_458, %c0_459, %c14_460] : memref<2x2x16x196xf32, #tpu.memory_space<vmem>>, vector<1x1x16x154xf32>
    %279 = vector.shape_cast %278 : vector<1x1x16x154xf32> to vector<16x154xf32>
    %c256 = arith.constant 256 : index
    %c0_461 = arith.constant 0 : index
    %280 = vector.load %arg20[%c256, %c0_461] : memref<400x154xf32, #tpu.memory_space<vmem>>, vector<16x154xf32>
    tpu.vector_store %arg20[%c256, %c0_461], %279 {strides = array<i32>} : memref<400x154xf32, #tpu.memory_space<vmem>>, vector<16x154xf32>,
    %c1_462 = arith.constant 1 : index
    %c0_463 = arith.constant 0 : index
    %c0_464 = arith.constant 0 : index
    %c15_465 = arith.constant 15 : index
    %281 = vector.load %arg19[%c1_462, %c0_463, %c0_464, %c15_465] : memref<2x2x16x196xf32, #tpu.memory_space<vmem>>, vector<1x1x16x154xf32>
    %282 = vector.shape_cast %281 : vector<1x1x16x154xf32> to vector<16x154xf32>
    %c272_466 = arith.constant 272 : index
    %c0_467 = arith.constant 0 : index
    %283 = vector.load %arg20[%c272_466, %c0_467] : memref<400x154xf32, #tpu.memory_space<vmem>>, vector<16x154xf32>
    tpu.vector_store %arg20[%c272_466, %c0_467], %282 {strides = array<i32>} : memref<400x154xf32, #tpu.memory_space<vmem>>, vector<16x154xf32>,
    %c1_468 = arith.constant 1 : index
    %c1_469 = arith.constant 1 : index
    %c0_470 = arith.constant 0 : index
    %c15_471 = arith.constant 15 : index
    %284 = vector.load %arg19[%c1_468, %c1_469, %c0_470, %c15_471] : memref<2x2x16x196xf32, #tpu.memory_space<vmem>>, vector<1x1x16x154xf32>
    %285 = vector.shape_cast %284 : vector<1x1x16x154xf32> to vector<16x154xf32>
    %c288 = arith.constant 288 : index
    %c0_472 = arith.constant 0 : index
    %286 = vector.load %arg20[%c288, %c0_472] : memref<400x154xf32, #tpu.memory_space<vmem>>, vector<16x154xf32>
    tpu.vector_store %arg20[%c288, %c0_472], %285 {strides = array<i32>} : memref<400x154xf32, #tpu.memory_space<vmem>>, vector<16x154xf32>,
    %c1_473 = arith.constant 1 : index
    %c0_474 = arith.constant 0 : index
    %c0_475 = arith.constant 0 : index
    %c16_476 = arith.constant 16 : index
    %287 = vector.load %arg19[%c1_473, %c0_474, %c0_475, %c16_476] : memref<2x2x16x196xf32, #tpu.memory_space<vmem>>, vector<1x1x16x154xf32>
    %288 = vector.shape_cast %287 : vector<1x1x16x154xf32> to vector<16x154xf32>
    %c304_477 = arith.constant 304 : index
    %c0_478 = arith.constant 0 : index
    %289 = vector.load %arg20[%c304_477, %c0_478] : memref<400x154xf32, #tpu.memory_space<vmem>>, vector<16x154xf32>
    tpu.vector_store %arg20[%c304_477, %c0_478], %288 {strides = array<i32>} : memref<400x154xf32, #tpu.memory_space<vmem>>, vector<16x154xf32>,
    %c0_479 = arith.constant 0 : index
    %c0_480 = arith.constant 0 : index
    %c0_481 = arith.constant 0 : index
    %c28 = arith.constant 28 : index
    %290 = vector.load %arg19[%c0_479, %c0_480, %c0_481, %c28] : memref<2x2x16x196xf32, #tpu.memory_space<vmem>>, vector<1x1x16x154xf32>
    %291 = vector.shape_cast %290 : vector<1x1x16x154xf32> to vector<16x154xf32>
    %c320 = arith.constant 320 : index
    %c0_482 = arith.constant 0 : index
    %292 = vector.load %arg20[%c320, %c0_482] : memref<400x154xf32, #tpu.memory_space<vmem>>, vector<16x154xf32>
    tpu.vector_store %arg20[%c320, %c0_482], %291 {strides = array<i32>} : memref<400x154xf32, #tpu.memory_space<vmem>>, vector<16x154xf32>,
    %c0_483 = arith.constant 0 : index
    %c1_484 = arith.constant 1 : index
    %c0_485 = arith.constant 0 : index
    %c28_486 = arith.constant 28 : index
    %293 = vector.load %arg19[%c0_483, %c1_484, %c0_485, %c28_486] : memref<2x2x16x196xf32, #tpu.memory_space<vmem>>, vector<1x1x16x154xf32>
    %294 = vector.shape_cast %293 : vector<1x1x16x154xf32> to vector<16x154xf32>
    %c336_487 = arith.constant 336 : index
    %c0_488 = arith.constant 0 : index
    %295 = vector.load %arg20[%c336_487, %c0_488] : memref<400x154xf32, #tpu.memory_space<vmem>>, vector<16x154xf32>
    tpu.vector_store %arg20[%c336_487, %c0_488], %294 {strides = array<i32>} : memref<400x154xf32, #tpu.memory_space<vmem>>, vector<16x154xf32>,
    %c0_489 = arith.constant 0 : index
    %c0_490 = arith.constant 0 : index
    %c0_491 = arith.constant 0 : index
    %c29 = arith.constant 29 : index
    %296 = vector.load %arg19[%c0_489, %c0_490, %c0_491, %c29] : memref<2x2x16x196xf32, #tpu.memory_space<vmem>>, vector<1x1x16x154xf32>
    %297 = vector.shape_cast %296 : vector<1x1x16x154xf32> to vector<16x154xf32>
    %c352 = arith.constant 352 : index
    %c0_492 = arith.constant 0 : index
    %298 = vector.load %arg20[%c352, %c0_492] : memref<400x154xf32, #tpu.memory_space<vmem>>, vector<16x154xf32>
    tpu.vector_store %arg20[%c352, %c0_492], %297 {strides = array<i32>} : memref<400x154xf32, #tpu.memory_space<vmem>>, vector<16x154xf32>,
    %c0_493 = arith.constant 0 : index
    %c1_494 = arith.constant 1 : index
    %c0_495 = arith.constant 0 : index
    %c29_496 = arith.constant 29 : index
    %299 = vector.load %arg19[%c0_493, %c1_494, %c0_495, %c29_496] : memref<2x2x16x196xf32, #tpu.memory_space<vmem>>, vector<1x1x16x154xf32>
    %300 = vector.shape_cast %299 : vector<1x1x16x154xf32> to vector<16x154xf32>
    %c368 = arith.constant 368 : index
    %c0_497 = arith.constant 0 : index
    %301 = vector.load %arg20[%c368, %c0_497] : memref<400x154xf32, #tpu.memory_space<vmem>>, vector<16x154xf32>
    tpu.vector_store %arg20[%c368, %c0_497], %300 {strides = array<i32>} : memref<400x154xf32, #tpu.memory_space<vmem>>, vector<16x154xf32>,
    %c0_498 = arith.constant 0 : index
    %c0_499 = arith.constant 0 : index
    %c0_500 = arith.constant 0 : index
    %c30 = arith.constant 30 : index
    %302 = vector.load %arg19[%c0_498, %c0_499, %c0_500, %c30] : memref<2x2x16x196xf32, #tpu.memory_space<vmem>>, vector<1x1x16x154xf32>
    %303 = vector.shape_cast %302 : vector<1x1x16x154xf32> to vector<16x154xf32>
    %c384_501 = arith.constant 384 : index
    %c0_502 = arith.constant 0 : index
    %304 = vector.load %arg20[%c384_501, %c0_502] : memref<400x154xf32, #tpu.memory_space<vmem>>, vector<16x154xf32>
    tpu.vector_store %arg20[%c384_501, %c0_502], %303 {strides = array<i32>} : memref<400x154xf32, #tpu.memory_space<vmem>>, vector<16x154xf32>,
    %c0_503 = arith.constant 0 : index
    %c0_504 = arith.constant 0 : index
    %305 = vector.load %arg4[%c0_503, %c0_504] : memref<32x400xf32, #tpu.memory_space<vmem>>, vector<32x400xf32>
    %c0_505 = arith.constant 0 : index
    %c0_506 = arith.constant 0 : index
    %306 = vector.load %arg20[%c0_505, %c0_506] : memref<400x154xf32, #tpu.memory_space<vmem>>, vector<400x154xf32>
    %cst_507 = arith.constant dense<0.000000e+00> : vector<32x154xf32>
    %307 = tpu.matmul %305, %306, %cst_507 {dimension_numbers = #tpu.dot_dimension_numbers<[1], [0], [0], [1], [0, 0, 1, 1], [], []>} : vector<32x400xf32>, vector<400x154xf32>, vector<32x154xf32> -> vector<32x154xf32>
    %c0_508 = arith.constant 0 : index
    %c0_509 = arith.constant 0 : index
    %308 = vector.load %arg5[%c0_508, %c0_509] : memref<32x1xf32, #tpu.memory_space<vmem>>, vector<32x1xf32>
    %309 = vector.broadcast %308 : vector<32x1xf32> to vector<32x154xf32>
    %310 = arith.addf %307, %309 : vector<32x154xf32>
    %cst_510 = arith.constant 0.000000e+00 : f32
    %311 = vector.broadcast %cst_510 : f32 to vector<32x154xf32>
    %312 = arith.cmpf ogt, %310, %311 : vector<32x154xf32>
    %cst_511 = arith.constant 0.00999999977 : f32
    %313 = vector.broadcast %cst_511 : f32 to vector<32x154xf32>
    %314 = arith.mulf %313, %310 : vector<32x154xf32>
    %315 = arith.select %312, %310, %314 : vector<32x154xi1>, vector<32x154xf32>
    %c0_512 = arith.constant 0 : index
    %c0_513 = arith.constant 0 : index
    %316 = vector.load %arg21[%c0_512, %c0_513] : memref<32x168xf32, #tpu.memory_space<vmem>>, vector<32x154xf32>
    tpu.vector_store %arg21[%c0_512, %c0_513], %315 {strides = array<i32>} : memref<32x168xf32, #tpu.memory_space<vmem>>, vector<32x154xf32>,
    %c0_514 = arith.constant 0 : index
    %c0_515 = arith.constant 0 : index
    %317 = vector.load %arg21[%c0_514, %c0_515] : memref<32x168xf32, #tpu.memory_space<vmem>>, vector<32x126xf32>
    %c0_516 = arith.constant 0 : index
    %c0_517 = arith.constant 0 : index
    %318 = vector.load %arg22[%c0_516, %c0_517] : memref<288x126xf32, #tpu.memory_space<vmem>>, vector<32x126xf32>
    tpu.vector_store %arg22[%c0_516, %c0_517], %317 {strides = array<i32>} : memref<288x126xf32, #tpu.memory_space<vmem>>, vector<32x126xf32>,
    %c0_518 = arith.constant 0 : index
    %c1_519 = arith.constant 1 : index
    %319 = vector.load %arg21[%c0_518, %c1_519] : memref<32x168xf32, #tpu.memory_space<vmem>>, vector<32x126xf32>
    %c32_520 = arith.constant 32 : index
    %c0_521 = arith.constant 0 : index
    %320 = vector.load %arg22[%c32_520, %c0_521] : memref<288x126xf32, #tpu.memory_space<vmem>>, vector<32x126xf32>
    tpu.vector_store %arg22[%c32_520, %c0_521], %319 {strides = array<i32>} : memref<288x126xf32, #tpu.memory_space<vmem>>, vector<32x126xf32>,
    %c0_522 = arith.constant 0 : index
    %c2_523 = arith.constant 2 : index
    %321 = vector.load %arg21[%c0_522, %c2_523] : memref<32x168xf32, #tpu.memory_space<vmem>>, vector<32x126xf32>
    %c64_524 = arith.constant 64 : index
    %c0_525 = arith.constant 0 : index
    %322 = vector.load %arg22[%c64_524, %c0_525] : memref<288x126xf32, #tpu.memory_space<vmem>>, vector<32x126xf32>
    tpu.vector_store %arg22[%c64_524, %c0_525], %321 {strides = array<i32>} : memref<288x126xf32, #tpu.memory_space<vmem>>, vector<32x126xf32>,
    %c0_526 = arith.constant 0 : index
    %c14_527 = arith.constant 14 : index
    %323 = vector.load %arg21[%c0_526, %c14_527] : memref<32x168xf32, #tpu.memory_space<vmem>>, vector<32x126xf32>
    %c96_528 = arith.constant 96 : index
    %c0_529 = arith.constant 0 : index
    %324 = vector.load %arg22[%c96_528, %c0_529] : memref<288x126xf32, #tpu.memory_space<vmem>>, vector<32x126xf32>
    tpu.vector_store %arg22[%c96_528, %c0_529], %323 {strides = array<i32>} : memref<288x126xf32, #tpu.memory_space<vmem>>, vector<32x126xf32>,
    %c0_530 = arith.constant 0 : index
    %c15_531 = arith.constant 15 : index
    %325 = vector.load %arg21[%c0_530, %c15_531] : memref<32x168xf32, #tpu.memory_space<vmem>>, vector<32x126xf32>
    %c128_532 = arith.constant 128 : index
    %c0_533 = arith.constant 0 : index
    %326 = vector.load %arg22[%c128_532, %c0_533] : memref<288x126xf32, #tpu.memory_space<vmem>>, vector<32x126xf32>
    tpu.vector_store %arg22[%c128_532, %c0_533], %325 {strides = array<i32>} : memref<288x126xf32, #tpu.memory_space<vmem>>, vector<32x126xf32>,
    %c0_534 = arith.constant 0 : index
    %c16_535 = arith.constant 16 : index
    %327 = vector.load %arg21[%c0_534, %c16_535] : memref<32x168xf32, #tpu.memory_space<vmem>>, vector<32x126xf32>
    %c160_536 = arith.constant 160 : index
    %c0_537 = arith.constant 0 : index
    %328 = vector.load %arg22[%c160_536, %c0_537] : memref<288x126xf32, #tpu.memory_space<vmem>>, vector<32x126xf32>
    tpu.vector_store %arg22[%c160_536, %c0_537], %327 {strides = array<i32>} : memref<288x126xf32, #tpu.memory_space<vmem>>, vector<32x126xf32>,
    %c0_538 = arith.constant 0 : index
    %c28_539 = arith.constant 28 : index
    %329 = vector.load %arg21[%c0_538, %c28_539] : memref<32x168xf32, #tpu.memory_space<vmem>>, vector<32x126xf32>
    %c192_540 = arith.constant 192 : index
    %c0_541 = arith.constant 0 : index
    %330 = vector.load %arg22[%c192_540, %c0_541] : memref<288x126xf32, #tpu.memory_space<vmem>>, vector<32x126xf32>
    tpu.vector_store %arg22[%c192_540, %c0_541], %329 {strides = array<i32>} : memref<288x126xf32, #tpu.memory_space<vmem>>, vector<32x126xf32>,
    %c0_542 = arith.constant 0 : index
    %c29_543 = arith.constant 29 : index
    %331 = vector.load %arg21[%c0_542, %c29_543] : memref<32x168xf32, #tpu.memory_space<vmem>>, vector<32x126xf32>
    %c224_544 = arith.constant 224 : index
    %c0_545 = arith.constant 0 : index
    %332 = vector.load %arg22[%c224_544, %c0_545] : memref<288x126xf32, #tpu.memory_space<vmem>>, vector<32x126xf32>
    tpu.vector_store %arg22[%c224_544, %c0_545], %331 {strides = array<i32>} : memref<288x126xf32, #tpu.memory_space<vmem>>, vector<32x126xf32>,
    %c0_546 = arith.constant 0 : index
    %c30_547 = arith.constant 30 : index
    %333 = vector.load %arg21[%c0_546, %c30_547] : memref<32x168xf32, #tpu.memory_space<vmem>>, vector<32x126xf32>
    %c256_548 = arith.constant 256 : index
    %c0_549 = arith.constant 0 : index
    %334 = vector.load %arg22[%c256_548, %c0_549] : memref<288x126xf32, #tpu.memory_space<vmem>>, vector<32x126xf32>
    tpu.vector_store %arg22[%c256_548, %c0_549], %333 {strides = array<i32>} : memref<288x126xf32, #tpu.memory_space<vmem>>, vector<32x126xf32>,
    %c0_550 = arith.constant 0 : index
    %c0_551 = arith.constant 0 : index
    %335 = vector.load %arg6[%c0_550, %c0_551] : memref<32x288xf32, #tpu.memory_space<vmem>>, vector<32x288xf32>
    %c0_552 = arith.constant 0 : index
    %c0_553 = arith.constant 0 : index
    %336 = vector.load %arg22[%c0_552, %c0_553] : memref<288x126xf32, #tpu.memory_space<vmem>>, vector<288x126xf32>
    %cst_554 = arith.constant dense<0.000000e+00> : vector<32x126xf32>
    %337 = tpu.matmul %335, %336, %cst_554 {dimension_numbers = #tpu.dot_dimension_numbers<[1], [0], [0], [1], [0, 0, 1, 1], [], []>} : vector<32x288xf32>, vector<288x126xf32>, vector<32x126xf32> -> vector<32x126xf32>
    %c0_555 = arith.constant 0 : index
    %c0_556 = arith.constant 0 : index
    %338 = vector.load %arg7[%c0_555, %c0_556] : memref<32x1xf32, #tpu.memory_space<vmem>>, vector<32x1xf32>
    %339 = vector.broadcast %338 : vector<32x1xf32> to vector<32x126xf32>
    %340 = arith.addf %337, %339 : vector<32x126xf32>
    %cst_557 = arith.constant 0.000000e+00 : f32
    %341 = vector.broadcast %cst_557 : f32 to vector<32x126xf32>
    %342 = arith.cmpf ogt, %340, %341 : vector<32x126xf32>
    %cst_558 = arith.constant 0.00999999977 : f32
    %343 = vector.broadcast %cst_558 : f32 to vector<32x126xf32>
    %344 = arith.mulf %343, %340 : vector<32x126xf32>
    %345 = arith.select %342, %340, %344 : vector<32x126xi1>, vector<32x126xf32>
    %c0_559 = arith.constant 0 : index
    %c0_560 = arith.constant 0 : index
    %346 = vector.load %arg23[%c0_559, %c0_560] : memref<32x140xf32, #tpu.memory_space<vmem>>, vector<32x126xf32>
    tpu.vector_store %arg23[%c0_559, %c0_560], %345 {strides = array<i32>} : memref<32x140xf32, #tpu.memory_space<vmem>>, vector<32x126xf32>,
    %c0_561 = arith.constant 0 : index
    %c0_562 = arith.constant 0 : index
    %347 = vector.load %arg23[%c0_561, %c0_562] : memref<32x140xf32, #tpu.memory_space<vmem>>, vector<32x98xf32>
    %c0_563 = arith.constant 0 : index
    %c0_564 = arith.constant 0 : index
    %348 = vector.load %arg24[%c0_563, %c0_564] : memref<288x98xf32, #tpu.memory_space<vmem>>, vector<32x98xf32>
    tpu.vector_store %arg24[%c0_563, %c0_564], %347 {strides = array<i32>} : memref<288x98xf32, #tpu.memory_space<vmem>>, vector<32x98xf32>,
    %c0_565 = arith.constant 0 : index
    %c1_566 = arith.constant 1 : index
    %349 = vector.load %arg23[%c0_565, %c1_566] : memref<32x140xf32, #tpu.memory_space<vmem>>, vector<32x98xf32>
    %c32_567 = arith.constant 32 : index
    %c0_568 = arith.constant 0 : index
    %350 = vector.load %arg24[%c32_567, %c0_568] : memref<288x98xf32, #tpu.memory_space<vmem>>, vector<32x98xf32>
    tpu.vector_store %arg24[%c32_567, %c0_568], %349 {strides = array<i32>} : memref<288x98xf32, #tpu.memory_space<vmem>>, vector<32x98xf32>,
    %c0_569 = arith.constant 0 : index
    %c2_570 = arith.constant 2 : index
    %351 = vector.load %arg23[%c0_569, %c2_570] : memref<32x140xf32, #tpu.memory_space<vmem>>, vector<32x98xf32>
    %c64_571 = arith.constant 64 : index
    %c0_572 = arith.constant 0 : index
    %352 = vector.load %arg24[%c64_571, %c0_572] : memref<288x98xf32, #tpu.memory_space<vmem>>, vector<32x98xf32>
    tpu.vector_store %arg24[%c64_571, %c0_572], %351 {strides = array<i32>} : memref<288x98xf32, #tpu.memory_space<vmem>>, vector<32x98xf32>,
    %c0_573 = arith.constant 0 : index
    %c14_574 = arith.constant 14 : index
    %353 = vector.load %arg23[%c0_573, %c14_574] : memref<32x140xf32, #tpu.memory_space<vmem>>, vector<32x98xf32>
    %c96_575 = arith.constant 96 : index
    %c0_576 = arith.constant 0 : index
    %354 = vector.load %arg24[%c96_575, %c0_576] : memref<288x98xf32, #tpu.memory_space<vmem>>, vector<32x98xf32>
    tpu.vector_store %arg24[%c96_575, %c0_576], %353 {strides = array<i32>} : memref<288x98xf32, #tpu.memory_space<vmem>>, vector<32x98xf32>,
    %c0_577 = arith.constant 0 : index
    %c15_578 = arith.constant 15 : index
    %355 = vector.load %arg23[%c0_577, %c15_578] : memref<32x140xf32, #tpu.memory_space<vmem>>, vector<32x98xf32>
    %c128_579 = arith.constant 128 : index
    %c0_580 = arith.constant 0 : index
    %356 = vector.load %arg24[%c128_579, %c0_580] : memref<288x98xf32, #tpu.memory_space<vmem>>, vector<32x98xf32>
    tpu.vector_store %arg24[%c128_579, %c0_580], %355 {strides = array<i32>} : memref<288x98xf32, #tpu.memory_space<vmem>>, vector<32x98xf32>,
    %c0_581 = arith.constant 0 : index
    %c16_582 = arith.constant 16 : index
    %357 = vector.load %arg23[%c0_581, %c16_582] : memref<32x140xf32, #tpu.memory_space<vmem>>, vector<32x98xf32>
    %c160_583 = arith.constant 160 : index
    %c0_584 = arith.constant 0 : index
    %358 = vector.load %arg24[%c160_583, %c0_584] : memref<288x98xf32, #tpu.memory_space<vmem>>, vector<32x98xf32>
    tpu.vector_store %arg24[%c160_583, %c0_584], %357 {strides = array<i32>} : memref<288x98xf32, #tpu.memory_space<vmem>>, vector<32x98xf32>,
    %c0_585 = arith.constant 0 : index
    %c28_586 = arith.constant 28 : index
    %359 = vector.load %arg23[%c0_585, %c28_586] : memref<32x140xf32, #tpu.memory_space<vmem>>, vector<32x98xf32>
    %c192_587 = arith.constant 192 : index
    %c0_588 = arith.constant 0 : index
    %360 = vector.load %arg24[%c192_587, %c0_588] : memref<288x98xf32, #tpu.memory_space<vmem>>, vector<32x98xf32>
    tpu.vector_store %arg24[%c192_587, %c0_588], %359 {strides = array<i32>} : memref<288x98xf32, #tpu.memory_space<vmem>>, vector<32x98xf32>,
    %c0_589 = arith.constant 0 : index
    %c29_590 = arith.constant 29 : index
    %361 = vector.load %arg23[%c0_589, %c29_590] : memref<32x140xf32, #tpu.memory_space<vmem>>, vector<32x98xf32>
    %c224_591 = arith.constant 224 : index
    %c0_592 = arith.constant 0 : index
    %362 = vector.load %arg24[%c224_591, %c0_592] : memref<288x98xf32, #tpu.memory_space<vmem>>, vector<32x98xf32>
    tpu.vector_store %arg24[%c224_591, %c0_592], %361 {strides = array<i32>} : memref<288x98xf32, #tpu.memory_space<vmem>>, vector<32x98xf32>,
    %c0_593 = arith.constant 0 : index
    %c30_594 = arith.constant 30 : index
    %363 = vector.load %arg23[%c0_593, %c30_594] : memref<32x140xf32, #tpu.memory_space<vmem>>, vector<32x98xf32>
    %c256_595 = arith.constant 256 : index
    %c0_596 = arith.constant 0 : index
    %364 = vector.load %arg24[%c256_595, %c0_596] : memref<288x98xf32, #tpu.memory_space<vmem>>, vector<32x98xf32>
    tpu.vector_store %arg24[%c256_595, %c0_596], %363 {strides = array<i32>} : memref<288x98xf32, #tpu.memory_space<vmem>>, vector<32x98xf32>,
    %c0_597 = arith.constant 0 : index
    %c0_598 = arith.constant 0 : index
    %365 = vector.load %arg8[%c0_597, %c0_598] : memref<16x288xf32, #tpu.memory_space<vmem>>, vector<16x288xf32>
    %c0_599 = arith.constant 0 : index
    %c0_600 = arith.constant 0 : index
    %366 = vector.load %arg24[%c0_599, %c0_600] : memref<288x98xf32, #tpu.memory_space<vmem>>, vector<288x98xf32>
    %cst_601 = arith.constant dense<0.000000e+00> : vector<16x98xf32>
    %367 = tpu.matmul %365, %366, %cst_601 {dimension_numbers = #tpu.dot_dimension_numbers<[1], [0], [0], [1], [0, 0, 1, 1], [], []>} : vector<16x288xf32>, vector<288x98xf32>, vector<16x98xf32> -> vector<16x98xf32>
    %c0_602 = arith.constant 0 : index
    %c0_603 = arith.constant 0 : index
    %368 = vector.load %arg9[%c0_602, %c0_603] : memref<16x1xf32, #tpu.memory_space<vmem>>, vector<16x1xf32>
    %369 = vector.broadcast %368 : vector<16x1xf32> to vector<16x98xf32>
    %370 = arith.addf %367, %369 : vector<16x98xf32>
    %cst_604 = arith.constant 0.000000e+00 : f32
    %371 = vector.broadcast %cst_604 : f32 to vector<16x98xf32>
    %372 = arith.cmpf ogt, %370, %371 : vector<16x98xf32>
    %cst_605 = arith.constant 0.00999999977 : f32
    %373 = vector.broadcast %cst_605 : f32 to vector<16x98xf32>
    %374 = arith.mulf %373, %370 : vector<16x98xf32>
    %375 = arith.select %372, %370, %374 : vector<16x98xi1>, vector<16x98xf32>
    %c0_606 = arith.constant 0 : index
    %c0_607 = arith.constant 0 : index
    %376 = vector.load %arg25[%c0_606, %c0_607] : memref<16x98xf32, #tpu.memory_space<vmem>>, vector<16x98xf32>
    tpu.vector_store %arg25[%c0_606, %c0_607], %375 {strides = array<i32>} : memref<16x98xf32, #tpu.memory_space<vmem>>, vector<16x98xf32>,
    %c0_608 = arith.constant 0 : index
    %c0_609 = arith.constant 0 : index
    %377 = vector.load %arg11[%c0_608, %c0_609] : memref<1x64xf32, #tpu.memory_space<vmem>>, vector<1x64xf32>
    %c0_610 = arith.constant 0 : index
    %c0_611 = arith.constant 0 : index
    %378 = vector.load %arg25[%c0_610, %c0_611] : memref<16x98xf32, #tpu.memory_space<vmem>>, vector<1x98xf32>
    %c0_612 = arith.constant 0 : index
    %c0_613 = arith.constant 0 : index
    %c0_614 = arith.constant 0 : index
    %379 = vector.load %arg10[%c0_612, %c0_613, %c0_614] : memref<16x98x64xf32, #tpu.memory_space<vmem>>, vector<1x98x64xf32>
    %380 = vector.shape_cast %379 : vector<1x98x64xf32> to vector<98x64xf32>
    %cst_615 = arith.constant dense<0.000000e+00> : vector<1x64xf32>
    %381 = tpu.matmul %378, %380, %cst_615 {dimension_numbers = #tpu.dot_dimension_numbers<[1], [0], [0], [1], [0, 0, 1, 1], [], []>} : vector<1x98xf32>, vector<98x64xf32>, vector<1x64xf32> -> vector<1x64xf32>
    %382 = arith.addf %377, %381 : vector<1x64xf32>
    %c1_616 = arith.constant 1 : index
    %c0_617 = arith.constant 0 : index
    %383 = vector.load %arg25[%c1_616, %c0_617] : memref<16x98xf32, #tpu.memory_space<vmem>>, vector<1x98xf32>
    %c1_618 = arith.constant 1 : index
    %c0_619 = arith.constant 0 : index
    %c0_620 = arith.constant 0 : index
    %384 = vector.load %arg10[%c1_618, %c0_619, %c0_620] : memref<16x98x64xf32, #tpu.memory_space<vmem>>, vector<1x98x64xf32>
    %385 = vector.shape_cast %384 : vector<1x98x64xf32> to vector<98x64xf32>
    %cst_621 = arith.constant dense<0.000000e+00> : vector<1x64xf32>
    %386 = tpu.matmul %383, %385, %cst_621 {dimension_numbers = #tpu.dot_dimension_numbers<[1], [0], [0], [1], [0, 0, 1, 1], [], []>} : vector<1x98xf32>, vector<98x64xf32>, vector<1x64xf32> -> vector<1x64xf32>
    %387 = arith.addf %382, %386 : vector<1x64xf32>
    %c2_622 = arith.constant 2 : index
    %c0_623 = arith.constant 0 : index
    %388 = vector.load %arg25[%c2_622, %c0_623] : memref<16x98xf32, #tpu.memory_space<vmem>>, vector<1x98xf32>
    %c2_624 = arith.constant 2 : index
    %c0_625 = arith.constant 0 : index
    %c0_626 = arith.constant 0 : index
    %389 = vector.load %arg10[%c2_624, %c0_625, %c0_626] : memref<16x98x64xf32, #tpu.memory_space<vmem>>, vector<1x98x64xf32>
    %390 = vector.shape_cast %389 : vector<1x98x64xf32> to vector<98x64xf32>
    %cst_627 = arith.constant dense<0.000000e+00> : vector<1x64xf32>
    %391 = tpu.matmul %388, %390, %cst_627 {dimension_numbers = #tpu.dot_dimension_numbers<[1], [0], [0], [1], [0, 0, 1, 1], [], []>} : vector<1x98xf32>, vector<98x64xf32>, vector<1x64xf32> -> vector<1x64xf32>
    %392 = arith.addf %387, %391 : vector<1x64xf32>
    %c3_628 = arith.constant 3 : index
    %c0_629 = arith.constant 0 : index
    %393 = vector.load %arg25[%c3_628, %c0_629] : memref<16x98xf32, #tpu.memory_space<vmem>>, vector<1x98xf32>
    %c3_630 = arith.constant 3 : index
    %c0_631 = arith.constant 0 : index
    %c0_632 = arith.constant 0 : index
    %394 = vector.load %arg10[%c3_630, %c0_631, %c0_632] : memref<16x98x64xf32, #tpu.memory_space<vmem>>, vector<1x98x64xf32>
    %395 = vector.shape_cast %394 : vector<1x98x64xf32> to vector<98x64xf32>
    %cst_633 = arith.constant dense<0.000000e+00> : vector<1x64xf32>
    %396 = tpu.matmul %393, %395, %cst_633 {dimension_numbers = #tpu.dot_dimension_numbers<[1], [0], [0], [1], [0, 0, 1, 1], [], []>} : vector<1x98xf32>, vector<98x64xf32>, vector<1x64xf32> -> vector<1x64xf32>
    %397 = arith.addf %392, %396 : vector<1x64xf32>
    %c4_634 = arith.constant 4 : index
    %c0_635 = arith.constant 0 : index
    %398 = vector.load %arg25[%c4_634, %c0_635] : memref<16x98xf32, #tpu.memory_space<vmem>>, vector<1x98xf32>
    %c4_636 = arith.constant 4 : index
    %c0_637 = arith.constant 0 : index
    %c0_638 = arith.constant 0 : index
    %399 = vector.load %arg10[%c4_636, %c0_637, %c0_638] : memref<16x98x64xf32, #tpu.memory_space<vmem>>, vector<1x98x64xf32>
    %400 = vector.shape_cast %399 : vector<1x98x64xf32> to vector<98x64xf32>
    %cst_639 = arith.constant dense<0.000000e+00> : vector<1x64xf32>
    %401 = tpu.matmul %398, %400, %cst_639 {dimension_numbers = #tpu.dot_dimension_numbers<[1], [0], [0], [1], [0, 0, 1, 1], [], []>} : vector<1x98xf32>, vector<98x64xf32>, vector<1x64xf32> -> vector<1x64xf32>
    %402 = arith.addf %397, %401 : vector<1x64xf32>
    %c5_640 = arith.constant 5 : index
    %c0_641 = arith.constant 0 : index
    %403 = vector.load %arg25[%c5_640, %c0_641] : memref<16x98xf32, #tpu.memory_space<vmem>>, vector<1x98xf32>
    %c5_642 = arith.constant 5 : index
    %c0_643 = arith.constant 0 : index
    %c0_644 = arith.constant 0 : index
    %404 = vector.load %arg10[%c5_642, %c0_643, %c0_644] : memref<16x98x64xf32, #tpu.memory_space<vmem>>, vector<1x98x64xf32>
    %405 = vector.shape_cast %404 : vector<1x98x64xf32> to vector<98x64xf32>
    %cst_645 = arith.constant dense<0.000000e+00> : vector<1x64xf32>
    %406 = tpu.matmul %403, %405, %cst_645 {dimension_numbers = #tpu.dot_dimension_numbers<[1], [0], [0], [1], [0, 0, 1, 1], [], []>} : vector<1x98xf32>, vector<98x64xf32>, vector<1x64xf32> -> vector<1x64xf32>
    %407 = arith.addf %402, %406 : vector<1x64xf32>
    %c6 = arith.constant 6 : index
    %c0_646 = arith.constant 0 : index
    %408 = vector.load %arg25[%c6, %c0_646] : memref<16x98xf32, #tpu.memory_space<vmem>>, vector<1x98xf32>
    %c6_647 = arith.constant 6 : index
    %c0_648 = arith.constant 0 : index
    %c0_649 = arith.constant 0 : index
    %409 = vector.load %arg10[%c6_647, %c0_648, %c0_649] : memref<16x98x64xf32, #tpu.memory_space<vmem>>, vector<1x98x64xf32>
    %410 = vector.shape_cast %409 : vector<1x98x64xf32> to vector<98x64xf32>
    %cst_650 = arith.constant dense<0.000000e+00> : vector<1x64xf32>
    %411 = tpu.matmul %408, %410, %cst_650 {dimension_numbers = #tpu.dot_dimension_numbers<[1], [0], [0], [1], [0, 0, 1, 1], [], []>} : vector<1x98xf32>, vector<98x64xf32>, vector<1x64xf32> -> vector<1x64xf32>
    %412 = arith.addf %407, %411 : vector<1x64xf32>
    %c7 = arith.constant 7 : index
    %c0_651 = arith.constant 0 : index
    %413 = vector.load %arg25[%c7, %c0_651] : memref<16x98xf32, #tpu.memory_space<vmem>>, vector<1x98xf32>
    %c7_652 = arith.constant 7 : index
    %c0_653 = arith.constant 0 : index
    %c0_654 = arith.constant 0 : index
    %414 = vector.load %arg10[%c7_652, %c0_653, %c0_654] : memref<16x98x64xf32, #tpu.memory_space<vmem>>, vector<1x98x64xf32>
    %415 = vector.shape_cast %414 : vector<1x98x64xf32> to vector<98x64xf32>
    %cst_655 = arith.constant dense<0.000000e+00> : vector<1x64xf32>
    %416 = tpu.matmul %413, %415, %cst_655 {dimension_numbers = #tpu.dot_dimension_numbers<[1], [0], [0], [1], [0, 0, 1, 1], [], []>} : vector<1x98xf32>, vector<98x64xf32>, vector<1x64xf32> -> vector<1x64xf32>
    %417 = arith.addf %412, %416 : vector<1x64xf32>
    %c8 = arith.constant 8 : index
    %c0_656 = arith.constant 0 : index
    %418 = vector.load %arg25[%c8, %c0_656] : memref<16x98xf32, #tpu.memory_space<vmem>>, vector<1x98xf32>
    %c8_657 = arith.constant 8 : index
    %c0_658 = arith.constant 0 : index
    %c0_659 = arith.constant 0 : index
    %419 = vector.load %arg10[%c8_657, %c0_658, %c0_659] : memref<16x98x64xf32, #tpu.memory_space<vmem>>, vector<1x98x64xf32>
    %420 = vector.shape_cast %419 : vector<1x98x64xf32> to vector<98x64xf32>
    %cst_660 = arith.constant dense<0.000000e+00> : vector<1x64xf32>
    %421 = tpu.matmul %418, %420, %cst_660 {dimension_numbers = #tpu.dot_dimension_numbers<[1], [0], [0], [1], [0, 0, 1, 1], [], []>} : vector<1x98xf32>, vector<98x64xf32>, vector<1x64xf32> -> vector<1x64xf32>
    %422 = arith.addf %417, %421 : vector<1x64xf32>
    %c9 = arith.constant 9 : index
    %c0_661 = arith.constant 0 : index
    %423 = vector.load %arg25[%c9, %c0_661] : memref<16x98xf32, #tpu.memory_space<vmem>>, vector<1x98xf32>
    %c9_662 = arith.constant 9 : index
    %c0_663 = arith.constant 0 : index
    %c0_664 = arith.constant 0 : index
    %424 = vector.load %arg10[%c9_662, %c0_663, %c0_664] : memref<16x98x64xf32, #tpu.memory_space<vmem>>, vector<1x98x64xf32>
    %425 = vector.shape_cast %424 : vector<1x98x64xf32> to vector<98x64xf32>
    %cst_665 = arith.constant dense<0.000000e+00> : vector<1x64xf32>
    %426 = tpu.matmul %423, %425, %cst_665 {dimension_numbers = #tpu.dot_dimension_numbers<[1], [0], [0], [1], [0, 0, 1, 1], [], []>} : vector<1x98xf32>, vector<98x64xf32>, vector<1x64xf32> -> vector<1x64xf32>
    %427 = arith.addf %422, %426 : vector<1x64xf32>
    %c10 = arith.constant 10 : index
    %c0_666 = arith.constant 0 : index
    %428 = vector.load %arg25[%c10, %c0_666] : memref<16x98xf32, #tpu.memory_space<vmem>>, vector<1x98xf32>
    %c10_667 = arith.constant 10 : index
    %c0_668 = arith.constant 0 : index
    %c0_669 = arith.constant 0 : index
    %429 = vector.load %arg10[%c10_667, %c0_668, %c0_669] : memref<16x98x64xf32, #tpu.memory_space<vmem>>, vector<1x98x64xf32>
    %430 = vector.shape_cast %429 : vector<1x98x64xf32> to vector<98x64xf32>
    %cst_670 = arith.constant dense<0.000000e+00> : vector<1x64xf32>
    %431 = tpu.matmul %428, %430, %cst_670 {dimension_numbers = #tpu.dot_dimension_numbers<[1], [0], [0], [1], [0, 0, 1, 1], [], []>} : vector<1x98xf32>, vector<98x64xf32>, vector<1x64xf32> -> vector<1x64xf32>
    %432 = arith.addf %427, %431 : vector<1x64xf32>
    %c11 = arith.constant 11 : index
    %c0_671 = arith.constant 0 : index
    %433 = vector.load %arg25[%c11, %c0_671] : memref<16x98xf32, #tpu.memory_space<vmem>>, vector<1x98xf32>
    %c11_672 = arith.constant 11 : index
    %c0_673 = arith.constant 0 : index
    %c0_674 = arith.constant 0 : index
    %434 = vector.load %arg10[%c11_672, %c0_673, %c0_674] : memref<16x98x64xf32, #tpu.memory_space<vmem>>, vector<1x98x64xf32>
    %435 = vector.shape_cast %434 : vector<1x98x64xf32> to vector<98x64xf32>
    %cst_675 = arith.constant dense<0.000000e+00> : vector<1x64xf32>
    %436 = tpu.matmul %433, %435, %cst_675 {dimension_numbers = #tpu.dot_dimension_numbers<[1], [0], [0], [1], [0, 0, 1, 1], [], []>} : vector<1x98xf32>, vector<98x64xf32>, vector<1x64xf32> -> vector<1x64xf32>
    %437 = arith.addf %432, %436 : vector<1x64xf32>
    %c12 = arith.constant 12 : index
    %c0_676 = arith.constant 0 : index
    %438 = vector.load %arg25[%c12, %c0_676] : memref<16x98xf32, #tpu.memory_space<vmem>>, vector<1x98xf32>
    %c12_677 = arith.constant 12 : index
    %c0_678 = arith.constant 0 : index
    %c0_679 = arith.constant 0 : index
    %439 = vector.load %arg10[%c12_677, %c0_678, %c0_679] : memref<16x98x64xf32, #tpu.memory_space<vmem>>, vector<1x98x64xf32>
    %440 = vector.shape_cast %439 : vector<1x98x64xf32> to vector<98x64xf32>
    %cst_680 = arith.constant dense<0.000000e+00> : vector<1x64xf32>
    %441 = tpu.matmul %438, %440, %cst_680 {dimension_numbers = #tpu.dot_dimension_numbers<[1], [0], [0], [1], [0, 0, 1, 1], [], []>} : vector<1x98xf32>, vector<98x64xf32>, vector<1x64xf32> -> vector<1x64xf32>
    %442 = arith.addf %437, %441 : vector<1x64xf32>
    %c13 = arith.constant 13 : index
    %c0_681 = arith.constant 0 : index
    %443 = vector.load %arg25[%c13, %c0_681] : memref<16x98xf32, #tpu.memory_space<vmem>>, vector<1x98xf32>
    %c13_682 = arith.constant 13 : index
    %c0_683 = arith.constant 0 : index
    %c0_684 = arith.constant 0 : index
    %444 = vector.load %arg10[%c13_682, %c0_683, %c0_684] : memref<16x98x64xf32, #tpu.memory_space<vmem>>, vector<1x98x64xf32>
    %445 = vector.shape_cast %444 : vector<1x98x64xf32> to vector<98x64xf32>
    %cst_685 = arith.constant dense<0.000000e+00> : vector<1x64xf32>
    %446 = tpu.matmul %443, %445, %cst_685 {dimension_numbers = #tpu.dot_dimension_numbers<[1], [0], [0], [1], [0, 0, 1, 1], [], []>} : vector<1x98xf32>, vector<98x64xf32>, vector<1x64xf32> -> vector<1x64xf32>
    %447 = arith.addf %442, %446 : vector<1x64xf32>
    %c14_686 = arith.constant 14 : index
    %c0_687 = arith.constant 0 : index
    %448 = vector.load %arg25[%c14_686, %c0_687] : memref<16x98xf32, #tpu.memory_space<vmem>>, vector<1x98xf32>
    %c14_688 = arith.constant 14 : index
    %c0_689 = arith.constant 0 : index
    %c0_690 = arith.constant 0 : index
    %449 = vector.load %arg10[%c14_688, %c0_689, %c0_690] : memref<16x98x64xf32, #tpu.memory_space<vmem>>, vector<1x98x64xf32>
    %450 = vector.shape_cast %449 : vector<1x98x64xf32> to vector<98x64xf32>
    %cst_691 = arith.constant dense<0.000000e+00> : vector<1x64xf32>
    %451 = tpu.matmul %448, %450, %cst_691 {dimension_numbers = #tpu.dot_dimension_numbers<[1], [0], [0], [1], [0, 0, 1, 1], [], []>} : vector<1x98xf32>, vector<98x64xf32>, vector<1x64xf32> -> vector<1x64xf32>
    %452 = arith.addf %447, %451 : vector<1x64xf32>
    %c15_692 = arith.constant 15 : index
    %c0_693 = arith.constant 0 : index
    %453 = vector.load %arg25[%c15_692, %c0_693] : memref<16x98xf32, #tpu.memory_space<vmem>>, vector<1x98xf32>
    %c15_694 = arith.constant 15 : index
    %c0_695 = arith.constant 0 : index
    %c0_696 = arith.constant 0 : index
    %454 = vector.load %arg10[%c15_694, %c0_695, %c0_696] : memref<16x98x64xf32, #tpu.memory_space<vmem>>, vector<1x98x64xf32>
    %455 = vector.shape_cast %454 : vector<1x98x64xf32> to vector<98x64xf32>
    %cst_697 = arith.constant dense<0.000000e+00> : vector<1x64xf32>
    %456 = tpu.matmul %453, %455, %cst_697 {dimension_numbers = #tpu.dot_dimension_numbers<[1], [0], [0], [1], [0, 0, 1, 1], [], []>} : vector<1x98xf32>, vector<98x64xf32>, vector<1x64xf32> -> vector<1x64xf32>
    %457 = arith.addf %452, %456 : vector<1x64xf32>
    %cst_698 = arith.constant 0.000000e+00 : f32
    %458 = vector.broadcast %cst_698 : f32 to vector<1x64xf32>
    %459 = arith.cmpf ogt, %457, %458 : vector<1x64xf32>
    %cst_699 = arith.constant 0.00999999977 : f32
    %460 = vector.broadcast %cst_699 : f32 to vector<1x64xf32>
    %461 = arith.mulf %460, %457 : vector<1x64xf32>
    %462 = arith.select %459, %457, %461 : vector<1x64xi1>, vector<1x64xf32>
    %c0_700 = arith.constant 0 : index
    %c0_701 = arith.constant 0 : index
    %463 = vector.load %arg12[%c0_700, %c0_701] : memref<64x32xf32, #tpu.memory_space<vmem>>, vector<64x32xf32>
    %cst_702 = arith.constant dense<0.000000e+00> : vector<1x32xf32>
    %464 = tpu.matmul %462, %463, %cst_702 {dimension_numbers = #tpu.dot_dimension_numbers<[1], [0], [0], [1], [0, 0, 1, 1], [], []>} : vector<1x64xf32>, vector<64x32xf32>, vector<1x32xf32> -> vector<1x32xf32>
    %c0_703 = arith.constant 0 : index
    %c0_704 = arith.constant 0 : index
    %465 = vector.load %arg13[%c0_703, %c0_704] : memref<1x32xf32, #tpu.memory_space<vmem>>, vector<1x32xf32>
    %466 = arith.addf %464, %465 : vector<1x32xf32>
    %c0_705 = arith.constant 0 : index
    %c0_706 = arith.constant 0 : index
    %467 = vector.load %arg14[%c0_705, %c0_706] : memref<1x32xf32, #tpu.memory_space<vmem>>, vector<1x32xf32>
    %468 = arith.mulf %466, %467 : vector<1x32xf32>
    %cst_707 = arith.constant dense<0.000000e+00> : vector<1xf32>
    %469 = vector.multi_reduction <add>, %468, %cst_707 [1] : vector<1x32xf32> to vector<1xf32>
    %470 = vector.shape_cast %469 : vector<1xf32> to vector<1x1xf32>
    %c0_708 = arith.constant 0 : index
    %c0_709 = arith.constant 0 : index
    %471 = vector.load %arg15[%c0_708, %c0_709] : memref<1x1xf32, #tpu.memory_space<vmem>>, vector<1x1xf32>
    %472 = arith.addf %470, %471 : vector<1x1xf32>
    %473 = vector.shape_cast %466 : vector<1x32xf32> to vector<1x1x32xf32>
    %c0_710 = arith.constant 0 : index
    %c0_711 = arith.constant 0 : index
    %c0_712 = arith.constant 0 : index
    %474 = vector.load %arg16[%c0_710, %c0_711, %c0_712] : memref<1x1x32xf32, #tpu.memory_space<vmem>>, vector<1x1x32xf32>
    tpu.vector_store %arg16[%c0_710, %c0_711, %c0_712], %473 {strides = array<i32>} : memref<1x1x32xf32, #tpu.memory_space<vmem>>, vector<1x1x32xf32>,
    %475 = vector.shape_cast %472 : vector<1x1xf32> to vector<1x1x1xf32>
    %c0_713 = arith.constant 0 : index
    %c0_714 = arith.constant 0 : index
    %c0_715 = arith.constant 0 : index
    %476 = vector.load %arg17[%c0_713, %c0_714, %c0_715] : memref<1x1x1xf32, #tpu.memory_space<vmem>>, vector<1x1x1xf32>
    tpu.vector_store %arg17[%c0_713, %c0_714, %c0_715], %475 {strides = array<i32>} : memref<1x1x1xf32, #tpu.memory_space<vmem>>, vector<1x1x1xf32>,
    return
  }
  func.func @transform_0(%arg0: i32) -> (i32, i32, i32, i32) {
    %c0_i32 = arith.constant 0 : i32
    %c0_i32_0 = arith.constant 0 : i32
    %c0_i32_1 = arith.constant 0 : i32
    %c0_i32_2 = arith.constant 0 : i32
    return %arg0, %c0_i32, %c0_i32_0, %c0_i32_1 : i32, i32, i32, i32
  }
  func.func @transform_1(%arg0: i32) -> (i32, i32) {
    %c0_i32 = arith.constant 0 : i32
    %c0_i32_0 = arith.constant 0 : i32
    %c0_i32_1 = arith.constant 0 : i32
    return %c0_i32, %c0_i32_0 : i32, i32
  }
  func.func @transform_2(%arg0: i32) -> (i32, i32) {
    %c0_i32 = arith.constant 0 : i32
    %c0_i32_0 = arith.constant 0 : i32
    %c0_i32_1 = arith.constant 0 : i32
    return %c0_i32, %c0_i32_0 : i32, i32
  }
  func.func @transform_3(%arg0: i32) -> (i32, i32) {
    %c0_i32 = arith.constant 0 : i32
    %c0_i32_0 = arith.constant 0 : i32
    %c0_i32_1 = arith.constant 0 : i32
    return %c0_i32, %c0_i32_0 : i32, i32
  }
  func.func @transform_4(%arg0: i32) -> (i32, i32) {
    %c0_i32 = arith.constant 0 : i32
    %c0_i32_0 = arith.constant 0 : i32
    %c0_i32_1 = arith.constant 0 : i32
    return %c0_i32, %c0_i32_0 : i32, i32
  }
  func.func @transform_5(%arg0: i32) -> (i32, i32) {
    %c0_i32 = arith.constant 0 : i32
    %c0_i32_0 = arith.constant 0 : i32
    %c0_i32_1 = arith.constant 0 : i32
    return %c0_i32, %c0_i32_0 : i32, i32
  }
  func.func @transform_6(%arg0: i32) -> (i32, i32) {
    %c0_i32 = arith.constant 0 : i32
    %c0_i32_0 = arith.constant 0 : i32
    %c0_i32_1 = arith.constant 0 : i32
    return %c0_i32, %c0_i32_0 : i32, i32
  }
  func.func @transform_7(%arg0: i32) -> (i32, i32) {
    %c0_i32 = arith.constant 0 : i32
    %c0_i32_0 = arith.constant 0 : i32
    %c0_i32_1 = arith.constant 0 : i32
    return %c0_i32, %c0_i32_0 : i32, i32
  }
  func.func @transform_8(%arg0: i32) -> (i32, i32) {
    %c0_i32 = arith.constant 0 : i32
    %c0_i32_0 = arith.constant 0 : i32
    %c0_i32_1 = arith.constant 0 : i32
    return %c0_i32, %c0_i32_0 : i32, i32
  }
  func.func @transform_9(%arg0: i32) -> (i32, i32, i32) {
    %c0_i32 = arith.constant 0 : i32
    %c0_i32_0 = arith.constant 0 : i32
    %c0_i32_1 = arith.constant 0 : i32
    %c0_i32_2 = arith.constant 0 : i32
    return %c0_i32, %c0_i32_0, %c0_i32_1 : i32, i32, i32
  }
  func.func @transform_10(%arg0: i32) -> (i32, i32) {
    %c0_i32 = arith.constant 0 : i32
    %c0_i32_0 = arith.constant 0 : i32
    %c0_i32_1 = arith.constant 0 : i32
    return %c0_i32, %c0_i32_0 : i32, i32
  }
  func.func @transform_11(%arg0: i32) -> (i32, i32) {
    %c0_i32 = arith.constant 0 : i32
    %c0_i32_0 = arith.constant 0 : i32
    %c0_i32_1 = arith.constant 0 : i32
    return %c0_i32, %c0_i32_0 : i32, i32
  }
  func.func @transform_12(%arg0: i32) -> (i32, i32) {
    %c0_i32 = arith.constant 0 : i32
    %c0_i32_0 = arith.constant 0 : i32
    %c0_i32_1 = arith.constant 0 : i32
    return %c0_i32, %c0_i32_0 : i32, i32
  }
  func.func @transform_13(%arg0: i32) -> (i32, i32) {
    %c0_i32 = arith.constant 0 : i32
    %c0_i32_0 = arith.constant 0 : i32
    %c0_i32_1 = arith.constant 0 : i32
    return %c0_i32, %c0_i32_0 : i32, i32
  }
  func.func @transform_14(%arg0: i32) -> (i32, i32) {
    %c0_i32 = arith.constant 0 : i32
    %c0_i32_0 = arith.constant 0 : i32
    %c0_i32_1 = arith.constant 0 : i32
    return %c0_i32, %c0_i32_0 : i32, i32
  }
  func.func @transform_15(%arg0: i32) -> (i32, i32, i32) {
    %c0_i32 = arith.constant 0 : i32
    %c0_i32_0 = arith.constant 0 : i32
    %c0_i32_1 = arith.constant 0 : i32
    return %arg0, %c0_i32, %c0_i32_0 : i32, i32, i32
  }
  func.func @transform_16(%arg0: i32) -> (i32, i32, i32) {
    %c0_i32 = arith.constant 0 : i32
    %c0_i32_0 = arith.constant 0 : i32
    %c0_i32_1 = arith.constant 0 : i32
    return %arg0, %c0_i32, %c0_i32_0 : i32, i32, i32
  }
}

</mosaic_0001>

<bundles_post_ra>
// kernel: forward.1
= control target key start
LH: loop header
LB: loop body
LE: loop exit
PB: predicated region body
PF: predicated region fallthrough
CT: control target
= control target key end

     0   :  { %s9650_s23 = smov 0   ;;  %s13192_s0 = inlined_call_operand.vmem [shape: f32[4,6,48,210], index: 0, kind: input, shape index: {}]   ;;  %s13193_s1 = inlined_call_operand.vmem [shape: f32[16,392], index: 1, kind: input, shape index: {}]   ;;  %s13194_s2 = inlined_call_operand.vmem [shape: f32[16,1], index: 2, kind: input, shape index: {}]   ;;  %s13195_s3 = inlined_call_operand.vmem [shape: f32[32,400], index: 3, kind: input, shape index: {}]   ;;  %s13196_s4 = inlined_call_operand.vmem [shape: f32[32,1], index: 4, kind: input, shape index: {}]   ;;  %s13197_s5 = inlined_call_operand.vmem [shape: f32[32,288], index: 5, kind: input, shape index: {}]   ;;  %s13198_s6 = inlined_call_operand.vmem [shape: f32[32,1], index: 6, kind: input, shape index: {}]   ;;  %s13199_s7 = inlined_call_operand.vmem [shape: f32[16,288], index: 7, kind: input, shape index: {}]   ;;  %s13200_s8 = inlined_call_operand.vmem [shape: f32[16,1], index: 8, kind: input, shape index: {}]   ;;  %s13201_s9 = inlined_call_operand.vmem [shape: f32[16,98,64], index: 9, kind: input, shape index: {}]   ;;  %s13202_s10 = inlined_call_operand.vmem [shape: f32[1,64], index: 10, kind: input, shape index: {}]   ;;  %s13203_s11 = inlined_call_operand.vmem [shape: f32[64,32], index: 11, kind: input, shape index: {}]   ;;  %s13204_s12 = inlined_call_operand.vmem [shape: f32[1,32], index: 12, kind: input, shape index: {}]   ;;  %s13205_s13 = inlined_call_operand.vmem [shape: f32[1,32], index: 13, kind: input, shape index: {}]   ;;  %s13206_s14 = inlined_call_operand.<no memory space> [shape: f32[1,1], index: 14, kind: input, shape index: {}]   ;;  %s13207_s15 = inlined_call_operand.vmem [shape: f32[4,1,32], index: 15, kind: output, shape index: {0}]   ;;  %s13208_s16 = inlined_call_operand.vmem [shape: f32[4,1,1], index: 16, kind: output, shape index: {1}]  }
   0x1   :  { %13273 = sst [smem:[#allocation63_spill]] %s13192_s0  ;;  %v22_v0 = vstv %s13206_s14 }
   0x2   :  { %23 = vst [vmem:[#allocation10] sm:$0x1] %v22_v0 }
   0x3 LB: > { %s7170_s24 = sadd.s32 4294967295, %s9548_s23   ;;  %p7174_p0 = scmp.ge.s32.totalorder %s9548_s23, 1  ;;  %s9548_s23 = sphi %s9650_s23, %s29_s23  }
   0x4   : > { %p467_p1 = scmp.lt.s32.totalorder %s9548_s23, 5 }
   0x6   : > { %p468_p2 = pnand %p7174_p0, %p467_p1 }
   0x8   : > { %471 = sbr.rel (%p468_p2) target bundleno = 3107 (0xc23), region = 80 }
   0xf   : > { %p518_p3 = scmp.lt.s32.totalorder %s7170_s24, 3  ;;  %s13274_s27 = sld [smem:[#allocation63_spill]]  ;;  %vm577_vm0 = vcmask 441344   ;;  %vm597_vm1 = vcmask 1039360   ;;  %vm1004_vm2 = vcmask 64512   ;;  %vm841_vm3 = vcmask 932864  }
  0x10   : > { %s9550_s29 = smov 127   ;;  %s13265_s30 = smov 114   ;;  %vm880_vm4 = vcmask 924672   ;;  %vm530_vm5 = vcmask 556032   ;;  %vm3577_vm10 = vcmask 211968  }
  0x11   : > { %s13405_s24 = smov (!%p518_p3, %s7170_s24), 3  ;;  %s9552_s0 = smov 113  }
  0x12   : > { %s9512_s14 = smul.u32 576, %s13405_s24  ;;  %s9556_s25 = smov 112  }
  0x13   : > { %s9557_s26 = smov 100   ;;  %s13269_s18 = smov 99  }
  0x14   : > { %s13267_s19 = smov 98   ;;  %s13403_s17 = smov 99  }
  0x15   : > { %s9664_s28 = scalar_lea.vmem %s13274_s27, %s9512_s14  ;;  %s13271_s14 = smov 126  }
  0x16   : > { %v9667_v1 = vld [vmem:[%s9664_s28 + $0x60] sm:$0xff]  ;;  %v9673_v3 = vld [vmem:[%s9664_s28 + $0x68] sm:$0xff]  ;;  %v9704_v9 = vld [vmem:[%s9664_s28 + $0x18] sm:$0xff]  ;;  %s13402_s27 = smov 126   ;;  %s528_s22 = scalar_lea.vmem %s13208_s16, %s13405_s24 }
  0x17   : > { %v9670_v2 = vld [vmem:[%s9664_s28] sm:$0xff]  ;;  %632 = vrot.lane.b32.xlu1 %v9667_v1, %s9550_s29  ;;  %v9680_v4 = vld [vmem:[%s9664_s28 + $0x8] sm:$0xff]  ;;  %617 = vst.msk [vmem:[#allocation2 + $0x78] sm:$0xff] %vm577_vm0, %v9673_v3  ;;  %580 = vst.msk [vmem:[#allocation2 + $0x18] sm:$0xff] %vm577_vm0, %v9704_v9 }
  0x18   : > { %593 = vrot.lane.b32.xlu0 %v9670_v2, %s9550_s29  ;;  %v9683_v5 = vld [vmem:[%s9664_s28 + $0xc8] sm:$0xff]  ;;  %v9691_v7 = vld [vmem:[%s9664_s28 + $0x120] sm:$0xff]  ;;  %578 = vst.msk [vmem:[#allocation2 + $0x8] sm:$0xff] %vm577_vm0, %v9680_v4  ;;  %v9721_v12 = vld [vmem:[%s9664_s28 + $0x38] sm:$0xff] }
  0x19   : > { %v9688_v6 = vld [vmem:[%s9664_s28 + $0x128] sm:$0xff]  ;;  %655 = vst.msk [vmem:[#allocation2 + $0xe8] sm:$0xff] %vm577_vm0, %v9683_v5  ;;  %1963 = vst [vmem:[#allocation2] sm:$0xff] %v9691_v7  ;;  %v9718_v11 = vld [vmem:[%s9664_s28 + $0xc0] sm:$0xff] }
  0x1a   : > { %v9698_v8 = vld [vmem:[%s9664_s28 + $0x188] sm:$0xff]  ;;  %693 = vst.msk [vmem:[#allocation2 + $0x158] sm:$0xff] %vm577_vm0, %v9688_v6  ;;  %v9729_v14 = vld [vmem:[%s9664_s28 + $0x58] sm:$0xff]  ;;  %v9732_v15 = vld [vmem:[%s9664_s28 + $0x50] sm:$0xff] }
  0x1b   : > { %731 = vst.msk [vmem:[#allocation2 + $0x1c8] sm:$0xff] %vm577_vm0, %v9698_v8  ;;  %634 = vrot.lane.b32.xlu1 %v9673_v3, %s9550_s29  ;;  %v9713_v10 = vld [vmem:[%s9664_s28 + $0x28] sm:$0xff]  ;;  %584 = vst.msk [vmem:[#allocation2 + $0x38] sm:$0xff] %vm577_vm0, %v9721_v12  ;;  %v9739_v16 = vld [vmem:[%s9664_s28 + $0x78] sm:$0xff] }
  0x1c   : > { %595 = vrot.lane.b32.xlu0 %v9680_v4, %s9550_s29  ;;  %v9724_v13 = vld [vmem:[%s9664_s28 + $0x48] sm:$0xff]  ;;  %582 = vst.msk [vmem:[#allocation2 + $0x28] sm:$0xff] %vm577_vm0, %v9713_v10  ;;  %13275 = vst [vmem:[#allocation11_spill] sm:$0xff] %v9739_v16  ;;  %v9752_v18 = vld [vmem:[%s9664_s28 + $0x98] sm:$0xff] }
  0x1d   : > { %586 = vst.msk [vmem:[#allocation2 + $0x48] sm:$0xff] %vm577_vm0, %v9724_v13  ;;  %v9742_v17 = vld [vmem:[%s9664_s28 + $0x88] sm:$0xff]  ;;  %1191 = vst [vmem:[#allocation2 + $0x20] sm:$0xff] %v9732_v15  ;;  %v9759_v20 = vld [vmem:[%s9664_s28 + $0x90] sm:$0xff] }
  0x1e   : > { %13276 = vst [vmem:[#allocation12_spill] sm:$0xff] %v9742_v17  ;;  %588 = vst.msk [vmem:[#allocation2 + $0x58] sm:$0xff] %vm577_vm0, %v9729_v14  ;;  %v9762_v21 = vld [vmem:[%s9664_s28 + $0xd8] sm:$0xff]  ;;  %v9769_v22 = vld [vmem:[%s9664_s28 + $0xe8] sm:$0xff] }
  0x1f   : > { %672 = vrot.lane.b32.xlu1 %v9683_v5, %s9550_s29  ;;  %v895_v19 = vld [vmem:[#allocation2 + $0x8] sm:$0xff]  ;;  %619 = vst.msk [vmem:[#allocation2 + $0x88] sm:$0xff] %vm577_vm0, %v9739_v16  ;;  %621 = vst.msk [vmem:[#allocation2 + $0x98] sm:$0xff] %vm577_vm0, %v9742_v17  ;;  %v9772_v23 = vld [vmem:[%s9664_s28 + $0xf8] sm:$0xff] }
  0x20   : > { %670 = vrot.lane.b32.xlu0 %v9718_v11, %s9550_s29  ;;  %1188 = vst.msk [vmem:[#allocation2 + $0x8] sm:$0xff] %vm577_vm0, %v9721_v12  ;;  %623 = vst.msk [vmem:[#allocation2 + $0xa8] sm:$0xff] %vm577_vm0, %v9752_v18  ;;  %v9778_v24 = vld [vmem:[%s9664_s28 + $0x180] sm:$0xff]  ;;  %v9781_v25 = vld [vmem:[%s9664_s28 + $0xf0] sm:$0xff] }
  0x21   : > { %1251 = vst [vmem:[#allocation2 + $0x70] sm:$0xff] %v9759_v20  ;;  %657 = vst.msk [vmem:[#allocation2 + $0xf8] sm:$0xff] %vm577_vm0, %v9762_v21  ;;  %v9784_v26 = vld [vmem:[%s9664_s28 + $0x138] sm:$0xff]  ;;  %v9787_v27 = vld [vmem:[%s9664_s28 + $0x130] sm:$0xff] }
  0x22   : > { %659 = vst.msk [vmem:[#allocation2 + $0x108] sm:$0xff] %vm577_vm0, %v9769_v22  ;;  %661 = vst.msk [vmem:[#allocation2 + $0x118] sm:$0xff] %vm577_vm0, %v9772_v23  ;;  %v9798_v28 = vld [vmem:[%s9664_s28 + $0x10] sm:$0xff]  ;;  %v9801_v29 = vld [vmem:[%s9664_s28 + $0x148] sm:$0xff] }
  0x23   : > { %710 = vrot.lane.b32.xlu1 %v9688_v6, %s9550_s29  ;;  %v897_v30 = vld [vmem:[#allocation2 + $0x18] sm:$0xff]  ;;  %1965 = vst [vmem:[#allocation2 + $0x10] sm:$0xff] %v9787_v27  ;;  %1315 = vst [vmem:[#allocation2 + $0xe0] sm:$0xff] %v9781_v25  ;;  %v9811_v32 = vld [vmem:[%s9664_s28 + $0x150] sm:$0xff]  ;;  %v8571_v34 = vpack.c.bf16 %v9798_v28, %v9670_v2 }
  0x24   : > { %708 = vrot.lane.b32.xlu0 %v9691_v7, %s9550_s29  ;;  %695 = vst.msk [vmem:[#allocation2 + $0x168] sm:$0xff] %vm577_vm0, %v9784_v26  ;;  %v9808_v31 = vld [vmem:[%s9664_s28 + $0x158] sm:$0xff]  ;;  %v8569_v33 = vpack.c.bf16 %v897_v30, %v895_v19  ;;  %1190 = vst.msk [vmem:[#allocation2 + $0x18] sm:$0xff] %vm577_vm0, %v9724_v13  ;;  %v899_v35 = vld [vmem:[#allocation2 + $0x28] sm:$0xff] }
  0x25   : > { %697 = vst.msk [vmem:[#allocation2 + $0x178] sm:$0xff] %vm577_vm0, %v9801_v29  ;;  %v9820_v36 = vld [vmem:[%s9664_s28 + $0x20] sm:$0xff]  ;;  %v9823_v37 = vld [vmem:[%s9664_s28 + $0x30] sm:$0xff]  ;;  %v901_v38 = vld [vmem:[#allocation2 + $0x38] sm:$0xff] }
  0x26   : > { %1192 = vst.msk [vmem:[#allocation2 + $0x28] sm:$0xff] %vm577_vm0, %v9729_v14  ;;  %v903_v39 = vld [vmem:[#allocation2 + $0x48] sm:$0xff]  ;;  %v905_v40 = vld [vmem:[#allocation2 + $0x58] sm:$0xff]  ;;  %699 = vst.msk [vmem:[#allocation2 + $0x188] sm:$0xff] %vm577_vm0, %v9808_v31  ;;  %8570 = vmatprep.subr.bf16.mxu0 %v8569_v33  ;;  %v8573_v43 = vpack.c.bf16 %v901_v38, %v899_v35  ;;  %v8575_v50 = vpack.c.bf16 %v9823_v37, %v9820_v36 }
  0x27   : > { %1969 = vst [vmem:[#allocation2 + $0x30] sm:$0xff] %v9811_v32  ;;  %v9831_v41 = vld [vmem:[%s9664_s28 + $0x1e8] sm:$0xff]  ;;  %v9834_v42 = vld [vmem:[%s9664_s28 + $0x1e0] sm:$0xff]  ;;  %v9836_v44 = vld [vmem:[#allocation2 + $0x78] sm:$0xff]  ;;  %748 = vrot.lane.b32.xlu1 %v9698_v8, %s9550_s29  ;;  %8572 = vmatpush1.bf16.msra.mxu0 %v8571_v34  ;;  %v8577_v55 = vpack.c.bf16 %v905_v40, %v903_v39 }
  0x28   : > { %v9838_v45 = vld [vmem:[#allocation2 + $0x88] sm:$0xff]  ;;  %v9840_v46 = vld [vmem:[#allocation2 + $0x98] sm:$0xff]  ;;  %746 = vrot.lane.b32.xlu0 %v9778_v24, %s9550_s29  ;;  %1252 = vst.msk [vmem:[#allocation2 + $0x78] sm:$0xff] %vm577_vm0, %v9752_v18  ;;  %v9863_v51 = vld [vmem:[%s9664_s28 + $0xa0] sm:$0xff]  ;;  %8574 = vmatprep.subr.bf16.mxu0 %v8573_v43 }
  0x29   : > { %v9851_v48 = vld [vmem:[%s9664_s28 + $0xa8] sm:$0xff]  ;;  %v9854_v49 = vld [vmem:[%s9664_s28 + $0xb8] sm:$0xff]  ;;  %v9866_v52 = vld [vmem:[%s9664_s28 + $0xb0] sm:$0xff]  ;;  %1253 = vst [vmem:[#allocation2 + $0x80] sm:$0xff] %v9863_v51 }
  0x2a   : > { %13277 = vst [vmem:[#allocation13_spill] sm:$0xff] %v9851_v48  ;;  %13278 = vst [vmem:[#allocation14_spill] sm:$0xff] %v9854_v49  ;;  %v9872_v53 = vld [vmem:[#allocation2 + $0xe8] sm:$0xff]  ;;  %v9875_v54 = vld [vmem:[%s9664_s28 + $0x40] sm:$0xff] }
  0x2b   : > { %1254 = vst.msk [vmem:[#allocation2 + $0x88] sm:$0xff] %vm577_vm0, %v9851_v48  ;;  %1256 = vst.msk [vmem:[#allocation2 + $0x98] sm:$0xff] %vm577_vm0, %v9854_v49  ;;  %v9879_v56 = vld [vmem:[#allocation2 + $0xf8] sm:$0xff]  ;;  %v7265_v57 = vld [vmem:[%s9664_s28 + $0x108] sm:$0xff]  ;;  %786 = vrot.lane.b32.xlu1 %v9831_v41, %s9550_s29  ;;  %8576 = vmatpush1.bf16.msra.mxu0 %v8575_v50  ;;  %v8579_v0 = vpack.c.bf16 %v9732_v15, %v9875_v54 }
  0x2c   : > { %625 = vst.msk [vmem:[#allocation2 + $0xb8] sm:$0xff] %vm577_vm0, %v9851_v48  ;;  %627 = vst.msk [vmem:[#allocation2 + $0xc8] sm:$0xff] %vm577_vm0, %v9854_v49  ;;  %v9888_v59 = vld [vmem:[%s9664_s28 + $0x100] sm:$0xff]  ;;  %v9890_v60 = vld [vmem:[#allocation2 + $0x108] sm:$0xff]  ;;  %784 = vrot.lane.b32.xlu0 %v9834_v42, %s9550_s29  ;;  %8578 = vmatprep.subr.bf16.mxu0 %v8577_v55 }
  0x2d   : > { %1255 = vst [vmem:[#allocation2 + $0x90] sm:$0xff] %v9866_v52  ;;  %1316 = vst.msk [vmem:[#allocation2 + $0xe8] sm:$0xff] %vm577_vm0, %v9772_v23  ;;  %v7267_v61 = vld [vmem:[%s9664_s28 + $0x118] sm:$0xff]  ;;  %v9905_v63 = vld [vmem:[%s9664_s28 + $0x170] sm:$0xff] }
  0x2e   : > { %1318 = vst.msk [vmem:[#allocation2 + $0xf8] sm:$0xff] %vm577_vm0, %v7265_v57  ;;  %663 = vst.msk [vmem:[#allocation2 + $0x128] sm:$0xff] %vm577_vm0, %v7265_v57  ;;  %v9902_v62 = vld [vmem:[%s9664_s28 + $0x178] sm:$0xff]  ;;  %v9913_v19 = vld [vmem:[%s9664_s28 + $0x1e8] sm:$0xff] }
  0x2f   : > { %1317 = vst [vmem:[#allocation2 + $0xf0] sm:$0xff] %v9888_v59  ;;  %1320 = vst.msk [vmem:[#allocation2 + $0x108] sm:$0xff] %vm577_vm0, %v7267_v61  ;;  %v9916_v30 = vld [vmem:[%s9664_s28 + $0x238] sm:$0xff]  ;;  %v9921_v33 = vld [vmem:[%s9664_s28 + $0x230] sm:$0xff]  ;;  %819 = vrot.lane.b32.xlu1 %v9680_v4, %s13265_s30  ;;  %8580 = vmatpush1.bf16.msra.mxu0 %v8579_v0 }
  0x30   : > { %665 = vst.msk [vmem:[#allocation2 + $0x138] sm:$0xff] %vm577_vm0, %v7267_v61  ;;  %13279 = vst [vmem:[#allocation15_spill] sm:$0xff] %v9902_v62  ;;  %v9926_v34 = vld [vmem:[%s9664_s28 + $0x110] sm:$0xff]  ;;  %817 = vrot.lane.b32.xlu0 %v9670_v2, %s13265_s30  ;;  %v9938_v38 = vld [vmem:[%s9664_s28 + $0x168] sm:$0xff] }
  0x31   : > { %703 = vst.msk [vmem:[#allocation2 + $0x1a8] sm:$0xff] %vm577_vm0, %v9902_v62  ;;  %1973 = vst [vmem:[#allocation2 + $0x50] sm:$0xff] %v9905_v63  ;;  %v9947_v39 = vld [vmem:[%s9664_s28 + $0x198] sm:$0xff]  ;;  %v9956_v40 = vld [vmem:[%s9664_s28 + $0x1a8] sm:$0xff] }
  0x32   : > { %13280 = vst [vmem:[#allocation16_spill] sm:$0xff] %v9913_v19  ;;  %13281 = vst [vmem:[#allocation17_spill] sm:$0xff] %v9916_v30  ;;  %v9959_v43 = vld [vmem:[%s9664_s28 + $0x160] sm:$0xff]  ;;  %v9969_v50 = vld [vmem:[%s9664_s28 + $0x1b8] sm:$0xff] }
  0x33   : > { %769 = vst.msk [vmem:[#allocation2 + $0x238] sm:$0xff] %vm577_vm0, %v9913_v19  ;;  %13282 = vst [vmem:[#allocation18_spill] sm:$0xff] %v9921_v33  ;;  %823 = vrot.lane.b32.xlu1 %v9704_v9, %s13265_s30  ;;  %v9977_v55 = vld [vmem:[#allocation2 + $0x1c8] sm:$0xff]  ;;  %v9991_v35 = vld [vmem:[%s9664_s28 + $0x1d8] sm:$0xff] }
  0x34   : > { %779 = vst.msk [vmem:[#allocation2 + $0x288] sm:$0xff] %vm577_vm0, %v9916_v30  ;;  %1511 = vst [vmem:[#allocation2 + $0x250] sm:$0xff] %v9921_v33  ;;  %821 = vrot.lane.b32.xlu0 %v9798_v28, %s13265_s30  ;;  %v9982_v61 = vld [vmem:[%s9664_s28 + $0x1c8] sm:$0xff]  ;;  %v10004_v58 = vld [vmem:[%s9664_s28 + $0x1b0] sm:$0xff] }
  0x35   : > { %2047 = vst [vmem:[#allocation2 + $0x130] sm:$0xff] %v9921_v33  ;;  %1319 = vst [vmem:[#allocation2 + $0x100] sm:$0xff] %v9926_v34  ;;  %v10007_v47 = vld [vmem:[%s9664_s28 + $0x1c0] sm:$0xff]  ;;  %v10020_v33 = vld [vmem:[%s9664_s28 + $0x1f8] sm:$0xff] }
  0x36   : > { %13283 = vst [vmem:[#allocation19_spill] sm:$0xff] %v9938_v38  ;;  %701 = vst.msk [vmem:[#allocation2 + $0x198] sm:$0xff] %vm577_vm0, %v9938_v38  ;;  %v887_v49 = vld [vmem:[%s13193_s1 + $0x8] sm:$0xff]  ;;  %v10046_v38 = vld [vmem:[%s9664_s28 + $0x218] sm:$0xff] }
  0x37   : > { %827 = vrot.lane.b32.xlu1 %v9713_v10, %s13265_s30  ;;  %733 = vst.msk [vmem:[#allocation2 + $0x1d8] sm:$0xff] %vm577_vm0, %v9947_v39  ;;  %1971 = vst [vmem:[#allocation2 + $0x40] sm:$0xff] %v9959_v43  ;;  %1075 = vmatprep.mubr.f32.mxu0 %v887_v49 }
  0x38   : > { %825 = vrot.lane.b32.xlu0 %v9820_v36, %s13265_s30  ;;  %735 = vst.msk [vmem:[#allocation2 + $0x1e8] sm:$0xff] %vm577_vm0, %v9956_v40  ;;  %13284 = vst [vmem:[#allocation20_spill] sm:$0xff] %v9969_v50 }
  0x39   : > { %737 = vst.msk [vmem:[#allocation2 + $0x1f8] sm:$0xff] %vm577_vm0, %v9969_v50  ;;  %13285 = vst [vmem:[#allocation21_spill] sm:$0xff] %v9982_v61 }
  0x3a   : > { %1444 = vst.msk [vmem:[#allocation2 + $0x1c8] sm:$0xff] %vm577_vm0, %v9969_v50  ;;  %13286 = vst [vmem:[#allocation22_spill] sm:$0xff] %v9991_v35  ;;  %v10043_v62 = vld [vmem:[#allocation2 + $0x238] sm:$0xff]  ;;  %v10049_v50 = vld [vmem:[%s9664_s28 + $0x228] sm:$0xff] }
  0x3b   : > { %831 = vrot.lane.b32.xlu1 %v9721_v12, %s13265_s30  ;;  %739 = vst.msk [vmem:[#allocation2 + $0x208] sm:$0xff] %vm577_vm0, %v9982_v61  ;;  %741 = vst.msk [vmem:[#allocation2 + $0x218] sm:$0xff] %vm577_vm0, %v9991_v35 }
  0x3c   : > { %829 = vrot.lane.b32.xlu0 %v9823_v37, %s13265_s30  ;;  %13288 = vst [vmem:[#allocation24_spill] sm:$0xff] %v10004_v58  ;;  %13289 = vst [vmem:[#allocation25_spill] sm:$0xff] %v10007_v47 }
  0x3d   : > { %1443 = vst [vmem:[#allocation2 + $0x1c0] sm:$0xff] %v10004_v58  ;;  %1445 = vst [vmem:[#allocation2 + $0x1d0] sm:$0xff] %v10007_v47 }
  0x3e   : > { %v9979_v57 = vld [vmem:[#allocation2 + $0x1d8] sm:$0xff]  ;;  %2006 = vst [vmem:[#allocation2 + $0xa0] sm:$0xff] %v10004_v58  ;;  %2008 = vst [vmem:[#allocation2 + $0xb0] sm:$0xff] %v10007_v47  ;;  %v10066_v47 = vld [vmem:[%s9664_s28 + $0x210] sm:$0xff] }
  0x3f   : > { %835 = vrot.lane.b32.xlu1 %v9724_v13, %s13265_s30  ;;  %1446 = vst.msk [vmem:[#allocation2 + $0x1d8] sm:$0xff] %vm577_vm0, %v9982_v61  ;;  %v10001_v0 = vld [vmem:[#allocation2 + $0x1e8] sm:$0xff]  ;;  %13290 = vst [vmem:[#allocation26_spill] sm:$0xff] %v10020_v33  ;;  %v10026_v61 = vld [vmem:[%s9664_s28 + $0x1d0] sm:$0xff] }
  0x40   : > { %833 = vrot.lane.b32.xlu0 %v9875_v54, %s13265_s30  ;;  %13287 = vst [vmem:[#allocation23_spill] sm:$0xff] %v10001_v0  ;;  %1448 = vst.msk [vmem:[#allocation2 + $0x1e8] sm:$0xff] %vm577_vm0, %v9991_v35  ;;  %v10023_v35 = vld [vmem:[%s9664_s28 + $0x208] sm:$0xff]  ;;  %v10258_v0 = vld [vmem:[%s9664_s28 + $0x170] sm:$0xff] }
  0x41   : > { %13291 = vst [vmem:[#allocation27_spill] sm:$0xff] %v10023_v35  ;;  %13292 = vst [vmem:[#allocation28_spill] sm:$0xff] %v10026_v61 }
  0x42   : > { %771 = vst.msk [vmem:[#allocation2 + $0x248] sm:$0xff] %vm577_vm0, %v10020_v33  ;;  %773 = vst.msk [vmem:[#allocation2 + $0x258] sm:$0xff] %vm577_vm0, %v10023_v35 }
  0x43   : > { %839 = vrot.lane.b32.xlu1 %v9729_v14, %s13265_s30  ;;  %1447 = vst [vmem:[#allocation2 + $0x1e0] sm:$0xff] %v10026_v61  ;;  %2010 = vst [vmem:[#allocation2 + $0xc0] sm:$0xff] %v10026_v61  ;;  %v10094_v61 = vld [vmem:[%s9664_s28 + $0x70] sm:$0xff] }
  0x44   : > { %837 = vrot.lane.b32.xlu0 %v9732_v15, %s13265_s30  ;;  %13293 = vst [vmem:[#allocation29_spill] sm:$0xff] %v10043_v62  ;;  %13294 = vst [vmem:[#allocation30_spill] sm:$0xff] %v10046_v38  ;;  %v10139_v62 = vld [vmem:[%s9664_s28 + $0x138] sm:$0xff] }
  0x45   : > { %13295 = vst [vmem:[#allocation31_spill] sm:$0xff] %v10049_v50  ;;  %1508 = vst.msk [vmem:[#allocation2 + $0x238] sm:$0xff] %vm577_vm0, %v10046_v38 }
  0x46   : > { %775 = vst.msk [vmem:[#allocation2 + $0x268] sm:$0xff] %vm577_vm0, %v10046_v38  ;;  %777 = vst.msk [vmem:[#allocation2 + $0x278] sm:$0xff] %vm577_vm0, %v10049_v50  ;;  %v10081_v38 = vld [vmem:[%s9664_s28 + $0x220] sm:$0xff] }
  0x47   : > { %878 = vrot.lane.b32.xlu1 %v9680_v4, %s9552_s0  ;;  %13298 = vst [vmem:[#allocation34_spill] sm:$0xff] %v10066_v47  ;;  %1507 = vst [vmem:[#allocation2 + $0x230] sm:$0xff] %v10066_v47 }
  0x48   : > { %876 = vrot.lane.b32.xlu0 %v9670_v2, %s9552_s0  ;;  %2043 = vst [vmem:[#allocation2 + $0x110] sm:$0xff] %v10066_v47  ;;  %13299 = vst [vmem:[#allocation35_spill] sm:$0xff] %v10081_v38  ;;  %v10118_v47 = vld [vmem:[%s9664_s28 + $0x158] sm:$0xff] }
  0x49   : > { %v10061_v49 = vld [vmem:[#allocation2 + $0x248] sm:$0xff]  ;;  %v10063_v48 = vld [vmem:[#allocation2 + $0x258] sm:$0xff]  ;;  %1509 = vst [vmem:[#allocation2 + $0x240] sm:$0xff] %v10081_v38  ;;  %2045 = vst [vmem:[#allocation2 + $0x120] sm:$0xff] %v10081_v38 }
  0x4a   : > { %13296 = vst [vmem:[#allocation32_spill] sm:$0xff] %v10061_v49  ;;  %13297 = vst [vmem:[#allocation33_spill] sm:$0xff] %v10063_v48  ;;  %v10115_v38 = vld [vmem:[#allocation2 + $0x158] sm:$0xff]  ;;  %v10136_v48 = vld [vmem:[%s9664_s28 + $0x128] sm:$0xff] }
  0x4b   : > { %1211 = vrot.lane.b32.xlu1 %v9680_v4, %s9550_s29  ;;  %1510 = vst.msk [vmem:[#allocation2 + $0x248] sm:$0xff] %vm577_vm0, %v10049_v50  ;;  %1512 = vst.msk [vmem:[#allocation2 + $0x258] sm:$0xff] %vm577_vm0, %v9916_v30  ;;  %v10101_v30 = vld [vmem:[%s9664_s28 + $0x80] sm:$0xff]  ;;  %v10107_v50 = vld [vmem:[#allocation2 + $0x108] sm:$0xff] }
  0x4c   : > { %1209 = vrot.lane.b32.xlu0 %v9670_v2, %s9550_s29  ;;  %13300 = vst [vmem:[#allocation36_spill] sm:$0xff] %v10107_v50  ;;  %2042 = vst.msk [vmem:[#allocation2 + $0x108] sm:$0xff] %vm577_vm0, %v10023_v35  ;;  %v10124_v50 = vld [vmem:[#allocation2 + $0x8] sm:$0xff]  ;;  %v10131_v35 = vld [vmem:[%s9664_s28 + $0xd0] sm:$0xff] }
  0x4d   : > { %13301 = vst [vmem:[#allocation37_spill] sm:$0xff] %v10118_v47  ;;  %13302 = vst [vmem:[#allocation38_spill] sm:$0xff] %v10124_v50  ;;  %v10152_v49 = vld [vmem:[#allocation2 + $0x28] sm:$0xff] }
  0x4e   : > { %1380 = vst.msk [vmem:[#allocation2 + $0x158] sm:$0xff] %vm577_vm0, %v10118_v47  ;;  %13304 = vst [vmem:[#allocation40_spill] sm:$0xff] %v10136_v48  ;;  %v10155_v50 = vld [vmem:[%s9664_s28 + $0x148] sm:$0xff] }
  0x4f   : > { %1215 = vrot.lane.b32.xlu1 %v9704_v9, %s9550_s29  ;;  %13305 = vst [vmem:[#allocation41_spill] sm:$0xff] %v10139_v62  ;;  %1964 = vst.msk [vmem:[#allocation2 + $0x8] sm:$0xff] %vm577_vm0, %v10136_v48 }
  0x50   : > { %1213 = vrot.lane.b32.xlu0 %v9798_v28, %s9550_s29  ;;  %13306 = vst [vmem:[#allocation42_spill] sm:$0xff] %v10152_v49  ;;  %13307 = vst [vmem:[#allocation43_spill] sm:$0xff] %v10155_v50 }
  0x51   : > { %1968 = vst.msk [vmem:[#allocation2 + $0x28] sm:$0xff] %vm577_vm0, %v10155_v50  ;;  %v10180_v50 = vld [vmem:[#allocation2 + $0x98] sm:$0xff]  ;;  %13317 = vst [vmem:[#allocation53_spill] sm:$0xff] %v10258_v0 }
  0x52   : > { %13311 = vst [vmem:[#allocation47_spill] sm:$0xff] %v10180_v50  ;;  %2005 = vst.msk [vmem:[#allocation2 + $0x98] sm:$0xff] %vm577_vm0, %v9956_v40 }
  0x53   : > { %1219 = vrot.lane.b32.xlu1 %v9713_v10, %s9550_s29 }
  0x54   : > { %1217 = vrot.lane.b32.xlu0 %v9820_v36, %s9550_s29 }
  0x57   : > { %1223 = vrot.lane.b32.xlu1 %v9721_v12, %s9550_s29 }
  0x58   : > { %1221 = vrot.lane.b32.xlu0 %v9823_v37, %s9550_s29 }
  0x5b   : > { %1275 = vrot.lane.b32.xlu1 %v9673_v3, %s9550_s29 }
  0x5c   : > { %1273 = vrot.lane.b32.xlu0 %v9667_v1, %s9550_s29 }
  0x5f   : > { %1279 = vrot.lane.b32.xlu1 %v9739_v16, %s9550_s29  ;;  %v10255_v16 = vld [vmem:[#allocation2 + $0x20] sm:$0xff] }
  0x60   : > { %1277 = vrot.lane.b32.xlu0 %v10094_v61, %s9550_s29  ;;  %13316 = vst [vmem:[#allocation52_spill] sm:$0xff] %v10255_v16  ;;  %2731 = vst [vmem:[#allocation2 + $0x20] sm:$0xff] %v10258_v0  ;;  %v919_v0 = vld [vmem:[#allocation2 + $0xc8] sm:$0xff] }
  0x63   : > { %1283 = vrot.lane.b32.xlu1 %v9742_v17, %s9550_s29 }
  0x64   : > { %1281 = vrot.lane.b32.xlu0 %v10101_v30, %s9550_s29 }
  0x67   : > { %1287 = vrot.lane.b32.xlu1 %v9752_v18, %s9550_s29  ;;  %v10126_v18 = vld [vmem:[#allocation2 + $0x18] sm:$0xff] }
  0x68   : > { %1285 = vrot.lane.b32.xlu0 %v9759_v20, %s9550_s29  ;;  %13303 = vst [vmem:[#allocation39_spill] sm:$0xff] %v10126_v18  ;;  %1966 = vst.msk [vmem:[#allocation2 + $0x18] sm:$0xff] %vm577_vm0, %v10139_v62  ;;  %v10170_v62 = vld [vmem:[%s9664_s28 + $0x188] sm:$0xff] }
  0x69   : > { %13309 = vst [vmem:[#allocation45_spill] sm:$0xff] %v10170_v62 }
  0x6b   : > { %1339 = vrot.lane.b32.xlu1 %v9683_v5, %s9550_s29  ;;  %v10150_v5 = vld [vmem:[%s9664_s28 + $0xe0] sm:$0xff] }
  0x6c   : > { %1337 = vrot.lane.b32.xlu0 %v9718_v11, %s9550_s29 }
  0x6f   : > { %1343 = vrot.lane.b32.xlu1 %v9762_v21, %s9550_s29  ;;  %v10167_v21 = vld [vmem:[#allocation2 + $0x78] sm:$0xff] }
  0x70   : > { %1341 = vrot.lane.b32.xlu0 %v10131_v35, %s9550_s29  ;;  %13308 = vst [vmem:[#allocation44_spill] sm:$0xff] %v10167_v21  ;;  %2001 = vst.msk [vmem:[#allocation2 + $0x78] sm:$0xff] %vm577_vm0, %v10170_v62  ;;  %v10193_v62 = vld [vmem:[%s9664_s28 + $0x140] sm:$0xff]  ;;  %v10229_v21 = vld [vmem:[%s9664_s28 + $0x178] sm:$0xff] }
  0x71   : > { %13315 = vst [vmem:[#allocation51_spill] sm:$0xff] %v10229_v21 }
  0x73   : > { %1347 = vrot.lane.b32.xlu1 %v9769_v22, %s9550_s29  ;;  %v10178_v22 = vld [vmem:[#allocation2 + $0x88] sm:$0xff] }
  0x74   : > { %1345 = vrot.lane.b32.xlu0 %v10150_v5, %s9550_s29  ;;  %13310 = vst [vmem:[#allocation46_spill] sm:$0xff] %v10178_v22  ;;  %2003 = vst.msk [vmem:[#allocation2 + $0x88] sm:$0xff] %vm577_vm0, %v9947_v39 }
  0x77   : > { %1351 = vrot.lane.b32.xlu1 %v9772_v23, %s9550_s29  ;;  %v10203_v23 = vld [vmem:[#allocation2 + $0xe8] sm:$0xff] }
  0x78   : > { %1349 = vrot.lane.b32.xlu0 %v9781_v25, %s9550_s29  ;;  %13312 = vst [vmem:[#allocation48_spill] sm:$0xff] %v10203_v23  ;;  %2038 = vst.msk [vmem:[#allocation2 + $0xe8] sm:$0xff] %vm577_vm0, %v9913_v19 }
  0x7b   : > { %1403 = vrot.lane.b32.xlu1 %v9688_v6, %s9550_s29 }
  0x7c   : > { %1401 = vrot.lane.b32.xlu0 %v9691_v7, %s9550_s29 }
  0x7f   : > { %1407 = vrot.lane.b32.xlu1 %v9784_v26, %s9550_s29  ;;  %v10205_v26 = vld [vmem:[#allocation2 + $0xf8] sm:$0xff] }
  0x80   : > { %1405 = vrot.lane.b32.xlu0 %v9787_v27, %s9550_s29  ;;  %13313 = vst [vmem:[#allocation49_spill] sm:$0xff] %v10205_v26  ;;  %2040 = vst.msk [vmem:[#allocation2 + $0xf8] sm:$0xff] %vm577_vm0, %v10020_v33  ;;  %v10226_v26 = vld [vmem:[#allocation2 + $0x178] sm:$0xff] }
  0x81   : > { %1384 = vst.msk [vmem:[#allocation2 + $0x178] sm:$0xff] %vm577_vm0, %v10229_v21 }
  0x83   : > { %1411 = vrot.lane.b32.xlu1 %v9801_v29, %s9550_s29  ;;  %v10213_v29 = vld [vmem:[#allocation2 + $0x168] sm:$0xff] }
  0x84   : > { %1409 = vrot.lane.b32.xlu0 %v10193_v62, %s9550_s29 }
  0x87   : > { %1415 = vrot.lane.b32.xlu1 %v9808_v31, %s9550_s29  ;;  %v10216_v31 = vld [vmem:[%s9664_s28 + $0x168] sm:$0xff] }
  0x88   : > { %1413 = vrot.lane.b32.xlu0 %v9811_v32, %s9550_s29  ;;  %13314 = vst [vmem:[#allocation50_spill] sm:$0xff] %v10216_v31  ;;  %1382 = vst.msk [vmem:[#allocation2 + $0x168] sm:$0xff] %vm577_vm0, %v10216_v31 }
  0x89   : > { %v633_v48 = vpop.permute.xlu1 %632 }
  0x8a   : > { %v594_v22 = vpop.permute.xlu0 %593 }
  0x8b   : > { %1467 = vrot.lane.b32.xlu1 %v9698_v8, %s9550_s29 }
  0x8c   : > { %1465 = vrot.lane.b32.xlu0 %v9778_v24, %s9550_s29 }
  0x8d   : > { %v635_v50 = vpop.permute.xlu1 %634 }
  0x8e   : > { %v596_v23 = vpop.permute.xlu0 %595  ;;  %640 = vst.msk [vmem:[#allocation2 + $0xd8] sm:$0xff] %vm577_vm0, %v635_v50 }
  0x8f   : > { %602 = vst.msk [vmem:[#allocation2 + $0x68] sm:$0xff] %vm577_vm0, %v596_v23  ;;  %1981 = vrot.lane.b32.xlu1 %v9688_v6, %s9550_s29  ;;  %v598_v6 = vsel %vm597_vm1, %v594_v22, %v596_v23  ;;  %v917_v22 = vld [vmem:[#allocation2 + $0xb8] sm:$0xff] }
  0x90   : > { %1979 = vrot.lane.b32.xlu0 %v9691_v7, %s9550_s29 }
  0x91   : > { %v10237_v49 = vpop.permute.xlu1 %672 }
  0x92   : > { %v10239_v18 = vpop.permute.xlu0 %670  ;;  %678 = vst.msk [vmem:[#allocation2 + $0x148] sm:$0xff] %vm577_vm0, %v10237_v49 }
  0x93   : > { %2018 = vrot.lane.b32.xlu1 %v9698_v8, %s9550_s29  ;;  %v8583_v8 = vpack.c.bf16 %v9667_v1, %v598_v6 }
  0x94   : > { %2016 = vrot.lane.b32.xlu0 %v9778_v24, %s9550_s29  ;;  %v915_v24 = vld [vmem:[#allocation2 + $0xa8] sm:$0xff] }
  0x95   : > { %v10248_v33 = vpop.permute.xlu1 %710  ;;  %v921_v16 = vld [vmem:[#allocation2 + $0xd8] sm:$0xff] }
  0x96   : > { %v10250_v19 = vpop.permute.xlu0 %708  ;;  %v907_v17 = vld [vmem:[#allocation2 + $0x68] sm:$0xff]  ;;  %716 = vst.msk [vmem:[#allocation2 + $0x1b8] sm:$0xff] %vm577_vm0, %v10248_v33 }
  0x97   : > { %v8581_v58 = vpack.c.bf16 %v9836_v44, %v907_v17  ;;  %2055 = vrot.lane.b32.xlu1 %v9831_v41, %s9550_s29  ;;  %v8587_v44 = vpack.c.bf16 %v10101_v30, %v10094_v61  ;;  %v13318_v41 = vpack.c.bf16 %v9840_v46, %v9838_v45  ;;  %v636_v45 = vsel %vm597_vm1, %v633_v48, %v635_v50  ;;  %v931_v50 = vld [vmem:[#allocation2 + $0x128] sm:$0xff] }
  0x98   : > { %2053 = vrot.lane.b32.xlu0 %v9834_v42, %s9550_s29  ;;  %v8589_v42 = vpack.c.bf16 %v917_v22, %v915_v24  ;;  %v8593_v46 = vpack.c.bf16 %v921_v16, %v919_v0  ;;  %v8599_v48 = vpack.c.bf16 %v10131_v35, %v9718_v11  ;;  %v933_v0 = vld [vmem:[#allocation2 + $0x138] sm:$0xff] }
  0x99   : > { %8582 = vmatprep.subr.bf16.mxu0 %v8581_v58  ;;  %v10266_v23 = vpop.permute.xlu1 %748 }
  0x9a   : > { %v10268_v17 = vpop.permute.xlu0 %746  ;;  %8584 = vmatpush1.bf16.msra.mxu0 %v8583_v8  ;;  %754 = vst.msk [vmem:[#allocation2 + $0x228] sm:$0xff] %vm577_vm0, %v10266_v23  ;;  %v8591_v8 = vpack.c.bf16 %v9863_v51, %v9759_v20  ;;  %v929_v20 = vld [vmem:[#allocation2 + $0x118] sm:$0xff] }
  0x9b   : > { %8586 = vmatprep.subr.bf16.mxu0 %v13318_v41  ;;  %2088 = vrot.lane.b32.xlu1 %v9680_v4, %s13265_s30  ;;  %v935_v41 = vld [vmem:[#allocation2 + $0x148] sm:$0xff] }
  0x9c   : > { %2086 = vrot.lane.b32.xlu0 %v9670_v2, %s13265_s30 }
  0x9d   : > { %v10281_v58 = vpop.permute.xlu1 %786 }
  0x9e   : > { %v10283_v6 = vpop.permute.xlu0 %784  ;;  %8588 = vmatpush1.bf16.msra.mxu0 %v8587_v44  ;;  %792 = vst.msk [vmem:[#allocation2 + $0x298] sm:$0xff] %vm577_vm0, %v10281_v58  ;;  %v10341_v44 = vld [vmem:[#allocation2 + $0x18] sm:$0xff] }
  0x9f   : > { %8590 = vmatprep.subr.bf16.mxu0 %v8589_v42  ;;  %2092 = vrot.lane.b32.xlu1 %v9704_v9, %s13265_s30  ;;  %v8595_v9 = vpack.c.bf16 %v636_v45, %v9866_v52  ;;  %2730 = vst.msk [vmem:[#allocation2 + $0x18] sm:$0xff] %vm577_vm0, %v10216_v31  ;;  %v10355_v42 = vld [vmem:[#allocation2 + $0x10] sm:$0xff]  ;;  %v674_v45 = vsel %vm597_vm1, %v10239_v18, %v10237_v49  ;;  %v13351_v31 = vld [vmem:[#allocation35_spill] sm:$0xff] }
  0xa0   : > { %2090 = vrot.lane.b32.xlu0 %v9798_v28, %s13265_s30  ;;  %13321 = vst [vmem:[#allocation55_spill] sm:$0xff] %v10355_v42  ;;  %v975_v42 = vld [vmem:[#allocation2 + $0x288] sm:$0xff] }
  0xa1   : > { %v10294_v24 = vpop.permute.xlu1 %819 }
  0xa2   : > { %v10296_v22 = vpop.permute.xlu0 %817  ;;  %8592 = vmatpush1.bf16.msra.mxu0 %v8591_v8  ;;  %861 = vst.msk [vmem:[#allocation2 + $0x2a8] sm:$0xff] %vm577_vm0, %v10294_v24  ;;  %v7437_v8 = vld [vmem:[%s9664_s28 + $0x228] sm:$0xff] }
  0xa3   : > { %8594 = vmatprep.subr.bf16.mxu0 %v8593_v46  ;;  %2096 = vrot.lane.b32.xlu1 %v9713_v10, %s13265_s30  ;;  %v13319_v10 = vpack.c.bf16 %v9879_v56, %v9872_v53  ;;  %v8603_v53 = vpack.c.bf16 %v9781_v25, %v10150_v5  ;;  %v8605_v56 = vpack.c.bf16 %v933_v0, %v931_v50  ;;  %v10420_v50 = vld [vmem:[%s9664_s28 + $0x1b8] sm:$0xff]  ;;  %v10432_v0 = vld [vmem:[%s9664_s28 + $0x180] sm:$0xff] }
  0xa4   : > { %2094 = vrot.lane.b32.xlu0 %v9820_v36, %s13265_s30  ;;  %v8601_v36 = vpack.c.bf16 %v929_v20, %v9890_v60  ;;  %v10339_v60 = vld [vmem:[#allocation2 + $0x8] sm:$0xff]  ;;  %v8609_v46 = vpack.c.bf16 %v10115_v38, %v935_v41  ;;  %v10392_v38 = vld [vmem:[%s9664_s28 + $0x190] sm:$0xff]  ;;  %13326 = vst [vmem:[#allocation59_spill] sm:$0xff] %v10420_v50  ;;  %13327 = vst [vmem:[#allocation60_spill] sm:$0xff] %v10432_v0 }
  0xa5   : > { %v10305_v28 = vpop.permute.xlu1 %823  ;;  %2728 = vst.msk [vmem:[#allocation2 + $0x8] sm:$0xff] %vm577_vm0, %v10118_v47  ;;  %13323 = vst [vmem:[#allocation56_spill] sm:$0xff] %v10392_v38  ;;  %v7420_v41 = vld [vmem:[%s9664_s28 + $0x1b0] sm:$0xff] }
  0xa6   : > { %v10307_v16 = vpop.permute.xlu0 %821  ;;  %8596 = vmatpush1.bf16.msra.mxu0 %v8595_v9  ;;  %863 = vst.msk [vmem:[#allocation2 + $0x2b8] sm:$0xff] %vm577_vm0, %v10305_v28 }
  0xa7   : > { %8598 = vmatprep.subr.bf16.mxu0 %v13319_v10  ;;  %2100 = vrot.lane.b32.xlu1 %v9721_v12, %s13265_s30  ;;  %v10334_v12 = vld [vmem:[%s9664_s28 + $0x150] sm:$0xff]  ;;  %v10378_v10 = vld [vmem:[#allocation2 + $0x28] sm:$0xff] }
  0xa8   : > { %2098 = vrot.lane.b32.xlu0 %v9823_v37, %s13265_s30  ;;  %v10337_v37 = vld [vmem:[%s9664_s28 + $0x160] sm:$0xff]  ;;  %2732 = vst.msk [vmem:[#allocation2 + $0x28] sm:$0xff] %vm577_vm0, %v10229_v21  ;;  %v10569_v21 = vld [vmem:[#allocation2 + $0x108] sm:$0xff] }
  0xa9   : > { %v10321_v11 = vpop.permute.xlu1 %827  ;;  %2729 = vst [vmem:[#allocation2 + $0x10] sm:$0xff] %v10337_v37 }
  0xaa   : > { %v10323_v35 = vpop.permute.xlu0 %825  ;;  %8600 = vmatpush1.bf16.msra.mxu0 %v8599_v48  ;;  %865 = vst.msk [vmem:[#allocation2 + $0x2c8] sm:$0xff] %vm577_vm0, %v10321_v11  ;;  %v13322_v48 = vpack.c.bf16 %v9926_v34, %v9888_v59  ;;  %v943_v59 = vld [vmem:[#allocation2 + $0x188] sm:$0xff]  ;;  %v945_v34 = vld [vmem:[#allocation2 + $0x198] sm:$0xff] }
  0xab   : > { %8602 = vmatprep.subr.bf16.mxu0 %v8601_v36  ;;  %2104 = vrot.lane.b32.xlu1 %v9724_v13, %s13265_s30  ;;  %v949_v36 = vld [vmem:[#allocation2 + $0x1b8] sm:$0xff]  ;;  %v13339_v13 = vld [vmem:[#allocation12_spill] sm:$0xff] }
  0xac   : > { %2102 = vrot.lane.b32.xlu0 %v9875_v54, %s13265_s30  ;;  %v10353_v54 = vld [vmem:[#allocation2] sm:$0xff] }
  0xad   : > { %v10343_v25 = vpop.permute.xlu1 %831  ;;  %13320 = vst [vmem:[#allocation54_spill] sm:$0xff] %v10353_v54  ;;  %2727 = vst [vmem:[#allocation2] sm:$0xff] %v10334_v12 }
  0xae   : > { %v10345_v5 = vpop.permute.xlu0 %829  ;;  %8604 = vmatpush1.bf16.msra.mxu0 %v8603_v53  ;;  %867 = vst.msk [vmem:[#allocation2 + $0x2d8] sm:$0xff] %vm577_vm0, %v10343_v25 }
  0xaf   : > { %8606 = vmatprep.subr.bf16.mxu0 %v8605_v56  ;;  %2108 = vrot.lane.b32.xlu1 %v9729_v14, %s13265_s30  ;;  %v8613_v14 = vpack.c.bf16 %v10226_v26, %v10213_v29  ;;  %v8615_v26 = vpack.c.bf16 %v10193_v62, %v9787_v27  ;;  %v8619_v27 = vpack.c.bf16 %v9959_v43, %v9811_v32  ;;  %v947_v62 = vld [vmem:[#allocation2 + $0x1a8] sm:$0xff] }
  0xb0   : > { %2106 = vrot.lane.b32.xlu0 %v9732_v15, %s13265_s30  ;;  %v8611_v15 = vpack.c.bf16 %v9691_v7, %v674_v45  ;;  %v712_v32 = vsel %vm597_vm1, %v10250_v19, %v10248_v33  ;;  %v8621_v43 = vpack.c.bf16 %v949_v36, %v947_v62  ;;  %v10441_v45 = vld [vmem:[#allocation2 + $0x88] sm:$0xff]  ;;  %v7425_v33 = vld [vmem:[%s9664_s28 + $0x1d8] sm:$0xff] }
  0xb1   : > { %v10371_v9 = vpop.permute.xlu1 %835  ;;  %13328 = vst [vmem:[#allocation61_spill] sm:$0xff] %v10441_v45  ;;  %v7423_v19 = vld [vmem:[%s9664_s28 + $0x1c8] sm:$0xff] }
  0xb2   : > { %v10373_v20 = vpop.permute.xlu0 %833  ;;  %8608 = vmatpush1.bf16.msra.mxu0 %v13322_v48  ;;  %869 = vst.msk [vmem:[#allocation2 + $0x2e8] sm:$0xff] %vm577_vm0, %v10371_v9  ;;  %v8623_v48 = vpack.c.bf16 %v712_v32, %v9905_v63  ;;  %2794 = vst.msk [vmem:[#allocation2 + $0x88] sm:$0xff] %vm577_vm0, %v7423_v19  ;;  %v7422_v63 = vld [vmem:[%s9664_s28 + $0x1c0] sm:$0xff] }
  0xb3   : > { %8610 = vmatprep.subr.bf16.mxu0 %v8609_v46  ;;  %2146 = vrot.lane.b32.xlu1 %v9680_v4, %s9552_s0  ;;  %v10407_v4 = vld [vmem:[%s9664_s28 + $0x1a0] sm:$0xff]  ;;  %v10445_v46 = vld [vmem:[#allocation2 + $0x98] sm:$0xff] }
  0xb4   : > { %2144 = vrot.lane.b32.xlu0 %v9670_v2, %s9552_s0  ;;  %v8617_v2 = vpack.c.bf16 %v945_v34, %v943_v59  ;;  %13324 = vst [vmem:[#allocation57_spill] sm:$0xff] %v10407_v4  ;;  %13329 = vst [vmem:[#allocation62_spill] sm:$0xff] %v10445_v46  ;;  %v10458_v59 = vld [vmem:[#allocation2 + $0x80] sm:$0xff]  ;;  %v10561_v46 = vld [vmem:[#allocation2 + $0xf0] sm:$0xff] }
  0xb5   : > { %v10394_v49 = vpop.permute.xlu1 %839  ;;  %2796 = vst.msk [vmem:[#allocation2 + $0x98] sm:$0xff] %vm577_vm0, %v7425_v33  ;;  %v13331_v62 = vld [vmem:[#allocation23_spill] sm:$0xff]  ;;  %2793 = vst [vmem:[#allocation2 + $0x80] sm:$0xff] %v7422_v63 }
  0xb6   : > { %v10396_v18 = vpop.permute.xlu0 %837  ;;  %8612 = vmatpush1.bf16.msra.mxu0 %v8611_v15  ;;  %871 = vst.msk [vmem:[#allocation2 + $0x2f8] sm:$0xff] %vm577_vm0, %v10394_v49  ;;  %v13332_v32 = vld [vmem:[#allocation11_spill] sm:$0xff]  ;;  %v10522_v15 = vld [vmem:[%s9664_s28 + $0x218] sm:$0xff] }
  0xb7   : > { %8614 = vmatprep.subr.bf16.mxu0 %v8613_v14  ;;  %1471 = vrot.lane.b32.xlu1 %v9947_v39, %s9550_s29  ;;  %v10417_v39 = vld [vmem:[#allocation2 + $0x78] sm:$0xff]  ;;  %v963_v63 = vld [vmem:[#allocation2 + $0x228] sm:$0xff] }
  0xb8   : > { %1469 = vrot.lane.b32.xlu0 %v10392_v38, %s9550_s29  ;;  %13325 = vst [vmem:[#allocation58_spill] sm:$0xff] %v10417_v39  ;;  %2792 = vst.msk [vmem:[#allocation2 + $0x78] sm:$0xff] %vm577_vm0, %v10420_v50  ;;  %v957_v14 = vld [vmem:[#allocation2 + $0x1f8] sm:$0xff]  ;;  %v7368_v50 = vld [vmem:[%s9664_s28 + $0x90] sm:$0xff] }
  0xb9   : > { %v10409_v7 = vpop.permute.xlu1 %878  ;;  %v8629_v36 = vpack.c.bf16 %v957_v14, %v13331_v62  ;;  %v13350_v39 = vld [vmem:[#allocation34_spill] sm:$0xff] }
  0xba   : > { %v10411_v29 = vpop.permute.xlu0 %876  ;;  %8616 = vmatpush1.bf16.msra.mxu0 %v8615_v26  ;;  %885 = vst.msk [vmem:[#allocation2 + $0x308] sm:$0xff] %vm577_vm0, %v10409_v7  ;;  %v8647_v54 = vpack.c.bf16 %v13351_v31, %v13350_v39 }
  0xbb   : > { %8618 = vmatprep.subr.bf16.mxu0 %v8617_v2  ;;  %1475 = vrot.lane.b32.xlu1 %v9956_v40, %s9550_s29  ;;  %v10438_v40 = vld [vmem:[#allocation2 + $0x70] sm:$0xff] }
  0xbc   : > { %1473 = vrot.lane.b32.xlu0 %v10407_v4, %s9550_s29  ;;  %2791 = vst [vmem:[#allocation2 + $0x70] sm:$0xff] %v7420_v41  ;;  %v7424_v2 = vld [vmem:[%s9664_s28 + $0x1d0] sm:$0xff]  ;;  %v961_v41 = vld [vmem:[#allocation2 + $0x218] sm:$0xff] }
  0xbd   : > { %v10434_v53 = vpop.permute.xlu1 %1211 }
  0xbe   : > { %v10436_v56 = vpop.permute.xlu0 %1209  ;;  %8620 = vmatpush1.bf16.msra.mxu0 %v8619_v27  ;;  %1238 = vst.msk [vmem:[#allocation2 + $0x38] sm:$0xff] %vm577_vm0, %v10434_v53  ;;  %v13330_v27 = vpack.c.bf16 %v9979_v57, %v9977_v55  ;;  %v13333_v55 = vld [vmem:[#allocation24_spill] sm:$0xff] }
  0xbf   : > { %8622 = vmatprep.subr.bf16.mxu0 %v8621_v43  ;;  %2179 = vrot.lane.b32.xlu1 %v9673_v3, %s13265_s30  ;;  %v10466_v3 = vld [vmem:[#allocation2 + $0x90] sm:$0xff]  ;;  %v959_v43 = vld [vmem:[#allocation2 + $0x208] sm:$0xff]  ;;  %v8631_v57 = vpack.c.bf16 %v13333_v55, %v10407_v4  ;;  %13338 = vst [vmem:[#allocation24_spill] sm:$0xff] %v10522_v15 }
  0xc0   : > { %2177 = vrot.lane.b32.xlu0 %v9667_v1, %s13265_s30  ;;  %v8627_v1 = vpack.c.bf16 %v10392_v38, %v10432_v0  ;;  %2795 = vst [vmem:[#allocation2 + $0x90] sm:$0xff] %v7424_v2  ;;  %v8633_v14 = vpack.c.bf16 %v961_v41, %v959_v43  ;;  %v10512_v43 = vld [vmem:[%s9664_s28 + $0x1e0] sm:$0xff]  ;;  %v891_v41 = vld [vmem:[%s13193_s1 + $0x28] sm:$0xff]  ;;  %v7434_v4 = vld [vmem:[%s9664_s28 + $0x210] sm:$0xff] }
  0xc1   : > { %v10460_v34 = vpop.permute.xlu1 %1215  ;;  %v13344_v38 = vld [vmem:[#allocation15_spill] sm:$0xff] }
  0xc2   : > { %v10462_v26 = vpop.permute.xlu0 %1213  ;;  %8624 = vmatpush1.bf16.msra.mxu0 %v8623_v48  ;;  %1240 = vst.msk [vmem:[#allocation2 + $0x48] sm:$0xff] %vm577_vm0, %v10460_v34  ;;  %v7436_v0 = vld [vmem:[%s9664_s28 + $0x220] sm:$0xff] }
  0xc3   : > { %8626 = vmatprep.subr.bf16.mxu0 %v13330_v27  ;;  %2183 = vrot.lane.b32.xlu1 %v13332_v32, %s13265_s30  ;;  %v10507_v32 = vld [vmem:[#allocation2 + $0xf8] sm:$0xff]  ;;  %2857 = vst [vmem:[#allocation2 + $0xf0] sm:$0xff] %v7436_v0 }
  0xc4   : > { %2181 = vrot.lane.b32.xlu0 %v10094_v61, %s13265_s30  ;;  %v13334_v61 = vld [vmem:[#allocation20_spill] sm:$0xff]  ;;  %13336 = vst [vmem:[#allocation11_spill] sm:$0xff] %v10507_v32  ;;  %2858 = vst.msk [vmem:[#allocation2 + $0xf8] sm:$0xff] %vm577_vm0, %v7437_v8  ;;  %v889_v8 = vld [vmem:[%s13193_s1 + $0x18] sm:$0xff] }
  0xc5   : > { %v10480_v19 = vpop.permute.xlu1 %1219  ;;  %v10486_v48 = vld [vmem:[#allocation2 + $0x38] sm:$0xff]  ;;  %v10539_v32 = vld [vmem:[%s9664_s28 + $0x1f0] sm:$0xff]  ;;  %13345 = vst [vmem:[#allocation20_spill] sm:$0xff] %v10569_v21 }
  0xc6   : > { %v10482_v33 = vpop.permute.xlu0 %1217  ;;  %8628 = vmatpush1.bf16.msra.mxu0 %v8627_v1  ;;  %1242 = vst.msk [vmem:[#allocation2 + $0x58] sm:$0xff] %vm577_vm0, %v10480_v19  ;;  %1970 = vst.msk [vmem:[#allocation2 + $0x38] sm:$0xff] %vm577_vm0, %v10118_v47  ;;  %v886_v1 = vld [vmem:[%s13193_s1] sm:$0xff]  ;;  %v13346_v0 = vld [vmem:[#allocation33_spill] sm:$0xff] }
  0xc7   : > { %8630 = vmatprep.subr.bf16.mxu0 %v8629_v36  ;;  %1479 = vrot.lane.b32.xlu1 %v13334_v61, %s9550_s29  ;;  %v10505_v36 = vld [vmem:[#allocation2 + $0xe8] sm:$0xff]  ;;  %v13349_v21 = vld [vmem:[#allocation13_spill] sm:$0xff] }
  0xc8   : > { %1477 = vrot.lane.b32.xlu0 %v13333_v55, %s9550_s29  ;;  %13335 = vst [vmem:[#allocation23_spill] sm:$0xff] %v10505_v36  ;;  %v13337_v55 = vld [vmem:[#allocation19_spill] sm:$0xff]  ;;  %2856 = vst.msk [vmem:[#allocation2 + $0xe8] sm:$0xff] %vm577_vm0, %v10522_v15  ;;  %v977_v47 = vld [vmem:[#allocation2 + $0x298] sm:$0xff] }
  0xc9   : > { %v10499_v2 = vpop.permute.xlu1 %1223  ;;  %v10503_v62 = vld [vmem:[#allocation2 + $0x48] sm:$0xff]  ;;  %v10550_v15 = vld [vmem:[#allocation2 + $0xe0] sm:$0xff]  ;;  %v8649_v31 = vpack.c.bf16 %v977_v47, %v975_v42 }
  0xca   : > { %v10501_v27 = vpop.permute.xlu0 %1221  ;;  %8632 = vmatpush1.bf16.msra.mxu0 %v8631_v57  ;;  %1244 = vst.msk [vmem:[#allocation2 + $0x68] sm:$0xff] %vm577_vm0, %v10499_v2  ;;  %1972 = vst.msk [vmem:[#allocation2 + $0x48] sm:$0xff] %vm577_vm0, %v13337_v55  ;;  %v750_v55 = vsel %vm597_vm1, %v10268_v17, %v10266_v23  ;;  %v13340_v57 = vld [vmem:[#allocation29_spill] sm:$0xff]  ;;  %v13355_v47 = vld [vmem:[#allocation18_spill] sm:$0xff] }
  0xcb   : > { %8634 = vmatprep.subr.bf16.mxu0 %v8633_v14  ;;  %2187 = vrot.lane.b32.xlu1 %v13339_v13, %s13265_s30  ;;  %v7369_v14 = vld [vmem:[%s9664_s28 + $0x98] sm:$0xff]  ;;  %v8637_v36 = vpack.c.bf16 %v13340_v57, %v963_v63  ;;  %v10542_v13 = vld [vmem:[%s9664_s28 + $0x200] sm:$0xff]  ;;  %2855 = vst [vmem:[#allocation2 + $0xe0] sm:$0xff] %v7434_v4 }
  0xcc   : > { %2185 = vrot.lane.b32.xlu0 %v10101_v30, %s13265_s30  ;;  %v890_v30 = vld [vmem:[%s13193_s1 + $0x20] sm:$0xff]  ;;  %v13342_v63 = vld [vmem:[#allocation25_spill] sm:$0xff]  ;;  %v8643_v4 = vpack.c.bf16 %v10542_v13, %v10539_v32 }
  0xcd   : > { %1076 = vmatmul.mubr.f32.vlgmr.msra.gmra.mrb[0].mxu0 %v886_v1  ;;  %v10552_v23 = vpop.permute.xlu1 %1275  ;;  %v13341_v1 = vld [vmem:[#allocation28_spill] sm:$0xff]  ;;  %v10559_v45 = vld [vmem:[#allocation2 + $0x58] sm:$0xff] }
  0xce   : > { %v10554_v17 = vpop.permute.xlu0 %1273  ;;  %v13343_v57 = vpack.c.bf16 %v13341_v1, %v13342_v63  ;;  %1081 = vmatprep.mubr.f32.mxu0 %v891_v41  ;;  %1302 = vst.msk [vmem:[#allocation2 + $0xa8] sm:$0xff] %vm577_vm0, %v10552_v23  ;;  %1974 = vst.msk [vmem:[#allocation2 + $0x58] sm:$0xff] %vm577_vm0, %v13344_v38  ;;  %v7439_v1 = vld [vmem:[%s9664_s28 + $0x238] sm:$0xff]  ;;  %v8639_v41 = vpack.c.bf16 %v10512_v43, %v750_v55  ;;  %v971_v63 = vld [vmem:[#allocation2 + $0x268] sm:$0xff] }
  0xcf   : > { %2191 = vrot.lane.b32.xlu1 %v7369_v14, %s13265_s30  ;;  %2860 = vst.msk [vmem:[#allocation2 + $0x108] sm:$0xff] %vm577_vm0, %v7439_v1  ;;  %v10583_v14 = vld [vmem:[#allocation2 + $0x100] sm:$0xff]  ;;  %v13347_v55 = vld [vmem:[#allocation32_spill] sm:$0xff] }
  0xd0   : > { %8636 = vmatpush1.bf16.msra.mxu0 %v13343_v57  ;;  %2189 = vrot.lane.b32.xlu0 %v7368_v50, %s13265_s30  ;;  %v973_v57 = vld [vmem:[#allocation2 + $0x278] sm:$0xff]  ;;  %v7438_v50 = vld [vmem:[%s9664_s28 + $0x230] sm:$0xff]  ;;  %v13348_v1 = vpack.c.bf16 %v13346_v0, %v13347_v55 }
  0xd1   : > { %8638 = vmatprep.subr.bf16.mxu0 %v8637_v36  ;;  %1082 = vmatmul.mubr.f32.gmra.mrb[2].mxu0 %v890_v30  ;;  %v10576_v36 = vpop.permute.xlu1 %1279  ;;  %v8645_v30 = vpack.c.bf16 %v973_v57, %v971_v63  ;;  %2859 = vst [vmem:[#allocation2 + $0x100] sm:$0xff] %v7438_v50 }
  0xd2   : > { %v10578_v38 = vpop.permute.xlu0 %1277  ;;  %7246 = vmatprep.mubr.msk.f32.mxu0 %vm1004_vm2, %v889_v8  ;;  %1304 = vst.msk [vmem:[#allocation2 + $0xb8] sm:$0xff] %vm577_vm0, %v10576_v36 }
  0xd3   : > { %2195 = vrot.lane.b32.xlu1 %v13349_v21, %s13265_s30  ;;  %v788_v21 = vsel %vm597_vm1, %v10283_v6, %v10281_v58  ;;  %v979_v6 = vld [vmem:[#allocation2 + $0x2a8] sm:$0xff] }
  0xd4   : > { %8640 = vmatpush1.bf16.msra.mxu0 %v8639_v41  ;;  %2193 = vrot.lane.b32.xlu0 %v9863_v51, %s13265_s30  ;;  %v13352_v51 = vld [vmem:[#allocation14_spill] sm:$0xff]  ;;  %v8651_v58 = vpack.c.bf16 %v788_v21, %v13355_v47  ;;  %v842_v21 = vsel %vm841_vm3, %v10296_v22, %v10294_v24  ;;  %v7375_v22 = vld [vmem:[%s9664_s28 + $0x68] sm:$0xff] }
  0xd5   : > { %8642 = vmatprep.subr.bf16.mxu0 %v13348_v1  ;;  %v10595_v41 = vpop.permute.xlu1 %1283  ;;  %v10601_v0 = vld [vmem:[#allocation2 + $0xa8] sm:$0xff] }
  0xd6   : > { %v10597_v8 = vpop.permute.xlu0 %1281  ;;  %1306 = vst.msk [vmem:[#allocation2 + $0xc8] sm:$0xff] %vm577_vm0, %v10595_v41  ;;  %2007 = vst.msk [vmem:[#allocation2 + $0xa8] sm:$0xff] %vm577_vm0, %v13334_v61  ;;  %v13353_v61 = vld [vmem:[#allocation21_spill] sm:$0xff] }
  0xd7   : > { %2199 = vrot.lane.b32.xlu1 %v13352_v51, %s13265_s30 }
  0xd8   : > { %8644 = vmatpush1.bf16.msra.mxu0 %v8643_v4  ;;  %2197 = vrot.lane.b32.xlu0 %v9866_v52, %s13265_s30  ;;  %v981_v4 = vld [vmem:[#allocation2 + $0x2b8] sm:$0xff]  ;;  %v13354_v52 = vld [vmem:[#allocation16_spill] sm:$0xff] }
  0xd9   : > { %8646 = vmatprep.subr.bf16.mxu0 %v8645_v30  ;;  %v10614_v63 = vpop.permute.xlu1 %1287  ;;  %v10618_v50 = vld [vmem:[#allocation2 + $0xb8] sm:$0xff]  ;;  %v8653_v42 = vpack.c.bf16 %v981_v4, %v979_v6  ;;  %v983_v4 = vld [vmem:[#allocation2 + $0x2c8] sm:$0xff] }
  0xda   : > { %v10616_v57 = vpop.permute.xlu0 %1285  ;;  %1308 = vst.msk [vmem:[#allocation2 + $0xd8] sm:$0xff] %vm577_vm0, %v10614_v63  ;;  %2009 = vst.msk [vmem:[#allocation2 + $0xb8] sm:$0xff] %vm577_vm0, %v13353_v61  ;;  %v985_v30 = vld [vmem:[#allocation2 + $0x2d8] sm:$0xff]  ;;  %v845_v61 = vsel %vm841_vm3, %v10345_v5, %v10343_v25  ;;  %v987_v5 = vld [vmem:[#allocation2 + $0x2e8] sm:$0xff] }
  0xdb   : > { %1531 = vrot.lane.b32.xlu1 %v13354_v52, %s9550_s29  ;;  %v8657_v24 = vpack.c.bf16 %v985_v30, %v983_v4  ;;  %v7374_v52 = vld [vmem:[%s9664_s28 + $0x60] sm:$0xff]  ;;  %v989_v6 = vld [vmem:[#allocation2 + $0x2f8] sm:$0xff] }
  0xdc   : > { %8648 = vmatpush1.bf16.msra.mxu0 %v8647_v54  ;;  %1529 = vrot.lane.b32.xlu0 %v10512_v43, %s9550_s29  ;;  %v843_v54 = vsel %vm841_vm3, %v10307_v16, %v10305_v28  ;;  %v13356_v28 = vld [vmem:[#allocation22_spill] sm:$0xff]  ;;  %v8661_v30 = vpack.c.bf16 %v989_v6, %v987_v5  ;;  %v881_v6 = vsel %vm880_vm4, %v10411_v29, %v10409_v7  ;;  %v13361_v7 = vld [vmem:[#allocation39_spill] sm:$0xff] }
  0xdd   : > { %8650 = vmatprep.subr.bf16.mxu0 %v8649_v31  ;;  %v10632_v55 = vpop.permute.xlu1 %1339  ;;  %v10636_v51 = vld [vmem:[#allocation2 + $0xc8] sm:$0xff]  ;;  %v13357_v16 = vld [vmem:[#allocation26_spill] sm:$0xff]  ;;  %v8655_v31 = vpack.c.bf16 %v843_v54, %v842_v21  ;;  %v844_v54 = vsel %vm841_vm3, %v10323_v35, %v10321_v11 }
  0xde   : > { %v10634_v1 = vpop.permute.xlu0 %1337  ;;  %1366 = vst.msk [vmem:[#allocation2 + $0x118] sm:$0xff] %vm577_vm0, %v10632_v55  ;;  %2011 = vst.msk [vmem:[#allocation2 + $0xc8] sm:$0xff] %vm577_vm0, %v13356_v28  ;;  %v8659_v25 = vpack.c.bf16 %v845_v61, %v844_v54  ;;  %v10669_v21 = vld [vmem:[%s9664_s28 + $0xc8] sm:$0xff]  ;;  %v10672_v28 = vld [vmem:[%s9664_s28 + $0xc0] sm:$0xff] }
  0xdf   : > { %1535 = vrot.lane.b32.xlu1 %v13357_v16, %s9550_s29  ;;  %v9535_v54 = vld [vmem:[%s9664_s28 + $0x30] sm:$0xff]  ;;  %v13362_v29 = vld [vmem:[#allocation38_spill] sm:$0xff] }
  0xe0   : > { %8652 = vmatpush1.bf16.msra.mxu0 %v8651_v58  ;;  %1533 = vrot.lane.b32.xlu0 %v10539_v32, %s9550_s29 }
  0xe1   : > { %8654 = vmatprep.subr.bf16.mxu0 %v8653_v42  ;;  %v10654_v47 = vpop.permute.xlu1 %1343  ;;  %v847_v42 = vsel %vm841_vm3, %v10396_v18, %v10394_v49  ;;  %v13358_v49 = vld [vmem:[#allocation30_spill] sm:$0xff] }
  0xe2   : > { %v10656_v58 = vpop.permute.xlu0 %1341  ;;  %1368 = vst.msk [vmem:[#allocation2 + $0x128] sm:$0xff] %vm577_vm0, %v10654_v47 }
  0xe3   : > { %2237 = vrot.lane.b32.xlu1 %v7375_v22, %s9552_s0  ;;  %v13360_v22 = vld [vmem:[#allocation27_spill] sm:$0xff] }
  0xe4   : > { %8656 = vmatpush1.bf16.msra.mxu0 %v8655_v31  ;;  %2235 = vrot.lane.b32.xlu0 %v7374_v52, %s9552_s0  ;;  %v846_v31 = vsel %vm841_vm3, %v10373_v20, %v10371_v9  ;;  %v991_v20 = vld [vmem:[#allocation2 + $0x308] sm:$0xff]  ;;  %v888_v52 = vld [vmem:[%s13193_s1 + $0x10] sm:$0xff] }
  0xe5   : > { %8658 = vmatprep.subr.bf16.mxu0 %v8657_v24  ;;  %v10674_v11 = vpop.permute.xlu1 %1347  ;;  %v10678_v16 = vld [vmem:[#allocation2 + $0x118] sm:$0xff]  ;;  %v8663_v18 = vpack.c.bf16 %v847_v42, %v846_v31  ;;  %v13359_v24 = vld [vmem:[#allocation31_spill] sm:$0xff] }
  0xe6   : > { %v10676_v35 = vpop.permute.xlu0 %1345  ;;  %1370 = vst.msk [vmem:[#allocation2 + $0x138] sm:$0xff] %vm577_vm0, %v10674_v11  ;;  %2044 = vst.msk [vmem:[#allocation2 + $0x118] sm:$0xff] %vm577_vm0, %v13358_v49 }
  0xe7   : > { %2270 = vrot.lane.b32.xlu1 %v10669_v21, %s13265_s30 }
  0xe8   : > { %8660 = vmatpush1.bf16.msra.mxu0 %v8659_v25  ;;  %2268 = vrot.lane.b32.xlu0 %v10672_v28, %s13265_s30  ;;  %v9536_v25 = vld [vmem:[%s9664_s28 + $0x40] sm:$0xff] }
  0xe9   : > { %8662 = vmatprep.subr.bf16.mxu0 %v8661_v30  ;;  %v10691_v4 = vpop.permute.xlu1 %1351  ;;  %v10695_v61 = vld [vmem:[#allocation2 + $0x128] sm:$0xff]  ;;  %v8667_v5 = vpack.c.bf16 %v9536_v25, %v9535_v54  ;;  %v7379_v25 = vld [vmem:[%s9664_s28 + $0xd8] sm:$0xff] }
  0xea   : > { %v10693_v9 = vpop.permute.xlu0 %1349  ;;  %1372 = vst.msk [vmem:[#allocation2 + $0x148] sm:$0xff] %vm577_vm0, %v10691_v4  ;;  %2046 = vst.msk [vmem:[#allocation2 + $0x128] sm:$0xff] %vm577_vm0, %v13359_v24  ;;  %v13364_v24 = vld [vmem:[#allocation17_spill] sm:$0xff] }
  0xeb   : > { %1539 = vrot.lane.b32.xlu1 %v13360_v22, %s9550_s29  ;;  %v1225_v22 = vsel %vm597_vm1, %v10436_v56, %v10434_v53 }
  0xec   : > { %8664 = vmatpush1.bf16.msra.mxu0 %v8663_v18  ;;  %1537 = vrot.lane.b32.xlu0 %v10542_v13, %s9550_s29  ;;  %v893_v18 = vld [vmem:[%s13193_s1 + $0x38] sm:$0xff] }
  0xed   : > { %1120 = vmatprep.subr.mxu0 %v991_v20  ;;  %v10713_v42 = vpop.permute.xlu1 %1403  ;;  %v10717_v31 = vld [vmem:[#allocation2 + $0x138] sm:$0xff]  ;;  %v13363_v20 = vpack.c.bf16 %v13361_v7, %v13362_v29  ;;  %v7378_v7 = vld [vmem:[%s9664_s28 + $0xd0] sm:$0xff]  ;;  %v7381_v29 = vld [vmem:[%s9664_s28 + $0xe8] sm:$0xff] }
  0xee   : > { %v10715_v30 = vpop.permute.xlu0 %1401  ;;  %1430 = vst.msk [vmem:[#allocation2 + $0x188] sm:$0xff] %vm577_vm0, %v10713_v42  ;;  %2048 = vst.msk [vmem:[#allocation2 + $0x138] sm:$0xff] %vm577_vm0, %v13364_v24  ;;  %v1677_v24 = vld [vmem:[#allocation2 + $0x68] sm:$0xff] }
  0xef   : > { %1543 = vrot.lane.b32.xlu1 %v13358_v49, %s9550_s29 }
  0xf0   : > { %1121 = vmatpush1.msra.mxu0 %v881_v6  ;;  %1541 = vrot.lane.b32.xlu0 %v13350_v39, %s9550_s29  ;;  %v13365_v6 = vld [vmem:[#allocation42_spill] sm:$0xff]  ;;  %v10751_v39 = vld [vmem:[%s13193_s1 + $0x8] sm:$0xff] }
  0xf1   : > { %8666 = vmatprep.subr.bf16.mxu0 %v13363_v20  ;;  %1153 = vmatmul.mubr.f32.vlgmr.msra.gmra.mrb[0].mxu0 %v888_v52  ;;  %v8669_v54 = vpack.c.bf16 %v10486_v48, %v13365_v6  ;;  %v892_v52 = vld [vmem:[%s13193_s1 + $0x30] sm:$0xff]  ;;  %v10744_v53 = vpop.permute.xlu1 %1407  ;;  %v7380_v20 = vld [vmem:[%s9664_s28 + $0xe0] sm:$0xff]  ;;  %v10782_v6 = vld [vmem:[%s9664_s28 + $0x38] sm:$0xff] }
  0xf2   : > { %8668 = vmatpush1.bf16.msra.mxu0 %v8667_v5  ;;  %7247 = vmatprep.mubr.msk.f32.mxu0 %vm1004_vm2, %v893_v18  ;;  %v10746_v56 = vpop.permute.xlu0 %1405  ;;  %1432 = vst.msk [vmem:[#allocation2 + $0x198] sm:$0xff] %vm577_vm0, %v10744_v53  ;;  %v13366_v48 = vld [vmem:[#allocation52_spill] sm:$0xff]  ;;  %v1227_v5 = vsel %vm597_vm1, %v10482_v33, %v10480_v19  ;;  %v8673_v18 = vpack.c.bf16 %v10559_v45, %v10503_v62 }
  0xf3   : > { %8670 = vmatprep.subr.bf16.mxu0 %v8669_v54  ;;  %v8671_v49 = vpack.c.bf16 %v1225_v22, %v13366_v48  ;;  %2274 = vrot.lane.b32.xlu1 %v7379_v25, %s13265_s30  ;;  %v1226_v22 = vsel %vm597_vm1, %v10462_v26, %v10460_v34  ;;  %v1228_v62 = vsel %vm597_vm1, %v10501_v27, %v10499_v2  ;;  %v13367_v34 = vld [vmem:[#allocation44_spill] sm:$0xff] }
  0xf4   : > { %2272 = vrot.lane.b32.xlu0 %v7378_v7, %s13265_s30  ;;  %v8675_v45 = vpack.c.bf16 %v1227_v5, %v1226_v22  ;;  %v8677_v26 = vpack.c.bf16 %v13367_v34, %v1677_v24  ;;  %v10785_v54 = vld [vmem:[%s9664_s28 + $0x30] sm:$0xff]  ;;  %v8679_v2 = vpack.c.bf16 %v10438_v40, %v1228_v62  ;;  %v1568_v27 = vld [vmem:[%s9664_s28 + $0x48] sm:$0xff]  ;;  %v1567_v7 = vld [vmem:[%s9664_s28 + $0x40] sm:$0xff]  ;;  %v8683_v48 = vpack.c.bf16 %v10466_v3, %v10458_v59 }
  0xf5   : > { %1159 = vmatmul.mubr.f32.gmra.mrb[2].mxu0 %v892_v52  ;;  %v10769_v19 = vpop.permute.xlu1 %1411  ;;  %v13369_v40 = vld [vmem:[#allocation46_spill] sm:$0xff]  ;;  %v8685_v59 = vpack.c.bf16 %v10618_v50, %v10601_v0  ;;  %v7382_v24 = vld [vmem:[%s9664_s28 + $0xf0] sm:$0xff]  ;;  %v1292_v0 = vsel %vm597_vm1, %v10616_v57, %v10614_v63  ;;  %v1291_v34 = vsel %vm597_vm1, %v10597_v8, %v10595_v41  ;;  %v8695_v41 = vpack.c.bf16 %v10561_v46, %v10550_v15  ;;  %v1705_v8 = vld [vmem:[#allocation2 + $0x148] sm:$0xff] }
  0xf6   : > { %8672 = vmatpush1.bf16.msra.mxu0 %v8671_v49  ;;  %1844 = vmatprep.mubr.f32.mxu0 %v10751_v39  ;;  %v10771_v33 = vpop.permute.xlu0 %1409  ;;  %1434 = vst.msk [vmem:[#allocation2 + $0x1a8] sm:$0xff] %vm577_vm0, %v10769_v19  ;;  %v7383_v3 = vld [vmem:[%s9664_s28 + $0xf8] sm:$0xff]  ;;  %v7384_v50 = vld [vmem:[%s9664_s28 + $0x100] sm:$0xff]  ;;  %v8691_v63 = vpack.c.bf16 %v1292_v0, %v1291_v34  ;;  %v13374_v46 = vld [vmem:[#allocation36_spill] sm:$0xff] }
  0xf7   : > { %8674 = vmatprep.subr.bf16.mxu0 %v8673_v18  ;;  %2278 = vrot.lane.b32.xlu1 %v7381_v29, %s13265_s30  ;;  %v13368_v18 = vld [vmem:[#allocation47_spill] sm:$0xff]  ;;  %v1691_v22 = vld [vmem:[#allocation2 + $0xd8] sm:$0xff]  ;;  %v8697_v15 = vpack.c.bf16 %v10678_v16, %v13374_v46  ;;  %v8701_v16 = vpack.c.bf16 %v10717_v31, %v10695_v61  ;;  %v7386_v0 = vld [vmem:[%s9664_s28 + $0x110] sm:$0xff]  ;;  %v1417_v46 = vsel %vm597_vm1, %v10715_v30, %v10713_v42 }
  0xf8   : > { %2276 = vrot.lane.b32.xlu0 %v7380_v20, %s13265_s30  ;;  %v13370_v29 = vpack.c.bf16 %v13368_v18, %v13369_v40  ;;  %v1290_v20 = vsel %vm597_vm1, %v10578_v38, %v10576_v36  ;;  %v1570_v57 = vld [vmem:[%s9664_s28 + $0x58] sm:$0xff]  ;;  %v13372_v18 = vld [vmem:[#allocation48_spill] sm:$0xff]  ;;  %v10943_v30 = vld [vmem:[%s9664_s28 + $0x120] sm:$0xff] }
  0xf9   : > { %v10787_v52 = vpop.permute.xlu1 %1415 }
  0xfa   : > { %8676 = vmatpush1.bf16.msra.mxu0 %v8675_v45  ;;  %v10789_v25 = vpop.permute.xlu0 %1413  ;;  %1436 = vst.msk [vmem:[#allocation2 + $0x1b8] sm:$0xff] %vm577_vm0, %v10787_v52  ;;  %v1289_v45 = vsel %vm597_vm1, %v10554_v17, %v10552_v23  ;;  %v8689_v23 = vpack.c.bf16 %v1691_v22, %v10636_v51  ;;  %v7385_v17 = vld [vmem:[%s9664_s28 + $0x108] sm:$0xff]  ;;  %v1569_v51 = vld [vmem:[%s9664_s28 + $0x50] sm:$0xff] }
  0xfb   : > { %8678 = vmatprep.subr.bf16.mxu0 %v8677_v26  ;;  %1579 = vrot.lane.b32.xlu1 %v10782_v6, %s13265_s30  ;;  %v8687_v38 = vpack.c.bf16 %v1290_v20, %v1289_v45  ;;  %v1605_v20 = vld [vmem:[%s9664_s28 + $0x8] sm:$0xff] }
  0xfc   : > { %1577 = vrot.lane.b32.xlu0 %v10785_v54, %s13265_s30  ;;  %v1709_v45 = vld [vmem:[#allocation2 + $0x168] sm:$0xff] }
  0xfd   : > { %v10802_v49 = vpop.permute.xlu1 %1467 }
  0xfe   : > { %8680 = vmatpush1.bf16.msra.mxu0 %v8679_v2  ;;  %v10804_v5 = vpop.permute.xlu0 %1465  ;;  %1494 = vst.msk [vmem:[#allocation2 + $0x1f8] sm:$0xff] %vm577_vm0, %v10802_v49 }
  0xff   : > { %8682 = vmatprep.subr.bf16.mxu0 %v13370_v29  ;;  %1583 = vrot.lane.b32.xlu1 %v1568_v27, %s13265_s30  ;;  %v1353_v29 = vsel %vm597_vm1, %v10634_v1, %v10632_v55  ;;  %v1355_v1 = vsel %vm597_vm1, %v10676_v35, %v10674_v11  ;;  %v1356_v35 = vsel %vm597_vm1, %v10693_v9, %v10691_v4  ;;  %v13375_v4 = vld [vmem:[#allocation53_spill] sm:$0xff] }
 0x100   : > { %1581 = vrot.lane.b32.xlu0 %v1567_v7, %s13265_s30  ;;  %v8699_v55 = vpack.c.bf16 %v1353_v29, %v10583_v14  ;;  %v8707_v34 = vpack.c.bf16 %v10334_v12, %v1356_v35  ;;  %v8711_v9 = vpack.c.bf16 %v13375_v4, %v10337_v37 }
 0x101   : > { %v10823_v62 = vpop.permute.xlu1 %1981  ;;  %v1719_v29 = vld [vmem:[#allocation2 + $0x1b8] sm:$0xff] }
 0x102   : > { %8684 = vmatpush1.bf16.msra.mxu0 %v8683_v48  ;;  %v10825_v36 = vpop.permute.xlu0 %1979  ;;  %1987 = vst.msk [vmem:[#allocation2 + $0x68] sm:$0xff] %vm577_vm0, %v10823_v62  ;;  %v13371_v48 = vld [vmem:[#allocation49_spill] sm:$0xff] }
 0x103   : > { %8686 = vmatprep.subr.bf16.mxu0 %v8685_v59  ;;  %2282 = vrot.lane.b32.xlu1 %v7383_v3, %s13265_s30  ;;  %v13373_v40 = vpack.c.bf16 %v13371_v48, %v13372_v18  ;;  %v1604_v59 = vld [vmem:[%s9664_s28] sm:$0xff]  ;;  %v1707_v3 = vld [vmem:[#allocation2 + $0x158] sm:$0xff]  ;;  %v1609_v18 = vld [vmem:[%s9664_s28 + $0x28] sm:$0xff] }
 0x104   : > { %2280 = vrot.lane.b32.xlu0 %v7382_v24, %s13265_s30 }
 0x105   : > { %v10840_v26 = vpop.permute.xlu1 %2018  ;;  %v1727_v35 = vld [vmem:[#allocation2 + $0x1f8] sm:$0xff] }
 0x106   : > { %8688 = vmatpush1.bf16.msra.mxu0 %v8687_v38  ;;  %v10842_v2 = vpop.permute.xlu0 %2016  ;;  %2024 = vst.msk [vmem:[#allocation2 + $0xd8] sm:$0xff] %vm577_vm0, %v10840_v26  ;;  %v7387_v38 = vld [vmem:[%s9664_s28 + $0x118] sm:$0xff] }
 0x107   : > { %8690 = vmatprep.subr.bf16.mxu0 %v8689_v23  ;;  %2286 = vrot.lane.b32.xlu1 %v7385_v17, %s13265_s30  ;;  %v1354_v23 = vsel %vm597_vm1, %v10656_v58, %v10654_v47  ;;  %v8705_v47 = vpack.c.bf16 %v1707_v3, %v1705_v8  ;;  %v1711_v58 = vld [vmem:[#allocation2 + $0x178] sm:$0xff] }
 0x108   : > { %2284 = vrot.lane.b32.xlu0 %v7384_v50, %s13265_s30  ;;  %v8703_v11 = vpack.c.bf16 %v1355_v1, %v1354_v23  ;;  %v8709_v50 = vpack.c.bf16 %v1711_v58, %v1709_v45  ;;  %v1723_v3 = vld [vmem:[#allocation2 + $0x1d8] sm:$0xff]  ;;  %v1419_v1 = vsel %vm597_vm1, %v10771_v33, %v10769_v19  ;;  %v13376_v23 = vld [vmem:[#allocation40_spill] sm:$0xff] }
 0x109   : > { %v10852_v27 = vpop.permute.xlu1 %2055  ;;  %v10959_v19 = vld [vmem:[%s9664_s28 + $0x130] sm:$0xff] }
 0x10a   : > { %8692 = vmatpush1.bf16.msra.mxu0 %v8691_v63  ;;  %v10854_v7 = vpop.permute.xlu0 %2053  ;;  %2061 = vst.msk [vmem:[#allocation2 + $0x148] sm:$0xff] %vm577_vm0, %v10852_v27  ;;  %v1607_v63 = vld [vmem:[%s9664_s28 + $0x18] sm:$0xff] }
 0x10b   : > { %8694 = vmatprep.subr.bf16.mxu0 %v13373_v40  ;;  %1587 = vrot.lane.b32.xlu1 %v1570_v57, %s13265_s30  ;;  %v1606_v57 = vld [vmem:[%s9664_s28 + $0x10] sm:$0xff]  ;;  %v1608_v40 = vld [vmem:[%s9664_s28 + $0x20] sm:$0xff] }
 0x10c   : > { %1585 = vrot.lane.b32.xlu0 %v1569_v51, %s13265_s30  ;;  %v1715_v51 = vld [vmem:[#allocation2 + $0x198] sm:$0xff] }
 0x10d   : > { %v10870_v24 = vpop.permute.xlu1 %2088 }
 0x10e   : > { %8696 = vmatpush1.bf16.msra.mxu0 %v8695_v41  ;;  %v10872_v22 = vpop.permute.xlu0 %2086  ;;  %2129 = vst.msk [vmem:[#allocation2 + $0x158] sm:$0xff] %vm577_vm0, %v10870_v24  ;;  %v1713_v41 = vld [vmem:[#allocation2 + $0x188] sm:$0xff] }
 0x10f   : > { %8698 = vmatprep.subr.bf16.mxu0 %v8697_v15  ;;  %1622 = vrot.lane.b32.xlu1 %v1605_v20, %s9552_s0 }
 0x110   : > { %1620 = vrot.lane.b32.xlu0 %v1604_v59, %s9552_s0  ;;  %v1721_v59 = vld [vmem:[#allocation2 + $0x1c8] sm:$0xff] }
 0x111   : > { %v10889_v14 = vpop.permute.xlu1 %2092 }
 0x112   : > { %8700 = vmatpush1.bf16.msra.mxu0 %v8699_v55  ;;  %v10891_v17 = vpop.permute.xlu0 %2090  ;;  %2131 = vst.msk [vmem:[#allocation2 + $0x168] sm:$0xff] %vm577_vm0, %v10889_v14  ;;  %v1420_v55 = vsel %vm597_vm1, %v10789_v25, %v10787_v52  ;;  %v1720_v52 = vld [vmem:[#allocation2 + $0x1c0] sm:$0xff]  ;;  %v1722_v25 = vld [vmem:[#allocation2 + $0x1d0] sm:$0xff] }
 0x113   : > { %8702 = vmatprep.subr.bf16.mxu0 %v8701_v16  ;;  %2290 = vrot.lane.b32.xlu1 %v7387_v38, %s13265_s30  ;;  %v8721_v38 = vpack.c.bf16 %v1723_v3, %v1721_v59  ;;  %v8723_v33 = vpack.c.bf16 %v1722_v25, %v1720_v52  ;;  %v2445_v59 = vld [vmem:[#allocation2 + $0x58] sm:$0xff]  ;;  %v2442_v25 = vld [vmem:[#allocation2 + $0x40] sm:$0xff] }
 0x114   : > { %2288 = vrot.lane.b32.xlu0 %v7386_v0, %s13265_s30  ;;  %v8719_v0 = vpack.c.bf16 %v1420_v55, %v1419_v1  ;;  %v13382_v3 = vld [vmem:[#allocation54_spill] sm:$0xff] }
 0x115   : > { %v10900_v61 = vpop.permute.xlu1 %2096 }
 0x116   : > { %8704 = vmatpush1.bf16.msra.mxu0 %v8703_v11  ;;  %v10902_v31 = vpop.permute.xlu0 %2094  ;;  %2133 = vst.msk [vmem:[#allocation2 + $0x178] sm:$0xff] %vm577_vm0, %v10900_v61  ;;  %v1725_v11 = vld [vmem:[#allocation2 + $0x1e8] sm:$0xff] }
 0x117   : > { %8706 = vmatprep.subr.bf16.mxu0 %v8705_v47  ;;  %2328 = vrot.lane.b32.xlu1 %v10669_v21, %s9552_s0  ;;  %v1418_v21 = vsel %vm597_vm1, %v10746_v56, %v10744_v53  ;;  %v1717_v56 = vld [vmem:[#allocation2 + $0x1a8] sm:$0xff]  ;;  %v8725_v4 = vpack.c.bf16 %v1727_v35, %v1725_v11 }
 0x118   : > { %2326 = vrot.lane.b32.xlu0 %v10672_v28, %s9552_s0  ;;  %v8713_v28 = vpack.c.bf16 %v1715_v51, %v1713_v41  ;;  %v8715_v53 = vpack.c.bf16 %v1418_v21, %v1417_v46  ;;  %v8717_v42 = vpack.c.bf16 %v1719_v29, %v1717_v56  ;;  %v13378_v21 = vld [vmem:[#allocation43_spill] sm:$0xff]  ;;  %v2440_v46 = vld [vmem:[#allocation2 + $0x30] sm:$0xff] }
 0x119   : > { %v10915_v8 = vpop.permute.xlu1 %2100  ;;  %v2443_v56 = vld [vmem:[#allocation2 + $0x48] sm:$0xff] }
 0x11a   : > { %8708 = vmatpush1.bf16.msra.mxu0 %v8707_v34  ;;  %v10917_v48 = vpop.permute.xlu0 %2098  ;;  %2135 = vst.msk [vmem:[#allocation2 + $0x188] sm:$0xff] %vm577_vm0, %v10915_v8  ;;  %v13377_v34 = vld [vmem:[#allocation41_spill] sm:$0xff]  ;;  %v8769_v52 = vpack.c.bf16 %v2445_v59, %v2443_v56  ;;  %v2455_v59 = vld [vmem:[#allocation2 + $0xa8] sm:$0xff] }
 0x11b   : > { %8710 = vmatprep.subr.bf16.mxu0 %v8709_v50  ;;  %1626 = vrot.lane.b32.xlu1 %v1607_v63, %s9552_s0  ;;  %v1481_v50 = vsel %vm597_vm1, %v10804_v5, %v10802_v49  ;;  %v10975_v63 = vld [vmem:[%s9664_s28 + $0x140] sm:$0xff]  ;;  %v2441_v49 = vld [vmem:[#allocation2 + $0x38] sm:$0xff] }
 0x11c   : > { %1624 = vrot.lane.b32.xlu0 %v1606_v57, %s9552_s0  ;;  %v8765_v29 = vpack.c.bf16 %v2441_v49, %v10378_v10  ;;  %v13381_v10 = vld [vmem:[#allocation55_spill] sm:$0xff]  ;;  %v13384_v49 = vld [vmem:[#allocation50_spill] sm:$0xff] }
 0x11d   : > { %v10931_v15 = vpop.permute.xlu1 %2104  ;;  %v13383_v55 = vpack.c.bf16 %v13381_v10, %v13382_v3  ;;  %v13388_v3 = vld [vmem:[#allocation56_spill] sm:$0xff] }
 0x11e   : > { %8712 = vmatpush1.bf16.msra.mxu0 %v8711_v9  ;;  %v10933_v20 = vpop.permute.xlu0 %2102  ;;  %2137 = vst.msk [vmem:[#allocation2 + $0x198] sm:$0xff] %vm577_vm0, %v10931_v15  ;;  %v1724_v9 = vld [vmem:[#allocation2 + $0x1e0] sm:$0xff] }
 0x11f   : > { %8714 = vmatprep.subr.bf16.mxu0 %v8713_v28  ;;  %1630 = vrot.lane.b32.xlu1 %v1609_v18, %s9552_s0  ;;  %v8727_v41 = vpack.c.bf16 %v1481_v50, %v1724_v9  ;;  %v13379_v18 = vpack.c.bf16 %v10341_v44, %v10339_v60  ;;  %v11000_v60 = vld [vmem:[%s13193_s1 + $0x18] sm:$0xff] }
 0x120   : > { %1628 = vrot.lane.b32.xlu0 %v1608_v40, %s9552_s0  ;;  %v10988_v40 = vld [vmem:[%s13193_s1] sm:$0xff]  ;;  %v13380_v44 = vld [vmem:[#allocation37_spill] sm:$0xff]  ;;  %7318 = vmatprep.mubr.msk.f32.mxu1 %vm1004_vm2, %v11000_v60 }
 0x121   : > { %v10948_v16 = vpop.permute.xlu1 %2108 }
 0x122   : > { %8716 = vmatpush1.bf16.msra.mxu0 %v8715_v53  ;;  %v10950_v45 = vpop.permute.xlu0 %2106  ;;  %2139 = vst.msk [vmem:[#allocation2 + $0x1a8] sm:$0xff] %vm577_vm0, %v10948_v16  ;;  %v10995_v53 = vld [vmem:[%s13193_s1 + $0x28] sm:$0xff] }
 0x123   : > { %8718 = vmatprep.subr.bf16.mxu0 %v8717_v42  ;;  %2361 = vrot.lane.b32.xlu1 %v13376_v23, %s13265_s30 }
 0x124   : > { %2359 = vrot.lane.b32.xlu0 %v10943_v30, %s13265_s30 }
 0x125   : > { %v10961_v47 = vpop.permute.xlu1 %2146 }
 0x126   : > { %8720 = vmatpush1.bf16.msra.mxu0 %v8719_v0  ;;  %v10963_v58 = vpop.permute.xlu0 %2144  ;;  %2152 = vst.msk [vmem:[#allocation2 + $0x1b8] sm:$0xff] %vm577_vm0, %v10961_v47  ;;  %v2444_v0 = vld [vmem:[#allocation2 + $0x50] sm:$0xff] }
 0x127   : > { %8722 = vmatprep.subr.bf16.mxu0 %v8721_v38  ;;  %2365 = vrot.lane.b32.xlu1 %v13377_v34, %s13265_s30  ;;  %v8767_v38 = vpack.c.bf16 %v2440_v46, %v10975_v63  ;;  %v8771_v50 = vpack.c.bf16 %v2444_v0, %v2442_v25  ;;  %v9537_v46 = vld [vmem:[#allocation2 + $0x20] sm:$0xff]  ;;  %v13391_v25 = vld [vmem:[#allocation61_spill] sm:$0xff] }
 0x128   : > { %2363 = vrot.lane.b32.xlu0 %v10959_v19, %s13265_s30 }
 0x129   : > { %v1472_v57 = vpop.permute.xlu1 %1471 }
 0x12a   : > { %8724 = vmatpush1.bf16.msra.mxu0 %v8723_v33  ;;  %v1470_v51 = vpop.permute.xlu0 %1469  ;;  %1496 = vst.msk [vmem:[#allocation2 + $0x208] sm:$0xff] %vm577_vm0, %v1472_v57 }
 0x12b   : > { %8726 = vmatprep.subr.bf16.mxu0 %v8725_v4  ;;  %2369 = vrot.lane.b32.xlu1 %v13378_v21, %s13265_s30 }
 0x12c   : > { %2367 = vrot.lane.b32.xlu0 %v10975_v63, %s13265_s30 }
 0x12d   : > { %v1476_v5 = vpop.permute.xlu1 %1475 }
 0x12e   : > { %8728 = vmatpush1.bf16.msra.mxu0 %v8727_v41  ;;  %v1474_v28 = vpop.permute.xlu0 %1473  ;;  %1498 = vst.msk [vmem:[#allocation2 + $0x218] sm:$0xff] %vm577_vm0, %v1476_v5  ;;  %v2447_v41 = vld [vmem:[#allocation2 + $0x68] sm:$0xff] }
 0x12f   : > { %8762 = vmatprep.subr.bf16.mxu0 %v13379_v18  ;;  %2373 = vrot.lane.b32.xlu1 %v13380_v44, %s13265_s30  ;;  %v1483_v33 = vsel %vm597_vm1, %v1474_v28, %v1476_v5  ;;  %v1983_v28 = vsel %vm597_vm1, %v10825_v36, %v10823_v62  ;;  %v2457_v62 = vld [vmem:[#allocation2 + $0xb8] sm:$0xff] }
 0x130   : > { %2371 = vrot.lane.b32.xlu0 %v10334_v12, %s13265_s30  ;;  %v11021_v12 = vld [vmem:[%s13193_s1 + $0x20] sm:$0xff] }
 0x131   : > { %1845 = vmatmul.mubr.f32.vlgmr.msra.gmra.mrb[4].mxu0 %v10988_v40  ;;  %v11012_v42 = vpop.permute.xlu1 %2179  ;;  %v1729_v4 = vld [vmem:[#allocation2 + $0x208] sm:$0xff] }
 0x132   : > { %8764 = vmatpush1.bf16.msra.mxu0 %v13383_v55  ;;  %v11014_v1 = vpop.permute.xlu0 %2177  ;;  %1850 = vmatprep.mubr.f32.mxu0 %v10995_v53  ;;  %2220 = vst.msk [vmem:[#allocation2 + $0x1c8] sm:$0xff] %vm577_vm0, %v11012_v42  ;;  %v13389_v55 = vld [vmem:[#allocation57_spill] sm:$0xff] }
 0x133   : > { %8766 = vmatprep.subr.bf16.mxu0 %v8765_v29  ;;  %1634 = vrot.lane.b32.xlu1 %v10782_v6, %s9552_s0  ;;  %v1482_v6 = vsel %vm597_vm1, %v1470_v51, %v1472_v57  ;;  %v13386_v29 = vld [vmem:[#allocation51_spill] sm:$0xff] }
 0x134   : > { %1632 = vrot.lane.b32.xlu0 %v10785_v54, %s9552_s0  ;;  %v8731_v5 = vpack.c.bf16 %v1483_v33, %v1482_v6  ;;  %v8781_v33 = vpack.c.bf16 %v2457_v62, %v2455_v59  ;;  %v1739_v6 = vld [vmem:[#allocation2 + $0x258] sm:$0xff]  ;;  %v1736_v59 = vld [vmem:[#allocation2 + $0x240] sm:$0xff]  ;;  %v1738_v62 = vld [vmem:[#allocation2 + $0x250] sm:$0xff] }
 0x135   : > { %1851 = vmatmul.mubr.f32.gmra.mrb[6].mxu0 %v11021_v12  ;;  %v11031_v11 = vpop.permute.xlu1 %2183  ;;  %v1731_v9 = vld [vmem:[#allocation2 + $0x218] sm:$0xff] }
 0x136   : > { %8768 = vmatpush1.bf16.msra.mxu0 %v8767_v38  ;;  %v11033_v35 = vpop.permute.xlu0 %2181  ;;  %2614 = vmatprep.mubr.f32.mxu0 %v10751_v39  ;;  %2222 = vst.msk [vmem:[#allocation2 + $0x1d8] sm:$0xff] %vm577_vm0, %v11031_v11  ;;  %v8729_v54 = vpack.c.bf16 %v1731_v9, %v1729_v4  ;;  %v13385_v39 = vld [vmem:[#allocation58_spill] sm:$0xff]  ;;  %v8779_v38 = vpack.c.bf16 %v13389_v55, %v13388_v3  ;;  %v2456_v4 = vld [vmem:[#allocation2 + $0xb0] sm:$0xff] }
 0x137   : > { %8770 = vmatprep.subr.bf16.mxu0 %v8769_v52  ;;  %2377 = vrot.lane.b32.xlu1 %v13384_v49, %s13265_s30  ;;  %v8773_v18 = vpack.c.bf16 %v13385_v39, %v2447_v41  ;;  %v13390_v52 = vld [vmem:[#allocation62_spill] sm:$0xff]  ;;  %v1737_v41 = vld [vmem:[#allocation2 + $0x248] sm:$0xff]  ;;  %v1734_v49 = vld [vmem:[#allocation2 + $0x230] sm:$0xff] }
 0x138   : > { %2375 = vrot.lane.b32.xlu0 %v10337_v37, %s13265_s30  ;;  %8730 = vmatprep.subr.bf16.mxu1 %v8729_v54  ;;  %v13387_v37 = vld [vmem:[#allocation60_spill] sm:$0xff]  ;;  %v13392_v0 = vpack.c.bf16 %v13390_v52, %v13391_v25  ;;  %v1735_v9 = vld [vmem:[#allocation2 + $0x238] sm:$0xff]  ;;  %v2458_v55 = vld [vmem:[#allocation2 + $0xc0] sm:$0xff]  ;;  %v8739_v25 = vpack.c.bf16 %v1738_v62, %v1736_v59  ;;  %v2110_v59 = vsel %vm841_vm3, %v10872_v22, %v10870_v24 }
 0x139   : > { %v1480_v57 = vpop.permute.xlu1 %1479  ;;  %8732 = vmatpush1.bf16.msra.mxu1 %v8731_v5  ;;  %v8775_v56 = vpack.c.bf16 %v13387_v37, %v1983_v28  ;;  %v2479_v22 = vld [vmem:[#allocation2 + $0x168] sm:$0xff] }
 0x13a   : > { %8772 = vmatpush1.bf16.msra.mxu0 %v8771_v50  ;;  %v1478_v51 = vpop.permute.xlu0 %1477  ;;  %1500 = vst.msk [vmem:[#allocation2 + $0x228] sm:$0xff] %vm577_vm0, %v1480_v57  ;;  %v2454_v50 = vld [vmem:[#allocation2 + $0xa0] sm:$0xff] }
 0x13b   : > { %8774 = vmatprep.subr.bf16.mxu0 %v8773_v18  ;;  %2381 = vrot.lane.b32.xlu1 %v13386_v29, %s13265_s30  ;;  %v1484_v54 = vsel %vm597_vm1, %v1478_v51, %v1480_v57  ;;  %v8783_v39 = vpack.c.bf16 %v2456_v4, %v2454_v50  ;;  %v2459_v29 = vld [vmem:[#allocation2 + $0xc8] sm:$0xff]  ;;  %v2020_v51 = vsel %vm597_vm1, %v10842_v2, %v10840_v26  ;;  %v2469_v2 = vld [vmem:[#allocation2 + $0x118] sm:$0xff] }
 0x13c   : > { %2379 = vrot.lane.b32.xlu0 %v9537_v46, %s13265_s30  ;;  %v2461_v46 = vld [vmem:[#allocation2 + $0xd8] sm:$0xff]  ;;  %v8735_v57 = vpack.c.bf16 %v1734_v49, %v1484_v54  ;;  %v8787_v26 = vpack.c.bf16 %v2020_v51, %v2458_v55  ;;  %v13394_v50 = vld [vmem:[#allocation23_spill] sm:$0xff]  ;;  %v13396_v4 = vld [vmem:[#allocation20_spill] sm:$0xff] }
 0x13d   : > { %v11052_v36 = vpop.permute.xlu1 %2187  ;;  %v8785_v3 = vpack.c.bf16 %v2461_v46, %v2459_v29  ;;  %v7428_v51 = vld [vmem:[%s9664_s28 + $0x190] sm:$0xff] }
 0x13e   : > { %8776 = vmatpush1.bf16.msra.mxu0 %v8775_v56  ;;  %v11054_v10 = vpop.permute.xlu0 %2185  ;;  %2224 = vst.msk [vmem:[#allocation2 + $0x1e8] sm:$0xff] %vm577_vm0, %v11052_v36  ;;  %v8737_v56 = vpack.c.bf16 %v1739_v6, %v1737_v41  ;;  %v2471_v41 = vld [vmem:[#allocation2 + $0x128] sm:$0xff] }
 0x13f   : > { %8778 = vmatprep.subr.bf16.mxu0 %v13392_v0  ;;  %2419 = vrot.lane.b32.xlu1 %v13376_v23, %s9552_s0  ;;  %v8791_v0 = vpack.c.bf16 %v10539_v32, %v10512_v43  ;;  %v2473_v32 = vld [vmem:[#allocation2 + $0x138] sm:$0xff] }
 0x140   : > { %2417 = vrot.lane.b32.xlu0 %v10943_v30, %s9552_s0  ;;  %v8797_v49 = vpack.c.bf16 %v2473_v32, %v2471_v41  ;;  %v2111_v41 = vsel %vm841_vm3, %v10891_v17, %v10889_v14 }
 0x141   : > { %v11068_v5 = vpop.permute.xlu1 %2191  ;;  %v1733_v18 = vld [vmem:[#allocation2 + $0x228] sm:$0xff] }
 0x142   : > { %8780 = vmatpush1.bf16.msra.mxu0 %v8779_v38  ;;  %v11070_v28 = vpop.permute.xlu0 %2189  ;;  %2226 = vst.msk [vmem:[#allocation2 + $0x1f8] sm:$0xff] %vm577_vm0, %v11068_v5  ;;  %v8733_v37 = vpack.c.bf16 %v1735_v9, %v1733_v18  ;;  %v2468_v9 = vld [vmem:[#allocation2 + $0x110] sm:$0xff] }
 0x143   : > { %8782 = vmatprep.subr.bf16.mxu0 %v8781_v33  ;;  %2751 = vrot.lane.b32.xlu1 %v13376_v23, %s9550_s29  ;;  %v13393_v33 = vld [vmem:[#allocation11_spill] sm:$0xff]  ;;  %v8795_v54 = vpack.c.bf16 %v2468_v9, %v10542_v13  ;;  %v2472_v18 = vld [vmem:[#allocation2 + $0x130] sm:$0xff]  ;;  %v2477_v13 = vld [vmem:[#allocation2 + $0x158] sm:$0xff] }
 0x144   : > { %2749 = vrot.lane.b32.xlu0 %v10943_v30, %s9550_s29  ;;  %8734 = vmatprep.subr.bf16.mxu1 %v8733_v37  ;;  %v2485_v9 = vld [vmem:[#allocation2 + $0x198] sm:$0xff] }
 0x145   : > { %v11081_v38 = vpop.permute.xlu1 %2195  ;;  %8736 = vmatpush1.bf16.msra.mxu1 %v8735_v57  ;;  %v7429_v57 = vld [vmem:[%s9664_s28 + $0x198] sm:$0xff] }
 0x146   : > { %8784 = vmatpush1.bf16.msra.mxu0 %v8783_v39  ;;  %v11083_v52 = vpop.permute.xlu0 %2193  ;;  %2228 = vst.msk [vmem:[#allocation2 + $0x208] sm:$0xff] %vm577_vm0, %v11081_v38  ;;  %8738 = vmatprep.subr.bf16.mxu1 %v8737_v56  ;;  %v2470_v39 = vld [vmem:[#allocation2 + $0x120] sm:$0xff]  ;;  %v13397_v56 = vld [vmem:[#allocation45_spill] sm:$0xff] }
 0x147   : > { %8786 = vmatprep.subr.bf16.mxu0 %v8785_v3  ;;  %2755 = vrot.lane.b32.xlu1 %v13377_v34, %s9550_s29  ;;  %v13395_v34 = vpack.c.bf16 %v13393_v33, %v13394_v50  ;;  %v8799_v37 = vpack.c.bf16 %v2472_v18, %v2470_v39  ;;  %v7431_v50 = vld [vmem:[%s9664_s28 + $0x1a8] sm:$0xff]  ;;  %v2114_v39 = vsel %vm841_vm3, %v10933_v20, %v10931_v15  ;;  %v9539_v15 = vld [vmem:[#allocation2 + $0x70] sm:$0xff] }
 0x148   : > { %2753 = vrot.lane.b32.xlu0 %v10959_v19, %s9550_s29  ;;  %v8793_v19 = vpack.c.bf16 %v2469_v2, %v13396_v4  ;;  %v2112_v2 = vsel %vm841_vm3, %v10902_v31, %v10900_v61  ;;  %v2113_v18 = vsel %vm841_vm3, %v10917_v48, %v10915_v8  ;;  %v7440_v8 = vld [vmem:[%s9664_s28 + $0x1e0] sm:$0xff] }
 0x149   : > { %v11091_v30 = vpop.permute.xlu1 %2199  ;;  %8740 = vmatpush1.bf16.msra.mxu1 %v8739_v25  ;;  %v2481_v25 = vld [vmem:[#allocation2 + $0x178] sm:$0xff]  ;;  %v8807_v31 = vpack.c.bf16 %v2112_v2, %v2111_v41  ;;  %v8811_v20 = vpack.c.bf16 %v2114_v39, %v2113_v18  ;;  %v7445_v18 = vld [vmem:[%s9664_s28 + $0x208] sm:$0xff] }
 0x14a   : > { %8788 = vmatpush1.bf16.msra.mxu0 %v8787_v26  ;;  %v11093_v23 = vpop.permute.xlu0 %2197  ;;  %2230 = vst.msk [vmem:[#allocation2 + $0x218] sm:$0xff] %vm577_vm0, %v11091_v30  ;;  %v2057_v26 = vsel %vm597_vm1, %v10854_v7, %v10852_v27  ;;  %v8805_v33 = vpack.c.bf16 %v2481_v25, %v2479_v22  ;;  %v9553_v25 = vmov 0   ;;  %v2204_v22 = vsel %vm841_vm3, %v11070_v28, %v11068_v5 }
 0x14b   : > { %8790 = vmatprep.subr.bf16.mxu0 %v13395_v34  ;;  %2759 = vrot.lane.b32.xlu1 %v13378_v21, %s9550_s29  ;;  %v9538_v21 = vld [vmem:[#allocation2] sm:$0xff]  ;;  %v8803_v24 = vpack.c.bf16 %v2110_v59, %v2057_v26  ;;  %v2202_v59 = vsel %vm841_vm3, %v11033_v35, %v11031_v11  ;;  %v2497_v26 = vld [vmem:[#allocation2 + $0x1f8] sm:$0xff]  ;;  %v2495_v35 = vld [vmem:[#allocation2 + $0x1e8] sm:$0xff] }
 0x14c   : > { %2757 = vrot.lane.b32.xlu0 %v10975_v63, %s9550_s29  ;;  %v7426_v63 = vld [vmem:[%s9664_s28 + $0x180] sm:$0xff]  ;;  %9534 = vset.pattern.permute.xlu1 %v9553_v25 }
 0x14d   : > { %v1532_v43 = vpop.permute.xlu1 %1531  ;;  %v7430_v34 = vld [vmem:[%s9664_s28 + $0x1a0] sm:$0xff]  ;;  %9533 = vset.pattern.permute.xlu0 %v9553_v25 }
 0x14e   : > { %8792 = vmatpush1.bf16.msra.mxu0 %v8791_v0  ;;  %v1530_v6 = vpop.permute.xlu0 %1529  ;;  %1558 = vst.msk [vmem:[#allocation2 + $0x268] sm:$0xff] %vm577_vm0, %v1532_v43  ;;  %v9540_v25 = vld [vmem:[#allocation2 + $0xe0] sm:$0xff] }
 0x14f   : > { %8794 = vmatprep.subr.bf16.mxu0 %v8793_v19  ;;  %2763 = vrot.lane.b32.xlu1 %v13380_v44, %s9550_s29  ;;  %v2475_v44 = vld [vmem:[#allocation2 + $0x148] sm:$0xff]  ;;  %v1545_v32 = vsel %vm597_vm1, %v1530_v6, %v1532_v43  ;;  %v2489_v6 = vld [vmem:[#allocation2 + $0x1b8] sm:$0xff] }
 0x150   : > { %2761 = vrot.lane.b32.xlu0 %v9538_v21, %s9550_s29  ;;  %v8801_v62 = vpack.c.bf16 %v2477_v13, %v2475_v44  ;;  %v13398_v21 = vld [vmem:[#allocation59_spill] sm:$0xff]  ;;  %v2115_v44 = vsel %vm841_vm3, %v10950_v45, %v10948_v16 }
 0x151   : > { %v1536_v29 = vpop.permute.xlu1 %1535 }
 0x152   : > { %8796 = vmatpush1.bf16.msra.mxu0 %v8795_v54  ;;  %v1534_v46 = vpop.permute.xlu0 %1533  ;;  %1560 = vst.msk [vmem:[#allocation2 + $0x278] sm:$0xff] %vm577_vm0, %v1536_v29  ;;  %v2483_v54 = vld [vmem:[#allocation2 + $0x188] sm:$0xff] }
 0x153   : > { %8798 = vmatprep.subr.bf16.mxu0 %v8797_v49  ;;  %2815 = vrot.lane.b32.xlu1 %v13397_v56, %s9550_s29  ;;  %v1546_v0 = vsel %vm597_vm1, %v1534_v46, %v1536_v29  ;;  %v8809_v14 = vpack.c.bf16 %v2485_v9, %v2483_v54  ;;  %v2148_v29 = vsel %vm880_vm4, %v10963_v58, %v10961_v47  ;;  %v2493_v56 = vld [vmem:[#allocation2 + $0x1d8] sm:$0xff]  ;;  %v2491_v58 = vld [vmem:[#allocation2 + $0x1c8] sm:$0xff] }
 0x154   : > { %2813 = vrot.lane.b32.xlu0 %v7426_v63, %s9550_s29  ;;  %v8743_v49 = vpack.c.bf16 %v1546_v0, %v1545_v32  ;;  %v2487_v63 = vld [vmem:[#allocation2 + $0x1a8] sm:$0xff]  ;;  %v8815_v47 = vpack.c.bf16 %v2148_v29, %v2115_v44  ;;  %v8821_v0 = vpack.c.bf16 %v2497_v26, %v2495_v35  ;;  %v2203_v9 = vsel %vm841_vm3, %v11054_v10, %v11052_v36  ;;  %v7443_v36 = vld [vmem:[%s9664_s28 + $0x1f8] sm:$0xff]  ;;  %v7442_v10 = vld [vmem:[%s9664_s28 + $0x1f0] sm:$0xff] }
 0x155   : > { %v11122_v3 = vpop.permute.xlu1 %2237  ;;  %v1741_v4 = vld [vmem:[#allocation2 + $0x268] sm:$0xff]  ;;  %v8813_v46 = vpack.c.bf16 %v2489_v6, %v2487_v63  ;;  %v8823_v28 = vpack.c.bf16 %v2204_v22, %v2203_v9  ;;  %v11227_v29 = vld [vmem:[%s9664_s28 + $0x98] sm:$0xff]  ;;  %v11265_v26 = vld [vmem:[%s9664_s28 + $0x30] sm:$0xff] }
 0x156   : > { %8800 = vmatpush1.bf16.msra.mxu0 %v8799_v37  ;;  %v11124_v55 = vpop.permute.xlu0 %2235  ;;  %2243 = vst.msk [vmem:[#allocation2 + $0x228] sm:$0xff] %vm577_vm0, %v11122_v3  ;;  %v7441_v37 = vld [vmem:[%s9664_s28 + $0x1e8] sm:$0xff]  ;;  %v7466_v9 = vld [vmem:[%s9664_s28 + $0x110] sm:$0xff] }
 0x157   : > { %8802 = vmatprep.subr.bf16.mxu0 %v8801_v62  ;;  %2819 = vrot.lane.b32.xlu1 %v7429_v57, %s9550_s29  ;;  %v8817_v62 = vpack.c.bf16 %v2493_v56, %v2491_v58  ;;  %v7457_v57 = vld [vmem:[%s9664_s28 + $0x78] sm:$0xff]  ;;  %v2499_v32 = vld [vmem:[#allocation2 + $0x208] sm:$0xff]  ;;  %v2239_v63 = vsel %vm880_vm4, %v11124_v55, %v11122_v3 }
 0x158   : > { %2817 = vrot.lane.b32.xlu0 %v7428_v51, %s9550_s29  ;;  %v7456_v51 = vld [vmem:[%s9664_s28 + $0x70] sm:$0xff] }
 0x159   : > { %v11139_v27 = vpop.permute.xlu1 %2270  ;;  %v1743_v19 = vld [vmem:[#allocation2 + $0x278] sm:$0xff] }
 0x15a   : > { %8804 = vmatpush1.bf16.msra.mxu0 %v8803_v24  ;;  %v11141_v7 = vpop.permute.xlu0 %2268  ;;  %2311 = vst.msk [vmem:[#allocation2 + $0x238] sm:$0xff] %vm577_vm0, %v11139_v27  ;;  %v8741_v61 = vpack.c.bf16 %v1743_v19, %v1741_v4  ;;  %v2201_v24 = vsel %vm841_vm3, %v11014_v1, %v11012_v42  ;;  %v2501_v19 = vld [vmem:[#allocation2 + $0x218] sm:$0xff] }
 0x15b   : > { %8806 = vmatprep.subr.bf16.mxu0 %v8805_v33  ;;  %2823 = vrot.lane.b32.xlu1 %v7431_v50, %s9550_s29  ;;  %v8819_v11 = vpack.c.bf16 %v2202_v59, %v2201_v24  ;;  %v7459_v33 = vld [vmem:[%s9664_s28 + $0x88] sm:$0xff]  ;;  %v7458_v50 = vld [vmem:[%s9664_s28 + $0x80] sm:$0xff]  ;;  %v8825_v54 = vpack.c.bf16 %v2501_v19, %v2499_v32  ;;  %v7467_v19 = vld [vmem:[%s9664_s28 + $0x118] sm:$0xff] }
 0x15c   : > { %2821 = vrot.lane.b32.xlu0 %v7430_v34, %s9550_s29  ;;  %8742 = vmatprep.subr.bf16.mxu1 %v8741_v61 }
 0x15d   : > { %v1540_v17 = vpop.permute.xlu1 %1539  ;;  %8744 = vmatpush1.bf16.msra.mxu1 %v8743_v49 }
 0x15e   : > { %8808 = vmatpush1.bf16.msra.mxu0 %v8807_v31  ;;  %v1538_v43 = vpop.permute.xlu0 %1537  ;;  %1562 = vst.msk [vmem:[#allocation2 + $0x288] sm:$0xff] %vm577_vm0, %v1540_v17  ;;  %v2206_v31 = vsel %vm841_vm3, %v11093_v23, %v11091_v30  ;;  %v2503_v23 = vld [vmem:[#allocation2 + $0x228] sm:$0xff] }
 0x15f   : > { %8810 = vmatprep.subr.bf16.mxu0 %v8809_v14  ;;  %2827 = vrot.lane.b32.xlu1 %v13398_v21, %s9550_s29  ;;  %v1547_v41 = vsel %vm597_vm1, %v1538_v43, %v1540_v17  ;;  %v2205_v17 = vsel %vm841_vm3, %v11083_v52, %v11081_v38  ;;  %v2292_v43 = vsel %vm841_vm3, %v11141_v7, %v11139_v27  ;;  %v7444_v21 = vld [vmem:[%s9664_s28 + $0x200] sm:$0xff] }
 0x160   : > { %2825 = vrot.lane.b32.xlu0 %v9539_v15, %s9550_s29  ;;  %v8827_v30 = vpack.c.bf16 %v2206_v31, %v2205_v17  ;;  %v8831_v27 = vpack.c.bf16 %v2292_v43, %v2239_v63  ;;  %v2918_v17 = vld [vmem:[%s9664_s28 + $0x58] sm:$0xff] }
 0x161   : > { %v1544_v48 = vpop.permute.xlu1 %1543  ;;  %v2505_v14 = vld [vmem:[#allocation2 + $0x238] sm:$0xff] }
 0x162   : > { %8812 = vmatpush1.bf16.msra.mxu0 %v8811_v20  ;;  %v1542_v13 = vpop.permute.xlu0 %1541  ;;  %1564 = vst.msk [vmem:[#allocation2 + $0x298] sm:$0xff] %vm577_vm0, %v1544_v48  ;;  %v8829_v6 = vpack.c.bf16 %v2505_v14, %v2503_v23 }
 0x163   : > { %8814 = vmatprep.subr.bf16.mxu0 %v8813_v46  ;;  %2879 = vrot.lane.b32.xlu1 %v7441_v37, %s9550_s29  ;;  %v1548_v2 = vsel %vm597_vm1, %v1542_v13, %v1544_v48  ;;  %v11248_v48 = vld [vmem:[%s9664_s28 + $0xf0] sm:$0xff] }
 0x164   : > { %2877 = vrot.lane.b32.xlu0 %v7440_v8, %s9550_s29  ;;  %v8747_v61 = vpack.c.bf16 %v1548_v2, %v1547_v41  ;;  %v11245_v8 = vld [vmem:[%s9664_s28 + $0xf8] sm:$0xff] }
 0x165   : > { %v11177_v16 = vpop.permute.xlu1 %2274  ;;  %v1745_v34 = vld [vmem:[#allocation2 + $0x288] sm:$0xff] }
 0x166   : > { %8816 = vmatpush1.bf16.msra.mxu0 %v8815_v47  ;;  %v11179_v45 = vpop.permute.xlu0 %2272  ;;  %2313 = vst.msk [vmem:[#allocation2 + $0x248] sm:$0xff] %vm577_vm0, %v11177_v16 }
 0x167   : > { %8818 = vmatprep.subr.bf16.mxu0 %v8817_v62  ;;  %3065 = vrot.lane.b32.xlu1 %v7457_v57, %s9552_s0  ;;  %v2293_v46 = vsel %vm841_vm3, %v11179_v45, %v11177_v16  ;;  %v11262_v45 = vld [vmem:[%s9664_s28 + $0x38] sm:$0xff] }
 0x168   : > { %3063 = vrot.lane.b32.xlu0 %v7456_v51, %s9552_s0  ;;  %v13399_v51 = vld [vmem:[#allocation24_spill] sm:$0xff] }
 0x169   : > { %v2279_v42 = vpop.permute.xlu1 %2278  ;;  %v1747_v4 = vld [vmem:[#allocation2 + $0x298] sm:$0xff] }
 0x16a   : > { %8820 = vmatpush1.bf16.msra.mxu0 %v8819_v11  ;;  %v2277_v1 = vpop.permute.xlu0 %2276  ;;  %2315 = vst.msk [vmem:[#allocation2 + $0x258] sm:$0xff] %vm577_vm0, %v2279_v42  ;;  %v8745_v5 = vpack.c.bf16 %v1747_v4, %v1745_v34 }
 0x16b   : > { %8822 = vmatprep.subr.bf16.mxu0 %v8821_v0  ;;  %3069 = vrot.lane.b32.xlu1 %v7459_v33, %s9552_s0  ;;  %v2294_v7 = vsel %vm841_vm3, %v2277_v1, %v2279_v42  ;;  %v7464_v42 = vld [vmem:[%s9664_s28 + $0x100] sm:$0xff] }
 0x16c   : > { %3067 = vrot.lane.b32.xlu0 %v7458_v50, %s9552_s0  ;;  %8746 = vmatprep.subr.bf16.mxu1 %v8745_v5  ;;  %v7465_v50 = vld [vmem:[%s9664_s28 + $0x108] sm:$0xff] }
 0x16d   : > { %v1580_v49 = vpop.permute.xlu1 %1579  ;;  %8748 = vmatpush1.bf16.msra.mxu1 %v8747_v61  ;;  %v2507_v15 = vld [vmem:[#allocation2 + $0x248] sm:$0xff] }
 0x16e   : > { %8824 = vmatpush1.bf16.msra.mxu0 %v8823_v28  ;;  %v1578_v39 = vpop.permute.xlu0 %1577  ;;  %1599 = vst.msk [vmem:[#allocation2 + $0x2a8] sm:$0xff] %vm577_vm0, %v1580_v49 }
 0x16f   : > { %8826 = vmatprep.subr.bf16.mxu0 %v8825_v54  ;;  %2883 = vrot.lane.b32.xlu1 %v7443_v36, %s9550_s29  ;;  %v1589_v47 = vsel %vm841_vm3, %v1578_v39, %v1580_v49  ;;  %v2916_v36 = vld [vmem:[%s9664_s28 + $0x48] sm:$0xff] }
 0x170   : > { %2881 = vrot.lane.b32.xlu0 %v7442_v10, %s9550_s29  ;;  %v2915_v10 = vld [vmem:[%s9664_s28 + $0x40] sm:$0xff] }
 0x171   : > { %2615 = vmatmul.mubr.f32.vlgmr.msra.gmra.mrb[8].mxu0 %v10988_v40  ;;  %v1584_v38 = vpop.permute.xlu1 %1583  ;;  %v2509_v20 = vld [vmem:[#allocation2 + $0x258] sm:$0xff] }
 0x172   : > { %8828 = vmatpush1.bf16.msra.mxu0 %v8827_v30  ;;  %v1582_v52 = vpop.permute.xlu0 %1581  ;;  %2620 = vmatprep.mubr.f32.mxu0 %v10995_v53  ;;  %1601 = vst.msk [vmem:[#allocation2 + $0x2b8] sm:$0xff] %vm577_vm0, %v1584_v38  ;;  %v8833_v40 = vpack.c.bf16 %v2509_v20, %v2507_v15  ;;  %v11230_v53 = vld [vmem:[%s9664_s28 + $0x90] sm:$0xff]  ;;  %v7469_v15 = vld [vmem:[%s9664_s28 + $0xc8] sm:$0xff]  ;;  %v7468_v20 = vld [vmem:[%s9664_s28 + $0xc0] sm:$0xff] }
 0x173   : > { %8830 = vmatprep.subr.bf16.mxu0 %v8829_v6  ;;  %2887 = vrot.lane.b32.xlu1 %v7445_v18, %s9550_s29  ;;  %v1590_v37 = vsel %vm841_vm3, %v1582_v52, %v1584_v38  ;;  %v2917_v30 = vld [vmem:[%s9664_s28 + $0x50] sm:$0xff] }
 0x174   : > { %2885 = vrot.lane.b32.xlu0 %v7444_v21, %s9550_s29  ;;  %v8751_v59 = vpack.c.bf16 %v1590_v37, %v1589_v47  ;;  %v2952_v47 = vld [vmem:[%s9664_s28] sm:$0xff] }
 0x175   : > { %2621 = vmatmul.mubr.f32.gmra.mrb[10].mxu0 %v11021_v12  ;;  %v2283_v3 = vpop.permute.xlu1 %2282  ;;  %v8835_v12 = vpack.c.bf16 %v2294_v7, %v2293_v46  ;;  %v1749_v56 = vld [vmem:[#allocation2 + $0x2a8] sm:$0xff]  ;;  %v7471_v7 = vld [vmem:[%s9664_s28 + $0xd8] sm:$0xff] }
 0x176   : > { %8832 = vmatpush1.bf16.msra.mxu0 %v8831_v27  ;;  %v2281_v55 = vpop.permute.xlu0 %2280  ;;  %7404 = vmatprep.mubr.msk.f32.mxu0 %vm1004_vm2, %v11000_v60  ;;  %2317 = vst.msk [vmem:[#allocation2 + $0x268] sm:$0xff] %vm577_vm0, %v2283_v3 }
 0x177   : > { %8834 = vmatprep.subr.bf16.mxu0 %v8833_v40  ;;  %3073 = vrot.lane.b32.xlu1 %v11227_v29, %s9552_s0  ;;  %v2295_v2 = vsel %vm841_vm3, %v2281_v55, %v2283_v3  ;;  %v7470_v3 = vld [vmem:[%s9664_s28 + $0xd0] sm:$0xff] }
 0x178   : > { %3071 = vrot.lane.b32.xlu0 %v11230_v53, %s9552_s0 }
 0x179   : > { %v2287_v60 = vpop.permute.xlu1 %2286  ;;  %v1751_v44 = vld [vmem:[#allocation2 + $0x2b8] sm:$0xff] }
 0x17a   : > { %8836 = vmatpush1.bf16.msra.mxu0 %v8835_v12  ;;  %v2285_v13 = vpop.permute.xlu0 %2284  ;;  %2319 = vst.msk [vmem:[#allocation2 + $0x278] sm:$0xff] %vm577_vm0, %v2287_v60  ;;  %v8749_v58 = vpack.c.bf16 %v1751_v44, %v1749_v56  ;;  %v2953_v44 = vld [vmem:[%s9664_s28 + $0x8] sm:$0xff] }
 0x17b   : > { %3109 = vrot.lane.b32.xlu1 %v11245_v8, %s13265_s30  ;;  %v2296_v16 = vsel %vm841_vm3, %v2285_v13, %v2287_v60 }
 0x17c   : > { %3107 = vrot.lane.b32.xlu0 %v11248_v48, %s13265_s30  ;;  %8750 = vmatprep.subr.bf16.mxu1 %v8749_v58  ;;  %v8839_v33 = vpack.c.bf16 %v2296_v16, %v2295_v2 }
 0x17d   : > { %v1588_v62 = vpop.permute.xlu1 %1587  ;;  %8752 = vmatpush1.bf16.msra.mxu1 %v8751_v59  ;;  %v2511_v35 = vld [vmem:[#allocation2 + $0x268] sm:$0xff] }
 0x17e   : > { %v1586_v57 = vpop.permute.xlu0 %1585  ;;  %1603 = vst.msk [vmem:[#allocation2 + $0x2c8] sm:$0xff] %vm577_vm0, %v1588_v62 }
 0x17f   : > { %2891 = vrot.lane.b32.xlu1 %v13399_v51, %s9550_s29  ;;  %v1591_v61 = vsel %vm841_vm3, %v1586_v57, %v1588_v62  ;;  %v2955_v57 = vld [vmem:[%s9664_s28 + $0x18] sm:$0xff]  ;;  %v2954_v51 = vld [vmem:[%s9664_s28 + $0x10] sm:$0xff] }
 0x180   : > { %2889 = vrot.lane.b32.xlu0 %v9540_v25, %s9550_s29 }
 0x181   : > { %v1623_v24 = vpop.permute.xlu1 %1622  ;;  %v2513_v22 = vld [vmem:[#allocation2 + $0x278] sm:$0xff] }
 0x182   : > { %v1621_v11 = vpop.permute.xlu0 %1620  ;;  %1649 = vst.msk [vmem:[#allocation2 + $0x2d8] sm:$0xff] %vm577_vm0, %v1623_v24  ;;  %v8837_v0 = vpack.c.bf16 %v2513_v22, %v2511_v35 }
 0x183   : > { %2927 = vrot.lane.b32.xlu1 %v11262_v45, %s13265_s30  ;;  %v1636_v4 = vsel %vm880_vm4, %v1621_v11, %v1623_v24 }
 0x184   : > { %2925 = vrot.lane.b32.xlu0 %v11265_v26, %s13265_s30  ;;  %8838 = vmatprep.subr.bf16.mxu0 %v8837_v0  ;;  %v8755_v54 = vpack.c.bf16 %v1636_v4, %v1591_v61  ;;  %v7473_v0 = vld [vmem:[%s9664_s28 + $0xe8] sm:$0xff]  ;;  %v2956_v61 = vld [vmem:[%s9664_s28 + $0x20] sm:$0xff] }
 0x185   : > { %v2291_v1 = vpop.permute.xlu1 %2290  ;;  %8840 = vmatpush1.bf16.msra.mxu0 %v8839_v33  ;;  %v1753_v28 = vld [vmem:[#allocation2 + $0x2c8] sm:$0xff]  ;;  %v7472_v33 = vld [vmem:[%s9664_s28 + $0xe0] sm:$0xff] }
 0x186   : > { %v2289_v34 = vpop.permute.xlu0 %2288  ;;  %2321 = vst.msk [vmem:[#allocation2 + $0x288] sm:$0xff] %vm577_vm0, %v2291_v1 }
 0x187   : > { %3113 = vrot.lane.b32.xlu1 %v7465_v50, %s13265_s30  ;;  %v2297_v21 = vsel %vm841_vm3, %v2289_v34, %v2291_v1 }
 0x188   : > { %3111 = vrot.lane.b32.xlu0 %v7464_v42, %s13265_s30 }
 0x189   : > { %v2329_v41 = vpop.permute.xlu1 %2328  ;;  %v1755_v32 = vld [vmem:[#allocation2 + $0x2d8] sm:$0xff] }
 0x18a   : > { %v2327_v5 = vpop.permute.xlu0 %2326  ;;  %2334 = vst.msk [vmem:[#allocation2 + $0x298] sm:$0xff] %vm577_vm0, %v2329_v41  ;;  %v8753_v31 = vpack.c.bf16 %v1755_v32, %v1753_v28  ;;  %v2957_v32 = vld [vmem:[%s9664_s28 + $0x28] sm:$0xff] }
 0x18b   : > { %3117 = vrot.lane.b32.xlu1 %v7467_v19, %s13265_s30  ;;  %v2330_v14 = vsel %vm880_vm4, %v2327_v5, %v2329_v41 }
 0x18c   : > { %3115 = vrot.lane.b32.xlu0 %v7466_v9, %s13265_s30  ;;  %8754 = vmatprep.subr.bf16.mxu1 %v8753_v31  ;;  %v8843_v52 = vpack.c.bf16 %v2330_v14, %v2297_v21  ;;  %v11356_v14 = vld [vmem:[%s13193_s1 + $0x30] sm:$0xff] }
 0x18d   : > { %v1627_v49 = vpop.permute.xlu1 %1626  ;;  %8756 = vmatpush1.bf16.msra.mxu1 %v8755_v54  ;;  %v2515_v6 = vld [vmem:[#allocation2 + $0x288] sm:$0xff] }
 0x18e   : > { %v1625_v39 = vpop.permute.xlu0 %1624  ;;  %1651 = vst.msk [vmem:[#allocation2 + $0x2e8] sm:$0xff] %vm577_vm0, %v1627_v49 }
 0x18f   : > { %2931 = vrot.lane.b32.xlu1 %v2916_v36, %s13265_s30  ;;  %v1637_v60 = vsel %vm880_vm4, %v1625_v39, %v1627_v49 }
 0x190   : > { %2929 = vrot.lane.b32.xlu0 %v2915_v10, %s13265_s30  ;;  %v11339_v10 = vld [vmem:[%s13193_s1 + $0x10] sm:$0xff] }
 0x191   : > { %v1631_v23 = vpop.permute.xlu1 %1630  ;;  %v2517_v18 = vld [vmem:[#allocation2 + $0x298] sm:$0xff] }
 0x192   : > { %v1629_v43 = vpop.permute.xlu0 %1628  ;;  %1653 = vst.msk [vmem:[#allocation2 + $0x2f8] sm:$0xff] %vm577_vm0, %v1631_v23  ;;  %v8841_v38 = vpack.c.bf16 %v2517_v18, %v2515_v6 }
 0x193   : > { %2935 = vrot.lane.b32.xlu1 %v2918_v17, %s13265_s30  ;;  %v1638_v27 = vsel %vm880_vm4, %v1629_v43, %v1631_v23  ;;  %v11367_v23 = vld [vmem:[%s9664_s28 + $0x150] sm:$0xff] }
 0x194   : > { %2933 = vrot.lane.b32.xlu0 %v2917_v30, %s13265_s30  ;;  %8842 = vmatprep.subr.bf16.mxu0 %v8841_v38  ;;  %v8759_v56 = vpack.c.bf16 %v1638_v27, %v1637_v60  ;;  %v11364_v30 = vld [vmem:[%s9664_s28 + $0x158] sm:$0xff]  ;;  %v3290_v60 = vld [vmem:[#allocation2 + $0x28] sm:$0xff] }
 0x195   : > { %v2362_v63 = vpop.permute.xlu1 %2361  ;;  %8844 = vmatpush1.bf16.msra.mxu0 %v8843_v52  ;;  %v1757_v12 = vld [vmem:[#allocation2 + $0x2e8] sm:$0xff] }
 0x196   : > { %v2360_v40 = vpop.permute.xlu0 %2359  ;;  %2402 = vst.msk [vmem:[#allocation2 + $0x2a8] sm:$0xff] %vm577_vm0, %v2362_v63 }
 0x197   : > { %3152 = vrot.lane.b32.xlu1 %v7469_v15, %s9552_s0  ;;  %v2383_v35 = vsel %vm841_vm3, %v2360_v40, %v2362_v63  ;;  %v3286_v15 = vld [vmem:[#allocation2 + $0x8] sm:$0xff]  ;;  %v7478_v40 = vld [vmem:[%s9664_s28 + $0x160] sm:$0xff] }
 0x198   : > { %3150 = vrot.lane.b32.xlu0 %v7468_v20, %s9552_s0  ;;  %v3288_v20 = vld [vmem:[#allocation2 + $0x18] sm:$0xff]  ;;  %v7479_v63 = vld [vmem:[%s9664_s28 + $0x168] sm:$0xff] }
 0x199   : > { %v2366_v55 = vpop.permute.xlu1 %2365  ;;  %v1759_v37 = vld [vmem:[#allocation2 + $0x2f8] sm:$0xff] }
 0x19a   : > { %v2364_v46 = vpop.permute.xlu0 %2363  ;;  %2404 = vst.msk [vmem:[#allocation2 + $0x2b8] sm:$0xff] %vm577_vm0, %v2366_v55  ;;  %v8757_v13 = vpack.c.bf16 %v1759_v37, %v1757_v12  ;;  %v8857_v37 = vpack.c.bf16 %v3288_v20, %v3286_v15  ;;  %v7455_v15 = vld [vmem:[%s9664_s28 + $0x68] sm:$0xff]  ;;  %v7454_v20 = vld [vmem:[%s9664_s28 + $0x60] sm:$0xff] }
 0x19b   : > { %3156 = vrot.lane.b32.xlu1 %v7471_v7, %s9552_s0  ;;  %v2384_v62 = vsel %vm841_vm3, %v2364_v46, %v2366_v55  ;;  %v3285_v55 = vld [vmem:[#allocation2] sm:$0xff]  ;;  %v3287_v46 = vld [vmem:[#allocation2 + $0x10] sm:$0xff] }
 0x19c   : > { %3154 = vrot.lane.b32.xlu0 %v7470_v3, %s9552_s0  ;;  %8758 = vmatprep.subr.bf16.mxu1 %v8757_v13  ;;  %v8847_v2 = vpack.c.bf16 %v2384_v62, %v2383_v35 }
 0x19d   : > { %v2370_v58 = vpop.permute.xlu1 %2369  ;;  %8760 = vmatpush1.bf16.msra.mxu1 %v8759_v56  ;;  %v2519_v24 = vld [vmem:[#allocation2 + $0x2a8] sm:$0xff]  ;;  %v8859_v56 = vpack.c.bf16 %v3287_v46, %v3285_v55 }
 0x19e   : > { %v2368_v59 = vpop.permute.xlu0 %2367  ;;  %2406 = vst.msk [vmem:[#allocation2 + $0x2c8] sm:$0xff] %vm577_vm0, %v2370_v58 }
 0x19f   : > { %2970 = vrot.lane.b32.xlu1 %v2953_v44, %s9552_s0  ;;  %v2385_v41 = vsel %vm841_vm3, %v2368_v59, %v2370_v58 }
 0x1a0   : > { %2968 = vrot.lane.b32.xlu0 %v2952_v47, %s9552_s0 }
 0x1a1   : > { %v2374_v25 = vpop.permute.xlu1 %2373  ;;  %v2521_v11 = vld [vmem:[#allocation2 + $0x2b8] sm:$0xff] }
 0x1a2   : > { %v2372_v16 = vpop.permute.xlu0 %2371  ;;  %2408 = vst.msk [vmem:[#allocation2 + $0x2d8] sm:$0xff] %vm577_vm0, %v2374_v25  ;;  %v8845_v22 = vpack.c.bf16 %v2521_v11, %v2519_v24 }
 0x1a3   : > { %2974 = vrot.lane.b32.xlu1 %v2955_v57, %s9552_s0  ;;  %v2386_v1 = vsel %vm841_vm3, %v2372_v16, %v2374_v25  ;;  %v3289_v57 = vld [vmem:[#allocation2 + $0x20] sm:$0xff] }
 0x1a4   : > { %2972 = vrot.lane.b32.xlu0 %v2954_v51, %s9552_s0  ;;  %8846 = vmatprep.subr.bf16.mxu0 %v8845_v22  ;;  %v8851_v28 = vpack.c.bf16 %v2386_v1, %v2385_v41  ;;  %v7451_v51 = vld [vmem:[%s9664_s28 + $0xa8] sm:$0xff]  ;;  %v7450_v25 = vld [vmem:[%s9664_s28 + $0xa0] sm:$0xff]  ;;  %v7481_v22 = vld [vmem:[%s9664_s28 + $0x178] sm:$0xff] }
 0x1a5   : > { %v1635_v50 = vpop.permute.xlu1 %1634  ;;  %8848 = vmatpush1.bf16.msra.mxu0 %v8847_v2  ;;  %v2523_v19 = vld [vmem:[#allocation2 + $0x2c8] sm:$0xff]  ;;  %v7480_v2 = vld [vmem:[%s9664_s28 + $0x170] sm:$0xff]  ;;  %v3304_v41 = vld [vmem:[#allocation2 + $0x98] sm:$0xff] }
 0x1a6   : > { %v1633_v42 = vpop.permute.xlu0 %1632  ;;  %1655 = vst.msk [vmem:[#allocation2 + $0x308] sm:$0xff] %vm577_vm0, %v1635_v50 }
 0x1a7   : > { %3160 = vrot.lane.b32.xlu1 %v7473_v0, %s9552_s0 }
 0x1a8   : > { %3158 = vrot.lane.b32.xlu0 %v7472_v33, %s9552_s0 }
 0x1a9   : > { %v2378_v34 = vpop.permute.xlu1 %2377  ;;  %v2525_v9 = vld [vmem:[#allocation2 + $0x2d8] sm:$0xff] }
 0x1aa   : > { %v2376_v4 = vpop.permute.xlu0 %2375  ;;  %2410 = vst.msk [vmem:[#allocation2 + $0x2e8] sm:$0xff] %vm577_vm0, %v2378_v34  ;;  %v8849_v5 = vpack.c.bf16 %v2525_v9, %v2523_v19  ;;  %v3300_v19 = vld [vmem:[#allocation2 + $0x78] sm:$0xff]  ;;  %v3302_v9 = vld [vmem:[#allocation2 + $0x88] sm:$0xff] }
 0x1ab   : > { %3164 = vrot.lane.b32.xlu1 %v11245_v8, %s9552_s0  ;;  %v1639_v8 = vsel %vm880_vm4, %v1633_v42, %v1635_v50  ;;  %v2387_v38 = vsel %vm841_vm3, %v2376_v4, %v2378_v34 }
 0x1ac   : > { %3162 = vrot.lane.b32.xlu0 %v11248_v48, %s9552_s0  ;;  %8850 = vmatprep.subr.bf16.mxu0 %v8849_v5  ;;  %v11347_v48 = vld [vmem:[%s13193_s1 + $0x38] sm:$0xff]  ;;  %v7483_v5 = vld [vmem:[%s9664_s28 + $0x128] sm:$0xff] }
 0x1ad   : > { %v2382_v31 = vpop.permute.xlu1 %2381  ;;  %8852 = vmatpush1.bf16.msra.mxu0 %v8851_v28  ;;  %v1761_v36 = vld [vmem:[#allocation2 + $0x308] sm:$0xff]  ;;  %v7482_v28 = vld [vmem:[%s9664_s28 + $0x120] sm:$0xff] }
 0x1ae   : > { %v2380_v54 = vpop.permute.xlu0 %2379  ;;  %2412 = vst.msk [vmem:[#allocation2 + $0x2f8] sm:$0xff] %vm577_vm0, %v2382_v31  ;;  %1889 = vmatprep.subr.mxu1 %v1761_v36 }
 0x1af   : > { %2978 = vrot.lane.b32.xlu1 %v2957_v32, %s9552_s0  ;;  %1890 = vmatpush1.msra.mxu1 %v1639_v8  ;;  %v2388_v17 = vsel %vm841_vm3, %v2380_v54, %v2382_v31  ;;  %v3299_v32 = vld [vmem:[#allocation2 + $0x70] sm:$0xff] }
 0x1b0   : > { %2976 = vrot.lane.b32.xlu0 %v2956_v61, %s9552_s0  ;;  %1922 = vmatmul.mubr.f32.vlgmr.msra.gmra.mrb[0].mxu1 %v11339_v10  ;;  %v8855_v52 = vpack.c.bf16 %v2388_v17, %v2387_v38 }
 0x1b1   : > { %v2420_v49 = vpop.permute.xlu1 %2419  ;;  %7319 = vmatprep.mubr.msk.f32.mxu1 %vm1004_vm2, %v11347_v48  ;;  %v2527_v18 = vld [vmem:[#allocation2 + $0x2e8] sm:$0xff] }
 0x1b2   : > { %v2418_v39 = vpop.permute.xlu0 %2417  ;;  %2425 = vst.msk [vmem:[#allocation2 + $0x308] sm:$0xff] %vm577_vm0, %v2420_v49 }
 0x1b3   : > { %2982 = vrot.lane.b32.xlu1 %v11262_v45, %s9552_s0  ;;  %v2421_v13 = vsel %vm880_vm4, %v2418_v39, %v2420_v49  ;;  %v8873_v49 = vpack.c.bf16 %v3304_v41, %v3302_v9  ;;  %v3301_v39 = vld [vmem:[#allocation2 + $0x80] sm:$0xff]  ;;  %v993_v41 = vld [vmem:[%s13194_s2 + $0x8] sm:$0xff] }
 0x1b4   : > { %2980 = vrot.lane.b32.xlu0 %v11265_v26, %s9552_s0  ;;  %1928 = vmatmul.mubr.f32.gmra.mrb[2].mxu1 %v11356_v14 }
 0x1b5   : > { %v2752_v43 = vpop.permute.xlu1 %2751  ;;  %v2529_v21 = vld [vmem:[#allocation2 + $0x2f8] sm:$0xff] }
 0x1b6   : > { %v2750_v6 = vpop.permute.xlu0 %2749  ;;  %2778 = vst.msk [vmem:[#allocation2 + $0x38] sm:$0xff] %vm577_vm0, %v2752_v43  ;;  %v8853_v26 = vpack.c.bf16 %v2529_v21, %v2527_v18  ;;  %v7452_v18 = vld [vmem:[%s9664_s28 + $0xb0] sm:$0xff] }
 0x1b7   : > { %v2765_v45 = vsel %vm597_vm1, %v2750_v6, %v2752_v43  ;;  %3200 = vrot.lane.b32.xlu1 %v11364_v30, %s13265_s30  ;;  %v7453_v6 = vld [vmem:[%s9664_s28 + $0xb8] sm:$0xff] }
 0x1b8   : > { %2777 = vst [vmem:[#allocation2 + $0x30] sm:$0xff] %v2765_v45  ;;  %3198 = vrot.lane.b32.xlu0 %v11367_v23, %s13265_s30  ;;  %8854 = vmatprep.subr.bf16.mxu0 %v8853_v26 }
 0x1b9   : > { %v2756_v27 = vpop.permute.xlu1 %2755  ;;  %8856 = vmatpush1.bf16.msra.mxu0 %v8855_v52  ;;  %v2531_v3 = vld [vmem:[#allocation2 + $0x308] sm:$0xff] }
 0x1ba   : > { %v2754_v7 = vpop.permute.xlu0 %2753  ;;  %2780 = vst.msk [vmem:[#allocation2 + $0x48] sm:$0xff] %vm577_vm0, %v2756_v27  ;;  %2659 = vmatprep.subr.mxu0 %v2531_v3 }
 0x1bb   : > { %v2766_v12 = vsel %vm597_vm1, %v2754_v7, %v2756_v27  ;;  %3204 = vrot.lane.b32.xlu1 %v7479_v63, %s13265_s30 }
 0x1bc   : > { %2779 = vst [vmem:[#allocation2 + $0x40] sm:$0xff] %v2766_v12  ;;  %3202 = vrot.lane.b32.xlu0 %v7478_v40, %s13265_s30 }
 0x1bd   : > { %v2760_v44 = vpop.permute.xlu1 %2759  ;;  %2660 = vmatpush1.msra.mxu0 %v2421_v13  ;;  %v3292_v58 = vld [vmem:[#allocation2 + $0x38] sm:$0xff] }
 0x1be   : > { %v2758_v47 = vpop.permute.xlu0 %2757  ;;  %2782 = vst.msk [vmem:[#allocation2 + $0x58] sm:$0xff] %vm577_vm0, %v2760_v44  ;;  %8858 = vmatprep.subr.bf16.mxu0 %v8857_v37  ;;  %2692 = vmatmul.mubr.f32.vlgmr.msra.gmra.mrb[8].mxu0 %v11339_v10  ;;  %v8861_v62 = vpack.c.bf16 %v3292_v58, %v3290_v60  ;;  %v7485_v37 = vld [vmem:[%s9664_s28 + $0x138] sm:$0xff]  ;;  %v7484_v60 = vld [vmem:[%s9664_s28 + $0x130] sm:$0xff] }
 0x1bf   : > { %v2767_v59 = vsel %vm597_vm1, %v2758_v47, %v2760_v44  ;;  %3018 = vrot.lane.b32.xlu1 %v11227_v29, %s13265_s30  ;;  %8860 = vmatpush1.bf16.msra.mxu0 %v8859_v56  ;;  %v8863_v29 = vpack.c.bf16 %v2765_v45, %v3289_v57  ;;  %v3314_v47 = vld [vmem:[#allocation2 + $0xe8] sm:$0xff]  ;;  %v3316_v58 = vld [vmem:[#allocation2 + $0xf8] sm:$0xff] }
 0x1c0   : > { %2781 = vst [vmem:[#allocation2 + $0x50] sm:$0xff] %v2767_v59  ;;  %3016 = vrot.lane.b32.xlu0 %v11230_v53, %s13265_s30  ;;  %7405 = vmatprep.mubr.msk.f32.mxu0 %vm1004_vm2, %v11347_v48  ;;  %v8867_v4 = vpack.c.bf16 %v2767_v59, %v2766_v12  ;;  %v3278_v12 = vld [vmem:[%s13193_s1 + $0x8] sm:$0xff] }
 0x1c1   : > { %8862 = vmatprep.subr.bf16.mxu0 %v8861_v62  ;;  %v2764_v16 = vpop.permute.xlu1 %2763  ;;  %v3294_v50 = vld [vmem:[#allocation2 + $0x48] sm:$0xff]  ;;  %v7486_v62 = vld [vmem:[%s9664_s28 + $0x140] sm:$0xff] }
 0x1c2   : > { %v2762_v24 = vpop.permute.xlu0 %2761  ;;  %2784 = vst.msk [vmem:[#allocation2 + $0x68] sm:$0xff] %vm577_vm0, %v2764_v16  ;;  %2698 = vmatmul.mubr.f32.gmra.mrb[10].mxu0 %v11356_v14  ;;  %v3303_v14 = vld [vmem:[#allocation2 + $0x90] sm:$0xff]  ;;  %v7487_v59 = vld [vmem:[%s9664_s28 + $0x148] sm:$0xff]  ;;  %s13401_s28 = smov 98  }
 0x1c3   : > { %v2768_v11 = vsel %vm597_vm1, %v2762_v24, %v2764_v16  ;;  %3022 = vrot.lane.b32.xlu1 %v7451_v51, %s13265_s30  ;;  %8864 = vmatpush1.bf16.msra.mxu0 %v8863_v29  ;;  %v8875_v26 = vpack.c.bf16 %v3303_v14, %v3301_v39  ;;  %v8885_v29 = vpack.c.bf16 %v3316_v58, %v3314_v47 }
 0x1c4   : > { %v11398_v53 = vpop.f32.mrb[0].mxu0  ;;  %3020 = vrot.lane.b32.xlu0 %v7450_v25, %s13265_s30  ;;  %v8871_v17 = vpack.c.bf16 %v3299_v32, %v2768_v11  ;;  %3465 = vmatprep.mubr.f32.mxu0 %v3278_v12  ;;  %v9554_v32 = vmov 0.0  }
 0x1c5   : > { %v11402_v35 = vpop.f32.mrb[1].mxu0  ;;  %v2816_v0 = vpop.permute.xlu1 %2815  ;;  %v3296_v42 = vld [vmem:[#allocation2 + $0x58] sm:$0xff]  ;;  %533 = vst.msk [vmem:[#allocation3 + $0x18] sm:$0xff] %vm530_vm5, %v9554_v32  ;;  %531 = vst.msk [vmem:[#allocation3 + $0x8] sm:$0xff] %vm530_vm5, %v9554_v32 }
 0x1c6   : > { %v2814_v33 = vpop.permute.xlu0 %2813  ;;  %2842 = vst.msk [vmem:[#allocation2 + $0xa8] sm:$0xff] %vm577_vm0, %v2816_v0  ;;  %v8865_v34 = vpack.c.bf16 %v3296_v42, %v3294_v50  ;;  %555 = vst [vmem:[#allocation7] sm:$0xff] %v9554_v32 }
 0x1c7   : > { %v2829_v1 = vsel %vm597_vm1, %v2814_v33, %v2816_v0  ;;  %3208 = vrot.lane.b32.xlu1 %v7481_v22, %s13265_s30  ;;  %v3313_v22 = vld [vmem:[#allocation2 + $0xe0] sm:$0xff]  ;;  %535 = vst.msk [vmem:[#allocation3 + $0x28] sm:$0xff] %vm530_vm5, %v9554_v32  ;;  %537 = vst.msk [vmem:[#allocation3 + $0x38] sm:$0xff] %vm530_vm5, %v9554_v32 }
 0x1c8   : > { %2841 = vst [vmem:[#allocation2 + $0xa0] sm:$0xff] %v2829_v1  ;;  %3206 = vrot.lane.b32.xlu0 %v7480_v2, %s13265_s30  ;;  %8866 = vmatprep.subr.bf16.mxu0 %v8865_v34  ;;  %v11416_v43 = vpop.f32.mrb[2].mxu0  ;;  %v3315_v2 = vld [vmem:[#allocation2 + $0xf0] sm:$0xff]  ;;  %539 = vst.msk [vmem:[#allocation3 + $0x48] sm:$0xff] %vm530_vm5, %v9554_v32 }
 0x1c9   : > { %v2820_v61 = vpop.permute.xlu1 %2819  ;;  %8868 = vmatpush1.bf16.msra.mxu0 %v8867_v4  ;;  %v3298_v54 = vld [vmem:[#allocation2 + $0x68] sm:$0xff]  ;;  %v11420_v21 = vpop.f32.mrb[3].mxu0  ;;  %v8887_v42 = vpack.c.bf16 %v3315_v2, %v3313_v22  ;;  %v3280_v4 = vld [vmem:[%s13193_s1 + $0x18] sm:$0xff]  ;;  %541 = vst.msk [vmem:[#allocation3 + $0x58] sm:$0xff] %vm530_vm5, %v9554_v32  ;;  %543 = vst.msk [vmem:[#allocation3 + $0x68] sm:$0xff] %vm530_vm5, %v9554_v32 }
 0x1ca   : > { %v2818_v31 = vpop.permute.xlu0 %2817  ;;  %2844 = vst.msk [vmem:[#allocation2 + $0xb8] sm:$0xff] %vm577_vm0, %v2820_v61  ;;  %v8869_v8 = vpack.c.bf16 %v3300_v19, %v3298_v54  ;;  %7490 = vmatprep.mubr.msk.f32.mxu1 %vm1004_vm2, %v3280_v4  ;;  %558 = vst [vmem:[#allocation7 + $0x10] sm:$0xff] %v9554_v32 }
 0x1cb   : > { %v2830_v36 = vsel %vm597_vm1, %v2818_v31, %v2820_v61  ;;  %3243 = vrot.lane.b32.xlu1 %v7483_v5, %s9552_s0  ;;  %v992_v5 = vld [vmem:[%s13194_s2] sm:$0xff]  ;;  %545 = vst.msk [vmem:[#allocation3 + $0x78] sm:$0xff] %vm530_vm5, %v9554_v32  ;;  %560 = vst [vmem:[#allocation7 + $0x20] sm:$0xff] %v9554_v32 }
 0x1cc   : > { %2843 = vst [vmem:[#allocation2 + $0xb0] sm:$0xff] %v2830_v36  ;;  %3241 = vrot.lane.b32.xlu0 %v7482_v28, %s9552_s0  ;;  %8870 = vmatprep.subr.bf16.mxu0 %v8869_v8  ;;  %v8879_v46 = vpack.c.bf16 %v2830_v36, %v2829_v1  ;;  %v3318_v1 = vld [vmem:[#allocation2 + $0x108] sm:$0xff]  ;;  %v3317_v28 = vld [vmem:[#allocation2 + $0x100] sm:$0xff]  ;;  %562 = vst [vmem:[#allocation7 + $0x30] sm:$0xff] %v9554_v32 }
 0x1cd   : > { %v2824_v38 = vpop.permute.xlu1 %2823  ;;  %8872 = vmatpush1.bf16.msra.mxu0 %v8871_v17  ;;  %v3306_v27 = vld [vmem:[#allocation2 + $0xa8] sm:$0xff] }
 0x1ce   : > { %v2822_v45 = vpop.permute.xlu0 %2821  ;;  %2846 = vst.msk [vmem:[#allocation2 + $0xc8] sm:$0xff] %vm577_vm0, %v2824_v38  ;;  %8874 = vmatprep.subr.bf16.mxu0 %v8873_v49 }
 0x1cf   : > { %v2831_v52 = vsel %vm597_vm1, %v2822_v45, %v2824_v38  ;;  %3026 = vrot.lane.b32.xlu1 %v7453_v6, %s13265_s30 }
 0x1d0   : > { %2845 = vst [vmem:[#allocation2 + $0xc0] sm:$0xff] %v2831_v52  ;;  %3024 = vrot.lane.b32.xlu0 %v7452_v18, %s13265_s30 }
 0x1d1   : > { %v2828_v63 = vpop.permute.xlu1 %2827  ;;  %8876 = vmatpush1.bf16.msra.mxu0 %v8875_v26  ;;  %v3308_v7 = vld [vmem:[#allocation2 + $0xb8] sm:$0xff] }
 0x1d2   : > { %v2826_v40 = vpop.permute.xlu0 %2825  ;;  %2848 = vst.msk [vmem:[#allocation2 + $0xd8] sm:$0xff] %vm577_vm0, %v2828_v63  ;;  %v8877_v55 = vpack.c.bf16 %v3308_v7, %v3306_v27 }
 0x1d3   : > { %v2832_v3 = vsel %vm597_vm1, %v2826_v40, %v2828_v63  ;;  %3061 = vrot.lane.b32.xlu1 %v7455_v15, %s9552_s0 }
 0x1d4   : > { %3059 = vrot.lane.b32.xlu0 %v7454_v20, %s9552_s0  ;;  %8878 = vmatprep.subr.bf16.mxu0 %v8877_v55  ;;  %v8883_v0 = vpack.c.bf16 %v2832_v3, %v2831_v52 }
 0x1d5   : > { %v2880_v13 = vpop.permute.xlu1 %2879  ;;  %8880 = vmatpush1.bf16.msra.mxu0 %v8879_v46  ;;  %v3310_v25 = vld [vmem:[#allocation2 + $0xc8] sm:$0xff] }
 0x1d6   : > { %v2878_v56 = vpop.permute.xlu0 %2877  ;;  %2906 = vst.msk [vmem:[#allocation2 + $0x118] sm:$0xff] %vm577_vm0, %v2880_v13 }
 0x1d7   : > { %v11439_v44 = vsel %vm597_vm1, %v2878_v56, %v2880_v13  ;;  %3247 = vrot.lane.b32.xlu1 %v7485_v37, %s9552_s0 }
 0x1d8   : > { %2905 = vst [vmem:[#allocation2 + $0x110] sm:$0xff] %v11439_v44  ;;  %3245 = vrot.lane.b32.xlu0 %v7484_v60, %s9552_s0  ;;  %v8891_v31 = vpack.c.bf16 %v11439_v44, %v3317_v28 }
 0x1d9   : > { %v3066_v57 = vpop.permute.xlu1 %3065  ;;  %v3312_v16 = vld [vmem:[#allocation2 + $0xd8] sm:$0xff] }
 0x1da   : > { %v3064_v51 = vpop.permute.xlu0 %3063  ;;  %3090 = vst.msk [vmem:[#allocation2 + $0x208] sm:$0xff] %vm577_vm0, %v3066_v57  ;;  %v8881_v11 = vpack.c.bf16 %v3312_v16, %v3310_v25 }
 0x1db   : > { %v11448_v24 = vsel %vm880_vm4, %v3064_v51, %v3066_v57  ;;  %3251 = vrot.lane.b32.xlu1 %v7487_v59, %s9552_s0 }
 0x1dc   : > { %3249 = vrot.lane.b32.xlu0 %v7486_v62, %s9552_s0  ;;  %8882 = vmatprep.subr.bf16.mxu0 %v8881_v11 }
 0x1dd   : > { %v3070_v33 = vpop.permute.xlu1 %3069  ;;  %8884 = vmatpush1.bf16.msra.mxu0 %v8883_v0  ;;  %v3320_v34 = vld [vmem:[#allocation2 + $0x118] sm:$0xff] }
 0x1de   : > { %v3068_v50 = vpop.permute.xlu0 %3067  ;;  %3092 = vst.msk [vmem:[#allocation2 + $0x218] sm:$0xff] %vm577_vm0, %v3070_v33  ;;  %8886 = vmatprep.subr.bf16.mxu0 %v8885_v29  ;;  %v8889_v9 = vpack.c.bf16 %v3320_v34, %v3318_v1 }
 0x1df   : > { %v3077_v19 = vsel %vm880_vm4, %v3068_v50, %v3070_v33  ;;  %3255 = vrot.lane.b32.xlu1 %v11364_v30, %s9552_s0 }
 0x1e0   : > { %3253 = vrot.lane.b32.xlu0 %v11367_v23, %s9552_s0  ;;  %v8923_v17 = vpack.c.bf16 %v3077_v19, %v11448_v24 }
 0x1e1   : > { %v2884_v30 = vpop.permute.xlu1 %2883  ;;  %8888 = vmatpush1.bf16.msra.mxu0 %v8887_v42  ;;  %v3350_v8 = vld [vmem:[#allocation2 + $0x208] sm:$0xff] }
 0x1e2   : > { %v2882_v23 = vpop.permute.xlu0 %2881  ;;  %2908 = vst.msk [vmem:[#allocation2 + $0x128] sm:$0xff] %vm577_vm0, %v2884_v30  ;;  %8890 = vmatprep.subr.bf16.mxu0 %v8889_v9 }
 0x1e3   : > { %v2894_v61 = vsel %vm597_vm1, %v2882_v23, %v2884_v30  ;;  %1001 = vperm.xlu1 %9534, %v993_v41  }
 0x1e4   : > { %2907 = vst [vmem:[#allocation2 + $0x120] sm:$0xff] %v2894_v61  ;;  %996 = vperm.xlu0 %9533, %v992_v5  }
 0x1e5   : > { %v2888_v54 = vpop.permute.xlu1 %2887  ;;  %8892 = vmatpush1.bf16.msra.mxu0 %v8891_v31  ;;  %v3352_v49 = vld [vmem:[#allocation2 + $0x218] sm:$0xff] }
 0x1e6   : > { %v2886_v36 = vpop.permute.xlu0 %2885  ;;  %2910 = vst.msk [vmem:[#allocation2 + $0x138] sm:$0xff] %vm577_vm0, %v2888_v54  ;;  %v8921_v14 = vpack.c.bf16 %v3352_v49, %v3350_v8 }
 0x1e7   : > { %v2895_v39 = vsel %vm597_vm1, %v2886_v36, %v2888_v54  ;;  %1766 = vperm.xlu1 %9534, %v992_v5  }
 0x1e8   : > { %2909 = vst [vmem:[#allocation2 + $0x130] sm:$0xff] %v2895_v39  ;;  %1771 = vperm.xlu0 %9533, %v993_v41   ;;  %8922 = vmatprep.subr.bf16.mxu1 %v8921_v14  ;;  %v8895_v40 = vpack.c.bf16 %v2895_v39, %v2894_v61 }
 0x1e9   : > { %v3074_v6 = vpop.permute.xlu1 %3073  ;;  %8924 = vmatpush1.bf16.msra.mxu1 %v8923_v17  ;;  %v3322_v52 = vld [vmem:[#allocation2 + $0x128] sm:$0xff] }
 0x1ea   : > { %v3072_v18 = vpop.permute.xlu0 %3071  ;;  %3094 = vst.msk [vmem:[#allocation2 + $0x228] sm:$0xff] %vm577_vm0, %v3074_v6 }
 0x1eb   : > { %v3078_v38 = vsel %vm880_vm4, %v3072_v18, %v3074_v6  ;;  %2536 = vperm.xlu1 %9534, %v992_v5  }
 0x1ec   : > { %2541 = vperm.xlu0 %9533, %v993_v41  }
 0x1ed   : > { %v3110_v45 = vpop.permute.xlu1 %3109  ;;  %v3324_v15 = vld [vmem:[#allocation2 + $0x138] sm:$0xff] }
 0x1ee   : > { %v3108_v26 = vpop.permute.xlu0 %3107  ;;  %3129 = vst.msk [vmem:[#allocation2 + $0x238] sm:$0xff] %vm577_vm0, %v3110_v45  ;;  %v8893_v63 = vpack.c.bf16 %v3324_v15, %v3322_v52 }
 0x1ef   : > { %v3119_v20 = vsel %vm841_vm3, %v3108_v26, %v3110_v45  ;;  %3387 = vperm.xlu1 %9534, %v992_v5  }
 0x1f0   : > { %3128 = vst [vmem:[#allocation2 + $0x230] sm:$0xff] %v3119_v20  ;;  %3392 = vperm.xlu0 %9533, %v993_v41   ;;  %8894 = vmatprep.subr.bf16.mxu0 %v8893_v63  ;;  %v8927_v56 = vpack.c.bf16 %v3119_v20, %v3078_v38 }
 0x1f1   : > { %v2892_v27 = vpop.permute.xlu1 %2891  ;;  %8896 = vmatpush1.bf16.msra.mxu0 %v8895_v40  ;;  %v3354_v12 = vld [vmem:[#allocation2 + $0x228] sm:$0xff] }
 0x1f2   : > { %v2890_v7 = vpop.permute.xlu0 %2889  ;;  %2912 = vst.msk [vmem:[#allocation2 + $0x148] sm:$0xff] %vm577_vm0, %v2892_v27 }
 0x1f3   : > { %v2896_v3 = vsel %vm597_vm1, %v2890_v7, %v2892_v27 }
 0x1f5   : > { %v2928_v55 = vpop.permute.xlu1 %2927  ;;  %v3356_v37 = vld [vmem:[#allocation2 + $0x238] sm:$0xff] }
 0x1f6   : > { %v2926_v46 = vpop.permute.xlu0 %2925  ;;  %2947 = vst.msk [vmem:[#allocation2 + $0x158] sm:$0xff] %vm577_vm0, %v2928_v55  ;;  %v8925_v13 = vpack.c.bf16 %v3356_v37, %v3354_v12 }
 0x1f7   : > { %v2937_v60 = vsel %vm841_vm3, %v2926_v46, %v2928_v55 }
 0x1f8   : > { %8926 = vmatprep.subr.bf16.mxu1 %v8925_v13  ;;  %v8899_v24 = vpack.c.bf16 %v2937_v60, %v2896_v3 }
 0x1f9   : > { %v3114_v44 = vpop.permute.xlu1 %3113  ;;  %8928 = vmatpush1.bf16.msra.mxu1 %v8927_v56  ;;  %v3326_v57 = vld [vmem:[#allocation2 + $0x148] sm:$0xff] }
 0x1fa   : > { %v3112_v47 = vpop.permute.xlu0 %3111  ;;  %3131 = vst.msk [vmem:[#allocation2 + $0x248] sm:$0xff] %vm577_vm0, %v3114_v44 }
 0x1fb   : > { %v3120_v58 = vsel %vm841_vm3, %v3112_v47, %v3114_v44 }
 0x1fc   : > { %3130 = vst [vmem:[#allocation2 + $0x240] sm:$0xff] %v3120_v58 }
 0x1fd   : > { %v3118_v59 = vpop.permute.xlu1 %3117  ;;  %v3328_v51 = vld [vmem:[#allocation2 + $0x158] sm:$0xff] }
 0x1fe   : > { %v3116_v62 = vpop.permute.xlu0 %3115  ;;  %3133 = vst.msk [vmem:[#allocation2 + $0x258] sm:$0xff] %vm577_vm0, %v3118_v59  ;;  %v8897_v16 = vpack.c.bf16 %v3328_v51, %v3326_v57 }
 0x1ff   : > { %v3121_v25 = vsel %vm841_vm3, %v3116_v62, %v3118_v59 }
 0x200   : > { %3132 = vst [vmem:[#allocation2 + $0x250] sm:$0xff] %v3121_v25  ;;  %8898 = vmatprep.subr.bf16.mxu0 %v8897_v16  ;;  %v8931_v19 = vpack.c.bf16 %v3121_v25, %v3120_v58 }
 0x201   : > { %v2932_v11 = vpop.permute.xlu1 %2931  ;;  %8900 = vmatpush1.bf16.msra.mxu0 %v8899_v24  ;;  %v3358_v42 = vld [vmem:[#allocation2 + $0x248] sm:$0xff] }
 0x202   : > { %v2930_v29 = vpop.permute.xlu0 %2929  ;;  %2949 = vst.msk [vmem:[#allocation2 + $0x168] sm:$0xff] %vm577_vm0, %v2932_v11 }
 0x203   : > { %v2938_v22 = vsel %vm841_vm3, %v2930_v29, %v2932_v11 }
 0x204   : > { %v11488_v2 = vpop.f32.mrb[4].mxu0 }
 0x205   : > { %v11490_v0 = vpop.f32.mrb[5].mxu0  ;;  %v2936_v33 = vpop.permute.xlu1 %2935  ;;  %v3360_v1 = vld [vmem:[#allocation2 + $0x258] sm:$0xff] }
 0x206   : > { %v2934_v50 = vpop.permute.xlu0 %2933  ;;  %2951 = vst.msk [vmem:[#allocation2 + $0x178] sm:$0xff] %vm577_vm0, %v2936_v33  ;;  %v8929_v4 = vpack.c.bf16 %v3360_v1, %v3358_v42 }
 0x207   : > { %v2939_v34 = vsel %vm841_vm3, %v2934_v50, %v2936_v33 }
 0x208   : > { %v11494_v9 = vpop.f32.mrb[6].mxu0  ;;  %8930 = vmatprep.subr.bf16.mxu1 %v8929_v4  ;;  %v8903_v8 = vpack.c.bf16 %v2939_v34, %v2938_v22 }
 0x209   : > { %v11496_v41 = vpop.f32.mrb[7].mxu0  ;;  %v3153_v5 = vpop.permute.xlu1 %3152  ;;  %8932 = vmatpush1.bf16.msra.mxu1 %v8931_v19  ;;  %v3330_v61 = vld [vmem:[#allocation2 + $0x168] sm:$0xff] }
 0x20a   : > { %v3151_v28 = vpop.permute.xlu0 %3150  ;;  %3179 = vst.msk [vmem:[#allocation2 + $0x268] sm:$0xff] %vm577_vm0, %v3153_v5 }
 0x20b   : > { %v3166_v32 = vsel %vm880_vm4, %v3151_v28, %v3153_v5 }
 0x20d   : > { %v3157_v30 = vpop.permute.xlu1 %3156  ;;  %v3332_v31 = vld [vmem:[#allocation2 + $0x178] sm:$0xff] }
 0x20e   : > { %v3155_v23 = vpop.permute.xlu0 %3154  ;;  %3181 = vst.msk [vmem:[#allocation2 + $0x278] sm:$0xff] %vm577_vm0, %v3157_v30  ;;  %v8901_v36 = vpack.c.bf16 %v3332_v31, %v3330_v61 }
 0x20f   : > { %v3167_v54 = vsel %vm880_vm4, %v3155_v23, %v3157_v30 }
 0x210   : > { %8902 = vmatprep.subr.bf16.mxu0 %v8901_v36  ;;  %v8935_v52 = vpack.c.bf16 %v3167_v54, %v3166_v32 }
 0x211   : > { %v2971_v49 = vpop.permute.xlu1 %2970  ;;  %8904 = vmatpush1.bf16.msra.mxu0 %v8903_v8  ;;  %v3362_v18 = vld [vmem:[#allocation2 + $0x268] sm:$0xff] }
 0x212   : > { %v2969_v39 = vpop.permute.xlu0 %2968  ;;  %2997 = vst.msk [vmem:[#allocation2 + $0x188] sm:$0xff] %vm577_vm0, %v2971_v49 }
 0x213   : > { %v2984_v14 = vsel %vm880_vm4, %v2969_v39, %v2971_v49 }
 0x215   : > { %v2975_v17 = vpop.permute.xlu1 %2974  ;;  %v3364_v38 = vld [vmem:[#allocation2 + $0x278] sm:$0xff] }
 0x216   : > { %v2973_v6 = vpop.permute.xlu0 %2972  ;;  %2999 = vst.msk [vmem:[#allocation2 + $0x198] sm:$0xff] %vm577_vm0, %v2975_v17  ;;  %v8933_v26 = vpack.c.bf16 %v3364_v38, %v3362_v18 }
 0x217   : > { %v2985_v45 = vsel %vm880_vm4, %v2973_v6, %v2975_v17 }
 0x218   : > { %8934 = vmatprep.subr.bf16.mxu1 %v8933_v26  ;;  %v8907_v12 = vpack.c.bf16 %v2985_v45, %v2984_v14 }
 0x219   : > { %v3161_v15 = vpop.permute.xlu1 %3160  ;;  %8936 = vmatpush1.bf16.msra.mxu1 %v8935_v52  ;;  %v3334_v7 = vld [vmem:[#allocation2 + $0x188] sm:$0xff] }
 0x21a   : > { %v3159_v20 = vpop.permute.xlu0 %3158  ;;  %3183 = vst.msk [vmem:[#allocation2 + $0x288] sm:$0xff] %vm577_vm0, %v3161_v15 }
 0x21b   : > { %v3168_v63 = vsel %vm880_vm4, %v3159_v20, %v3161_v15 }
 0x21d   : > { %v3165_v40 = vpop.permute.xlu1 %3164  ;;  %v3336_v3 = vld [vmem:[#allocation2 + $0x198] sm:$0xff] }
 0x21e   : > { %v3163_v27 = vpop.permute.xlu0 %3162  ;;  %3185 = vst.msk [vmem:[#allocation2 + $0x298] sm:$0xff] %vm577_vm0, %v3165_v40  ;;  %v8905_v46 = vpack.c.bf16 %v3336_v3, %v3334_v7 }
 0x21f   : > { %v3169_v55 = vsel %vm880_vm4, %v3163_v27, %v3165_v40 }
 0x220   : > { %8906 = vmatprep.subr.bf16.mxu0 %v8905_v46  ;;  %v8939_v57 = vpack.c.bf16 %v3169_v55, %v3168_v63 }
 0x221   : > { %v2979_v37 = vpop.permute.xlu1 %2978  ;;  %8908 = vmatpush1.bf16.msra.mxu0 %v8907_v12  ;;  %v3366_v47 = vld [vmem:[#allocation2 + $0x288] sm:$0xff] }
 0x222   : > { %v2977_v60 = vpop.permute.xlu0 %2976  ;;  %3001 = vst.msk [vmem:[#allocation2 + $0x1a8] sm:$0xff] %vm577_vm0, %v2979_v37 }
 0x223   : > { %v2986_v13 = vsel %vm880_vm4, %v2977_v60, %v2979_v37 }
 0x225   : > { %v2983_v56 = vpop.permute.xlu1 %2982  ;;  %v3368_v58 = vld [vmem:[#allocation2 + $0x298] sm:$0xff] }
 0x226   : > { %v2981_v44 = vpop.permute.xlu0 %2980  ;;  %3003 = vst.msk [vmem:[#allocation2 + $0x1b8] sm:$0xff] %vm577_vm0, %v2983_v56  ;;  %v8937_v62 = vpack.c.bf16 %v3368_v58, %v3366_v47 }
 0x227   : > { %v2987_v59 = vsel %vm880_vm4, %v2981_v44, %v2983_v56 }
 0x228   : > { %8938 = vmatprep.subr.bf16.mxu1 %v8937_v62  ;;  %v8911_v42 = vpack.c.bf16 %v2987_v59, %v2986_v13  ;;  %v3277_v62 = vld [vmem:[%s13193_s1] sm:$0xff] }
 0x229   : > { %v3201_v51 = vpop.permute.xlu1 %3200  ;;  %8940 = vmatpush1.bf16.msra.mxu1 %v8939_v57  ;;  %v3338_v29 = vld [vmem:[#allocation2 + $0x1a8] sm:$0xff] }
 0x22a   : > { %v3199_v25 = vpop.permute.xlu0 %3198  ;;  %3220 = vst.msk [vmem:[#allocation2 + $0x2a8] sm:$0xff] %vm577_vm0, %v3201_v51 }
 0x22b   : > { %v3210_v16 = vsel %vm841_vm3, %v3199_v25, %v3201_v51  ;;  %v3282_v51 = vld [vmem:[%s13193_s1 + $0x28] sm:$0xff]  ;;  %v3281_v25 = vld [vmem:[%s13193_s1 + $0x20] sm:$0xff] }
 0x22d   : > { %v3205_v24 = vpop.permute.xlu1 %3204  ;;  %v3340_v22 = vld [vmem:[#allocation2 + $0x1b8] sm:$0xff] }
 0x22e   : > { %v3203_v11 = vpop.permute.xlu0 %3202  ;;  %3222 = vst.msk [vmem:[#allocation2 + $0x2b8] sm:$0xff] %vm577_vm0, %v3205_v24  ;;  %v8909_v50 = vpack.c.bf16 %v3340_v22, %v3338_v29 }
 0x22f   : > { %v3211_v33 = vsel %vm841_vm3, %v3203_v11, %v3205_v24 }
 0x230   : > { %8910 = vmatprep.subr.bf16.mxu0 %v8909_v50  ;;  %v8943_v61 = vpack.c.bf16 %v3211_v33, %v3210_v16  ;;  %v3283_v33 = vld [vmem:[%s13193_s1 + $0x30] sm:$0xff] }
 0x231   : > { %v3019_v1 = vpop.permute.xlu1 %3018  ;;  %8912 = vmatpush1.bf16.msra.mxu0 %v8911_v42  ;;  %v3370_v28 = vld [vmem:[#allocation2 + $0x2a8] sm:$0xff] }
 0x232   : > { %v3017_v34 = vpop.permute.xlu0 %3016  ;;  %3038 = vst.msk [vmem:[#allocation2 + $0x1c8] sm:$0xff] %vm577_vm0, %v3019_v1 }
 0x233   : > { %v3028_v4 = vsel %vm841_vm3, %v3017_v34, %v3019_v1 }
 0x234   : > { %3037 = vst [vmem:[#allocation2 + $0x1c0] sm:$0xff] %v3028_v4 }
 0x235   : > { %v3023_v19 = vpop.permute.xlu1 %3022  ;;  %v3372_v32 = vld [vmem:[#allocation2 + $0x2b8] sm:$0xff] }
 0x236   : > { %v3021_v5 = vpop.permute.xlu0 %3020  ;;  %3040 = vst.msk [vmem:[#allocation2 + $0x1d8] sm:$0xff] %vm577_vm0, %v3023_v19  ;;  %v8941_v23 = vpack.c.bf16 %v3372_v32, %v3370_v28 }
 0x237   : > { %v3029_v30 = vsel %vm841_vm3, %v3021_v5, %v3023_v19 }
 0x238   : > { %3039 = vst [vmem:[#allocation2 + $0x1d0] sm:$0xff] %v3029_v30  ;;  %8942 = vmatprep.subr.bf16.mxu1 %v8941_v23  ;;  %v8915_v18 = vpack.c.bf16 %v3029_v30, %v3028_v4 }
 0x239   : > { %v3209_v31 = vpop.permute.xlu1 %3208  ;;  %8944 = vmatpush1.bf16.msra.mxu1 %v8943_v61  ;;  %v3342_v39 = vld [vmem:[#allocation2 + $0x1c8] sm:$0xff] }
 0x23a   : > { %v3207_v54 = vpop.permute.xlu0 %3206  ;;  %3224 = vst.msk [vmem:[#allocation2 + $0x2c8] sm:$0xff] %vm577_vm0, %v3209_v31 }
 0x23b   : > { %v3212_v36 = vsel %vm841_vm3, %v3207_v54, %v3209_v31 }
 0x23d   : > { %v3244_v8 = vpop.permute.xlu1 %3243  ;;  %v3344_v14 = vld [vmem:[#allocation2 + $0x1d8] sm:$0xff] }
 0x23e   : > { %v3242_v49 = vpop.permute.xlu0 %3241  ;;  %3270 = vst.msk [vmem:[#allocation2 + $0x2d8] sm:$0xff] %vm577_vm0, %v3244_v8  ;;  %v8913_v6 = vpack.c.bf16 %v3344_v14, %v3342_v39 }
 0x23f   : > { %v3257_v17 = vsel %vm880_vm4, %v3242_v49, %v3244_v8 }
 0x240   : > { %8914 = vmatprep.subr.bf16.mxu0 %v8913_v6  ;;  %v8947_v7 = vpack.c.bf16 %v3257_v17, %v3212_v36 }
 0x241   : > { %v3027_v38 = vpop.permute.xlu1 %3026  ;;  %8916 = vmatpush1.bf16.msra.mxu0 %v8915_v18  ;;  %v3374_v20 = vld [vmem:[#allocation2 + $0x2c8] sm:$0xff] }
 0x242   : > { %v3025_v45 = vpop.permute.xlu0 %3024  ;;  %3042 = vst.msk [vmem:[#allocation2 + $0x1e8] sm:$0xff] %vm577_vm0, %v3027_v38 }
 0x243   : > { %v3030_v26 = vsel %vm841_vm3, %v3025_v45, %v3027_v38 }
 0x244   : > { %3041 = vst [vmem:[#allocation2 + $0x1e0] sm:$0xff] %v3030_v26 }
 0x245   : > { %v3062_v52 = vpop.permute.xlu1 %3061  ;;  %v3376_v63 = vld [vmem:[#allocation2 + $0x2d8] sm:$0xff] }
 0x246   : > { %v3060_v15 = vpop.permute.xlu0 %3059  ;;  %3088 = vst.msk [vmem:[#allocation2 + $0x1f8] sm:$0xff] %vm577_vm0, %v3062_v52  ;;  %v8945_v27 = vpack.c.bf16 %v3376_v63, %v3374_v20 }
 0x247   : > { %v3075_v40 = vsel %vm880_vm4, %v3060_v15, %v3062_v52 }
 0x248   : > { %8946 = vmatprep.subr.bf16.mxu1 %v8945_v27  ;;  %v8919_v47 = vpack.c.bf16 %v3075_v40, %v3030_v26 }
 0x249   : > { %v3248_v3 = vpop.permute.xlu1 %3247  ;;  %8948 = vmatpush1.bf16.msra.mxu1 %v8947_v7  ;;  %v3346_v60 = vld [vmem:[#allocation2 + $0x1e8] sm:$0xff] }
 0x24a   : > { %v3246_v55 = vpop.permute.xlu0 %3245  ;;  %3272 = vst.msk [vmem:[#allocation2 + $0x2e8] sm:$0xff] %vm577_vm0, %v3248_v3 }
 0x24b   : > { %v3258_v46 = vsel %vm880_vm4, %v3246_v55, %v3248_v3 }
 0x24d   : > { %v3252_v12 = vpop.permute.xlu1 %3251  ;;  %v3348_v13 = vld [vmem:[#allocation2 + $0x1f8] sm:$0xff] }
 0x24e   : > { %v3250_v37 = vpop.permute.xlu0 %3249  ;;  %3274 = vst.msk [vmem:[#allocation2 + $0x2f8] sm:$0xff] %vm577_vm0, %v3252_v12  ;;  %v8917_v44 = vpack.c.bf16 %v3348_v13, %v3346_v60 }
 0x24f   : > { %v3259_v56 = vsel %vm880_vm4, %v3250_v37, %v3252_v12 }
 0x250   : > { %8918 = vmatprep.subr.bf16.mxu0 %v8917_v44  ;;  %v8951_v29 = vpack.c.bf16 %v3259_v56, %v3258_v46 }
 0x251   : > { %8920 = vmatpush1.bf16.msra.mxu0 %v8919_v47  ;;  %v3256_v58 = vpop.permute.xlu1 %3255  ;;  %v3378_v16 = vld [vmem:[#allocation2 + $0x2e8] sm:$0xff] }
 0x252   : > { %v3254_v59 = vpop.permute.xlu0 %3253  ;;  %3276 = vst.msk [vmem:[#allocation2 + $0x308] sm:$0xff] %vm577_vm0, %v3256_v58 }
 0x253   : > { %v3260_v57 = vsel %vm880_vm4, %v3254_v59, %v3256_v58 }
 0x254   : > { %3466 = vmatmul.mubr.f32.vlgmr.msra.gmra.mrb[12].mxu0 %v3277_v62 }
 0x255   : > { %3471 = vmatprep.mubr.f32.mxu0 %v3282_v51  ;;  %v3380_v24 = vld [vmem:[#allocation2 + $0x2f8] sm:$0xff] }
 0x256   : > { %v8949_v11 = vpack.c.bf16 %v3380_v24, %v3378_v16 }
 0x258   : > { %3472 = vmatmul.mubr.f32.gmra.mrb[14].mxu0 %v3281_v25  ;;  %8950 = vmatprep.subr.bf16.mxu1 %v8949_v11 }
 0x259   : > { %8952 = vmatpush1.bf16.msra.mxu1 %v8951_v29  ;;  %v3382_v22 = vld [vmem:[#allocation2 + $0x308] sm:$0xff] }
 0x25a   : > { %3510 = vmatprep.subr.mxu1 %v3382_v22 }
 0x25d   : > { %3511 = vmatpush1.msra.mxu1 %v3260_v57 }
 0x25e   : > { %3543 = vmatmul.mubr.f32.vlgmr.msra.gmra.mrb[4].mxu1 %v11339_v10 }
 0x25f   : > { %7491 = vmatprep.mubr.msk.f32.mxu1 %vm1004_vm2, %v11347_v48 }
 0x262   : > { %v1002_v50 = vpop.permute.xlu1 %1001  ;;  %3549 = vmatmul.mubr.f32.gmra.mrb[6].mxu1 %v3283_v33 }
 0x263   : > { %v997_v42 = vpop.permute.xlu0 %996  ;;  %v9435_v1 = vadd.f32 %v11416_v43, %v1002_v50  ;;  %v9436_v34 = vadd.f32 %v11420_v21, %v1002_v50 }
 0x264   : > { %v9433_v4 = vadd.f32 %v11398_v53, %v997_v42  ;;  %v9434_v19 = vadd.f32 %v11402_v35, %v997_v42 }
 0x265   : > { %vm1167_vm6 = vcmp.gt.f32.partialorder %v9435_v1, 0.0  ;;  %vm1168_vm7 = vcmp.gt.f32.partialorder %v9436_v34, 0.0  ;;  %v1171_v10 = vmul.f32 0.01, %v9435_v1  ;;  %v1172_v5 = vmul.f32 0.01, %v9436_v34 }
 0x266   : > { %vm1165_vm8 = vcmp.gt.f32.partialorder %v9433_v4, 0.0  ;;  %vm1166_vm9 = vcmp.gt.f32.partialorder %v9434_v19, 0.0  ;;  %v1169_v48 = vmul.f32 0.01, %v9433_v4  ;;  %v1170_v28 = vmul.f32 0.01, %v9434_v19  ;;  %v1767_v36 = vpop.permute.xlu1 %1766 }
 0x267   : > { %v11555_v32 = vsel %vm1167_vm6, %v9435_v1, %v1171_v10  ;;  %v1176_v30 = vsel %vm1168_vm7, %v9436_v34, %v1172_v5  ;;  %v1847_v8 = vadd.f32 %v11488_v2, %v1767_v36  ;;  %v1849_v49 = vadd.f32 %v11490_v0, %v1767_v36  ;;  %v1772_v39 = vpop.permute.xlu0 %1771 }
 0x268   : > { %1179 = vst [vmem:[#allocation3 + $0x10] sm:$0xff] %v11555_v32  ;;  %1180 = vst.msk [vmem:[#allocation3 + $0x18] sm:$0xff] %vm577_vm0, %v1176_v30  ;;  %v11559_v43 = vsel %vm1165_vm8, %v9433_v4, %v1169_v48  ;;  %v1174_v53 = vsel %vm1166_vm9, %v9434_v19, %v1170_v28  ;;  %v1853_v18 = vadd.f32 %v11494_v9, %v1772_v39  ;;  %vm3657_vm7 = vcmask 1031168  }
 0x269   : > { %1178 = vst.msk [vmem:[#allocation3 + $0x8] sm:$0xff] %vm577_vm0, %v1174_v53  ;;  %3597 = vrot.lane.b32.xlu1 %v11559_v43, %s9550_s29  ;;  %v8955_v54 = vpack.c.bf16 %v11555_v32, %v11559_v43  ;;  %v1855_v45 = vadd.f32 %v11496_v41, %v1772_v39  ;;  %vm3882_vm8 = vcmask 916480  }
 0x26a   : > { %v2537_v3 = vpop.permute.xlu1 %2536 }
 0x26b   : > { %v2542_v56 = vpop.permute.xlu0 %2541 }
 0x26d   : > { %3601 = vrot.lane.b32.xlu1 %v11555_v32, %s9550_s29 }
 0x26e   : > { %v11698_v4 = vpop.permute.xlu1 %3387 }
 0x26f   : > { %v11566_v35 = vld [vmem:[#allocation3 + $0x18] sm:$0xff]  ;;  %v11700_v10 = vpop.permute.xlu0 %3392 }
 0x270   : > { %v11568_v21 = vld [vmem:[#allocation3 + $0x8] sm:$0xff]  ;;  %3580 = vst.msk [vmem:[#allocation4 + $0x18] sm:$0xff] %vm3577_vm10, %v11566_v35 }
 0x271   : > { %3599 = vrot.lane.b32.xlu0 %v11568_v21, %s9550_s29  ;;  %3649 = vrot.lane.b32.xlu1 %v11559_v43, %s13271_s14  ;;  %3578 = vst.msk [vmem:[#allocation4 + $0x8] sm:$0xff] %vm3577_vm10, %v11568_v21 }
 0x275   : > { %3603 = vrot.lane.b32.xlu0 %v11566_v35, %s9550_s29  ;;  %3653 = vrot.lane.b32.xlu1 %v11555_v32, %s13271_s14 }
 0x277   : > { %v4175_v23 = vld [vmem:[#allocation4 + $0x18] sm:$0xff] }
 0x278   : > { %v4173_v61 = vld [vmem:[#allocation4 + $0x8] sm:$0xff] }
 0x279   : > { %3651 = vrot.lane.b32.xlu0 %v11568_v21, %s13271_s14  ;;  %v8953_v31 = vpack.c.bf16 %v4175_v23, %v4173_v61  ;;  %3770 = vrot.lane.b32.xlu1 %v11559_v43, %s13265_s30 }
 0x27b   : > { %8954 = vmatprep.subr.bf16.mxu0 %v8953_v31 }
 0x27c   : > { %8956 = vmatpush1.bf16.msra.mxu0 %v8955_v54 }
 0x27d   : > { %3655 = vrot.lane.b32.xlu0 %v11566_v35, %s13271_s14  ;;  %3774 = vrot.lane.b32.xlu1 %v11555_v32, %s13265_s30 }
 0x281   : > { %3772 = vrot.lane.b32.xlu0 %v11568_v21, %s13265_s30 }
 0x283   : > { %v1923_v14 = vpop.f32.mrb[0].mxu1 }
 0x284   : > { %v1924_v17 = vadd.f32 %v1923_v14, %v1847_v8  ;;  %v1925_v6 = vpop.f32.mrb[1].mxu1 }
 0x285   : > { %3776 = vrot.lane.b32.xlu0 %v11566_v35, %s13265_s30  ;;  %v1926_v38 = vadd.f32 %v1925_v6, %v1849_v49 }
 0x286   : > { %vm1934_vm11 = vcmp.gt.f32.partialorder %v1924_v17, 0.0  ;;  %v1938_v26 = vmul.f32 0.01, %v1924_v17 }
 0x287   : > { %vm1935_vm12 = vcmp.gt.f32.partialorder %v1926_v38, 0.0  ;;  %v1939_v52 = vmul.f32 0.01, %v1926_v38  ;;  %v1929_v15 = vpop.f32.mrb[2].mxu1 }
 0x288   : > { %v11600_v2 = vsel %vm1934_vm11, %v1924_v17, %v1938_v26  ;;  %v1930_v0 = vadd.f32 %v1929_v15, %v1853_v18  ;;  %v1931_v20 = vpop.f32.mrb[3].mxu1 }
 0x289   : > { %v1943_v63 = vsel %vm1935_vm12, %v1926_v38, %v1939_v52  ;;  %v1932_v40 = vadd.f32 %v1931_v20, %v1855_v45  ;;  %3623 = vrot.lane.b32.xlu1 %v11600_v2, %s9550_s29 }
 0x28a   : > { %1948 = vst.msk [vmem:[#allocation3 + $0x28] sm:$0xff] %vm577_vm0, %v1943_v63  ;;  %vm1936_vm13 = vcmp.gt.f32.partialorder %v1930_v0, 0.0  ;;  %v1940_v9 = vmul.f32 0.01, %v1930_v0 }
 0x28b   : > { %vm1937_vm14 = vcmp.gt.f32.partialorder %v1932_v40, 0.0  ;;  %v1941_v41 = vmul.f32 0.01, %v1932_v40 }
 0x28c   : > { %v11605_v27 = vsel %vm1936_vm13, %v1930_v0, %v1940_v9 }
 0x28d   : > { %v1945_v7 = vsel %vm1937_vm14, %v1932_v40, %v1941_v41  ;;  %3796 = vrot.lane.b32.xlu1 %v11600_v2, %s13265_s30  ;;  %v8959_v1 = vpack.c.bf16 %v11605_v27, %v11600_v2  ;;  %vm4296_vm14 = vcmask 130048  }
 0x28e   : > { %1950 = vst.msk [vmem:[#allocation3 + $0x38] sm:$0xff] %vm577_vm0, %v1945_v7 }
 0x291   : > { %v2693_v55 = vpop.f32.mrb[8].mxu0  ;;  %v11610_v46 = vld [vmem:[#allocation3 + $0x28] sm:$0xff]  ;;  %3627 = vrot.lane.b32.xlu1 %v11605_v27, %s9550_s29 }
 0x292   : > { %v9445_v12 = vadd.f32 %v2693_v55, %v2537_v3  ;;  %v2695_v37 = vpop.f32.mrb[9].mxu0  ;;  %3625 = vrot.lane.b32.xlu0 %v11610_v46, %s9550_s29  ;;  %3586 = vst.msk [vmem:[#allocation4 + $0x28] sm:$0xff] %vm3577_vm10, %v11610_v46 }
 0x293   : > { %v9446_v60 = vadd.f32 %v2695_v37, %v2537_v3 }
 0x294   : > { %vm2704_vm15 = vcmp.gt.f32.partialorder %v9445_v12, 0.0  ;;  %v2708_v13 = vmul.f32 0.01, %v9445_v12 }
 0x295   : > { %vm2705_vm2 = vcmp.gt.f32.partialorder %v9446_v60, 0.0  ;;  %v2709_v44 = vmul.f32 0.01, %v9446_v60  ;;  %v2699_v47 = vpop.f32.mrb[10].mxu0  ;;  %v11618_v58 = vld [vmem:[#allocation3 + $0x38] sm:$0xff]  ;;  %3800 = vrot.lane.b32.xlu1 %v11605_v27, %s13265_s30 }
 0x296   : > { %v11622_v59 = vsel %vm2704_vm15, %v9445_v12, %v2708_v13  ;;  %v9447_v62 = vadd.f32 %v2699_v47, %v2542_v56  ;;  %v2701_v57 = vpop.f32.mrb[11].mxu0  ;;  %3798 = vrot.lane.b32.xlu0 %v11610_v46, %s13265_s30  ;;  %3588 = vst.msk [vmem:[#allocation4 + $0x38] sm:$0xff] %vm3577_vm10, %v11618_v58  ;;  %vm4145_vm15 = vcmask 801792  }
 0x297   : > { %v2713_v51 = vsel %vm2705_vm2, %v9446_v60, %v2709_v44  ;;  %v9448_v25 = vadd.f32 %v2701_v57, %v2542_v56  ;;  %vm547_vm2 = vcmask 326656  }
 0x298   : > { %2718 = vst.msk [vmem:[#allocation3 + $0x48] sm:$0xff] %vm577_vm0, %v2713_v51  ;;  %vm2706_vm5 = vcmp.gt.f32.partialorder %v9447_v62, 0.0  ;;  %v2710_v16 = vmul.f32 0.01, %v9447_v62 }
 0x299   : > { %vm2707_vm6 = vcmp.gt.f32.partialorder %v9448_v25, 0.0  ;;  %v2711_v24 = vmul.f32 0.01, %v9448_v25  ;;  %3822 = vrot.lane.b32.xlu1 %v11559_v43, %s9552_s0  ;;  %v4177_v22 = vld [vmem:[#allocation4 + $0x28] sm:$0xff] }
 0x29a   : > { %v11631_v11 = vsel %vm2706_vm5, %v9447_v62, %v2710_v16  ;;  %3629 = vrot.lane.b32.xlu0 %v11618_v58, %s9550_s29 }
 0x29b   : > { %v2715_v29 = vsel %vm2707_vm6, %v9448_v25, %v2711_v24 }
 0x29c   : > { %2720 = vst.msk [vmem:[#allocation3 + $0x58] sm:$0xff] %vm577_vm0, %v2715_v29 }
 0x29d   : > { %3826 = vrot.lane.b32.xlu1 %v11555_v32, %s9552_s0  ;;  %v4179_v33 = vld [vmem:[#allocation4 + $0x38] sm:$0xff] }
 0x29e   : > { %3802 = vrot.lane.b32.xlu0 %v11618_v58, %s13265_s30  ;;  %v8957_v50 = vpack.c.bf16 %v4179_v33, %v4177_v22 }
 0x29f   : > { %v11640_v42 = vld [vmem:[#allocation3 + $0x48] sm:$0xff] }
 0x2a0   : > { %3673 = vst.msk [vmem:[#allocation4 + $0xa8] sm:$0xff] %vm3577_vm10, %v11640_v42  ;;  %8958 = vmatprep.subr.bf16.mxu0 %v8957_v50 }
 0x2a1   : > { %8960 = vmatpush1.bf16.msra.mxu0 %v8959_v1  ;;  %3848 = vrot.lane.b32.xlu1 %v11600_v2, %s9552_s0 }
 0x2a2   : > { %3824 = vrot.lane.b32.xlu0 %v11568_v21, %s9552_s0 }
 0x2a3   : > { %v11650_v34 = vld [vmem:[#allocation3 + $0x58] sm:$0xff] }
 0x2a4   : > { %3675 = vst.msk [vmem:[#allocation4 + $0xb8] sm:$0xff] %vm3577_vm10, %v11650_v34 }
 0x2a5   : > { %3852 = vrot.lane.b32.xlu1 %v11605_v27, %s9552_s0 }
 0x2a6   : > { %3828 = vrot.lane.b32.xlu0 %v11566_v35, %s9552_s0 }
 0x2a9   : > { %3874 = vrot.lane.b32.xlu1 %v11559_v43, %s9556_s25 }
 0x2aa   : > { %3850 = vrot.lane.b32.xlu0 %v11610_v46, %s9552_s0 }
 0x2ad   : > { %3878 = vrot.lane.b32.xlu1 %v11555_v32, %s9556_s25 }
 0x2ae   : > { %3854 = vrot.lane.b32.xlu0 %v11618_v58, %s9552_s0 }
 0x2b1   : > { %3692 = vrot.lane.b32.xlu1 %v11622_v59, %s9550_s29 }
 0x2b2   : > { %3876 = vrot.lane.b32.xlu0 %v11568_v21, %s9556_s25 }
 0x2b5   : > { %3744 = vrot.lane.b32.xlu1 %v11622_v59, %s13271_s14 }
 0x2b6   : > { %3880 = vrot.lane.b32.xlu0 %v11566_v35, %s9556_s25 }
 0x2b9   : > { %3901 = vrot.lane.b32.xlu1 %v11622_v59, %s13265_s30 }
 0x2ba   : > { %3694 = vrot.lane.b32.xlu0 %v11640_v42, %s9550_s29 }
 0x2bd   : > { %3953 = vrot.lane.b32.xlu1 %v11622_v59, %s9552_s0 }
 0x2be   : > { %3746 = vrot.lane.b32.xlu0 %v11640_v42, %s13271_s14 }
 0x2c1   : > { %3696 = vrot.lane.b32.xlu1 %v11631_v11, %s9550_s29 }
 0x2c2   : > { %3903 = vrot.lane.b32.xlu0 %v11640_v42, %s13265_s30 }
 0x2c5   : > { %3748 = vrot.lane.b32.xlu1 %v11631_v11, %s13271_s14 }
 0x2c6   : > { %3955 = vrot.lane.b32.xlu0 %v11640_v42, %s9552_s0 }
 0x2c9   : > { %3905 = vrot.lane.b32.xlu1 %v11631_v11, %s13265_s30 }
 0x2ca   : > { %3698 = vrot.lane.b32.xlu0 %v11650_v34, %s9550_s29 }
 0x2ce   : > { %3750 = vrot.lane.b32.xlu0 %v11650_v34, %s13271_s14 }
 0x2d2   : > { %3907 = vrot.lane.b32.xlu0 %v11650_v34, %s13265_s30 }
 0x2db   : > { %v3598_v19 = vpop.permute.xlu1 %3597 }
 0x2df   : > { %v3602_v5 = vpop.permute.xlu1 %3601 }
 0x2e3   : > { %v3600_v48 = vpop.permute.xlu0 %3599  ;;  %v3650_v30 = vpop.permute.xlu1 %3649 }
 0x2e4   : > { %3612 = vst.msk [vmem:[#allocation4 + $0x48] sm:$0xff] %vm3577_vm10, %v3600_v48  ;;  %v3605_v28 = vsel %vm597_vm1, %v3598_v19, %v3600_v48  ;;  %v4193_v19 = vld [vmem:[#allocation4 + $0xa8] sm:$0xff] }
 0x2e7   : > { %v3604_v53 = vpop.permute.xlu0 %3603  ;;  %v3654_v31 = vpop.permute.xlu1 %3653 }
 0x2e8   : > { %3614 = vst.msk [vmem:[#allocation4 + $0x58] sm:$0xff] %vm3577_vm10, %v3604_v53  ;;  %v3606_v23 = vsel %vm597_vm1, %v3602_v5, %v3604_v53  ;;  %v4195_v5 = vld [vmem:[#allocation4 + $0xb8] sm:$0xff] }
 0x2e9   : > { %v8963_v6 = vpack.c.bf16 %v3606_v23, %v3605_v28  ;;  %v8973_v53 = vpack.c.bf16 %v4195_v5, %v4193_v19 }
 0x2eb   : > { %v3652_v61 = vpop.permute.xlu0 %3651  ;;  %v4181_v8 = vld [vmem:[#allocation4 + $0x48] sm:$0xff]  ;;  %v3771_v17 = vpop.permute.xlu1 %3770 }
 0x2ec   : > { %3665 = vst.msk [vmem:[#allocation4 + $0x88] sm:$0xff] %vm3577_vm10, %v3652_v61  ;;  %v11708_v54 = vsel %vm3657_vm7, %v3650_v30, %v3652_v61 }
 0x2ef   : > { %v3656_v36 = vpop.permute.xlu0 %3655  ;;  %v4183_v49 = vld [vmem:[#allocation4 + $0x58] sm:$0xff]  ;;  %v3775_v26 = vpop.permute.xlu1 %3774 }
 0x2f0   : > { %3667 = vst.msk [vmem:[#allocation4 + $0x98] sm:$0xff] %vm3577_vm10, %v3656_v36  ;;  %v3659_v39 = vsel %vm3657_vm7, %v3654_v31, %v3656_v36  ;;  %v8961_v14 = vpack.c.bf16 %v4183_v49, %v4181_v8  ;;  %v8975_v36 = vpack.c.bf16 %v11631_v11, %v11622_v59 }
 0x2f1   : > { %v8971_v28 = vpack.c.bf16 %v3659_v39, %v11708_v54 }
 0x2f2   : > { %8962 = vmatprep.subr.bf16.mxu0 %v8961_v14 }
 0x2f3   : > { %v3773_v18 = vpop.permute.xlu0 %3772  ;;  %8964 = vmatpush1.bf16.msra.mxu0 %v8963_v6  ;;  %v4189_v22 = vld [vmem:[#allocation4 + $0x88] sm:$0xff] }
 0x2f4   : > { %3785 = vst.msk [vmem:[#allocation4 + $0x148] sm:$0xff] %vm3577_vm10, %v3773_v18  ;;  %v11714_v38 = vsel %vm841_vm3, %v3771_v17, %v3773_v18 }
 0x2f7   : > { %v3777_v45 = vpop.permute.xlu0 %3776  ;;  %v4191_v25 = vld [vmem:[#allocation4 + $0x98] sm:$0xff] }
 0x2f8   : > { %3787 = vst.msk [vmem:[#allocation4 + $0x158] sm:$0xff] %vm3577_vm10, %v3777_v45  ;;  %v11718_v52 = vsel %vm841_vm3, %v3775_v26, %v3777_v45  ;;  %v8969_v33 = vpack.c.bf16 %v4191_v25, %v4189_v22 }
 0x2f9   : > { %v8995_v15 = vpack.c.bf16 %v11718_v52, %v11714_v38 }
 0x2fb   : > { %v3624_v0 = vpop.permute.xlu1 %3623 }
 0x2ff   : > { %v3797_v20 = vpop.permute.xlu1 %3796 }
 0x303   : > { %v3628_v63 = vpop.permute.xlu1 %3627 }
 0x304   : > { %v3626_v40 = vpop.permute.xlu0 %3625 }
 0x305   : > { %v3631_v9 = vsel %vm597_vm1, %v3624_v0, %v3626_v40  ;;  %3638 = vst.msk [vmem:[#allocation4 + $0x68] sm:$0xff] %vm3577_vm10, %v3626_v40 }
 0x307   : > { %v3801_v41 = vpop.permute.xlu1 %3800 }
 0x308   : > { %v3799_v7 = vpop.permute.xlu0 %3798 }
 0x309   : > { %v11725_v3 = vsel %vm841_vm3, %v3797_v20, %v3799_v7  ;;  %3811 = vst.msk [vmem:[#allocation4 + $0x168] sm:$0xff] %vm3577_vm10, %v3799_v7 }
 0x30b   : > { %v3823_v55 = vpop.permute.xlu1 %3822 }
 0x30c   : > { %v3630_v12 = vpop.permute.xlu0 %3629  ;;  %v4185_v44 = vld [vmem:[#allocation4 + $0x68] sm:$0xff] }
 0x30d   : > { %v3632_v37 = vsel %vm597_vm1, %v3628_v63, %v3630_v12  ;;  %3640 = vst.msk [vmem:[#allocation4 + $0x78] sm:$0xff] %vm3577_vm10, %v3630_v12 }
 0x30e   : > { %v8967_v29 = vpack.c.bf16 %v3632_v37, %v3631_v9 }
 0x30f   : > { %v3827_v60 = vpop.permute.xlu1 %3826 }
 0x310   : > { %v3803_v13 = vpop.permute.xlu0 %3802 }
 0x311   : > { %v11731_v56 = vsel %vm841_vm3, %v3801_v41, %v3803_v13  ;;  %3813 = vst.msk [vmem:[#allocation4 + $0x178] sm:$0xff] %vm3577_vm10, %v3803_v13 }
 0x312   : > { %v8999_v47 = vpack.c.bf16 %v11731_v56, %v11725_v3 }
 0x313   : > { %v3849_v62 = vpop.permute.xlu1 %3848 }
 0x314   : > { %v3825_v57 = vpop.permute.xlu0 %3824  ;;  %v4187_v51 = vld [vmem:[#allocation4 + $0x78] sm:$0xff] }
 0x315   : > { %v11737_v16 = vsel %vm880_vm4, %v3823_v55, %v3825_v57  ;;  %3837 = vst.msk [vmem:[#allocation4 + $0x188] sm:$0xff] %vm3577_vm10, %v3825_v57  ;;  %v8965_v24 = vpack.c.bf16 %v4187_v51, %v4185_v44 }
 0x317   : > { %8966 = vmatprep.subr.bf16.mxu0 %v8965_v24  ;;  %v3853_v50 = vpop.permute.xlu1 %3852 }
 0x318   : > { %v3829_v1 = vpop.permute.xlu0 %3828  ;;  %8968 = vmatpush1.bf16.msra.mxu0 %v8967_v29 }
 0x319   : > { %v11741_v48 = vsel %vm880_vm4, %v3827_v60, %v3829_v1  ;;  %3839 = vst.msk [vmem:[#allocation4 + $0x198] sm:$0xff] %vm3577_vm10, %v3829_v1  ;;  %8970 = vmatprep.subr.bf16.mxu0 %v8969_v33 }
 0x31a   : > { %v9003_v30 = vpack.c.bf16 %v11741_v48, %v11737_v16 }
 0x31b   : > { %v3875_v23 = vpop.permute.xlu1 %3874 }
 0x31c   : > { %v3851_v61 = vpop.permute.xlu0 %3850  ;;  %8972 = vmatpush1.bf16.msra.mxu0 %v8971_v28 }
 0x31d   : > { %v11748_v31 = vsel %vm880_vm4, %v3849_v62, %v3851_v61  ;;  %3863 = vst.msk [vmem:[#allocation4 + $0x1a8] sm:$0xff] %vm3577_vm10, %v3851_v61  ;;  %8974 = vmatprep.subr.bf16.mxu0 %v8973_v53 }
 0x31f   : > { %v3879_v8 = vpop.permute.xlu1 %3878 }
 0x320   : > { %v3855_v49 = vpop.permute.xlu0 %3854  ;;  %8976 = vmatpush1.bf16.msra.mxu0 %v8975_v36 }
 0x321   : > { %v11754_v54 = vsel %vm880_vm4, %v3853_v50, %v3855_v49  ;;  %3865 = vst.msk [vmem:[#allocation4 + $0x1b8] sm:$0xff] %vm3577_vm10, %v3855_v49 }
 0x322   : > { %v9007_v39 = vpack.c.bf16 %v11754_v54, %v11748_v31  ;;  %v4156_v54 = vld [vmem:[%s13195_s3] sm:$0xff] }
 0x323   : > { %v3693_v14 = vpop.permute.xlu1 %3692 }
 0x324   : > { %v3877_v17 = vpop.permute.xlu0 %3876  ;;  %v4225_v52 = vld [vmem:[#allocation4 + $0x1a8] sm:$0xff] }
 0x325   : > { %v11760_v6 = vsel %vm3882_vm8, %v3875_v23, %v3877_v17  ;;  %3890 = vst.msk [vmem:[#allocation4 + $0x1c8] sm:$0xff] %vm3577_vm10, %v3877_v17 }
 0x327   : > { %v3467_v18 = vpop.f32.mrb[12].mxu0  ;;  %v3745_v26 = vpop.permute.xlu1 %3744 }
 0x328   : > { %v3469_v45 = vpop.f32.mrb[13].mxu0  ;;  %v3881_v0 = vpop.permute.xlu0 %3880  ;;  %v3468_v12 = vadd.f32 %v3467_v18, %v11698_v4 }
 0x329   : > { %v11764_v20 = vsel %vm3882_vm8, %v3879_v8, %v3881_v0  ;;  %3892 = vst.msk [vmem:[#allocation4 + $0x1d8] sm:$0xff] %vm3577_vm10, %v3881_v0  ;;  %v3470_v60 = vadd.f32 %v3469_v45, %v11698_v4 }
 0x32a   : > { %v9011_v40 = vpack.c.bf16 %v11764_v20, %v11760_v6 }
 0x32b   : > { %v3473_v63 = vpop.f32.mrb[14].mxu0  ;;  %v3902_v41 = vpop.permute.xlu1 %3901 }
 0x32c   : > { %v3475_v9 = vpop.f32.mrb[15].mxu0  ;;  %v3695_v7 = vpop.permute.xlu0 %3694  ;;  %v3474_v24 = vadd.f32 %v3473_v63, %v11700_v10  ;;  %v4229_v56 = vld [vmem:[#allocation4 + $0x1c8] sm:$0xff] }
 0x32d   : > { %3707 = vst.msk [vmem:[#allocation4 + $0xe8] sm:$0xff] %vm3577_vm10, %v3695_v7  ;;  %v11771_v55 = vsel %vm597_vm1, %v3693_v14, %v3695_v7  ;;  %v3476_v22 = vadd.f32 %v3475_v9, %v11700_v10 }
 0x32f   : > { %v3954_v37 = vpop.permute.xlu1 %3953 }
 0x330   : > { %v3747_v44 = vpop.permute.xlu0 %3746 }
 0x331   : > { %v3544_v13 = vpop.f32.mrb[4].mxu1  ;;  %3759 = vst.msk [vmem:[#allocation4 + $0x128] sm:$0xff] %vm3577_vm10, %v3747_v44  ;;  %v11777_v51 = vsel %vm3657_vm7, %v3745_v26, %v3747_v44 }
 0x332   : > { %v3545_v62 = vadd.f32 %v3544_v13, %v3468_v12  ;;  %v3546_v57 = vpop.f32.mrb[5].mxu1 }
 0x333   : > { %v3547_v25 = vadd.f32 %v3546_v57, %v3470_v60  ;;  %v3697_v61 = vpop.permute.xlu1 %3696 }
 0x334   : > { %vm3555_vm9 = vcmp.gt.f32.partialorder %v3545_v62, 0.0  ;;  %v3559_v29 = vmul.f32 0.01, %v3545_v62  ;;  %v3904_v4 = vpop.permute.xlu0 %3903 }
 0x335   : > { %vm3556_vm11 = vcmp.gt.f32.partialorder %v3547_v25, 0.0  ;;  %v3560_v33 = vmul.f32 0.01, %v3547_v25  ;;  %v3550_v50 = vpop.f32.mrb[6].mxu1  ;;  %3916 = vst.msk [vmem:[#allocation4 + $0x1e8] sm:$0xff] %vm3577_vm10, %v3904_v4  ;;  %v11783_v28 = vsel %vm841_vm3, %v3902_v41, %v3904_v4 }
 0x336   : > { %v3563_v1 = vsel %vm3555_vm9, %v3545_v62, %v3559_v29  ;;  %v3551_v19 = vadd.f32 %v3550_v50, %v3474_v24  ;;  %v3552_v5 = vpop.f32.mrb[7].mxu1  ;;  %v4201_v62 = vld [vmem:[#allocation4 + $0xe8] sm:$0xff] }
 0x337   : > { %v3564_v53 = vsel %vm3556_vm11, %v3547_v25, %v3560_v33  ;;  %v3553_v23 = vadd.f32 %v3552_v5, %v3476_v22  ;;  %3718 = vrot.lane.b32.xlu1 %v3563_v1, %s9550_s29  ;;  %v3749_v26 = vpop.permute.xlu1 %3748 }
 0x338   : > { %3569 = vst.msk [vmem:[#allocation3 + $0x68] sm:$0xff] %vm577_vm0, %v3564_v53  ;;  %vm3557_vm12 = vcmp.gt.f32.partialorder %v3551_v19, 0.0  ;;  %v3561_v10 = vmul.f32 0.01, %v3551_v19  ;;  %v3956_v8 = vpop.permute.xlu0 %3955 }
 0x339   : > { %vm3558_vm13 = vcmp.gt.f32.partialorder %v3553_v23, 0.0  ;;  %v3562_v36 = vmul.f32 0.01, %v3553_v23  ;;  %3968 = vst.msk [vmem:[#allocation4 + $0x228] sm:$0xff] %vm3577_vm10, %v3956_v8  ;;  %v11789_v14 = vsel %vm880_vm4, %v3954_v37, %v3956_v8 }
 0x33a   : > { %v3565_v49 = vsel %vm3557_vm12, %v3551_v19, %v3561_v10 }
 0x33b   : > { %v3566_v17 = vsel %vm3558_vm13, %v3553_v23, %v3562_v36  ;;  %3927 = vrot.lane.b32.xlu1 %v3563_v1, %s13265_s30  ;;  %v8979_v18 = vpack.c.bf16 %v3565_v49, %v3563_v1  ;;  %v3906_v12 = vpop.permute.xlu1 %3905 }
 0x33c   : > { %3571 = vst.msk [vmem:[#allocation3 + $0x78] sm:$0xff] %vm577_vm0, %v3566_v17  ;;  %v3699_v45 = vpop.permute.xlu0 %3698  ;;  %vm4039_vm0 = vcmask 818176  }
 0x33d   : > { %3709 = vst.msk [vmem:[#allocation4 + $0xf8] sm:$0xff] %vm3577_vm10, %v3699_v45  ;;  %v3701_v0 = vsel %vm597_vm1, %v3697_v61, %v3699_v45  ;;  %v4209_v61 = vld [vmem:[#allocation4 + $0x128] sm:$0xff] }
 0x33e   : > { %v8983_v33 = vpack.c.bf16 %v3701_v0, %v11771_v55 }
 0x33f   : > { %v3711_v63 = vld [vmem:[#allocation3 + $0x68] sm:$0xff]  ;;  %3722 = vrot.lane.b32.xlu1 %v3565_v49, %s9550_s29 }
 0x340   : > { %3720 = vrot.lane.b32.xlu0 %v3711_v63, %s9550_s29  ;;  %3681 = vst.msk [vmem:[#allocation4 + $0xc8] sm:$0xff] %vm3577_vm10, %v3711_v63  ;;  %v3751_v9 = vpop.permute.xlu0 %3750 }
 0x341   : > { %3761 = vst.msk [vmem:[#allocation4 + $0x138] sm:$0xff] %vm3577_vm10, %v3751_v9  ;;  %v11800_v41 = vsel %vm3657_vm7, %v3749_v26, %v3751_v9 }
 0x342   : > { %v8991_v37 = vpack.c.bf16 %v11800_v41, %v11777_v51  ;;  %v4221_v41 = vld [vmem:[#allocation4 + $0x188] sm:$0xff] }
 0x343   : > { %v3713_v7 = vld [vmem:[#allocation3 + $0x78] sm:$0xff]  ;;  %3957 = vrot.lane.b32.xlu1 %v11631_v11, %s9552_s0 }
 0x344   : > { %3929 = vrot.lane.b32.xlu0 %v3711_v63, %s13265_s30  ;;  %3683 = vst.msk [vmem:[#allocation4 + $0xd8] sm:$0xff] %vm3577_vm10, %v3713_v7  ;;  %v3908_v60 = vpop.permute.xlu0 %3907  ;;  %v4203_v57 = vld [vmem:[#allocation4 + $0xf8] sm:$0xff] }
 0x345   : > { %3918 = vst.msk [vmem:[#allocation4 + $0x1f8] sm:$0xff] %vm3577_vm10, %v3908_v60  ;;  %v11810_v13 = vsel %vm841_vm3, %v3906_v12, %v3908_v60  ;;  %v8981_v22 = vpack.c.bf16 %v4203_v57, %v4201_v62  ;;  %v4213_v60 = vld [vmem:[#allocation4 + $0x148] sm:$0xff] }
 0x346   : > { %v9015_v44 = vpack.c.bf16 %v11810_v13, %v11783_v28 }
 0x347   : > { %3931 = vrot.lane.b32.xlu1 %v3565_v49, %s13265_s30  ;;  %v4197_v25 = vld [vmem:[#allocation4 + $0xc8] sm:$0xff] }
 0x348   : > { %3724 = vrot.lane.b32.xlu0 %v3713_v7, %s9550_s29  ;;  %v4211_v17 = vld [vmem:[#allocation4 + $0x138] sm:$0xff] }
 0x349   : > { %v8989_v0 = vpack.c.bf16 %v4211_v17, %v4209_v61  ;;  %v4164_v17 = vld [vmem:[%s13195_s3 + $0x40] sm:$0xff] }
 0x34b   : > { %v4199_v24 = vld [vmem:[#allocation4 + $0xd8] sm:$0xff]  ;;  %3979 = vrot.lane.b32.xlu1 %v3563_v1, %s9552_s0 }
 0x34c   : > { %3959 = vrot.lane.b32.xlu0 %v11650_v34, %s9552_s0  ;;  %v8977_v29 = vpack.c.bf16 %v4199_v24, %v4197_v25  ;;  %v4219_v24 = vld [vmem:[#allocation4 + $0x178] sm:$0xff] }
 0x34e   : > { %8978 = vmatprep.subr.bf16.mxu0 %v8977_v29 }
 0x34f   : > { %8980 = vmatpush1.bf16.msra.mxu0 %v8979_v18  ;;  %3983 = vrot.lane.b32.xlu1 %v3565_v49, %s9552_s0 }
 0x350   : > { %3981 = vrot.lane.b32.xlu0 %v3711_v63, %s9552_s0  ;;  %8982 = vmatprep.subr.bf16.mxu0 %v8981_v22  ;;  %v4217_v22 = vld [vmem:[#allocation4 + $0x168] sm:$0xff] }
 0x353   : > { %8984 = vmatpush1.bf16.msra.mxu0 %v8983_v33  ;;  %4005 = vrot.lane.b32.xlu1 %v11622_v59, %s9556_s25  ;;  %v4157_v59 = vld [vmem:[%s13195_s3 + $0x8] sm:$0xff]  ;;  %v8997_v33 = vpack.c.bf16 %v4219_v24, %v4217_v22  ;;  %v4168_v22 = vld [vmem:[%s13195_s3 + $0x60] sm:$0xff] }
 0x354   : > { %4007 = vrot.lane.b32.xlu0 %v11640_v42, %s9556_s25  ;;  %4373 = vmatprep.mubr.f32.mxu0 %v4157_v59 }
 0x357   : > { %4009 = vrot.lane.b32.xlu1 %v11631_v11, %s9556_s25 }
 0x358   : > { %4011 = vrot.lane.b32.xlu0 %v11650_v34, %s9556_s25 }
 0x35b   : > { %4031 = vrot.lane.b32.xlu1 %v11559_v43, %s9557_s26 }
 0x35c   : > { %4033 = vrot.lane.b32.xlu0 %v11568_v21, %s9557_s26 }
 0x35f   : > { %4035 = vrot.lane.b32.xlu1 %v11555_v32, %s9557_s26 }
 0x360   : > { %4037 = vrot.lane.b32.xlu0 %v11566_v35, %s9557_s26 }
 0x363   : > { %4058 = vrot.lane.b32.xlu1 %v11600_v2, %s9557_s26 }
 0x364   : > { %4060 = vrot.lane.b32.xlu0 %v11610_v46, %s9557_s26 }
 0x367   : > { %4062 = vrot.lane.b32.xlu1 %v11605_v27, %s9557_s26 }
 0x368   : > { %3933 = vrot.lane.b32.xlu0 %v3713_v7, %s13265_s30 }
 0x36b   : > { %4084 = vrot.lane.b32.xlu1 %v11559_v43, %s13269_s18 }
 0x36c   : > { %4064 = vrot.lane.b32.xlu0 %v11618_v58, %s9557_s26 }
 0x36f   : > { %4088 = vrot.lane.b32.xlu1 %v11555_v32, %s13269_s18  ;;  %v4131_v32 = vld [vmem:[#allocation3 + $0x10] sm:$0xff] }
 0x370   : > { %3985 = vrot.lane.b32.xlu0 %v3713_v7, %s9552_s0  ;;  %v4215_v7 = vld [vmem:[#allocation4 + $0x158] sm:$0xff] }
 0x371   : > { %v8993_v62 = vpack.c.bf16 %v4215_v7, %v4213_v60 }
 0x373   : > { %4111 = vrot.lane.b32.xlu1 %v11600_v2, %s13269_s18  ;;  %v4272_v2 = vld [vmem:[%s13196_s4] sm:$0xff] }
 0x374   : > { %4086 = vrot.lane.b32.xlu0 %v11568_v21, %s13269_s18 }
 0x377   : > { %4115 = vrot.lane.b32.xlu1 %v11605_v27, %s13269_s18  ;;  %v4273_v27 = vld [vmem:[%s13196_s4 + $0x8] sm:$0xff] }
 0x378   : > { %4090 = vrot.lane.b32.xlu0 %v11566_v35, %s13269_s18 }
 0x37b   : > { %4137 = vrot.lane.b32.xlu1 %v11559_v43, %s13267_s19  ;;  %v4274_v43 = vld [vmem:[%s13196_s4 + $0x10] sm:$0xff] }
 0x37c   : > { %4113 = vrot.lane.b32.xlu0 %v11610_v46, %s13269_s18  ;;  %v4275_v46 = vld [vmem:[%s13196_s4 + $0x18] sm:$0xff] }
 0x37f   : > { %4141 = vrot.lane.b32.xlu1 %v4131_v32, %s13267_s19 }
 0x380   : > { %4117 = vrot.lane.b32.xlu0 %v11618_v58, %s13269_s18 }
 0x383   : > { %4278 = vperm.xlu1 %9534, %v4272_v2   ;;  %v4223_v2 = vld [vmem:[#allocation4 + $0x198] sm:$0xff] }
 0x384   : > { %4139 = vrot.lane.b32.xlu0 %v11568_v21, %s13267_s19 }
 0x387   : > { %4288 = vperm.xlu1 %9534, %v4274_v43  }
 0x388   : > { %4143 = vrot.lane.b32.xlu0 %v11566_v35, %s13267_s19  ;;  %s13400_s19 = smov 114  }
 0x38c   : > { %4283 = vperm.xlu0 %9533, %v4273_v27  }
 0x390   : > { %4293 = vperm.xlu0 %9533, %v4275_v46   ;;  %v4227_v46 = vld [vmem:[#allocation4 + $0x1b8] sm:$0xff] }
 0x3a9   : > { %v3719_v58 = vpop.permute.xlu1 %3718 }
 0x3ad   : > { %v3928_v21 = vpop.permute.xlu1 %3927 }
 0x3b1   : > { %v3723_v11 = vpop.permute.xlu1 %3722 }
 0x3b2   : > { %v3721_v42 = vpop.permute.xlu0 %3720 }
 0x3b3   : > { %v3726_v34 = vsel %vm597_vm1, %v3719_v58, %v3721_v42  ;;  %3733 = vst.msk [vmem:[#allocation4 + $0x108] sm:$0xff] %vm3577_vm10, %v3721_v42 }
 0x3b5   : > { %v3958_v55 = vpop.permute.xlu1 %3957 }
 0x3b6   : > { %v3930_v35 = vpop.permute.xlu0 %3929 }
 0x3b7   : > { %v11889_v50 = vsel %vm841_vm3, %v3928_v21, %v3930_v35  ;;  %3942 = vst.msk [vmem:[#allocation4 + $0x208] sm:$0xff] %vm3577_vm10, %v3930_v35  ;;  %v4235_v35 = vld [vmem:[#allocation4 + $0x1f8] sm:$0xff] }
 0x3b9   : > { %v11892_v4 = vpop.permute.xlu1 %3931 }
 0x3ba   : > { %v3725_v1 = vpop.permute.xlu0 %3724  ;;  %v4205_v8 = vld [vmem:[#allocation4 + $0x108] sm:$0xff] }
 0x3bb   : > { %v3727_v19 = vsel %vm597_vm1, %v3723_v11, %v3725_v1  ;;  %3735 = vst.msk [vmem:[#allocation4 + $0x118] sm:$0xff] %vm3577_vm10, %v3725_v1  ;;  %v4231_v11 = vld [vmem:[#allocation4 + $0x1d8] sm:$0xff]  ;;  %vm4092_vm1 = vcmask 809984  }
 0x3bc   : > { %v8987_v26 = vpack.c.bf16 %v3727_v19, %v3726_v34 }
 0x3bd   : > { %v3980_v5 = vpop.permute.xlu1 %3979 }
 0x3be   : > { %v3960_v53 = vpop.permute.xlu0 %3959 }
 0x3bf   : > { %v11897_v23 = vsel %vm880_vm4, %v3958_v55, %v3960_v53  ;;  %3970 = vst.msk [vmem:[#allocation4 + $0x238] sm:$0xff] %vm3577_vm10, %v3960_v53  ;;  %v4233_v55 = vld [vmem:[#allocation4 + $0x1e8] sm:$0xff]  ;;  %v4161_v53 = vld [vmem:[%s13195_s3 + $0x28] sm:$0xff] }
 0x3c0   : > { %v9013_v48 = vpack.c.bf16 %v4235_v35, %v4233_v55 }
 0x3c1   : > { %v11900_v10 = vpop.permute.xlu1 %3983 }
 0x3c2   : > { %v3982_v36 = vpop.permute.xlu0 %3981  ;;  %v4207_v49 = vld [vmem:[#allocation4 + $0x118] sm:$0xff] }
 0x3c3   : > { %3994 = vst.msk [vmem:[#allocation4 + $0x248] sm:$0xff] %vm3577_vm10, %v3982_v36  ;;  %v11904_v18 = vsel %vm880_vm4, %v3980_v5, %v3982_v36  ;;  %v8985_v45 = vpack.c.bf16 %v4207_v49, %v4205_v8  ;;  %v4241_v36 = vld [vmem:[#allocation4 + $0x228] sm:$0xff]  ;;  %v9023_v8 = vpack.c.bf16 %v11897_v23, %v11789_v14  ;;  %v4169_v14 = vld [vmem:[%s13195_s3 + $0x68] sm:$0xff] }
 0x3c5   : > { %8986 = vmatprep.subr.bf16.mxu0 %v8985_v45  ;;  %v4006_v63 = vpop.permute.xlu1 %4005 }
 0x3c6   : > { %v4008_v9 = vpop.permute.xlu0 %4007  ;;  %8988 = vmatpush1.bf16.msra.mxu0 %v8987_v26  ;;  %v4243_v5 = vld [vmem:[#allocation4 + $0x238] sm:$0xff] }
 0x3c7   : > { %4020 = vst.msk [vmem:[#allocation4 + $0x268] sm:$0xff] %vm3577_vm10, %v4008_v9  ;;  %8990 = vmatprep.subr.bf16.mxu0 %v8989_v0  ;;  %v11908_v12 = vsel %vm3882_vm8, %v4006_v63, %v4008_v9  ;;  %v9021_v28 = vpack.c.bf16 %v4243_v5, %v4241_v36  ;;  %v4171_v5 = vld [vmem:[%s13195_s3 + $0x78] sm:$0xff] }
 0x3c9   : > { %v4010_v57 = vpop.permute.xlu1 %4009 }
 0x3ca   : > { %v4012_v25 = vpop.permute.xlu0 %4011  ;;  %8992 = vmatpush1.bf16.msra.mxu0 %v8991_v37  ;;  %v9001_v37 = vpack.c.bf16 %v4223_v2, %v4221_v41  ;;  %v4245_v26 = vld [vmem:[#allocation4 + $0x248] sm:$0xff] }
 0x3cb   : > { %4022 = vst.msk [vmem:[#allocation4 + $0x278] sm:$0xff] %vm3577_vm10, %v4012_v25  ;;  %8994 = vmatprep.subr.bf16.mxu0 %v8993_v62  ;;  %v11915_v29 = vsel %vm3882_vm8, %v4010_v57, %v4012_v25 }
 0x3cd   : > { %v4032_v59 = vpop.permute.xlu1 %4031 }
 0x3ce   : > { %v4034_v32 = vpop.permute.xlu0 %4033  ;;  %8996 = vmatpush1.bf16.msra.mxu0 %v8995_v15  ;;  %v9005_v15 = vpack.c.bf16 %v4227_v46, %v4225_v52  ;;  %v4249_v60 = vld [vmem:[#allocation4 + $0x268] sm:$0xff] }
 0x3cf   : > { %4047 = vst.msk [vmem:[#allocation4 + $0x288] sm:$0xff] %vm3577_vm10, %v4034_v32  ;;  %8998 = vmatprep.subr.bf16.mxu0 %v8997_v33  ;;  %v11922_v51 = vsel %vm4039_vm0, %v4032_v59, %v4034_v32  ;;  %v9031_v59 = vpack.c.bf16 %v11915_v29, %v11908_v12 }
 0x3d1   : > { %v4036_v43 = vpop.permute.xlu1 %4035 }
 0x3d2   : > { %v4038_v27 = vpop.permute.xlu0 %4037  ;;  %9000 = vmatpush1.bf16.msra.mxu0 %v8999_v47  ;;  %v9009_v47 = vpack.c.bf16 %v4231_v11, %v4229_v56  ;;  %v4251_v63 = vld [vmem:[#allocation4 + $0x278] sm:$0xff] }
 0x3d3   : > { %4049 = vst.msk [vmem:[#allocation4 + $0x298] sm:$0xff] %vm3577_vm10, %v4038_v27  ;;  %9002 = vmatprep.subr.bf16.mxu0 %v9001_v37  ;;  %v11929_v38 = vsel %vm4039_vm0, %v4036_v43, %v4038_v27  ;;  %v9029_v62 = vpack.c.bf16 %v4251_v63, %v4249_v60 }
 0x3d4   : > { %v9035_v46 = vpack.c.bf16 %v11929_v38, %v11922_v51 }
 0x3d5   : > { %v4059_v58 = vpop.permute.xlu1 %4058 }
 0x3d6   : > { %v4061_v21 = vpop.permute.xlu0 %4060  ;;  %9004 = vmatpush1.bf16.msra.mxu0 %v9003_v30  ;;  %v4253_v32 = vld [vmem:[#allocation4 + $0x288] sm:$0xff] }
 0x3d7   : > { %4073 = vst.msk [vmem:[#allocation4 + $0x2a8] sm:$0xff] %vm3577_vm10, %v4061_v21  ;;  %9006 = vmatprep.subr.bf16.mxu0 %v9005_v15  ;;  %v11936_v3 = vsel %vm4039_vm0, %v4059_v58, %v4061_v21 }
 0x3d9   : > { %v4063_v42 = vpop.permute.xlu1 %4062 }
 0x3da   : > { %v3934_v34 = vpop.permute.xlu0 %3933  ;;  %9008 = vmatpush1.bf16.msra.mxu0 %v9007_v39  ;;  %v4255_v24 = vld [vmem:[#allocation4 + $0x298] sm:$0xff] }
 0x3db   : > { %v3936_v16 = vsel %vm841_vm3, %v11892_v4, %v3934_v34  ;;  %3944 = vst.msk [vmem:[#allocation4 + $0x218] sm:$0xff] %vm3577_vm10, %v3934_v34  ;;  %9010 = vmatprep.subr.bf16.mxu0 %v9009_v47  ;;  %v4237_v4 = vld [vmem:[#allocation4 + $0x208] sm:$0xff]  ;;  %v9033_v2 = vpack.c.bf16 %v4255_v24, %v4253_v32 }
 0x3dc   : > { %v9019_v61 = vpack.c.bf16 %v3936_v16, %v11889_v50  ;;  %v4165_v50 = vld [vmem:[%s13195_s3 + $0x48] sm:$0xff] }
 0x3dd   : > { %v4085_v30 = vpop.permute.xlu1 %4084 }
 0x3de   : > { %v4065_v1 = vpop.permute.xlu0 %4064  ;;  %9012 = vmatpush1.bf16.msra.mxu0 %v9011_v40  ;;  %v4257_v52 = vld [vmem:[#allocation4 + $0x2a8] sm:$0xff] }
 0x3df   : > { %4075 = vst.msk [vmem:[#allocation4 + $0x2b8] sm:$0xff] %vm3577_vm10, %v4065_v1  ;;  %9014 = vmatprep.subr.bf16.mxu0 %v9013_v48  ;;  %v11949_v31 = vsel %vm4039_vm0, %v4063_v42, %v4065_v1 }
 0x3e0   : > { %v9039_v21 = vpack.c.bf16 %v11949_v31, %v11936_v3  ;;  %v4158_v31 = vld [vmem:[%s13195_s3 + $0x10] sm:$0xff] }
 0x3e1   : > { %v4089_v6 = vpop.permute.xlu1 %4088 }
 0x3e2   : > { %v3986_v39 = vpop.permute.xlu0 %3985  ;;  %9016 = vmatpush1.bf16.msra.mxu0 %v9015_v44  ;;  %v4239_v19 = vld [vmem:[#allocation4 + $0x218] sm:$0xff]  ;;  %v4160_v44 = vld [vmem:[%s13195_s3 + $0x20] sm:$0xff] }
 0x3e3   : > { %v3988_v20 = vsel %vm880_vm4, %v11900_v10, %v3986_v39  ;;  %3996 = vst.msk [vmem:[#allocation4 + $0x258] sm:$0xff] %vm3577_vm10, %v3986_v39  ;;  %v9017_v40 = vpack.c.bf16 %v4239_v19, %v4237_v4  ;;  %v4162_v39 = vld [vmem:[%s13195_s3 + $0x30] sm:$0xff]  ;;  %v4167_v4 = vld [vmem:[%s13195_s3 + $0x58] sm:$0xff] }
 0x3e4   : > { %v9027_v23 = vpack.c.bf16 %v3988_v20, %v11904_v18  ;;  %v4159_v18 = vld [vmem:[%s13195_s3 + $0x18] sm:$0xff]  ;;  %v4166_v19 = vld [vmem:[%s13195_s3 + $0x50] sm:$0xff] }
 0x3e5   : > { %9018 = vmatprep.subr.bf16.mxu0 %v9017_v40  ;;  %4374 = vmatmul.mubr.f32.vlgmr.msra.gmra.mrb[16].mxu0 %v4156_v54  ;;  %v4112_v49 = vpop.permute.xlu1 %4111  ;;  %v4163_v54 = vld [vmem:[%s13195_s3 + $0x38] sm:$0xff]  ;;  %v12031_v20 = vld [vmem:[#allocation7] sm:$0xff] }
 0x3e6   : > { %v4087_v13 = vpop.permute.xlu0 %4086  ;;  %9020 = vmatpush1.bf16.msra.mxu0 %v9019_v61  ;;  %4379 = vmatprep.mubr.f32.mxu0 %v4161_v53  ;;  %v4259_v37 = vld [vmem:[#allocation4 + $0x2b8] sm:$0xff]  ;;  %548 = vst.msk [vmem:[#allocation5 + $0x8] sm:$0xff] %vm547_vm2, %v12031_v20  ;;  %550 = vst.msk [vmem:[#allocation5 + $0x18] sm:$0xff] %vm547_vm2, %v12031_v20 }
 0x3e7   : > { %v11968_v10 = vsel %vm4092_vm1, %v4085_v30, %v4087_v13  ;;  %4100 = vst.msk [vmem:[#allocation4 + $0x2c8] sm:$0xff] %vm3577_vm10, %v4087_v13  ;;  %9022 = vmatprep.subr.bf16.mxu0 %v9021_v28  ;;  %v9037_v12 = vpack.c.bf16 %v4259_v37, %v4257_v52 }
 0x3e8   : > { %552 = vst.msk [vmem:[#allocation5 + $0x28] sm:$0xff] %vm547_vm2, %v12031_v20  ;;  %554 = vst.msk [vmem:[#allocation5 + $0x38] sm:$0xff] %vm547_vm2, %v12031_v20 }
 0x3e9   : > { %4380 = vmatmul.mubr.f32.gmra.mrb[18].mxu0 %v4160_v44  ;;  %v4116_v25 = vpop.permute.xlu1 %4115 }
 0x3ea   : > { %v4091_v45 = vpop.permute.xlu0 %4090  ;;  %9024 = vmatpush1.bf16.msra.mxu0 %v9023_v8  ;;  %v4247_v0 = vld [vmem:[#allocation4 + $0x258] sm:$0xff]  ;;  %4385 = vmatprep.mubr.f32.mxu0 %v4165_v50 }
 0x3eb   : > { %v4094_v9 = vsel %vm4092_vm1, %v4089_v6, %v4091_v45  ;;  %4102 = vst.msk [vmem:[#allocation4 + $0x2d8] sm:$0xff] %vm3577_vm10, %v4091_v45  ;;  %v9025_v7 = vpack.c.bf16 %v4247_v0, %v4245_v26  ;;  %v4170_v6 = vld [vmem:[%s13195_s3 + $0x70] sm:$0xff] }
 0x3ec   : > { %v9043_v38 = vpack.c.bf16 %v4094_v9, %v11968_v10 }
 0x3ed   : > { %9026 = vmatprep.subr.bf16.mxu0 %v9025_v7  ;;  %4386 = vmatmul.mubr.f32.gmra.mrb[20].mxu0 %v4164_v17  ;;  %v4138_v27 = vpop.permute.xlu1 %4137 }
 0x3ee   : > { %v4114_v57 = vpop.permute.xlu0 %4113  ;;  %9028 = vmatpush1.bf16.msra.mxu0 %v9027_v23  ;;  %4391 = vmatprep.mubr.f32.mxu0 %v4169_v14  ;;  %v4261_v11 = vld [vmem:[#allocation4 + $0x2c8] sm:$0xff] }
 0x3ef   : > { %v4119_v33 = vsel %vm4092_vm1, %v4112_v49, %v4114_v57  ;;  %4126 = vst.msk [vmem:[#allocation4 + $0x2e8] sm:$0xff] %vm3577_vm10, %v4114_v57  ;;  %9030 = vmatprep.subr.bf16.mxu0 %v9029_v62 }
 0x3f1   : > { %4392 = vmatmul.mubr.f32.gmra.mrb[22].mxu0 %v4168_v22  ;;  %v4142_v47 = vpop.permute.xlu1 %4141 }
 0x3f2   : > { %v4118_v41 = vpop.permute.xlu0 %4117  ;;  %9032 = vmatpush1.bf16.msra.mxu0 %v9031_v59  ;;  %7492 = vmatprep.mubr.msk.f32.mxu0 %vm4296_vm14, %v4159_v18  ;;  %v4263_v15 = vld [vmem:[#allocation4 + $0x2d8] sm:$0xff] }
 0x3f3   : > { %v4120_v43 = vsel %vm4092_vm1, %v4116_v25, %v4118_v41  ;;  %4128 = vst.msk [vmem:[#allocation4 + $0x2f8] sm:$0xff] %vm3577_vm10, %v4118_v41  ;;  %9034 = vmatprep.subr.bf16.mxu0 %v9033_v2  ;;  %v9041_v56 = vpack.c.bf16 %v4263_v15, %v4261_v11  ;;  %v4889_v11 = vld [vmem:[%s13198_s6 + $0x10] sm:$0xff] }
 0x3f4   : > { %v9047_v16 = vpack.c.bf16 %v4120_v43, %v4119_v33 }
 0x3f6   : > { %v4140_v29 = vpop.permute.xlu0 %4139  ;;  %9036 = vmatpush1.bf16.msra.mxu0 %v9035_v46  ;;  %v4265_v55 = vld [vmem:[#allocation4 + $0x2e8] sm:$0xff] }
 0x3f7   : > { %v4146_v58 = vsel %vm4145_vm15, %v4138_v27, %v4140_v29  ;;  %4153 = vst.msk [vmem:[#allocation4 + $0x308] sm:$0xff] %vm3577_vm10, %v4140_v29  ;;  %9038 = vmatprep.subr.bf16.mxu0 %v9037_v12 }
 0x3fa   : > { %v4144_v42 = vpop.permute.xlu0 %4143  ;;  %9040 = vmatpush1.bf16.msra.mxu0 %v9039_v21  ;;  %v4267_v34 = vld [vmem:[#allocation4 + $0x2f8] sm:$0xff]  ;;  %v4887_v21 = vld [vmem:[%s13198_s6] sm:$0xff] }
 0x3fb   : > { %v4147_v51 = vsel %vm4145_vm15, %v4142_v47, %v4144_v42  ;;  %4155 = vst.msk [vmem:[#allocation4 + $0x318] sm:$0xff] %vm3577_vm10, %v4144_v42  ;;  %9042 = vmatprep.subr.bf16.mxu0 %v9041_v56  ;;  %v9045_v35 = vpack.c.bf16 %v4267_v34, %v4265_v55  ;;  %v4841_v47 = vld [vmem:[%s13197_s5 + $0x10] sm:$0xff]  ;;  %v4888_v42 = vld [vmem:[%s13198_s6 + $0x8] sm:$0xff] }
 0x3fc   : > { %v9051_v1 = vpack.c.bf16 %v4147_v51, %v4146_v58  ;;  %v4840_v58 = vld [vmem:[%s13197_s5 + $0x8] sm:$0xff]  ;;  %v4890_v51 = vld [vmem:[%s13198_s6 + $0x18] sm:$0xff] }
 0x3fe   : > { %9044 = vmatpush1.bf16.msra.mxu0 %v9043_v38  ;;  %v4269_v3 = vld [vmem:[#allocation4 + $0x308] sm:$0xff] }
 0x3ff   : > { %9046 = vmatprep.subr.bf16.mxu0 %v9045_v35 }
 0x402   : > { %9048 = vmatpush1.bf16.msra.mxu0 %v9047_v16  ;;  %v4271_v48 = vld [vmem:[#allocation4 + $0x318] sm:$0xff]  ;;  %v4279_v40 = vpop.permute.xlu1 %4278 }
 0x403   : > { %v9049_v30 = vpack.c.bf16 %v4271_v48, %v4269_v3 }
 0x405   : > { %9050 = vmatprep.subr.bf16.mxu0 %v9049_v30 }
 0x406   : > { %9052 = vmatpush1.bf16.msra.mxu0 %v9051_v1  ;;  %v4289_v63 = vpop.permute.xlu1 %4288 }
 0x409   : > { %4463 = vmatmul.mubr.f32.vlgmr.msra.gmra.mrb[16].mxu0 %v4158_v31 }
 0x40a   : > { %7493 = vmatprep.mubr.msk.f32.mxu0 %vm4296_vm14, %v4163_v54 }
 0x40b   : > { %v4284_v44 = vpop.permute.xlu0 %4283 }
 0x40d   : > { %4469 = vmatmul.mubr.f32.gmra.mrb[18].mxu0 %v4162_v39 }
 0x40e   : > { %7494 = vmatprep.mubr.msk.f32.mxu0 %vm4296_vm14, %v4167_v4 }
 0x40f   : > { %v4294_v24 = vpop.permute.xlu0 %4293 }
 0x411   : > { %4475 = vmatmul.mubr.f32.gmra.mrb[20].mxu0 %v4166_v19 }
 0x412   : > { %7495 = vmatprep.mubr.msk.f32.mxu0 %vm4296_vm14, %v4171_v5 }
 0x415   : > { %4481 = vmatmul.mubr.f32.gmra.mrb[22].mxu0 %v4170_v6 }
 0x416   : > { %4988 = vmatprep.mubr.f32.mxu0 %v4840_v58 }
 0x4dc   : > { %v4464_v53 = vpop.f32.mrb[16].mxu0 }
 0x4dd   : > { %v9457_v61 = vadd.f32 %v4464_v53, %v4279_v40  ;;  %v4466_v36 = vpop.f32.mrb[17].mxu0 }
 0x4de   : > { %v9458_v28 = vadd.f32 %v4466_v36, %v4279_v40 }
 0x4df   : > { %vm4487_vm5 = vcmp.gt.f32.partialorder %v9457_v61, 0.0  ;;  %v4495_v13 = vmul.f32 0.01, %v9457_v61 }
 0x4e0   : > { %vm4488_vm6 = vcmp.gt.f32.partialorder %v9458_v28, 0.0  ;;  %v4496_v10 = vmul.f32 0.01, %v9458_v28  ;;  %v4470_v50 = vpop.f32.mrb[18].mxu0 }
 0x4e1   : > { %v12037_v8 = vsel %vm4487_vm5, %v9457_v61, %v4495_v13  ;;  %v9459_v49 = vadd.f32 %v4470_v50, %v4284_v44  ;;  %v4472_v17 = vpop.f32.mrb[19].mxu0 }
 0x4e2   : > { %4523 = vst.msk [vmem:[#allocation6] sm:$0xff] %vm3657_vm7, %v12037_v8  ;;  %v4504_v45 = vsel %vm4488_vm6, %v9458_v28, %v4496_v10  ;;  %v9460_v26 = vadd.f32 %v4472_v17, %v4284_v44  ;;  %4635 = vrot.lane.b32.xlu1 %v12037_v8, %s9552_s0 }
 0x4e3   : > { %4512 = vst.msk [vmem:[#allocation5 + $0x8] sm:$0xff] %vm3577_vm10, %v4504_v45  ;;  %vm4489_vm9 = vcmp.gt.f32.partialorder %v9459_v49, 0.0  ;;  %v4497_v0 = vmul.f32 0.01, %v9459_v49 }
 0x4e4   : > { %vm4490_vm11 = vcmp.gt.f32.partialorder %v9460_v26, 0.0  ;;  %v4498_v9 = vmul.f32 0.01, %v9460_v26  ;;  %v4476_v7 = vpop.f32.mrb[20].mxu0 }
 0x4e5   : > { %v12044_v14 = vsel %vm4489_vm9, %v9459_v49, %v4497_v0  ;;  %v9461_v23 = vadd.f32 %v4476_v7, %v4289_v63  ;;  %v4478_v60 = vpop.f32.mrb[21].mxu0 }
 0x4e6   : > { %4524 = vst.msk [vmem:[#allocation6 + $0x8] sm:$0xff] %vm3657_vm7, %v12044_v14  ;;  %v4506_v62 = vsel %vm4490_vm11, %v9460_v26, %v4498_v9  ;;  %v9462_v57 = vadd.f32 %v4478_v60, %v4289_v63  ;;  %4679 = vrot.lane.b32.xlu1 %v12037_v8, %s9556_s25  ;;  %vm7089_vm11 = vcmask 253952  }
 0x4e7   : > { %4514 = vst.msk [vmem:[#allocation5 + $0x18] sm:$0xff] %vm3577_vm10, %v4506_v62  ;;  %vm4491_vm12 = vcmp.gt.f32.partialorder %v9461_v23, 0.0  ;;  %v4499_v25 = vmul.f32 0.01, %v9461_v23 }
 0x4e8   : > { %vm4492_vm13 = vcmp.gt.f32.partialorder %v9462_v57, 0.0  ;;  %v4500_v22 = vmul.f32 0.01, %v9462_v57  ;;  %v4482_v33 = vpop.f32.mrb[22].mxu0 }
 0x4e9   : > { %v12051_v18 = vsel %vm4491_vm12, %v9461_v23, %v4499_v25  ;;  %v9463_v59 = vadd.f32 %v4482_v33, %v4294_v24  ;;  %v4484_v32 = vpop.f32.mrb[23].mxu0  ;;  %v4851_v7 = vld [vmem:[#allocation6] sm:$0xff]  ;;  %vm7096_vm12 = vcmask 0  }
 0x4ea   : > { %4525 = vst.msk [vmem:[#allocation6 + $0x10] sm:$0xff] %vm3657_vm7, %v12051_v18  ;;  %v4508_v2 = vsel %vm4492_vm13, %v9462_v57, %v4500_v22  ;;  %v9464_v41 = vadd.f32 %v4484_v32, %v4294_v24  ;;  %v4620_v37 = vld [vmem:[#allocation5 + $0x8] sm:$0xff]  ;;  %4535 = vrot.lane.b32.xlu1 %v12037_v8, %s9550_s29 }
 0x4eb   : > { %4516 = vst.msk [vmem:[#allocation5 + $0x28] sm:$0xff] %vm3577_vm10, %v4508_v2  ;;  %vm4493_vm14 = vcmp.gt.f32.partialorder %v9463_v59, 0.0  ;;  %v4501_v43 = vmul.f32 0.01, %v9463_v59  ;;  %4637 = vrot.lane.b32.xlu0 %v4620_v37, %s9552_s0 }
 0x4ec   : > { %vm4494_vm2 = vcmp.gt.f32.partialorder %v9464_v41, 0.0  ;;  %v4502_v27 = vmul.f32 0.01, %v9464_v41 }
 0x4ed   : > { %v4509_v46 = vsel %vm4493_vm14, %v9463_v59, %v4501_v43  ;;  %v4852_v45 = vld [vmem:[#allocation6 + $0x8] sm:$0xff] }
 0x4ee   : > { %4526 = vst.msk [vmem:[#allocation6 + $0x18] sm:$0xff] %vm3657_vm7, %v4509_v46  ;;  %v4510_v52 = vsel %vm4494_vm2, %v9464_v41, %v4502_v27  ;;  %4723 = vrot.lane.b32.xlu1 %v12037_v8, %s9557_s26  ;;  %v4622_v12 = vld [vmem:[#allocation5 + $0x18] sm:$0xff] }
 0x4ef   : > { %4518 = vst.msk [vmem:[#allocation5 + $0x38] sm:$0xff] %vm3577_vm10, %v4510_v52  ;;  %4681 = vrot.lane.b32.xlu0 %v4620_v37, %s9556_s25  ;;  %vm4911_vm10 = vcmask 261120  }
 0x4f0   : > { %8069 = vmatprep.mubr.msk.f32.mxu1 %vm4911_vm10, %v4841_v47 }
 0x4f2   : > { %4559 = vrot.lane.b32.xlu1 %v12037_v8, %s13271_s14  ;;  %v4624_v29 = vld [vmem:[#allocation5 + $0x28] sm:$0xff] }
 0x4f3   : > { %4725 = vrot.lane.b32.xlu0 %v4620_v37, %s9557_s26 }
 0x4f6   : > { %4767 = vrot.lane.b32.xlu1 %v12037_v8, %s13269_s18  ;;  %v4626_v15 = vld [vmem:[#allocation5 + $0x38] sm:$0xff] }
 0x4f7   : > { %4769 = vrot.lane.b32.xlu0 %v4620_v37, %s13269_s18 }
 0x4fa   : > { %4591 = vrot.lane.b32.xlu1 %v12037_v8, %s13400_s19 }
 0x4fb   : > { %4593 = vrot.lane.b32.xlu0 %v4620_v37, %s13400_s19 }
 0x4fe   : > { %4639 = vrot.lane.b32.xlu1 %v12044_v14, %s9552_s0 }
 0x4ff   : > { %4537 = vrot.lane.b32.xlu0 %v12044_v14, %s9550_s29 }
 0x502   : > { %4683 = vrot.lane.b32.xlu1 %v12044_v14, %s9556_s25 }
 0x503   : > { %4561 = vrot.lane.b32.xlu0 %v12044_v14, %s13271_s14 }
 0x506   : > { %4727 = vrot.lane.b32.xlu1 %v12044_v14, %s9557_s26 }
 0x507   : > { %4641 = vrot.lane.b32.xlu0 %v4622_v12, %s9552_s0 }
 0x50a   : > { %4771 = vrot.lane.b32.xlu1 %v12044_v14, %s13269_s18 }
 0x50b   : > { %4685 = vrot.lane.b32.xlu0 %v4622_v12, %s9556_s25 }
 0x50e   : > { %4595 = vrot.lane.b32.xlu1 %v12044_v14, %s13400_s19 }
 0x50f   : > { %4729 = vrot.lane.b32.xlu0 %v4622_v12, %s9557_s26 }
 0x512   : > { %4643 = vrot.lane.b32.xlu1 %v12051_v18, %s9552_s0 }
 0x513   : > { %4773 = vrot.lane.b32.xlu0 %v4622_v12, %s13269_s18 }
 0x516   : > { %4687 = vrot.lane.b32.xlu1 %v12051_v18, %s9556_s25 }
 0x517   : > { %4597 = vrot.lane.b32.xlu0 %v4622_v12, %s13400_s19 }
 0x51a   : > { %4539 = vrot.lane.b32.xlu1 %v12051_v18, %s9550_s29 }
 0x51b   : > { %4645 = vrot.lane.b32.xlu0 %v4624_v29, %s9552_s0 }
 0x51e   : > { %4731 = vrot.lane.b32.xlu1 %v12051_v18, %s9557_s26 }
 0x51f   : > { %4689 = vrot.lane.b32.xlu0 %v4624_v29, %s9556_s25 }
 0x522   : > { %4563 = vrot.lane.b32.xlu1 %v12051_v18, %s13271_s14 }
 0x523   : > { %4733 = vrot.lane.b32.xlu0 %v4624_v29, %s9557_s26 }
 0x526   : > { %4775 = vrot.lane.b32.xlu1 %v12051_v18, %s13269_s18 }
 0x527   : > { %4777 = vrot.lane.b32.xlu0 %v4624_v29, %s13269_s18 }
 0x52a   : > { %4647 = vrot.lane.b32.xlu1 %v4509_v46, %s9552_s0 }
 0x52b   : > { %4541 = vrot.lane.b32.xlu0 %v4509_v46, %s9550_s29 }
 0x52e   : > { %4599 = vrot.lane.b32.xlu1 %v12051_v18, %s13400_s19 }
 0x52f   : > { %4565 = vrot.lane.b32.xlu0 %v4509_v46, %s13271_s14 }
 0x532   : > { %4691 = vrot.lane.b32.xlu1 %v4509_v46, %s9556_s25 }
 0x533   : > { %4649 = vrot.lane.b32.xlu0 %v4626_v15, %s9552_s0 }
 0x536   : > { %4735 = vrot.lane.b32.xlu1 %v4509_v46, %s9557_s26 }
 0x537   : > { %4601 = vrot.lane.b32.xlu0 %v4624_v29, %s13400_s19 }
 0x53a   : > { %4779 = vrot.lane.b32.xlu1 %v4509_v46, %s13269_s18 }
 0x53b   : > { %4693 = vrot.lane.b32.xlu0 %v4626_v15, %s9556_s25 }
 0x53e   : > { %4603 = vrot.lane.b32.xlu1 %v4509_v46, %s13400_s19 }
 0x53f   : > { %4813 = vrot.lane.b32.xlu0 %v4620_v37, %s13401_s28 }
 0x542   : > { %4811 = vrot.lane.b32.xlu1 %v12037_v8, %s13401_s28 }
 0x543   : > { %4737 = vrot.lane.b32.xlu0 %v4626_v15, %s9557_s26 }
 0x546   : > { %4815 = vrot.lane.b32.xlu1 %v12044_v14, %s13401_s28  ;;  %v9055_v14 = vpack.c.bf16 %v4852_v45, %v4851_v7 }
 0x547   : > { %4781 = vrot.lane.b32.xlu0 %v4626_v15, %s13269_s18 }
 0x54a   : > { %4819 = vrot.lane.b32.xlu1 %v12051_v18, %s13401_s28 }
 0x54b   : > { %4605 = vrot.lane.b32.xlu0 %v4626_v15, %s13400_s19 }
 0x54e   : > { %4823 = vrot.lane.b32.xlu1 %v4509_v46, %s13401_s28 }
 0x54f   : > { %4817 = vrot.lane.b32.xlu0 %v4622_v12, %s13401_s28 }
 0x552   : > { %4893 = vperm.xlu1 %9534, %v4887_v21  }
 0x553   : > { %4821 = vrot.lane.b32.xlu0 %v4624_v29, %s13401_s28 }
 0x554   : > { %v4636_v56 = vpop.permute.xlu1 %4635 }
 0x556   : > { %4903 = vperm.xlu1 %9534, %v4889_v11  }
 0x557   : > { %4825 = vrot.lane.b32.xlu0 %v4626_v15, %s13401_s28 }
 0x558   : > { %v4680_v34 = vpop.permute.xlu1 %4679 }
 0x55b   : > { %4898 = vperm.xlu0 %9533, %v4888_v42  }
 0x55c   : > { %v4536_v38 = vpop.permute.xlu1 %4535 }
 0x55d   : > { %v4638_v55 = vpop.permute.xlu0 %4637  ;;  %4547 = vst.msk [vmem:[#allocation6 + $0x20] sm:$0xff] %vm3657_vm7, %v4536_v38 }
 0x55e   : > { %v4651_v35 = vsel %vm880_vm4, %v4636_v56, %v4638_v55  ;;  %v4854_v55 = vld [vmem:[#allocation6 + $0x18] sm:$0xff] }
 0x55f   : > { %4659 = vst.msk [vmem:[#allocation6 + $0x80] sm:$0xff] %vm3657_vm7, %v4651_v35  ;;  %4908 = vperm.xlu0 %9533, %v4890_v51  }
 0x560   : > { %v4724_v16 = vpop.permute.xlu1 %4723 }
 0x561   : > { %v4682_v3 = vpop.permute.xlu0 %4681 }
 0x562   : > { %v4695_v48 = vsel %vm3882_vm8, %v4680_v34, %v4682_v3 }
 0x563   : > { %4703 = vst.msk [vmem:[#allocation6 + $0xa0] sm:$0xff] %vm3657_vm7, %v4695_v48 }
 0x564   : > { %v4560_v30 = vpop.permute.xlu1 %4559 }
 0x565   : > { %v4726_v1 = vpop.permute.xlu0 %4725  ;;  %4571 = vst.msk [vmem:[#allocation6 + $0x40] sm:$0xff] %vm3657_vm7, %v4560_v30 }
 0x566   : > { %v4739_v31 = vsel %vm4039_vm0, %v4724_v16, %v4726_v1  ;;  %v4867_v0 = vld [vmem:[#allocation6 + $0x80] sm:$0xff]  ;;  %v4853_v1 = vld [vmem:[#allocation6 + $0x10] sm:$0xff] }
 0x567   : > { %4747 = vst.msk [vmem:[#allocation6 + $0xc0] sm:$0xff] %vm3657_vm7, %v4739_v31  ;;  %v9059_v31 = vpack.c.bf16 %v4854_v55, %v4853_v1  ;;  %v4845_v1 = vld [vmem:[%s13197_s5 + $0x30] sm:$0xff] }
 0x568   : > { %v4768_v54 = vpop.permute.xlu1 %4767 }
 0x569   : > { %v4770_v39 = vpop.permute.xlu0 %4769 }
 0x56a   : > { %v4783_v4 = vsel %vm4092_vm1, %v4768_v54, %v4770_v39  ;;  %v4871_v54 = vld [vmem:[#allocation6 + $0xa0] sm:$0xff] }
 0x56b   : > { %4791 = vst.msk [vmem:[#allocation6 + $0xe0] sm:$0xff] %vm3657_vm7, %v4783_v4 }
 0x56c   : > { %v4592_v19 = vpop.permute.xlu1 %4591  ;;  %v4859_v7 = vld [vmem:[#allocation6 + $0x40] sm:$0xff] }
 0x56d   : > { %v4594_v5 = vpop.permute.xlu0 %4593 }
 0x56e   : > { %v4607_v6 = vsel %vm841_vm3, %v4592_v19, %v4594_v5  ;;  %v4875_v45 = vld [vmem:[#allocation6 + $0xc0] sm:$0xff] }
 0x56f   : > { %4615 = vst.msk [vmem:[#allocation6 + $0x60] sm:$0xff] %vm3657_vm7, %v4607_v6  ;;  %v4855_v6 = vld [vmem:[#allocation6 + $0x20] sm:$0xff] }
 0x570   : > { %v4640_v40 = vpop.permute.xlu1 %4639 }
 0x571   : > { %v4538_v53 = vpop.permute.xlu0 %4537 }
 0x572   : > { %4548 = vst.msk [vmem:[#allocation6 + $0x28] sm:$0xff] %vm3657_vm7, %v4538_v53 }
 0x574   : > { %v4684_v61 = vpop.permute.xlu1 %4683 }
 0x575   : > { %v4562_v36 = vpop.permute.xlu0 %4561 }
 0x576   : > { %4572 = vst.msk [vmem:[#allocation6 + $0x48] sm:$0xff] %vm3657_vm7, %v4562_v36 }
 0x578   : > { %v4728_v28 = vpop.permute.xlu1 %4727 }
 0x579   : > { %v4642_v13 = vpop.permute.xlu0 %4641  ;;  %v4856_v5 = vld [vmem:[#allocation6 + $0x28] sm:$0xff] }
 0x57a   : > { %v4652_v44 = vsel %vm880_vm4, %v4640_v40, %v4642_v13  ;;  %v9063_v40 = vpack.c.bf16 %v4856_v5, %v4855_v6  ;;  %v4848_v5 = vld [vmem:[%s13197_s5 + $0x48] sm:$0xff]  ;;  %v4847_v6 = vld [vmem:[%s13197_s5 + $0x40] sm:$0xff] }
 0x57b   : > { %4660 = vst.msk [vmem:[#allocation6 + $0x88] sm:$0xff] %vm3657_vm7, %v4652_v44 }
 0x57c   : > { %v4772_v10 = vpop.permute.xlu1 %4771 }
 0x57d   : > { %v4686_v50 = vpop.permute.xlu0 %4685 }
 0x57e   : > { %v4696_v8 = vsel %vm3882_vm8, %v4684_v61, %v4686_v50 }
 0x57f   : > { %4704 = vst.msk [vmem:[#allocation6 + $0xa8] sm:$0xff] %vm3657_vm7, %v4696_v8 }
 0x580   : > { %v4596_v49 = vpop.permute.xlu1 %4595 }
 0x581   : > { %v4730_v17 = vpop.permute.xlu0 %4729 }
 0x582   : > { %v4740_v26 = vsel %vm4039_vm0, %v4728_v28, %v4730_v17  ;;  %v4868_v63 = vld [vmem:[#allocation6 + $0x88] sm:$0xff] }
 0x583   : > { %4748 = vst.msk [vmem:[#allocation6 + $0xc8] sm:$0xff] %vm3657_vm7, %v4740_v26  ;;  %v9053_v9 = vpack.c.bf16 %v4868_v63, %v4867_v0  ;;  %v4860_v63 = vld [vmem:[#allocation6 + $0x48] sm:$0xff] }
 0x584   : > { %v4644_v23 = vpop.permute.xlu1 %4643 }
 0x585   : > { %v4774_v60 = vpop.permute.xlu0 %4773  ;;  %9054 = vmatprep.subr.bf16.mxu0 %v9053_v9 }
 0x586   : > { %v4784_v62 = vsel %vm4092_vm1, %v4772_v10, %v4774_v60  ;;  %9056 = vmatpush3.bf16.msra.mxu0 %v9055_v14  ;;  %v4872_v48 = vld [vmem:[#allocation6 + $0xa8] sm:$0xff]  ;;  %v9071_v14 = vpack.c.bf16 %v4860_v63, %v4859_v7 }
 0x587   : > { %4792 = vst.msk [vmem:[#allocation6 + $0xe8] sm:$0xff] %vm3657_vm7, %v4784_v62  ;;  %v9061_v19 = vpack.c.bf16 %v4872_v48, %v4871_v54  ;;  %v4842_v48 = vld [vmem:[%s13197_s5 + $0x18] sm:$0xff] }
 0x588   : > { %v4688_v57 = vpop.permute.xlu1 %4687 }
 0x589   : > { %v4598_v25 = vpop.permute.xlu0 %4597 }
 0x58a   : > { %v4608_v24 = vsel %vm841_vm3, %v4596_v49, %v4598_v25  ;;  %v4876_v50 = vld [vmem:[#allocation6 + $0xc8] sm:$0xff] }
 0x58b   : > { %4616 = vst.msk [vmem:[#allocation6 + $0x68] sm:$0xff] %vm3657_vm7, %v4608_v24  ;;  %v9069_v0 = vpack.c.bf16 %v4876_v50, %v4875_v45 }
 0x58c   : > { %v4540_v22 = vpop.permute.xlu1 %4539 }
 0x58d   : > { %v4646_v33 = vpop.permute.xlu0 %4645  ;;  %4549 = vst.msk [vmem:[#allocation6 + $0x30] sm:$0xff] %vm3657_vm7, %v4540_v22 }
 0x58e   : > { %v4653_v18 = vsel %vm880_vm4, %v4644_v23, %v4646_v33  ;;  %v4880_v22 = vld [vmem:[#allocation6 + $0xe8] sm:$0xff] }
 0x58f   : > { %4661 = vst.msk [vmem:[#allocation6 + $0x90] sm:$0xff] %vm3657_vm7, %v4653_v18 }
 0x590   : > { %v4732_v59 = vpop.permute.xlu1 %4731 }
 0x591   : > { %v4690_v32 = vpop.permute.xlu0 %4689 }
 0x592   : > { %v4697_v2 = vsel %vm3882_vm8, %v4688_v57, %v4690_v32  ;;  %v4879_v32 = vld [vmem:[#allocation6 + $0xe0] sm:$0xff] }
 0x593   : > { %4705 = vst.msk [vmem:[#allocation6 + $0xb0] sm:$0xff] %vm3657_vm7, %v4697_v2 }
 0x594   : > { %v4564_v41 = vpop.permute.xlu1 %4563  ;;  %v4857_v49 = vld [vmem:[#allocation6 + $0x30] sm:$0xff] }
 0x595   : > { %v4734_v37 = vpop.permute.xlu0 %4733  ;;  %4573 = vst.msk [vmem:[#allocation6 + $0x50] sm:$0xff] %vm3657_vm7, %v4564_v41  ;;  %v9077_v41 = vpack.c.bf16 %v4880_v22, %v4879_v32 }
 0x596   : > { %v4741_v43 = vsel %vm4039_vm0, %v4732_v59, %v4734_v37  ;;  %v4869_v16 = vld [vmem:[#allocation6 + $0x90] sm:$0xff]  ;;  %v4864_v37 = vld [vmem:[#allocation6 + $0x68] sm:$0xff] }
 0x597   : > { %4749 = vst.msk [vmem:[#allocation6 + $0xd0] sm:$0xff] %vm3657_vm7, %v4741_v43 }
 0x598   : > { %v4776_v27 = vpop.permute.xlu1 %4775 }
 0x599   : > { %v4778_v46 = vpop.permute.xlu0 %4777 }
 0x59a   : > { %v4785_v52 = vsel %vm4092_vm1, %v4776_v27, %v4778_v46  ;;  %v4873_v44 = vld [vmem:[#allocation6 + $0xb0] sm:$0xff] }
 0x59b   : > { %4793 = vst.msk [vmem:[#allocation6 + $0xf0] sm:$0xff] %vm3657_vm7, %v4785_v52  ;;  %v4863_v52 = vld [vmem:[#allocation6 + $0x60] sm:$0xff] }
 0x59c   : > { %v4648_v12 = vpop.permute.xlu1 %4647  ;;  %v4861_v18 = vld [vmem:[#allocation6 + $0x50] sm:$0xff] }
 0x59d   : > { %v4542_v29 = vpop.permute.xlu0 %4541 }
 0x59e   : > { %4550 = vst.msk [vmem:[#allocation6 + $0x38] sm:$0xff] %vm3657_vm7, %v4542_v29  ;;  %v4877_v25 = vld [vmem:[#allocation6 + $0xd0] sm:$0xff] }
 0x5a0   : > { %v4600_v15 = vpop.permute.xlu1 %4599 }
 0x5a1   : > { %v4566_v58 = vpop.permute.xlu0 %4565 }
 0x5a2   : > { %4574 = vst.msk [vmem:[#allocation6 + $0x58] sm:$0xff] %vm3657_vm7, %v4566_v58  ;;  %v4881_v29 = vld [vmem:[#allocation6 + $0xf0] sm:$0xff] }
 0x5a4   : > { %v4692_v21 = vpop.permute.xlu1 %4691 }
 0x5a5   : > { %v4650_v11 = vpop.permute.xlu0 %4649  ;;  %v4858_v36 = vld [vmem:[#allocation6 + $0x38] sm:$0xff] }
 0x5a6   : > { %v4654_v56 = vsel %vm880_vm4, %v4648_v12, %v4650_v11  ;;  %v9067_v17 = vpack.c.bf16 %v4858_v36, %v4857_v49  ;;  %v9079_v12 = vpack.c.bf16 %v4864_v37, %v4863_v52 }
 0x5a7   : > { %4662 = vst.msk [vmem:[#allocation6 + $0x98] sm:$0xff] %vm3657_vm7, %v4654_v56 }
 0x5a8   : > { %v4736_v47 = vpop.permute.xlu1 %4735 }
 0x5a9   : > { %v4602_v42 = vpop.permute.xlu0 %4601  ;;  %v4862_v62 = vld [vmem:[#allocation6 + $0x58] sm:$0xff] }
 0x5aa   : > { %v4609_v34 = vsel %vm841_vm3, %v4600_v15, %v4602_v42  ;;  %v9075_v59 = vpack.c.bf16 %v4862_v62, %v4861_v18 }
 0x5ab   : > { %4617 = vst.msk [vmem:[#allocation6 + $0x70] sm:$0xff] %vm3657_vm7, %v4609_v34 }
 0x5ac   : > { %v4780_v51 = vpop.permute.xlu1 %4779 }
 0x5ad   : > { %v4694_v38 = vpop.permute.xlu0 %4693 }
 0x5ae   : > { %v4698_v35 = vsel %vm3882_vm8, %v4692_v21, %v4694_v38  ;;  %v4870_v3 = vld [vmem:[#allocation6 + $0x98] sm:$0xff]  ;;  %v4839_v38 = vld [vmem:[%s13197_s5] sm:$0xff] }
 0x5af   : > { %4706 = vst.msk [vmem:[#allocation6 + $0xb8] sm:$0xff] %vm3657_vm7, %v4698_v35  ;;  %v9057_v30 = vpack.c.bf16 %v4870_v3, %v4869_v16  ;;  %v4843_v3 = vld [vmem:[%s13197_s5 + $0x20] sm:$0xff] }
 0x5b0   : > { %v4604_v39 = vpop.permute.xlu1 %4603 }
 0x5b1   : > { %v4814_v4 = vpop.permute.xlu0 %4813  ;;  %9058 = vmatprep.subr.bf16.mxu0 %v9057_v30  ;;  %v4846_v30 = vld [vmem:[%s13197_s5 + $0x38] sm:$0xff] }
 0x5b2   : > { %9060 = vmatpush3.bf16.msra.mxu0 %v9059_v31  ;;  %v4865_v11 = vld [vmem:[#allocation6 + $0x70] sm:$0xff] }
 0x5b3   : > { %9062 = vmatprep.subr.bf16.mxu0 %v9061_v19  ;;  %v4844_v19 = vld [vmem:[%s13197_s5 + $0x28] sm:$0xff] }
 0x5b4   : > { %v4812_v53 = vpop.permute.xlu1 %4811 }
 0x5b5   : > { %v4738_v61 = vpop.permute.xlu0 %4737  ;;  %v4827_v28 = vsel %vm4145_vm15, %v4812_v53, %v4814_v4  ;;  %v4849_v4 = vld [vmem:[%s13197_s5 + $0x50] sm:$0xff] }
 0x5b6   : > { %v4742_v13 = vsel %vm4039_vm0, %v4736_v47, %v4738_v61  ;;  %9064 = vmatpush3.bf16.msra.mxu0 %v9063_v40  ;;  %v4874_v10 = vld [vmem:[#allocation6 + $0xb8] sm:$0xff]  ;;  %4835 = vst.msk [vmem:[#allocation6 + $0x100] sm:$0xff] %vm3657_vm7, %v4827_v28  ;;  %v4850_v40 = vld [vmem:[%s13197_s5 + $0x58] sm:$0xff] }
 0x5b7   : > { %4750 = vst.msk [vmem:[#allocation6 + $0xd8] sm:$0xff] %vm3657_vm7, %v4742_v13  ;;  %v9065_v8 = vpack.c.bf16 %v4874_v10, %v4873_v44 }
 0x5b8   : > { %v4816_v60 = vpop.permute.xlu1 %4815 }
 0x5b9   : > { %v4782_v26 = vpop.permute.xlu0 %4781  ;;  %9066 = vmatprep.subr.bf16.mxu0 %v9065_v8 }
 0x5ba   : > { %v4786_v9 = vsel %vm4092_vm1, %v4780_v51, %v4782_v26  ;;  %9068 = vmatpush3.bf16.msra.mxu0 %v9067_v17  ;;  %vm9561_vm1 = vmmov 0  }
 0x5bb   : > { %4794 = vst.msk [vmem:[#allocation6 + $0xf8] sm:$0xff] %vm3657_vm7, %v4786_v9  ;;  %9070 = vmatprep.subr.bf16.mxu0 %v9069_v0 }
 0x5bc   : > { %v4820_v46 = vpop.permute.xlu1 %4819 }
 0x5bd   : > { %v4606_v23 = vpop.permute.xlu0 %4605  ;;  %v4883_v55 = vld [vmem:[#allocation6 + $0x100] sm:$0xff] }
 0x5be   : > { %v4610_v57 = vsel %vm841_vm3, %v4604_v39, %v4606_v23  ;;  %9072 = vmatpush3.bf16.msra.mxu0 %v9071_v14  ;;  %v4878_v24 = vld [vmem:[#allocation6 + $0xd8] sm:$0xff] }
 0x5bf   : > { %4618 = vst.msk [vmem:[#allocation6 + $0x78] sm:$0xff] %vm3657_vm7, %v4610_v57  ;;  %v9073_v33 = vpack.c.bf16 %v4878_v24, %v4877_v25 }
 0x5c0   : > { %v4824_v42 = vpop.permute.xlu1 %4823 }
 0x5c1   : > { %v4818_v2 = vpop.permute.xlu0 %4817  ;;  %9074 = vmatprep.subr.bf16.mxu0 %v9073_v33 }
 0x5c2   : > { %v4828_v43 = vsel %vm4145_vm15, %v4816_v60, %v4818_v2  ;;  %9076 = vmatpush3.bf16.msra.mxu0 %v9075_v59  ;;  %v4882_v27 = vld [vmem:[#allocation6 + $0xf8] sm:$0xff] }
 0x5c3   : > { %4836 = vst.msk [vmem:[#allocation6 + $0x108] sm:$0xff] %vm3657_vm7, %v4828_v43  ;;  %9078 = vmatprep.subr.bf16.mxu0 %v9077_v41  ;;  %v9081_v58 = vpack.c.bf16 %v4882_v27, %v4881_v29 }
 0x5c5   : > { %v4822_v15 = vpop.permute.xlu0 %4821 }
 0x5c6   : > { %v4829_v21 = vsel %vm4145_vm15, %v4820_v46, %v4822_v15  ;;  %9080 = vmatpush3.bf16.msra.mxu0 %v9079_v12  ;;  %v4866_v56 = vld [vmem:[#allocation6 + $0x78] sm:$0xff] }
 0x5c7   : > { %4837 = vst.msk [vmem:[#allocation6 + $0x110] sm:$0xff] %vm3657_vm7, %v4829_v21  ;;  %9082 = vmatprep.subr.bf16.mxu0 %v9081_v58  ;;  %v9083_v47 = vpack.c.bf16 %v4866_v56, %v4865_v11  ;;  %v5311_v21 = vld [vmem:[%s13199_s7 + $0x8] sm:$0xff]  ;;  %v5312_v11 = vld [vmem:[%s13199_s7 + $0x10] sm:$0xff] }
 0x5c8   : > { %v5353_v56 = vld [vmem:[%s13200_s8 + $0x8] sm:$0xff] }
 0x5c9   : > { %v4826_v34 = vpop.permute.xlu0 %4825 }
 0x5ca   : > { %v4830_v51 = vsel %vm4145_vm15, %v4824_v42, %v4826_v34  ;;  %9084 = vmatpush3.bf16.msra.mxu0 %v9083_v47  ;;  %v4884_v35 = vld [vmem:[#allocation6 + $0x108] sm:$0xff]  ;;  %v5352_v47 = vld [vmem:[%s13200_s8] sm:$0xff] }
 0x5cb   : > { %4838 = vst.msk [vmem:[#allocation6 + $0x118] sm:$0xff] %vm3657_vm7, %v4830_v51  ;;  %v9085_v16 = vpack.c.bf16 %v4884_v35, %v4883_v55 }
 0x5cd   : > { %4989 = vmatmul.mubr.f32.vlgmr.msra.gmra.mrb[24].mxu0 %v4839_v38  ;;  %9086 = vmatprep.subr.bf16.mxu1 %v9085_v16 }
 0x5ce   : > { %9088 = vmatpush3.bf16.msra.mxu1 %v9085_v16  ;;  %4993 = vmatprep.mubr.f32.mxu0 %v4843_v3  ;;  %v4885_v31 = vld [vmem:[#allocation6 + $0x110] sm:$0xff] }
 0x5d1   : > { %4994 = vmatmul.mubr.f32.gmra.mrb[26].mxu0 %v4842_v48  ;;  %v4894_v10 = vpop.permute.xlu1 %4893 }
 0x5d2   : > { %4998 = vmatprep.mubr.f32.mxu0 %v4846_v30  ;;  %v4886_v54 = vld [vmem:[#allocation6 + $0x118] sm:$0xff] }
 0x5d3   : > { %v9089_v39 = vpack.c.bf16 %v4886_v54, %v4885_v31 }
 0x5d5   : > { %4999 = vmatmul.mubr.f32.gmra.mrb[28].mxu0 %v4845_v1  ;;  %9090 = vmatprep.subr.bf16.mxu1 %v9089_v39  ;;  %v4904_v62 = vpop.permute.xlu1 %4903 }
 0x5d6   : > { %9092 = vmatpush3.bf16.msra.mxu1 %v9089_v39  ;;  %5003 = vmatprep.mubr.f32.mxu0 %v4849_v4 }
 0x5d9   : > { %8070 = vmatmul.mubr.msk.f32.vlgmr.msra.gmra.mrb[8].mxu1 %vm4911_vm10, %v4844_v19  ;;  %5004 = vmatmul.mubr.f32.gmra.mrb[30].mxu0 %v4848_v5 }
 0x5da   : > { %8072 = vmatprep.mubr.msk.f32.mxu1 %vm4911_vm10, %v4847_v6  ;;  %v4899_v8 = vpop.permute.xlu0 %4898  ;;  %5434 = vmatprep.mubr.f32.mxu0 %v5311_v21 }
 0x5dd   : > { %8073 = vmatmul.mubr.msk.f32.gmra.mrb[10].mxu1 %vm4911_vm10, %v4850_v40 }
 0x5de   : > { %v4909_v57 = vpop.permute.xlu0 %4908  ;;  %8083 = vmatprep.mubr.msk.f32.mxu1 %vm4911_vm10, %v5312_v11 }
 0x6a0   : > { %v7764_v53 = vpop.f32.mrb[24].mxu0 }
 0x6a1   : > { %v7765_v61 = vpop.f32.mrb[25].mxu0 }
 0x6a2   : > { %v7766_v36 = vadd.f32 %v7765_v61, %v7764_v53 }
 0x6a4   : > { %v7767_v28 = vpop.f32.mrb[26].mxu0  ;;  %v4991_v63 = vadd.f32 %v7766_v36, %v4894_v10 }
 0x6a5   : > { %v7768_v13 = vpop.f32.mrb[27].mxu0 }
 0x6a6   : > { %v7769_v44 = vadd.f32 %v7768_v13, %v7767_v28 }
 0x6a8   : > { %v7770_v50 = vpop.f32.mrb[28].mxu0  ;;  %v4996_v45 = vadd.f32 %v7769_v44, %v4899_v8 }
 0x6a9   : > { %v7771_v49 = vpop.f32.mrb[29].mxu0 }
 0x6aa   : > { %v7772_v17 = vadd.f32 %v7771_v49, %v7770_v50 }
 0x6ac   : > { %v7773_v26 = vpop.f32.mrb[30].mxu0  ;;  %v8071_v0 = vpop.f32.mrb[8].mxu1  ;;  %v5001_v18 = vadd.f32 %v7772_v17, %v4904_v62 }
 0x6ad   : > { %v5081_v9 = vadd.f32 %v8071_v0, %v4996_v45  ;;  %v7774_v7 = vpop.f32.mrb[31].mxu0  ;;  %v5075_v14 = vpop.f32.mrb[9].mxu1 }
 0x6ae   : > { %v7775_v23 = vadd.f32 %v7774_v7, %v7773_v26  ;;  %v5076_v60 = vadd.f32 %v5075_v14, %v4991_v63 }
 0x6af   : > { %vm5095_vm3 = vcmp.gt.f32.partialorder %v5081_v9, 0.0  ;;  %v5099_v25 = vmul.f32 0.01, %v5081_v9 }
 0x6b0   : > { %vm5094_vm4 = vcmp.gt.f32.partialorder %v5076_v60, 0.0  ;;  %v5098_v24 = vmul.f32 0.01, %v5076_v60  ;;  %v5006_v22 = vadd.f32 %v7775_v23, %v4909_v57  ;;  %v8074_v33 = vpop.f32.mrb[10].mxu1 }
 0x6b1   : > { %v5103_v59 = vsel %vm5095_vm3, %v5081_v9, %v5099_v25  ;;  %v5085_v32 = vpop.f32.mrb[11].mxu1 }
 0x6b2   : > { %5107 = vst.msk [vmem:[#allocation7 + $0x10] sm:$0xff] %vm3657_vm7, %v5103_v59  ;;  %v5102_v2 = vsel %vm5094_vm4, %v5076_v60, %v5098_v24  ;;  %v5091_v41 = vadd.f32 %v8074_v33, %v5006_v22  ;;  %v5086_v37 = vadd.f32 %v5085_v32, %v5001_v18 }
 0x6b3   : > { %5106 = vst.msk [vmem:[#allocation7] sm:$0xff] %vm3657_vm7, %v5102_v2 }
 0x6b4   : > { %vm5097_vm8 = vcmp.gt.f32.partialorder %v5091_v41, 0.0  ;;  %v5101_v43 = vmul.f32 0.01, %v5091_v41  ;;  %vm5096_vm0 = vcmp.gt.f32.partialorder %v5086_v37, 0.0  ;;  %v5100_v27 = vmul.f32 0.01, %v5086_v37 }
 0x6b6   : > { %v5105_v46 = vsel %vm5097_vm8, %v5091_v41, %v5101_v43  ;;  %v5104_v52 = vsel %vm5096_vm0, %v5086_v37, %v5100_v27 }
 0x6b7   : > { %5109 = vst.msk [vmem:[#allocation7 + $0x30] sm:$0xff] %vm3657_vm7, %v5105_v46  ;;  %5108 = vst.msk [vmem:[#allocation7 + $0x20] sm:$0xff] %vm3657_vm7, %v5104_v52  ;;  %vm5546_vm7 = vcmask 1041408  }
 0x6b9   : > { %v5111_v12 = vld [vmem:[#allocation7 + $0x10] sm:$0xff] }
 0x6ba   : > { %5115 = vst.msk [vmem:[#allocation8 + $0x8] sm:$0xff] %vm4145_vm15, %v5111_v12  ;;  %v5110_v29 = vld [vmem:[#allocation7] sm:$0xff]  ;;  %5200 = vrot.lane.b32.xlu0 %v5111_v12, %s9552_s0 }
 0x6bb   : > { %5114 = vst.msk [vmem:[#allocation8] sm:$0xff] %vm4145_vm15, %v5110_v29  ;;  %5198 = vrot.lane.b32.xlu1 %v5110_v29, %s9552_s0 }
 0x6be   : > { %v5113_v15 = vld [vmem:[#allocation7 + $0x30] sm:$0xff]  ;;  %v5112_v58 = vld [vmem:[#allocation7 + $0x20] sm:$0xff]  ;;  %5224 = vrot.lane.b32.xlu0 %v5111_v12, %s9556_s25 }
 0x6bf   : > { %5117 = vst.msk [vmem:[#allocation8 + $0x18] sm:$0xff] %vm4145_vm15, %v5113_v15  ;;  %5116 = vst.msk [vmem:[#allocation8 + $0x10] sm:$0xff] %vm4145_vm15, %v5112_v58  ;;  %5222 = vrot.lane.b32.xlu1 %v5110_v29, %s9556_s25 }
 0x6c1   : > { %v5317_v3 = vld [vmem:[#allocation8 + $0x8] sm:$0xff] }
 0x6c2   : > { %5128 = vrot.lane.b32.xlu0 %v5111_v12, %s9550_s29  ;;  %v5316_v16 = vld [vmem:[#allocation8] sm:$0xff] }
 0x6c3   : > { %5126 = vrot.lane.b32.xlu1 %v5110_v29, %s9550_s29  ;;  %v9095_v31 = vpack.c.bf16 %v5317_v3, %v5316_v16 }
 0x6c6   : > { %5248 = vrot.lane.b32.xlu0 %v5111_v12, %s9557_s26  ;;  %v5318_v26 = vld [vmem:[#allocation8 + $0x10] sm:$0xff]  ;;  %v5319_v0 = vld [vmem:[#allocation8 + $0x18] sm:$0xff] }
 0x6c7   : > { %5246 = vrot.lane.b32.xlu1 %v5110_v29, %s9557_s26  ;;  %v9099_v60 = vpack.c.bf16 %v5319_v0, %v5318_v26  ;;  %v5532_v26 = vld [vmem:[%s13201_s9 + $0x10] sm:$0xff]  ;;  %v5533_v0 = vld [vmem:[%s13201_s9 + $0x18] sm:$0xff] }
 0x6ca   : > { %5152 = vrot.lane.b32.xlu0 %v5111_v12, %s13402_s27 }
 0x6cb   : > { %5150 = vrot.lane.b32.xlu1 %v5110_v29, %s13402_s27 }
 0x6ce   : > { %5272 = vrot.lane.b32.xlu0 %v5111_v12, %s13403_s17 }
 0x6cf   : > { %5270 = vrot.lane.b32.xlu1 %v5110_v29, %s13403_s17 }
 0x6d2   : > { %5176 = vrot.lane.b32.xlu0 %v5111_v12, %s13400_s19 }
 0x6d3   : > { %5174 = vrot.lane.b32.xlu1 %v5110_v29, %s13400_s19 }
 0x6d6   : > { %5296 = vrot.lane.b32.xlu0 %v5111_v12, %s13401_s28 }
 0x6d7   : > { %5294 = vrot.lane.b32.xlu1 %v5110_v29, %s13401_s28 }
 0x6da   : > { %5204 = vrot.lane.b32.xlu0 %v5113_v15, %s9552_s0 }
 0x6db   : > { %5202 = vrot.lane.b32.xlu1 %v5112_v58, %s9552_s0 }
 0x6de   : > { %5228 = vrot.lane.b32.xlu0 %v5113_v15, %s9556_s25 }
 0x6df   : > { %5226 = vrot.lane.b32.xlu1 %v5112_v58, %s9556_s25 }
 0x6e2   : > { %5132 = vrot.lane.b32.xlu0 %v5113_v15, %s9550_s29 }
 0x6e3   : > { %5130 = vrot.lane.b32.xlu1 %v5112_v58, %s9550_s29 }
 0x6e6   : > { %5252 = vrot.lane.b32.xlu0 %v5113_v15, %s9557_s26 }
 0x6e7   : > { %5250 = vrot.lane.b32.xlu1 %v5112_v58, %s9557_s26 }
 0x6ea   : > { %5156 = vrot.lane.b32.xlu0 %v5113_v15, %s13402_s27 }
 0x6eb   : > { %5154 = vrot.lane.b32.xlu1 %v5112_v58, %s13402_s27 }
 0x6ee   : > { %5276 = vrot.lane.b32.xlu0 %v5113_v15, %s13403_s17 }
 0x6ef   : > { %5274 = vrot.lane.b32.xlu1 %v5112_v58, %s13403_s17 }
 0x6f2   : > { %5180 = vrot.lane.b32.xlu0 %v5113_v15, %s13400_s19 }
 0x6f3   : > { %5178 = vrot.lane.b32.xlu1 %v5112_v58, %s13400_s19  ;;  %s525_s19 = scalar_lea.vmem %s13207_s15, %s13405_s24 }
 0x6f6   : > { %5300 = vrot.lane.b32.xlu0 %v5113_v15, %s13401_s28 }
 0x6f7   : > { %5298 = vrot.lane.b32.xlu1 %v5112_v58, %s13401_s28 }
 0x6fa   : > { %5361 = vperm.xlu0 %9533, %v5353_v56  }
 0x6fb   : > { %5356 = vperm.xlu1 %9534, %v5352_v47  }
 0x72c   : > { %v5201_v42 = vpop.permute.xlu0 %5200 }
 0x72d   : > { %5211 = vst.msk [vmem:[#allocation8 + $0x88] sm:$0xff] %vm4145_vm15, %v5201_v42  ;;  %v5199_v34 = vpop.permute.xlu1 %5198 }
 0x72e   : > { %5210 = vst.msk [vmem:[#allocation8 + $0x80] sm:$0xff] %vm4145_vm15, %v5199_v34 }
 0x730   : > { %v5225_v51 = vpop.permute.xlu0 %5224 }
 0x731   : > { %5235 = vst.msk [vmem:[#allocation8 + $0xa8] sm:$0xff] %vm4145_vm15, %v5225_v51  ;;  %v5223_v38 = vpop.permute.xlu1 %5222 }
 0x732   : > { %5234 = vst.msk [vmem:[#allocation8 + $0xa0] sm:$0xff] %vm4145_vm15, %v5223_v38 }
 0x734   : > { %v5129_v55 = vpop.permute.xlu0 %5128  ;;  %v5333_v35 = vld [vmem:[#allocation8 + $0x88] sm:$0xff] }
 0x735   : > { %5139 = vst.msk [vmem:[#allocation8 + $0x28] sm:$0xff] %vm4145_vm15, %v5129_v55  ;;  %v5127_v48 = vpop.permute.xlu1 %5126  ;;  %v5332_v30 = vld [vmem:[#allocation8 + $0x80] sm:$0xff] }
 0x736   : > { %5138 = vst.msk [vmem:[#allocation8 + $0x20] sm:$0xff] %vm4145_vm15, %v5127_v48  ;;  %v9093_v1 = vpack.c.bf16 %v5333_v35, %v5332_v30 }
 0x738   : > { %v5249_v54 = vpop.permute.xlu0 %5248  ;;  %9094 = vmatprep.subr.bf16.mxu0 %v9093_v1  ;;  %v5337_v14 = vld [vmem:[#allocation8 + $0xa8] sm:$0xff] }
 0x739   : > { %5259 = vst.msk [vmem:[#allocation8 + $0xc8] sm:$0xff] %vm4145_vm15, %v5249_v54  ;;  %v5247_v39 = vpop.permute.xlu1 %5246  ;;  %9096 = vmatpush3.bf16.msra.mxu0 %v9095_v31  ;;  %v5336_v7 = vld [vmem:[#allocation8 + $0xa0] sm:$0xff] }
 0x73a   : > { %5258 = vst.msk [vmem:[#allocation8 + $0xc0] sm:$0xff] %vm4145_vm15, %v5247_v39  ;;  %v9101_v57 = vpack.c.bf16 %v5337_v14, %v5336_v7  ;;  %v5535_v7 = vld [vmem:[%s13201_s9 + $0x28] sm:$0xff] }
 0x73c   : > { %v5153_v4 = vpop.permute.xlu0 %5152  ;;  %v5321_v24 = vld [vmem:[#allocation8 + $0x28] sm:$0xff] }
 0x73d   : > { %5163 = vst.msk [vmem:[#allocation8 + $0x48] sm:$0xff] %vm4145_vm15, %v5153_v4  ;;  %v5151_v19 = vpop.permute.xlu1 %5150  ;;  %v5320_v25 = vld [vmem:[#allocation8 + $0x20] sm:$0xff] }
 0x73e   : > { %5162 = vst.msk [vmem:[#allocation8 + $0x40] sm:$0xff] %vm4145_vm15, %v5151_v19  ;;  %v9103_v59 = vpack.c.bf16 %v5321_v24, %v5320_v25  ;;  %v5539_v25 = vld [vmem:[%s13201_s9 + $0x48] sm:$0xff] }
 0x740   : > { %v5273_v5 = vpop.permute.xlu0 %5272  ;;  %v5341_v46 = vld [vmem:[#allocation8 + $0xc8] sm:$0xff] }
 0x741   : > { %5283 = vst.msk [vmem:[#allocation8 + $0xe8] sm:$0xff] %vm4145_vm15, %v5273_v5  ;;  %v5271_v6 = vpop.permute.xlu1 %5270  ;;  %v5340_v27 = vld [vmem:[#allocation8 + $0xc0] sm:$0xff] }
 0x742   : > { %5282 = vst.msk [vmem:[#allocation8 + $0xe0] sm:$0xff] %vm4145_vm15, %v5271_v6  ;;  %v9109_v29 = vpack.c.bf16 %v5341_v46, %v5340_v27 }
 0x744   : > { %v5177_v40 = vpop.permute.xlu0 %5176  ;;  %v5325_v58 = vld [vmem:[#allocation8 + $0x48] sm:$0xff] }
 0x745   : > { %5187 = vst.msk [vmem:[#allocation8 + $0x68] sm:$0xff] %vm4145_vm15, %v5177_v40  ;;  %v5175_v53 = vpop.permute.xlu1 %5174  ;;  %v5324_v15 = vld [vmem:[#allocation8 + $0x40] sm:$0xff] }
 0x746   : > { %5186 = vst.msk [vmem:[#allocation8 + $0x60] sm:$0xff] %vm4145_vm15, %v5175_v53  ;;  %v9111_v47 = vpack.c.bf16 %v5325_v58, %v5324_v15 }
 0x748   : > { %v5297_v61 = vpop.permute.xlu0 %5296  ;;  %v5345_v16 = vld [vmem:[#allocation8 + $0xe8] sm:$0xff] }
 0x749   : > { %5307 = vst.msk [vmem:[#allocation8 + $0x108] sm:$0xff] %vm4145_vm15, %v5297_v61  ;;  %v5295_v36 = vpop.permute.xlu1 %5294  ;;  %v5344_v35 = vld [vmem:[#allocation8 + $0xe0] sm:$0xff] }
 0x74a   : > { %5306 = vst.msk [vmem:[#allocation8 + $0x100] sm:$0xff] %vm4145_vm15, %v5295_v36  ;;  %v9117_v30 = vpack.c.bf16 %v5345_v16, %v5344_v35  ;;  %v5310_v36 = vld [vmem:[%s13199_s7] sm:$0xff]  ;;  %v7506_v35 = vld [vmem:[%s13201_s9 + $0x78] sm:$0xff] }
 0x74b   : > { %v7507_v16 = vld [vmem:[%s13201_s9 + $0x80] sm:$0xff] }
 0x74c   : > { %v5205_v28 = vpop.permute.xlu0 %5204  ;;  %v5329_v31 = vld [vmem:[#allocation8 + $0x68] sm:$0xff] }
 0x74d   : > { %5213 = vst.msk [vmem:[#allocation8 + $0x98] sm:$0xff] %vm4145_vm15, %v5205_v28  ;;  %v5203_v13 = vpop.permute.xlu1 %5202  ;;  %v5328_v1 = vld [vmem:[#allocation8 + $0x60] sm:$0xff] }
 0x74e   : > { %5212 = vst.msk [vmem:[#allocation8 + $0x90] sm:$0xff] %vm4145_vm15, %v5203_v13  ;;  %v9119_v19 = vpack.c.bf16 %v5329_v31, %v5328_v1  ;;  %v7509_v1 = vld [vmem:[%s13201_s9 + $0x90] sm:$0xff] }
 0x750   : > { %v5229_v44 = vpop.permute.xlu0 %5228  ;;  %v5349_v10 = vld [vmem:[#allocation8 + $0x108] sm:$0xff] }
 0x751   : > { %5237 = vst.msk [vmem:[#allocation8 + $0xb8] sm:$0xff] %vm4145_vm15, %v5229_v44  ;;  %v5227_v50 = vpop.permute.xlu1 %5226  ;;  %v5348_v8 = vld [vmem:[#allocation8 + $0x100] sm:$0xff]  ;;  %v5314_v44 = vld [vmem:[%s13199_s7 + $0x20] sm:$0xff] }
 0x752   : > { %5236 = vst.msk [vmem:[#allocation8 + $0xb0] sm:$0xff] %vm4145_vm15, %v5227_v50  ;;  %v9125_v49 = vpack.c.bf16 %v5349_v10, %v5348_v8  ;;  %v5530_v10 = vld [vmem:[%s13201_s9] sm:$0xff]  ;;  %v5531_v50 = vld [vmem:[%s13201_s9 + $0x8] sm:$0xff]  ;;  %v9560_v8 = vmov 0.0|0.0  }
 0x754   : > { %v5133_v17 = vpop.permute.xlu0 %5132  ;;  %9126 = vmatprep.subr.bf16.mxu1 %v9125_v49  ;;  %v5335_v45 = vld [vmem:[#allocation8 + $0x98] sm:$0xff] }
 0x755   : > { %5141 = vst.msk [vmem:[#allocation8 + $0x38] sm:$0xff] %vm4145_vm15, %v5133_v17  ;;  %9128 = vmatpush3.bf16.msra.mxu1 %v9125_v49  ;;  %v5131_v63 = vpop.permute.xlu1 %5130  ;;  %v5334_v9 = vld [vmem:[#allocation8 + $0x90] sm:$0xff]  ;;  %v5313_v49 = vld [vmem:[%s13199_s7 + $0x18] sm:$0xff]  ;;  %v5315_v17 = vld [vmem:[%s13199_s7 + $0x28] sm:$0xff] }
 0x756   : > { %5140 = vst.msk [vmem:[#allocation8 + $0x30] sm:$0xff] %vm4145_vm15, %v5131_v63  ;;  %v9097_v23 = vpack.c.bf16 %v5335_v45, %v5334_v9  ;;  %v9134_v45 = vpack.c.bf16 %v5531_v50, %v5530_v10  ;;  %v9137_v63 = vpack.c.bf16 %v5533_v0, %v5532_v26  ;;  %v5534_v9 = vld [vmem:[%s13201_s9 + $0x20] sm:$0xff]  ;;  %v7522_v50 = vld [vmem:[%s13201_s9 + $0xe8] sm:$0xff]  ;;  %v7524_v26 = vld [vmem:[%s13201_s9 + $0xf8] sm:$0xff] }
 0x757   : > { %v9140_v14 = vpack.c.bf16 %v5535_v7, %v5534_v9  ;;  %v7521_v10 = vld [vmem:[%s13201_s9 + $0xe0] sm:$0xff]  ;;  %v7526_v9 = vld [vmem:[%s13201_s9 + $0x108] sm:$0xff] }
 0x758   : > { %v5253_v62 = vpop.permute.xlu0 %5252  ;;  %9098 = vmatprep.subr.bf16.mxu0 %v9097_v23  ;;  %v5339_v18 = vld [vmem:[#allocation8 + $0xb8] sm:$0xff]  ;;  %v5536_v23 = vld [vmem:[%s13201_s9 + $0x30] sm:$0xff] }
 0x759   : > { %5261 = vst.msk [vmem:[#allocation8 + $0xd8] sm:$0xff] %vm4145_vm15, %v5253_v62  ;;  %v5251_v22 = vpop.permute.xlu1 %5250  ;;  %9100 = vmatpush3.bf16.msra.mxu0 %v9099_v60  ;;  %v5338_v33 = vld [vmem:[#allocation8 + $0xb0] sm:$0xff]  ;;  %v5537_v60 = vld [vmem:[%s13201_s9 + $0x38] sm:$0xff] }
 0x75a   : > { %5260 = vst.msk [vmem:[#allocation8 + $0xd0] sm:$0xff] %vm4145_vm15, %v5251_v22  ;;  %9102 = vmatprep.subr.bf16.mxu0 %v9101_v57  ;;  %v9105_v2 = vpack.c.bf16 %v5339_v18, %v5338_v33  ;;  %v9143_v62 = vpack.c.bf16 %v5537_v60, %v5536_v23  ;;  %v5538_v57 = vld [vmem:[%s13201_s9 + $0x40] sm:$0xff]  ;;  %v5540_v22 = vld [vmem:[%s13201_s9 + $0x50] sm:$0xff]  ;;  %v5541_v33 = vld [vmem:[%s13201_s9 + $0x58] sm:$0xff] }
 0x75b   : > { %v9146_v24 = vpack.c.bf16 %v5539_v25, %v5538_v57  ;;  %v9149_v18 = vpack.c.bf16 %v5541_v33, %v5540_v22  ;;  %v7528_v23 = vld [vmem:[%s13201_s9 + $0x118] sm:$0xff]  ;;  %v7530_v57 = vld [vmem:[%s13201_s9 + $0x128] sm:$0xff]  ;;  %v7535_v22 = vld [vmem:[%s13201_s9 + $0x140] sm:$0xff] }
 0x75c   : > { %v5157_v32 = vpop.permute.xlu0 %5156  ;;  %v5323_v41 = vld [vmem:[#allocation8 + $0x38] sm:$0xff]  ;;  %v7531_v33 = vld [vmem:[%s13201_s9 + $0x130] sm:$0x3] }
 0x75d   : > { %5165 = vst.msk [vmem:[#allocation8 + $0x58] sm:$0xff] %vm4145_vm15, %v5157_v32  ;;  %v5155_v37 = vpop.permute.xlu1 %5154  ;;  %9104 = vmatpush3.bf16.msra.mxu0 %v9103_v59  ;;  %v5322_v43 = vld [vmem:[#allocation8 + $0x30] sm:$0xff] }
 0x75e   : > { %5164 = vst.msk [vmem:[#allocation8 + $0x50] sm:$0xff] %vm4145_vm15, %v5155_v37  ;;  %9106 = vmatprep.subr.bf16.mxu0 %v9105_v2  ;;  %v9107_v52 = vpack.c.bf16 %v5323_v41, %v5322_v43  ;;  %v5542_v59 = vld [vmem:[%s13201_s9 + $0x60] sm:$0x3] }
 0x760   : > { %v5277_v12 = vpop.permute.xlu0 %5276  ;;  %v5343_v56 = vld [vmem:[#allocation8 + $0xd8] sm:$0xff] }
 0x761   : > { %5285 = vst.msk [vmem:[#allocation8 + $0xf8] sm:$0xff] %vm4145_vm15, %v5277_v12  ;;  %v5275_v21 = vpop.permute.xlu1 %5274  ;;  %9108 = vmatpush3.bf16.msra.mxu0 %v9107_v52  ;;  %v5342_v11 = vld [vmem:[#allocation8 + $0xd0] sm:$0xff] }
 0x762   : > { %5284 = vst.msk [vmem:[#allocation8 + $0xf0] sm:$0xff] %vm4145_vm15, %v5275_v21  ;;  %9110 = vmatprep.subr.bf16.mxu0 %v9109_v29  ;;  %v9113_v34 = vpack.c.bf16 %v5343_v56, %v5342_v11 }
 0x764   : > { %v5181_v42 = vpop.permute.xlu0 %5180  ;;  %v5327_v51 = vld [vmem:[#allocation8 + $0x58] sm:$0xff] }
 0x765   : > { %5189 = vst.msk [vmem:[#allocation8 + $0x78] sm:$0xff] %vm4145_vm15, %v5181_v42  ;;  %v5179_v38 = vpop.permute.xlu1 %5178  ;;  %9112 = vmatpush3.bf16.msra.mxu0 %v9111_v47  ;;  %v5326_v55 = vld [vmem:[#allocation8 + $0x50] sm:$0xff] }
 0x766   : > { %5188 = vst.msk [vmem:[#allocation8 + $0x70] sm:$0xff] %vm4145_vm15, %v5179_v38  ;;  %9114 = vmatprep.subr.bf16.mxu0 %v9113_v34  ;;  %v9115_v3 = vpack.c.bf16 %v5327_v51, %v5326_v55  ;;  %v7504_v34 = vld [vmem:[%s13201_s9 + $0x68] sm:$0xff]  ;;  %v7505_v51 = vld [vmem:[%s13201_s9 + $0x70] sm:$0xff] }
 0x767   : > { %v9152_v55 = vpack.c.bf16 %v7505_v51, %v7504_v34  ;;  %v7546_v34 = vld [vmem:[%s13201_s9 + $0x198] sm:$0x3] }
 0x768   : > { %v5301_v48 = vpop.permute.xlu0 %5300  ;;  %v5347_v4 = vld [vmem:[#allocation8 + $0xf8] sm:$0xff] }
 0x769   : > { %5309 = vst.msk [vmem:[#allocation8 + $0x118] sm:$0xff] %vm4145_vm15, %v5301_v48  ;;  %v5299_v54 = vpop.permute.xlu1 %5298  ;;  %9116 = vmatpush3.bf16.msra.mxu0 %v9115_v3  ;;  %v5346_v39 = vld [vmem:[#allocation8 + $0xf0] sm:$0xff]  ;;  %v9155_v48 = vpack.c.bf16 %v7507_v16, %v7506_v35 }
 0x76a   : > { %5308 = vst.msk [vmem:[#allocation8 + $0x110] sm:$0xff] %vm4145_vm15, %v5299_v54  ;;  %9118 = vmatprep.subr.bf16.mxu0 %v9117_v30  ;;  %v9121_v5 = vpack.c.bf16 %v5347_v4, %v5346_v39  ;;  %v7508_v30 = vld [vmem:[%s13201_s9 + $0x88] sm:$0xff]  ;;  %v7510_v54 = vld [vmem:[%s13201_s9 + $0x98] sm:$0xff]  ;;  %v7511_v39 = vld [vmem:[%s13201_s9 + $0xa0] sm:$0xff] }
 0x76b   : > { %v9158_v31 = vpack.c.bf16 %v7509_v1, %v7508_v30  ;;  %v9161_v4 = vpack.c.bf16 %v7511_v39, %v7510_v54  ;;  %v7555_v1 = vld [vmem:[%s13201_s9 + $0x1d0] sm:$0xff]  ;;  %v7557_v39 = vld [vmem:[%s13201_s9 + $0x1e0] sm:$0xff] }
 0x76c   : > { %v5331_v6 = vld [vmem:[#allocation8 + $0x78] sm:$0xff] }
 0x76d   : > { %9120 = vmatpush3.bf16.msra.mxu0 %v9119_v19  ;;  %v5330_v40 = vld [vmem:[#allocation8 + $0x70] sm:$0xff]  ;;  %v7512_v19 = vld [vmem:[%s13201_s9 + $0xa8] sm:$0xff] }
 0x76e   : > { %9122 = vmatprep.subr.bf16.mxu0 %v9121_v5  ;;  %v9123_v53 = vpack.c.bf16 %v5331_v6, %v5330_v40  ;;  %v7513_v5 = vld [vmem:[%s13201_s9 + $0xb0] sm:$0xff]  ;;  %v7514_v40 = vld [vmem:[%s13201_s9 + $0xb8] sm:$0xff] }
 0x76f   : > { %v9164_v6 = vpack.c.bf16 %v7513_v5, %v7512_v19  ;;  %v7559_v5 = vld [vmem:[%s13201_s9 + $0x1f0] sm:$0xff] }
 0x770   : > { %v5351_v61 = vld [vmem:[#allocation8 + $0x118] sm:$0xff] }
 0x771   : > { %9124 = vmatpush3.bf16.msra.mxu0 %v9123_v53  ;;  %v5350_v28 = vld [vmem:[#allocation8 + $0x110] sm:$0xff] }
 0x772   : > { %v9129_v13 = vpack.c.bf16 %v5351_v61, %v5350_v28  ;;  %9421 = vmatprep.subr.bf16.mxu0 %v9560_v8  ;;  %v7515_v53 = vld [vmem:[%s13201_s9 + $0xc0] sm:$0xff]  ;;  %v7520_v28 = vld [vmem:[%s13201_s9 + $0xd8] sm:$0xff] }
 0x773   : > { %v9167_v61 = vpack.c.bf16 %v7515_v53, %v7514_v40  ;;  %v7564_v53 = vld [vmem:[%s13201_s9 + $0x208] sm:$0xff] }
 0x774   : > { %5435 = vmatmul.mubr.f32.vlgmr.msra.gmra.mrb[32].mxu0 %v5310_v36  ;;  %9130 = vmatprep.subr.bf16.mxu1 %v9129_v13  ;;  %v7519_v36 = vld [vmem:[%s13201_s9 + $0xd0] sm:$0xff] }
 0x775   : > { %9132 = vmatpush3.bf16.msra.mxu1 %v9129_v13  ;;  %5439 = vmatprep.mubr.f32.mxu0 %v5314_v44  ;;  %v7516_v13 = vld [vmem:[%s13201_s9 + $0xc8] sm:$0x3]  ;;  %v9170_v44 = vpack.c.bf16 %v7520_v28, %v7519_v36  ;;  %v7561_v36 = vld [vmem:[%s13201_s9 + $0x200] sm:$0x3] }
 0x776   : > { %9133 = vmatprep.subr.bf16.mxu1 %v9560_v8 }
 0x778   : > { %5440 = vmatmul.mubr.f32.gmra.mrb[34].mxu0 %v5313_v49  ;;  %8084 = vmatmul.mubr.msk.f32.vlgmr.msra.gmra.mrb[12].mxu1 %vm4911_vm10, %v5315_v17  ;;  %v9173_v17 = vpack.c.bf16 %v7522_v50, %v7521_v10 }
 0x779   : > { %9135 = vmatpush3.bf16.msra.mxu1 %v9134_v45  ;;  %8112 = vmatprep.mubr.msk.f32.mxu1 %vm9561_vm1, %v12031_v20  ;;  %v5362_v58 = vpop.permute.xlu0 %5361  ;;  %v7523_v45 = vld [vmem:[%s13201_s9 + $0xf0] sm:$0xff] }
 0x77a   : > { %9136 = vmatprep.subr.bf16.mxu1 %v9560_v8  ;;  %8566 = vmatprep.mubr.msk.f32.mxu0 %vm9561_vm1, %v12031_v20  ;;  %v5357_v37 = vpop.permute.xlu1 %5356  ;;  %v9176_v0 = vpack.c.bf16 %v7524_v26, %v7523_v45  ;;  %v7570_v26 = vld [vmem:[%s13201_s9 + $0x238] sm:$0xff] }
 0x77d   : > { %9138 = vmatpush3.bf16.msra.mxu1 %v9137_v63  ;;  %v7525_v63 = vld [vmem:[%s13201_s9 + $0x100] sm:$0xff] }
 0x77e   : > { %9139 = vmatprep.subr.bf16.mxu1 %v9560_v8  ;;  %v9179_v7 = vpack.c.bf16 %v7526_v9, %v7525_v63  ;;  %v7572_v9 = vld [vmem:[%s13201_s9 + $0x248] sm:$0xff] }
 0x781   : > { %9141 = vmatpush3.bf16.msra.mxu1 %v9140_v14  ;;  %v7527_v14 = vld [vmem:[%s13201_s9 + $0x110] sm:$0xff] }
 0x782   : > { %9142 = vmatprep.subr.bf16.mxu1 %v9560_v8  ;;  %v9182_v60 = vpack.c.bf16 %v7528_v23, %v7527_v14  ;;  %v7574_v23 = vld [vmem:[%s13201_s9 + $0x258] sm:$0xff] }
 0x785   : > { %9144 = vmatpush3.bf16.msra.mxu1 %v9143_v62  ;;  %v7529_v62 = vld [vmem:[%s13201_s9 + $0x120] sm:$0xff] }
 0x786   : > { %9145 = vmatprep.subr.bf16.mxu1 %v9560_v8  ;;  %v9185_v25 = vpack.c.bf16 %v7530_v57, %v7529_v62  ;;  %v7579_v57 = vld [vmem:[%s13201_s9 + $0x270] sm:$0xff] }
 0x789   : > { %9147 = vmatpush3.bf16.msra.mxu1 %v9146_v24  ;;  %v7534_v24 = vld [vmem:[%s13201_s9 + $0x138] sm:$0xff] }
 0x78a   : > { %9148 = vmatprep.subr.bf16.mxu1 %v9560_v8 }
 0x78d   : > { %9150 = vmatpush3.bf16.msra.mxu1 %v9149_v18  ;;  %v9188_v18 = vpack.c.bf16 %v7535_v22, %v7534_v24  ;;  %v7576_v24 = vld [vmem:[%s13201_s9 + $0x268] sm:$0x3] }
 0x78e   : > { %8110 = vmatprep.subr.mxu1 %v12031_v20 }
 0x791   : > { %8111 = vmatpush3.msk.msra.mxu1 %vm5546_vm7, %v5542_v59  ;;  %v7536_v59 = vld [vmem:[%s13201_s9 + $0x148] sm:$0xff] }
 0x792   : > { %9151 = vmatprep.subr.bf16.mxu1 %v9560_v8 }
 0x847   : > { %v7816_v32 = vpop.f32.mrb[32].mxu0 }
 0x848   : > { %v7817_v2 = vpop.f32.mrb[33].mxu0 }
 0x849   : > { %v7818_v41 = vadd.f32 %v7817_v2, %v7816_v32  ;;  %v7537_v32 = vld [vmem:[%s13201_s9 + $0x150] sm:$0xff] }
 0x84b   : > { %v7819_v43 = vpop.f32.mrb[34].mxu0  ;;  %v8085_v27 = vpop.f32.mrb[12].mxu1  ;;  %v5437_v46 = vadd.f32 %v7818_v41, %v5357_v37  ;;  %v9191_v41 = vpack.c.bf16 %v7537_v32, %v7536_v59  ;;  %v7538_v37 = vld [vmem:[%s13201_s9 + $0x158] sm:$0xff] }
 0x84c   : > { %v7820_v52 = vpop.f32.mrb[35].mxu0  ;;  %v5511_v12 = vpop.f32.mrb[13].mxu1 }
 0x84d   : > { %v7821_v29 = vadd.f32 %v7820_v52, %v7819_v43  ;;  %v5512_v15 = vadd.f32 %v5511_v12, %v5437_v46  ;;  %v7539_v43 = vld [vmem:[%s13201_s9 + $0x160] sm:$0xff]  ;;  %v7540_v46 = vld [vmem:[%s13201_s9 + $0x168] sm:$0xff]  ;;  %v7541_v52 = vld [vmem:[%s13201_s9 + $0x170] sm:$0xff] }
 0x84e   : > { %v9197_v12 = vpack.c.bf16 %v7541_v52, %v7540_v46  ;;  %v7587_v52 = vld [vmem:[%s13201_s9 + $0x2b0] sm:$0xff] }
 0x84f   : > { %v5442_v21 = vadd.f32 %v7821_v29, %v5362_v58  ;;  %vm5520_vm5 = vcmp.gt.f32.partialorder %v5512_v15, 0.0  ;;  %v5522_v11 = vmul.f32 0.01, %v5512_v15  ;;  %v7542_v29 = vld [vmem:[%s13201_s9 + $0x178] sm:$0xff] }
 0x851   : > { %v5517_v56 = vadd.f32 %v8085_v27, %v5442_v21  ;;  %v5524_v47 = vsel %vm5520_vm5, %v5512_v15, %v5522_v11  ;;  %v9194_v27 = vpack.c.bf16 %v7539_v43, %v7538_v37  ;;  %v7543_v15 = vld [vmem:[%s13201_s9 + $0x180] sm:$0xff]  ;;  %v7544_v21 = vld [vmem:[%s13201_s9 + $0x188] sm:$0xff]  ;;  %v7545_v11 = vld [vmem:[%s13201_s9 + $0x190] sm:$0xff] }
 0x852   : > { %5526 = vst.msk [vmem:[#allocation9] sm:$0xff] %vm4145_vm15, %v5524_v47  ;;  %v9200_v58 = vpack.c.bf16 %v7543_v15, %v7542_v29  ;;  %v7549_v47 = vld [vmem:[%s13201_s9 + $0x1a0] sm:$0xff] }
 0x853   : > { %vm5521_vm6 = vcmp.gt.f32.partialorder %v5517_v56, 0.0  ;;  %v5523_v42 = vmul.f32 0.01, %v5517_v56  ;;  %v7585_v43 = vld [vmem:[%s13201_s9 + $0x2a0] sm:$0xff] }
 0x854   : > { %v7589_v15 = vld [vmem:[%s13201_s9 + $0x2c0] sm:$0xff] }
 0x855   : > { %v5525_v38 = vsel %vm5521_vm6, %v5517_v56, %v5523_v42  ;;  %v9203_v56 = vpack.c.bf16 %v7545_v11, %v7544_v21  ;;  %v7550_v42 = vld [vmem:[%s13201_s9 + $0x1a8] sm:$0xff]  ;;  %v7594_v11 = vld [vmem:[%s13201_s9 + $0x2d8] sm:$0xff] }
 0x856   : > { %5527 = vst.msk [vmem:[#allocation9 + $0x8] sm:$0xff] %vm4145_vm15, %v5525_v38  ;;  %v9206_v51 = vpack.c.bf16 %v7550_v42, %v7549_v47  ;;  %v7551_v38 = vld [vmem:[%s13201_s9 + $0x1b0] sm:$0xff] }
 0x857   : > { %v7591_v47 = vld [vmem:[%s13201_s9 + $0x2d0] sm:$0x3] }
 0x859   : > { %v5529_v3 = vld [vmem:[#allocation9] sm:$0x1]  ;;  %v5621_v49 = vld [vmem:[#allocation9 + $0x1] sm:$0x1]  ;;  %v5713_v2 = vld [vmem:[#allocation9 + $0x2] sm:$0x1] }
 0x85a   : > { %8113 = vmatmul.mubr.msk.f32.vlgmr.msra.gmra.mrb[14].mxu1 %vm4145_vm15, %v5529_v3  ;;  %v5805_v35 = vld [vmem:[#allocation9 + $0x3] sm:$0x1]  ;;  %v7553_v3 = vld [vmem:[%s13201_s9 + $0x1c0] sm:$0xff]  ;;  %v5897_v10 = vld [vmem:[#allocation9 + $0x4] sm:$0x1] }
 0x85b   : > { %9153 = vmatpush3.bf16.msra.mxu1 %v9152_v55  ;;  %8141 = vmatprep.mubr.msk.f32.mxu1 %vm9561_vm1, %v12031_v20  ;;  %v7552_v55 = vld [vmem:[%s13201_s9 + $0x1b8] sm:$0xff]  ;;  %v5989_v59 = vld [vmem:[#allocation9 + $0x5] sm:$0x1] }
 0x85c   : > { %9154 = vmatprep.subr.bf16.mxu1 %v9560_v8  ;;  %v9209_v16 = vpack.c.bf16 %v7552_v55, %v7551_v38  ;;  %v6081_v38 = vld [vmem:[#allocation9 + $0x6] sm:$0x1] }
 0x85f   : > { %9156 = vmatpush3.bf16.msra.mxu1 %v9155_v48  ;;  %v7554_v48 = vld [vmem:[%s13201_s9 + $0x1c8] sm:$0xff] }
 0x860   : > { %9157 = vmatprep.subr.bf16.mxu1 %v9560_v8  ;;  %v9212_v30 = vpack.c.bf16 %v7554_v48, %v7553_v3  ;;  %v7600_v48 = vld [vmem:[%s13201_s9 + $0x308] sm:$0xff] }
 0x863   : > { %9159 = vmatpush3.bf16.msra.mxu1 %v9158_v31  ;;  %v7556_v31 = vld [vmem:[%s13201_s9 + $0x1d8] sm:$0xff] }
 0x864   : > { %9160 = vmatprep.subr.bf16.mxu1 %v9560_v8  ;;  %v9215_v54 = vpack.c.bf16 %v7556_v31, %v7555_v1  ;;  %v7602_v31 = vld [vmem:[%s13201_s9 + $0x318] sm:$0xff] }
 0x867   : > { %9162 = vmatpush3.bf16.msra.mxu1 %v9161_v4  ;;  %v7558_v4 = vld [vmem:[%s13201_s9 + $0x1e8] sm:$0xff] }
 0x868   : > { %9163 = vmatprep.subr.bf16.mxu1 %v9560_v8  ;;  %v9218_v19 = vpack.c.bf16 %v7558_v4, %v7557_v39  ;;  %v7604_v4 = vld [vmem:[%s13201_s9 + $0x328] sm:$0xff] }
 0x86b   : > { %9165 = vmatpush3.bf16.msra.mxu1 %v9164_v6  ;;  %v7560_v6 = vld [vmem:[%s13201_s9 + $0x1f8] sm:$0xff] }
 0x86c   : > { %9166 = vmatprep.subr.bf16.mxu1 %v9560_v8  ;;  %v9221_v40 = vpack.c.bf16 %v7560_v6, %v7559_v5  ;;  %v7609_v6 = vld [vmem:[%s13201_s9 + $0x340] sm:$0xff] }
 0x86f   : > { %9168 = vmatpush3.bf16.msra.mxu1 %v9167_v61  ;;  %v7565_v61 = vld [vmem:[%s13201_s9 + $0x210] sm:$0xff] }
 0x870   : > { %8139 = vmatprep.subr.mxu1 %v12031_v20  ;;  %v9224_v28 = vpack.c.bf16 %v7565_v61, %v7564_v53  ;;  %v7606_v53 = vld [vmem:[%s13201_s9 + $0x338] sm:$0x3] }
 0x873   : > { %8140 = vmatpush3.msk.msra.mxu1 %vm5546_vm7, %v7516_v13  ;;  %v7566_v13 = vld [vmem:[%s13201_s9 + $0x218] sm:$0xff] }
 0x874   : > { %8142 = vmatmul.mubr.msk.f32.vlgmr.msra.gmra.mrb[14].mxu1 %vm4145_vm15, %v5621_v49  ;;  %9169 = vmatprep.subr.bf16.mxu1 %v9560_v8  ;;  %v7568_v49 = vld [vmem:[%s13201_s9 + $0x228] sm:$0xff] }
 0x875   : > { %9171 = vmatpush3.bf16.msra.mxu1 %v9170_v44  ;;  %8170 = vmatprep.mubr.msk.f32.mxu1 %vm9561_vm1, %v12031_v20  ;;  %v7567_v44 = vld [vmem:[%s13201_s9 + $0x220] sm:$0xff] }
 0x876   : > { %9172 = vmatprep.subr.bf16.mxu1 %v9560_v8  ;;  %v9227_v50 = vpack.c.bf16 %v7567_v44, %v7566_v13  ;;  %v6173_v13 = vld [vmem:[#allocation9 + $0x7] sm:$0x1] }
 0x879   : > { %9174 = vmatpush3.bf16.msra.mxu1 %v9173_v17  ;;  %v7569_v17 = vld [vmem:[%s13201_s9 + $0x230] sm:$0xff] }
 0x87a   : > { %9175 = vmatprep.subr.bf16.mxu1 %v9560_v8  ;;  %v9230_v45 = vpack.c.bf16 %v7569_v17, %v7568_v49  ;;  %v7615_v17 = vld [vmem:[%s13201_s9 + $0x370] sm:$0xff] }
 0x87d   : > { %9177 = vmatpush3.bf16.msra.mxu1 %v9176_v0  ;;  %v7571_v0 = vld [vmem:[%s13201_s9 + $0x240] sm:$0xff] }
 0x87e   : > { %9178 = vmatprep.subr.bf16.mxu1 %v9560_v8  ;;  %v9233_v63 = vpack.c.bf16 %v7571_v0, %v7570_v26  ;;  %v7617_v0 = vld [vmem:[%s13201_s9 + $0x380] sm:$0xff] }
 0x881   : > { %9180 = vmatpush3.bf16.msra.mxu1 %v9179_v7  ;;  %v7573_v7 = vld [vmem:[%s13201_s9 + $0x250] sm:$0xff] }
 0x882   : > { %9181 = vmatprep.subr.bf16.mxu1 %v9560_v8  ;;  %v9236_v14 = vpack.c.bf16 %v7573_v7, %v7572_v9  ;;  %v7619_v7 = vld [vmem:[%s13201_s9 + $0x390] sm:$0xff] }
 0x885   : > { %9183 = vmatpush3.bf16.msra.mxu1 %v9182_v60  ;;  %v7575_v60 = vld [vmem:[%s13201_s9 + $0x260] sm:$0xff] }
 0x886   : > { %9184 = vmatprep.subr.bf16.mxu1 %v9560_v8  ;;  %v9239_v62 = vpack.c.bf16 %v7575_v60, %v7574_v23  ;;  %v7624_v60 = vld [vmem:[%s13201_s9 + $0x3a8] sm:$0xff] }
 0x889   : > { %9186 = vmatpush3.bf16.msra.mxu1 %v9185_v25  ;;  %v7580_v25 = vld [vmem:[%s13201_s9 + $0x278] sm:$0xff] }
 0x88a   : > { %8168 = vmatprep.subr.mxu1 %v12031_v20  ;;  %v9242_v22 = vpack.c.bf16 %v7580_v25, %v7579_v57  ;;  %v7621_v57 = vld [vmem:[%s13201_s9 + $0x3a0] sm:$0x3] }
 0x88d   : > { %8169 = vmatpush3.msk.msra.mxu1 %vm5546_vm7, %v7531_v33  ;;  %v7581_v33 = vld [vmem:[%s13201_s9 + $0x280] sm:$0xff] }
 0x88e   : > { %8171 = vmatmul.mubr.msk.f32.vlgmr.msra.gmra.mrb[14].mxu1 %vm4145_vm15, %v5713_v2  ;;  %9187 = vmatprep.subr.bf16.mxu1 %v9560_v8  ;;  %v7583_v2 = vld [vmem:[%s13201_s9 + $0x290] sm:$0xff] }
 0x88f   : > { %9189 = vmatpush3.bf16.msra.mxu1 %v9188_v18  ;;  %8199 = vmatprep.mubr.msk.f32.mxu1 %vm9561_vm1, %v12031_v20  ;;  %v7582_v18 = vld [vmem:[%s13201_s9 + $0x288] sm:$0xff] }
 0x890   : > { %9190 = vmatprep.subr.bf16.mxu1 %v9560_v8  ;;  %v9245_v32 = vpack.c.bf16 %v7582_v18, %v7581_v33  ;;  %v6265_v33 = vld [vmem:[#allocation9 + $0x8] sm:$0x1] }
 0x893   : > { %9192 = vmatpush3.bf16.msra.mxu1 %v9191_v41  ;;  %v7584_v41 = vld [vmem:[%s13201_s9 + $0x298] sm:$0xff] }
 0x894   : > { %9193 = vmatprep.subr.bf16.mxu1 %v9560_v8  ;;  %v9248_v37 = vpack.c.bf16 %v7584_v41, %v7583_v2  ;;  %v7630_v41 = vld [vmem:[%s13201_s9 + $0x3d8] sm:$0xff] }
 0x897   : > { %9195 = vmatpush3.bf16.msra.mxu1 %v9194_v27  ;;  %v7586_v27 = vld [vmem:[%s13201_s9 + $0x2a8] sm:$0xff] }
 0x898   : > { %9196 = vmatprep.subr.bf16.mxu1 %v9560_v8  ;;  %v9251_v46 = vpack.c.bf16 %v7586_v27, %v7585_v43  ;;  %v7632_v27 = vld [vmem:[%s13201_s9 + $0x3e8] sm:$0xff] }
 0x89b   : > { %9198 = vmatpush3.bf16.msra.mxu1 %v9197_v12  ;;  %v7588_v12 = vld [vmem:[%s13201_s9 + $0x2b8] sm:$0xff] }
 0x89c   : > { %9199 = vmatprep.subr.bf16.mxu1 %v9560_v8  ;;  %v9254_v29 = vpack.c.bf16 %v7588_v12, %v7587_v52  ;;  %v7634_v12 = vld [vmem:[%s13201_s9 + $0x3f8] sm:$0xff] }
 0x89f   : > { %9201 = vmatpush3.bf16.msra.mxu1 %v9200_v58  ;;  %v7590_v58 = vld [vmem:[%s13201_s9 + $0x2c8] sm:$0xff] }
 0x8a0   : > { %9202 = vmatprep.subr.bf16.mxu1 %v9560_v8  ;;  %v9257_v21 = vpack.c.bf16 %v7590_v58, %v7589_v15  ;;  %v7639_v58 = vld [vmem:[%s13201_s9 + $0x410] sm:$0xff] }
 0x8a3   : > { %9204 = vmatpush3.bf16.msra.mxu1 %v9203_v56  ;;  %v7595_v56 = vld [vmem:[%s13201_s9 + $0x2e0] sm:$0xff] }
 0x8a4   : > { %8197 = vmatprep.subr.mxu1 %v12031_v20  ;;  %v9260_v42 = vpack.c.bf16 %v7595_v56, %v7594_v11  ;;  %v7636_v11 = vld [vmem:[%s13201_s9 + $0x408] sm:$0x3] }
 0x8a7   : > { %8198 = vmatpush3.msk.msra.mxu1 %vm5546_vm7, %v7546_v34  ;;  %v7596_v34 = vld [vmem:[%s13201_s9 + $0x2e8] sm:$0xff] }
 0x8a8   : > { %8200 = vmatmul.mubr.msk.f32.vlgmr.msra.gmra.mrb[14].mxu1 %vm4145_vm15, %v5805_v35  ;;  %9205 = vmatprep.subr.bf16.mxu1 %v9560_v8  ;;  %v7598_v35 = vld [vmem:[%s13201_s9 + $0x2f8] sm:$0xff] }
 0x8a9   : > { %9207 = vmatpush3.bf16.msra.mxu1 %v9206_v51  ;;  %8228 = vmatprep.mubr.msk.f32.mxu1 %vm9561_vm1, %v12031_v20  ;;  %v7597_v51 = vld [vmem:[%s13201_s9 + $0x2f0] sm:$0xff] }
 0x8aa   : > { %9208 = vmatprep.subr.bf16.mxu1 %v9560_v8  ;;  %v9263_v55 = vpack.c.bf16 %v7597_v51, %v7596_v34  ;;  %v6357_v34 = vld [vmem:[#allocation9 + $0x9] sm:$0x1] }
 0x8ad   : > { %9210 = vmatpush3.bf16.msra.mxu1 %v9209_v16  ;;  %v7599_v16 = vld [vmem:[%s13201_s9 + $0x300] sm:$0xff] }
 0x8ae   : > { %9211 = vmatprep.subr.bf16.mxu1 %v9560_v8  ;;  %v9266_v3 = vpack.c.bf16 %v7599_v16, %v7598_v35  ;;  %v7645_v16 = vld [vmem:[%s13201_s9 + $0x440] sm:$0xff] }
 0x8b1   : > { %9213 = vmatpush3.bf16.msra.mxu1 %v9212_v30  ;;  %v7601_v30 = vld [vmem:[%s13201_s9 + $0x310] sm:$0xff] }
 0x8b2   : > { %9214 = vmatprep.subr.bf16.mxu1 %v9560_v8  ;;  %v9269_v1 = vpack.c.bf16 %v7601_v30, %v7600_v48  ;;  %v7647_v30 = vld [vmem:[%s13201_s9 + $0x450] sm:$0xff] }
 0x8b5   : > { %9216 = vmatpush3.bf16.msra.mxu1 %v9215_v54  ;;  %v7603_v54 = vld [vmem:[%s13201_s9 + $0x320] sm:$0xff] }
 0x8b6   : > { %9217 = vmatprep.subr.bf16.mxu1 %v9560_v8  ;;  %v9272_v39 = vpack.c.bf16 %v7603_v54, %v7602_v31  ;;  %v7649_v54 = vld [vmem:[%s13201_s9 + $0x460] sm:$0xff] }
 0x8b9   : > { %9219 = vmatpush3.bf16.msra.mxu1 %v9218_v19  ;;  %v7605_v19 = vld [vmem:[%s13201_s9 + $0x330] sm:$0xff] }
 0x8ba   : > { %9220 = vmatprep.subr.bf16.mxu1 %v9560_v8  ;;  %v9275_v5 = vpack.c.bf16 %v7605_v19, %v7604_v4  ;;  %v7654_v19 = vld [vmem:[%s13201_s9 + $0x478] sm:$0xff] }
 0x8bd   : > { %9222 = vmatpush3.bf16.msra.mxu1 %v9221_v40  ;;  %v7610_v40 = vld [vmem:[%s13201_s9 + $0x348] sm:$0xff] }
 0x8be   : > { %8226 = vmatprep.subr.mxu1 %v12031_v20  ;;  %v9278_v61 = vpack.c.bf16 %v7610_v40, %v7609_v6  ;;  %v7651_v6 = vld [vmem:[%s13201_s9 + $0x470] sm:$0x3] }
 0x8c1   : > { %8227 = vmatpush3.msk.msra.mxu1 %vm5546_vm7, %v7561_v36  ;;  %v7611_v36 = vld [vmem:[%s13201_s9 + $0x350] sm:$0xff] }
 0x8c2   : > { %8229 = vmatmul.mubr.msk.f32.vlgmr.msra.gmra.mrb[14].mxu1 %vm4145_vm15, %v5897_v10  ;;  %9223 = vmatprep.subr.bf16.mxu1 %v9560_v8  ;;  %v7613_v10 = vld [vmem:[%s13201_s9 + $0x360] sm:$0xff] }
 0x8c3   : > { %9225 = vmatpush3.bf16.msra.mxu1 %v9224_v28  ;;  %8257 = vmatprep.mubr.msk.f32.mxu1 %vm9561_vm1, %v12031_v20  ;;  %v7612_v28 = vld [vmem:[%s13201_s9 + $0x358] sm:$0xff] }
 0x8c4   : > { %9226 = vmatprep.subr.bf16.mxu1 %v9560_v8  ;;  %v9281_v44 = vpack.c.bf16 %v7612_v28, %v7611_v36  ;;  %v6449_v36 = vld [vmem:[#allocation9 + $0xa] sm:$0x1] }
 0x8c7   : > { %9228 = vmatpush3.bf16.msra.mxu1 %v9227_v50  ;;  %v7614_v50 = vld [vmem:[%s13201_s9 + $0x368] sm:$0xff] }
 0x8c8   : > { %9229 = vmatprep.subr.bf16.mxu1 %v9560_v8  ;;  %v9284_v49 = vpack.c.bf16 %v7614_v50, %v7613_v10  ;;  %v7004_v10 = vld [vmem:[%s13203_s11] sm:$0xff]  ;;  %v7005_v50 = vld [vmem:[%s13203_s11 + $0x8] sm:$0xff] }
 0x8cb   : > { %9231 = vmatpush3.bf16.msra.mxu1 %v9230_v45  ;;  %v7616_v45 = vld [vmem:[%s13201_s9 + $0x378] sm:$0xff] }
 0x8cc   : > { %9232 = vmatprep.subr.bf16.mxu1 %v9560_v8  ;;  %v9287_v26 = vpack.c.bf16 %v7616_v45, %v7615_v17  ;;  %v9422_v17 = vpack.c.bf16 %v7005_v50, %v7004_v10  ;;  %v7007_v45 = vld [vmem:[%s13203_s11 + $0x18] sm:$0xff]  ;;  %v7701_v50 = vld [vmem:[%s13201_s9 + $0x5c0] sm:$0xff] }
 0x8ce   : > { %9423 = vmatpush3.bf16.msra.mxu0 %v9422_v17  ;;  %v6725_v17 = vld [vmem:[#allocation9 + $0xd] sm:$0x1] }
 0x8cf   : > { %9234 = vmatpush3.bf16.msra.mxu1 %v9233_v63  ;;  %v7618_v63 = vld [vmem:[%s13201_s9 + $0x388] sm:$0xff]  ;;  %9424 = vmatprep.subr.bf16.mxu0 %v9560_v8 }
 0x8d0   : > { %9235 = vmatprep.subr.bf16.mxu1 %v9560_v8  ;;  %v9290_v9 = vpack.c.bf16 %v7618_v63, %v7617_v0  ;;  %v7660_v0 = vld [vmem:[%s13201_s9 + $0x4a8] sm:$0xff] }
 0x8d3   : > { %9237 = vmatpush3.bf16.msra.mxu1 %v9236_v14  ;;  %v7620_v14 = vld [vmem:[%s13201_s9 + $0x398] sm:$0xff] }
 0x8d4   : > { %9238 = vmatprep.subr.bf16.mxu1 %v9560_v8  ;;  %v9293_v23 = vpack.c.bf16 %v7620_v14, %v7619_v7  ;;  %v7008_v7 = vld [vmem:[%s13203_s11 + $0x20] sm:$0xff]  ;;  %v7009_v14 = vld [vmem:[%s13203_s11 + $0x28] sm:$0xff] }
 0x8d7   : > { %9240 = vmatpush3.bf16.msra.mxu1 %v9239_v62  ;;  %v7625_v62 = vld [vmem:[%s13201_s9 + $0x3b0] sm:$0xff] }
 0x8d8   : > { %8255 = vmatprep.subr.mxu1 %v12031_v20  ;;  %v9296_v25 = vpack.c.bf16 %v7625_v62, %v7624_v60  ;;  %v9428_v60 = vpack.c.bf16 %v7009_v14, %v7008_v7  ;;  %v7662_v62 = vld [vmem:[%s13201_s9 + $0x4b8] sm:$0xff]  ;;  %v7706_v7 = vld [vmem:[%s13201_s9 + $0x5e8] sm:$0xff] }
 0x8db   : > { %8256 = vmatpush3.msk.msra.mxu1 %vm5546_vm7, %v7576_v24  ;;  %v7626_v24 = vld [vmem:[%s13201_s9 + $0x3b8] sm:$0xff] }
 0x8dc   : > { %8258 = vmatmul.mubr.msk.f32.vlgmr.msra.gmra.mrb[14].mxu1 %vm4145_vm15, %v5989_v59  ;;  %9241 = vmatprep.subr.bf16.mxu1 %v9560_v8  ;;  %v7628_v59 = vld [vmem:[%s13201_s9 + $0x3c8] sm:$0xff] }
 0x8dd   : > { %9243 = vmatpush3.bf16.msra.mxu1 %v9242_v22  ;;  %8286 = vmatprep.mubr.msk.f32.mxu1 %vm9561_vm1, %v12031_v20  ;;  %v7627_v22 = vld [vmem:[%s13201_s9 + $0x3c0] sm:$0xff] }
 0x8de   : > { %9244 = vmatprep.subr.bf16.mxu1 %v9560_v8  ;;  %v9299_v18 = vpack.c.bf16 %v7627_v22, %v7626_v24  ;;  %v7664_v24 = vld [vmem:[%s13201_s9 + $0x4c8] sm:$0xff]  ;;  %v7665_v22 = vld [vmem:[%s13201_s9 + $0x4d0] sm:$0xff] }
 0x8e1   : > { %9246 = vmatpush3.bf16.msra.mxu1 %v9245_v32  ;;  %v7629_v32 = vld [vmem:[%s13201_s9 + $0x3d0] sm:$0xff] }
 0x8e2   : > { %9247 = vmatprep.subr.bf16.mxu1 %v9560_v8  ;;  %v9302_v2 = vpack.c.bf16 %v7629_v32, %v7628_v59  ;;  %v7670_v59 = vld [vmem:[%s13201_s9 + $0x4e8] sm:$0xff]  ;;  %v7666_v32 = vld [vmem:[%s13201_s9 + $0x4d8] sm:$0x3] }
 0x8e5   : > { %9249 = vmatpush3.bf16.msra.mxu1 %v9248_v37  ;;  %v7631_v37 = vld [vmem:[%s13201_s9 + $0x3e0] sm:$0xff] }
 0x8e6   : > { %9250 = vmatprep.subr.bf16.mxu1 %v9560_v8  ;;  %v9305_v43 = vpack.c.bf16 %v7631_v37, %v7630_v41  ;;  %v7671_v41 = vld [vmem:[%s13201_s9 + $0x4f0] sm:$0xff]  ;;  %v7672_v37 = vld [vmem:[%s13201_s9 + $0x4f8] sm:$0xff] }
 0x8e9   : > { %9252 = vmatpush3.bf16.msra.mxu1 %v9251_v46  ;;  %v7633_v46 = vld [vmem:[%s13201_s9 + $0x3f0] sm:$0xff] }
 0x8ea   : > { %9253 = vmatprep.subr.bf16.mxu1 %v9560_v8  ;;  %v9308_v52 = vpack.c.bf16 %v7633_v46, %v7632_v27  ;;  %v9353_v27 = vpack.c.bf16 %v7672_v37, %v7671_v41  ;;  %v7673_v46 = vld [vmem:[%s13201_s9 + $0x500] sm:$0xff]  ;;  %v6817_v41 = vld [vmem:[#allocation9 + $0xe] sm:$0x1] }
 0x8ed   : > { %9255 = vmatpush3.bf16.msra.mxu1 %v9254_v29  ;;  %v7635_v29 = vld [vmem:[%s13201_s9 + $0x400] sm:$0xff] }
 0x8ee   : > { %9256 = vmatprep.subr.bf16.mxu1 %v9560_v8  ;;  %v9311_v15 = vpack.c.bf16 %v7635_v29, %v7634_v12  ;;  %v7675_v29 = vld [vmem:[%s13201_s9 + $0x510] sm:$0xff] }
 0x8f1   : > { %9258 = vmatpush3.bf16.msra.mxu1 %v9257_v21  ;;  %v7640_v21 = vld [vmem:[%s13201_s9 + $0x418] sm:$0xff] }
 0x8f2   : > { %8284 = vmatprep.subr.mxu1 %v12031_v20  ;;  %v9314_v56 = vpack.c.bf16 %v7640_v21, %v7639_v58  ;;  %v7677_v21 = vld [vmem:[%s13201_s9 + $0x520] sm:$0xff] }
 0x8f5   : > { %8285 = vmatpush3.msk.msra.mxu1 %vm5546_vm7, %v7591_v47  ;;  %v7641_v47 = vld [vmem:[%s13201_s9 + $0x420] sm:$0xff] }
 0x8f6   : > { %8287 = vmatmul.mubr.msk.f32.vlgmr.msra.gmra.mrb[14].mxu1 %vm4145_vm15, %v6081_v38  ;;  %9259 = vmatprep.subr.bf16.mxu1 %v9560_v8  ;;  %v7643_v38 = vld [vmem:[%s13201_s9 + $0x430] sm:$0xff] }
 0x8f7   : > { %9261 = vmatpush3.bf16.msra.mxu1 %v9260_v42  ;;  %8315 = vmatprep.mubr.msk.f32.mxu1 %vm9561_vm1, %v12031_v20  ;;  %v7642_v42 = vld [vmem:[%s13201_s9 + $0x428] sm:$0xff] }
 0x8f8   : > { %9262 = vmatprep.subr.bf16.mxu1 %v9560_v8  ;;  %v9317_v51 = vpack.c.bf16 %v7642_v42, %v7641_v47  ;;  %v7679_v47 = vld [vmem:[%s13201_s9 + $0x530] sm:$0xff]  ;;  %v7680_v42 = vld [vmem:[%s13201_s9 + $0x538] sm:$0xff] }
 0x8fb   : > { %9264 = vmatpush3.bf16.msra.mxu1 %v9263_v55  ;;  %v7644_v55 = vld [vmem:[%s13201_s9 + $0x438] sm:$0xff] }
 0x8fc   : > { %9265 = vmatprep.subr.bf16.mxu1 %v9560_v8  ;;  %v9320_v35 = vpack.c.bf16 %v7644_v55, %v7643_v38  ;;  %v7685_v38 = vld [vmem:[%s13201_s9 + $0x550] sm:$0xff]  ;;  %v7681_v55 = vld [vmem:[%s13201_s9 + $0x540] sm:$0x3] }
 0x8ff   : > { %9267 = vmatpush3.bf16.msra.mxu1 %v9266_v3  ;;  %v7646_v3 = vld [vmem:[%s13201_s9 + $0x448] sm:$0xff] }
 0x900   : > { %9268 = vmatprep.subr.bf16.mxu1 %v9560_v8  ;;  %v9323_v48 = vpack.c.bf16 %v7646_v3, %v7645_v16  ;;  %v7686_v16 = vld [vmem:[%s13201_s9 + $0x558] sm:$0xff]  ;;  %v7687_v3 = vld [vmem:[%s13201_s9 + $0x560] sm:$0xff] }
 0x903   : > { %9270 = vmatpush3.bf16.msra.mxu1 %v9269_v1  ;;  %v7648_v1 = vld [vmem:[%s13201_s9 + $0x458] sm:$0xff] }
 0x904   : > { %9271 = vmatprep.subr.bf16.mxu1 %v9560_v8  ;;  %v9326_v31 = vpack.c.bf16 %v7648_v1, %v7647_v30  ;;  %v9371_v30 = vpack.c.bf16 %v7687_v3, %v7686_v16  ;;  %v7688_v1 = vld [vmem:[%s13201_s9 + $0x568] sm:$0xff] }
 0x907   : > { %9273 = vmatpush3.bf16.msra.mxu1 %v9272_v39  ;;  %v7650_v39 = vld [vmem:[%s13201_s9 + $0x468] sm:$0xff] }
 0x908   : > { %9274 = vmatprep.subr.bf16.mxu1 %v9560_v8  ;;  %v9329_v4 = vpack.c.bf16 %v7650_v39, %v7649_v54  ;;  %v7690_v39 = vld [vmem:[%s13201_s9 + $0x578] sm:$0xff] }
 0x90b   : > { %9276 = vmatpush3.bf16.msra.mxu1 %v9275_v5  ;;  %v7655_v5 = vld [vmem:[%s13201_s9 + $0x480] sm:$0xff] }
 0x90c   : > { %8313 = vmatprep.subr.mxu1 %v12031_v20  ;;  %v9332_v40 = vpack.c.bf16 %v7655_v5, %v7654_v19  ;;  %v7692_v5 = vld [vmem:[%s13201_s9 + $0x588] sm:$0xff] }
 0x90f   : > { %8314 = vmatpush3.msk.msra.mxu1 %vm5546_vm7, %v7606_v53  ;;  %v7656_v53 = vld [vmem:[%s13201_s9 + $0x488] sm:$0xff] }
 0x910   : > { %8316 = vmatmul.mubr.msk.f32.vlgmr.msra.gmra.mrb[14].mxu1 %vm4145_vm15, %v6173_v13  ;;  %9277 = vmatprep.subr.bf16.mxu1 %v9560_v8  ;;  %v7658_v13 = vld [vmem:[%s13201_s9 + $0x498] sm:$0xff] }
 0x911   : > { %9279 = vmatpush3.bf16.msra.mxu1 %v9278_v61  ;;  %8344 = vmatprep.mubr.msk.f32.mxu1 %vm9561_vm1, %v12031_v20  ;;  %v7657_v61 = vld [vmem:[%s13201_s9 + $0x490] sm:$0xff] }
 0x912   : > { %9280 = vmatprep.subr.bf16.mxu1 %v9560_v8  ;;  %v9335_v28 = vpack.c.bf16 %v7657_v61, %v7656_v53  ;;  %v7694_v53 = vld [vmem:[%s13201_s9 + $0x598] sm:$0xff]  ;;  %v7695_v61 = vld [vmem:[%s13201_s9 + $0x5a0] sm:$0xff] }
 0x915   : > { %9282 = vmatpush3.bf16.msra.mxu1 %v9281_v44  ;;  %v7659_v44 = vld [vmem:[%s13201_s9 + $0x4a0] sm:$0xff] }
 0x916   : > { %9283 = vmatprep.subr.bf16.mxu1 %v9560_v8 }
 0x919   : > { %9285 = vmatpush3.bf16.msra.mxu1 %v9284_v49  ;;  %v7006_v49 = vld [vmem:[%s13203_s11 + $0x10] sm:$0xff] }
 0x91a   : > { %9286 = vmatprep.subr.bf16.mxu1 %v9560_v8  ;;  %v9425_v63 = vpack.c.bf16 %v7007_v45, %v7006_v49  ;;  %v7702_v49 = vld [vmem:[%s13201_s9 + $0x5c8] sm:$0xff] }
 0x91b   : > { %v9389_v45 = vpack.c.bf16 %v7702_v49, %v7701_v50 }
 0x91c   : > { %9426 = vmatpush3.bf16.msra.mxu0 %v9425_v63 }
 0x91d   : > { %9288 = vmatpush3.bf16.msra.mxu1 %v9287_v26  ;;  %v9338_v26 = vpack.c.bf16 %v7659_v44, %v7658_v13  ;;  %9427 = vmatprep.subr.bf16.mxu0 %v9560_v8  ;;  %v7700_v13 = vld [vmem:[%s13201_s9 + $0x5b8] sm:$0xff]  ;;  %v7696_v44 = vld [vmem:[%s13201_s9 + $0x5a8] sm:$0x3] }
 0x91e   : > { %9289 = vmatprep.subr.bf16.mxu1 %v9560_v8 }
 0x920   : > { %9429 = vmatpush3.bf16.msra.mxu0 %v9428_v60  ;;  %v7708_v60 = vld [vmem:[%s13201_s9 + $0x5f8] sm:$0xff] }
 0x921   : > { %9291 = vmatpush3.bf16.msra.mxu1 %v9290_v9  ;;  %v7661_v9 = vld [vmem:[%s13201_s9 + $0x4b0] sm:$0xff]  ;;  %9430 = vmatprep.subr.bf16.mxu0 %v9560_v8 }
 0x922   : > { %9292 = vmatprep.subr.bf16.mxu1 %v9560_v8 }
 0x925   : > { %9294 = vmatpush3.bf16.msra.mxu1 %v9293_v23  ;;  %v9341_v23 = vpack.c.bf16 %v7661_v9, %v7660_v0  ;;  %v7704_v0 = vld [vmem:[%s13201_s9 + $0x5d8] sm:$0xff]  ;;  %v7705_v9 = vld [vmem:[%s13201_s9 + $0x5e0] sm:$0xff] }
 0x926   : > { %8342 = vmatprep.subr.mxu1 %v12031_v20  ;;  %v9395_v14 = vpack.c.bf16 %v7706_v7, %v7705_v9 }
 0x929   : > { %8343 = vmatpush3.msk.msra.mxu1 %vm5546_vm7, %v7621_v57  ;;  %v7663_v57 = vld [vmem:[%s13201_s9 + $0x4c0] sm:$0xff] }
 0x92a   : > { %8345 = vmatmul.mubr.msk.f32.vlgmr.msra.gmra.mrb[14].mxu1 %vm4145_vm15, %v6265_v33  ;;  %9295 = vmatprep.subr.bf16.mxu1 %v9560_v8  ;;  %v9347_v33 = vpack.c.bf16 %v7665_v22, %v7664_v24  ;;  %v7714_v22 = vld [vmem:[%s13201_s9 + $0x618] sm:$0xff] }
 0x92b   : > { %9297 = vmatpush3.bf16.msra.mxu1 %v9296_v25  ;;  %8373 = vmatprep.mubr.msk.f32.mxu1 %vm9561_vm1, %v12031_v20  ;;  %v9344_v25 = vpack.c.bf16 %v7663_v57, %v7662_v62  ;;  %v7709_v57 = vld [vmem:[%s13201_s9 + $0x600] sm:$0xff] }
 0x92c   : > { %9298 = vmatprep.subr.bf16.mxu1 %v9560_v8 }
 0x92f   : > { %9300 = vmatpush3.bf16.msra.mxu1 %v9299_v18  ;;  %v7669_v18 = vld [vmem:[%s13201_s9 + $0x4e0] sm:$0xff] }
 0x930   : > { %9301 = vmatprep.subr.bf16.mxu1 %v9560_v8 }
 0x933   : > { %9303 = vmatpush3.bf16.msra.mxu1 %v9302_v2  ;;  %v9350_v2 = vpack.c.bf16 %v7670_v59, %v7669_v18  ;;  %v7711_v18 = vld [vmem:[%s13201_s9 + $0x610] sm:$0x3] }
 0x934   : > { %9304 = vmatprep.subr.bf16.mxu1 %v9560_v8 }
 0x937   : > { %9306 = vmatpush3.bf16.msra.mxu1 %v9305_v43  ;;  %v6541_v43 = vld [vmem:[#allocation9 + $0xb] sm:$0x1] }
 0x938   : > { %9307 = vmatprep.subr.bf16.mxu1 %v9560_v8 }
 0x93b   : > { %9309 = vmatpush3.bf16.msra.mxu1 %v9308_v52  ;;  %v7674_v52 = vld [vmem:[%s13201_s9 + $0x508] sm:$0xff] }
 0x93c   : > { %9310 = vmatprep.subr.bf16.mxu1 %v9560_v8  ;;  %v9356_v12 = vpack.c.bf16 %v7674_v52, %v7673_v46  ;;  %v7720_v52 = vld [vmem:[%s13201_s9 + $0x648] sm:$0xff] }
 0x93f   : > { %9312 = vmatpush3.bf16.msra.mxu1 %v9311_v15  ;;  %v7676_v15 = vld [vmem:[%s13201_s9 + $0x518] sm:$0xff] }
 0x940   : > { %8371 = vmatprep.subr.mxu1 %v12031_v20  ;;  %v9359_v58 = vpack.c.bf16 %v7676_v15, %v7675_v29  ;;  %v7722_v15 = vld [vmem:[%s13201_s9 + $0x658] sm:$0xff] }
 0x943   : > { %8372 = vmatpush3.msk.msra.mxu1 %vm5546_vm7, %v7636_v11  ;;  %v7678_v11 = vld [vmem:[%s13201_s9 + $0x528] sm:$0xff] }
 0x944   : > { %8374 = vmatmul.mubr.msk.f32.vlgmr.msra.gmra.mrb[14].mxu1 %vm4145_vm15, %v6357_v34  ;;  %9313 = vmatprep.subr.bf16.mxu1 %v9560_v8  ;;  %v9365_v34 = vpack.c.bf16 %v7680_v42, %v7679_v47  ;;  %v7726_v42 = vld [vmem:[%s13201_s9 + $0x678] sm:$0x3] }
 0x945   : > { %9315 = vmatpush3.bf16.msra.mxu1 %v9314_v56  ;;  %8402 = vmatprep.mubr.msk.f32.mxu1 %vm9561_vm1, %v12031_v20  ;;  %v9362_v56 = vpack.c.bf16 %v7678_v11, %v7677_v21  ;;  %v7724_v11 = vld [vmem:[%s13201_s9 + $0x668] sm:$0xff] }
 0x946   : > { %9316 = vmatprep.subr.bf16.mxu1 %v9560_v8 }
 0x949   : > { %9318 = vmatpush3.bf16.msra.mxu1 %v9317_v51  ;;  %v7684_v51 = vld [vmem:[%s13201_s9 + $0x548] sm:$0xff] }
 0x94a   : > { %9319 = vmatprep.subr.bf16.mxu1 %v9560_v8 }
 0x94d   : > { %9321 = vmatpush3.bf16.msra.mxu1 %v9320_v35  ;;  %v9368_v35 = vpack.c.bf16 %v7685_v38, %v7684_v51  ;;  %v7010_v51 = vld [vmem:[%s13203_s11 + $0x30] sm:$0xff] }
 0x94e   : > { %9322 = vmatprep.subr.bf16.mxu1 %v9560_v8 }
 0x951   : > { %9324 = vmatpush3.bf16.msra.mxu1 %v9323_v48  ;;  %v6633_v48 = vld [vmem:[#allocation9 + $0xc] sm:$0x1] }
 0x952   : > { %9325 = vmatprep.subr.bf16.mxu1 %v9560_v8 }
 0x955   : > { %9327 = vmatpush3.bf16.msra.mxu1 %v9326_v31  ;;  %v7689_v31 = vld [vmem:[%s13201_s9 + $0x570] sm:$0xff] }
 0x956   : > { %9328 = vmatprep.subr.bf16.mxu1 %v9560_v8  ;;  %v9374_v54 = vpack.c.bf16 %v7689_v31, %v7688_v1  ;;  %v7087_v31 = vld [vmem:[%s13205_s13] sm:$0x1] }
 0x959   : > { %9330 = vmatpush3.bf16.msra.mxu1 %v9329_v4  ;;  %v7691_v4 = vld [vmem:[%s13201_s9 + $0x580] sm:$0xff] }
 0x95a   : > { %8400 = vmatprep.subr.mxu1 %v12031_v20  ;;  %v9377_v19 = vpack.c.bf16 %v7691_v4, %v7690_v39 }
 0x95d   : > { %8401 = vmatpush3.msk.msra.mxu1 %vm5546_vm7, %v7651_v6  ;;  %v7693_v6 = vld [vmem:[%s13201_s9 + $0x590] sm:$0xff] }
 0x95e   : > { %8403 = vmatmul.mubr.msk.f32.vlgmr.msra.gmra.mrb[14].mxu1 %vm4145_vm15, %v6449_v36  ;;  %9331 = vmatprep.subr.bf16.mxu1 %v9560_v8  ;;  %v9383_v36 = vpack.c.bf16 %v7695_v61, %v7694_v53 }
 0x95f   : > { %9333 = vmatpush3.bf16.msra.mxu1 %v9332_v40  ;;  %8431 = vmatprep.mubr.msk.f32.mxu1 %vm9561_vm1, %v12031_v20  ;;  %v9380_v40 = vpack.c.bf16 %v7693_v6, %v7692_v5  ;;  %v7093_v5 = vld [vmem:[#allocation10] sm:$0x1] }
 0x960   : > { %9334 = vmatprep.subr.bf16.mxu1 %v9560_v8 }
 0x963   : > { %9336 = vmatpush3.bf16.msra.mxu1 %v9335_v28  ;;  %v7699_v28 = vld [vmem:[%s13201_s9 + $0x5b0] sm:$0xff] }
 0x964   : > { %9337 = vmatprep.subr.bf16.mxu1 %v9560_v8  ;;  %v9386_v10 = vpack.c.bf16 %v7700_v13, %v7699_v28 }
 0x967   : > { %9339 = vmatpush3.bf16.msra.mxu1 %v9338_v26  ;;  %v7703_v26 = vld [vmem:[%s13201_s9 + $0x5d0] sm:$0xff] }
 0x968   : > { %9340 = vmatprep.subr.bf16.mxu1 %v9560_v8  ;;  %v9392_v63 = vpack.c.bf16 %v7704_v0, %v7703_v26 }
 0x96b   : > { %9342 = vmatpush3.bf16.msra.mxu1 %v9341_v23  ;;  %v7707_v23 = vld [vmem:[%s13201_s9 + $0x5f0] sm:$0xff] }
 0x96c   : > { %9343 = vmatprep.subr.bf16.mxu1 %v9560_v8  ;;  %v9398_v62 = vpack.c.bf16 %v7708_v60, %v7707_v23 }
 0x96f   : > { %9345 = vmatpush3.bf16.msra.mxu1 %v9344_v25  ;;  %v7710_v25 = vld [vmem:[%s13201_s9 + $0x608] sm:$0xff] }
 0x970   : > { %9346 = vmatprep.subr.bf16.mxu1 %v9560_v8  ;;  %v9401_v24 = vpack.c.bf16 %v7710_v25, %v7709_v57 }
 0x973   : > { %9348 = vmatpush3.bf16.msra.mxu1 %v9347_v33  ;;  %v7715_v33 = vld [vmem:[%s13201_s9 + $0x620] sm:$0xff] }
 0x974   : > { %8429 = vmatprep.subr.mxu1 %v12031_v20  ;;  %v9404_v59 = vpack.c.bf16 %v7715_v33, %v7714_v22 }
 0x977   : > { %8430 = vmatpush3.msk.msra.mxu1 %vm5546_vm7, %v7666_v32  ;;  %v7716_v32 = vld [vmem:[%s13201_s9 + $0x628] sm:$0xff] }
 0x978   : > { %8432 = vmatmul.mubr.msk.f32.vlgmr.msra.gmra.mrb[14].mxu1 %vm4145_vm15, %v6541_v43  ;;  %9349 = vmatprep.subr.bf16.mxu1 %v9560_v8  ;;  %v7718_v43 = vld [vmem:[%s13201_s9 + $0x638] sm:$0xff] }
 0x979   : > { %9351 = vmatpush3.bf16.msra.mxu1 %v9350_v2  ;;  %8460 = vmatprep.mubr.msk.f32.mxu1 %vm9561_vm1, %v12031_v20  ;;  %v7717_v2 = vld [vmem:[%s13201_s9 + $0x630] sm:$0xff] }
 0x97a   : > { %9352 = vmatprep.subr.bf16.mxu1 %v9560_v8  ;;  %v9407_v37 = vpack.c.bf16 %v7717_v2, %v7716_v32 }
 0x97d   : > { %9354 = vmatpush3.bf16.msra.mxu1 %v9353_v27  ;;  %v7719_v27 = vld [vmem:[%s13201_s9 + $0x640] sm:$0xff] }
 0x97e   : > { %9355 = vmatprep.subr.bf16.mxu1 %v9560_v8  ;;  %v9410_v46 = vpack.c.bf16 %v7719_v27, %v7718_v43 }
 0x981   : > { %9357 = vmatpush3.bf16.msra.mxu1 %v9356_v12  ;;  %v7721_v12 = vld [vmem:[%s13201_s9 + $0x650] sm:$0xff] }
 0x982   : > { %9358 = vmatprep.subr.bf16.mxu1 %v9560_v8  ;;  %v9413_v29 = vpack.c.bf16 %v7721_v12, %v7720_v52 }
 0x985   : > { %9360 = vmatpush3.bf16.msra.mxu1 %v9359_v58  ;;  %v7723_v58 = vld [vmem:[%s13201_s9 + $0x660] sm:$0xff] }
 0x986   : > { %9361 = vmatprep.subr.bf16.mxu1 %v9560_v8  ;;  %v9416_v21 = vpack.c.bf16 %v7723_v58, %v7722_v15 }
 0x989   : > { %9363 = vmatpush3.bf16.msra.mxu1 %v9362_v56  ;;  %v7725_v56 = vld [vmem:[%s13201_s9 + $0x670] sm:$0xff] }
 0x98a   : > { %9364 = vmatprep.subr.bf16.mxu1 %v9560_v8  ;;  %v9419_v47 = vpack.c.bf16 %v7725_v56, %v7724_v11 }
 0x98d   : > { %9366 = vmatpush3.bf16.msra.mxu1 %v9365_v34  ;;  %v6909_v34 = vld [vmem:[#allocation9 + $0xf] sm:$0x1] }
 0x98e   : > { %8458 = vmatprep.subr.mxu1 %v12031_v20 }
 0x991   : > { %8459 = vmatpush3.msk.msra.mxu1 %vm5546_vm7, %v7681_v55 }
 0x992   : > { %8461 = vmatmul.mubr.msk.f32.vlgmr.msra.gmra.mrb[14].mxu1 %vm4145_vm15, %v6633_v48  ;;  %9367 = vmatprep.subr.bf16.mxu1 %v9560_v8 }
 0x993   : > { %9369 = vmatpush3.bf16.msra.mxu1 %v9368_v35  ;;  %8489 = vmatprep.mubr.msk.f32.mxu1 %vm9561_vm1, %v12031_v20 }
 0x994   : > { %9370 = vmatprep.subr.bf16.mxu1 %v9560_v8 }
 0x997   : > { %9372 = vmatpush3.bf16.msra.mxu1 %v9371_v30  ;;  %v7012_v30 = vld [vmem:[%s13204_s12] sm:$0x1] }
 0x998   : > { %9373 = vmatprep.subr.bf16.mxu1 %v9560_v8 }
 0x99b   : > { %9375 = vmatpush3.bf16.msra.mxu1 %v9374_v54 }
 0x99c   : > { %9376 = vmatprep.subr.bf16.mxu1 %v9560_v8 }
 0x99f   : > { %9378 = vmatpush3.bf16.msra.mxu1 %v9377_v19 }
 0x9a0   : > { %9379 = vmatprep.subr.bf16.mxu1 %v9560_v8 }
 0x9a3   : > { %9381 = vmatpush3.bf16.msra.mxu1 %v9380_v40 }
 0x9a4   : > { %9382 = vmatprep.subr.bf16.mxu1 %v9560_v8 }
 0x9a7   : > { %9384 = vmatpush3.bf16.msra.mxu1 %v9383_v36 }
 0x9a8   : > { %8487 = vmatprep.subr.mxu1 %v12031_v20 }
 0x9ab   : > { %8488 = vmatpush3.msk.msra.mxu1 %vm5546_vm7, %v7696_v44 }
 0x9ac   : > { %8490 = vmatmul.mubr.msk.f32.vlgmr.msra.gmra.mrb[14].mxu1 %vm4145_vm15, %v6725_v17  ;;  %9385 = vmatprep.subr.bf16.mxu1 %v9560_v8 }
 0x9ad   : > { %9387 = vmatpush3.bf16.msra.mxu1 %v9386_v10  ;;  %8518 = vmatprep.mubr.msk.f32.mxu1 %vm9561_vm1, %v12031_v20 }
 0x9ae   : > { %9388 = vmatprep.subr.bf16.mxu1 %v9560_v8 }
 0x9b1   : > { %9390 = vmatpush3.bf16.msra.mxu1 %v9389_v45 }
 0x9b2   : > { %9391 = vmatprep.subr.bf16.mxu1 %v9560_v8 }
 0x9b5   : > { %9393 = vmatpush3.bf16.msra.mxu1 %v9392_v63 }
 0x9b6   : > { %9394 = vmatprep.subr.bf16.mxu1 %v9560_v8 }
 0x9b9   : > { %9396 = vmatpush3.bf16.msra.mxu1 %v9395_v14 }
 0x9ba   : > { %9397 = vmatprep.subr.bf16.mxu1 %v9560_v8 }
 0x9bd   : > { %9399 = vmatpush3.bf16.msra.mxu1 %v9398_v62 }
 0x9be   : > { %9400 = vmatprep.subr.bf16.mxu1 %v9560_v8 }
 0x9c1   : > { %9402 = vmatpush3.bf16.msra.mxu1 %v9401_v24 }
 0x9c2   : > { %8516 = vmatprep.subr.mxu1 %v12031_v20 }
 0x9c5   : > { %8517 = vmatpush3.msk.msra.mxu1 %vm5546_vm7, %v7711_v18 }
 0x9c6   : > { %8519 = vmatmul.mubr.msk.f32.vlgmr.msra.gmra.mrb[14].mxu1 %vm4145_vm15, %v6817_v41  ;;  %9403 = vmatprep.subr.bf16.mxu1 %v9560_v8 }
 0x9c7   : > { %9405 = vmatpush3.bf16.msra.mxu1 %v9404_v59  ;;  %8547 = vmatprep.mubr.msk.f32.mxu1 %vm9561_vm1, %v12031_v20 }
 0x9c8   : > { %9406 = vmatprep.subr.bf16.mxu1 %v9560_v8 }
 0x9cb   : > { %9408 = vmatpush3.bf16.msra.mxu1 %v9407_v37 }
 0x9cc   : > { %9409 = vmatprep.subr.bf16.mxu1 %v9560_v8 }
 0x9cf   : > { %9411 = vmatpush3.bf16.msra.mxu1 %v9410_v46 }
 0x9d0   : > { %9412 = vmatprep.subr.bf16.mxu1 %v9560_v8 }
 0x9d3   : > { %9414 = vmatpush3.bf16.msra.mxu1 %v9413_v29 }
 0x9d4   : > { %9415 = vmatprep.subr.bf16.mxu1 %v9560_v8 }
 0x9d7   : > { %9417 = vmatpush3.bf16.msra.mxu1 %v9416_v21 }
 0x9d8   : > { %9418 = vmatprep.subr.bf16.mxu1 %v9560_v8  ;;  %v7011_v8 = vld [vmem:[%s13203_s11 + $0x38] sm:$0xff] }
 0x9d9   : > { %v9431_v38 = vpack.c.bf16 %v7011_v8, %v7010_v51 }
 0x9db   : > { %9420 = vmatpush3.bf16.msra.mxu1 %v9419_v47  ;;  %9432 = vmatpush3.bf16.msra.mxu0 %v9431_v38 }
 0x9dc   : > { %8545 = vmatprep.subr.mxu1 %v12031_v20  ;;  %v5528_v20 = vld [vmem:[%s13202_s10] sm:$0x1] }
 0x9df   : > { %8546 = vmatpush3.msk.msra.mxu1 %vm5546_vm7, %v7726_v42 }
 0x9e0   : > { %8548 = vmatmul.mubr.msk.f32.vlgmr.msra.gmra.mrb[14].mxu1 %vm4145_vm15, %v6909_v34  ;;  %vm7013_vm15 = vcmask 523264  }
 0xab3   : > { %v6996_v55 = vpop.f32.mrb[14].mxu1 }
 0xab4   : > { %v9465_v35 = vadd.f32 %v6996_v55, %v5528_v20  ;;  %v8549_v16 = vpop.f32.mrb[15].mxu1 }
 0xab6   : > { %vm7001_vm9 = vcmp.gt.f32.partialorder %v9465_v35, 0.0  ;;  %v7002_v3 = vmul.f32 0.01, %v9465_v35 }
 0xab8   : > { %v7003_v48 = vsel %vm7001_vm9, %v9465_v35, %v7002_v3 }
 0xab9   : > { %8567 = vmatmul.mubr.msk.f32.vlgmr.msra.gmra.mrb[36].mxu0 %vm7013_vm15, %v7003_v48 }
 0xb8c   : > { %v7083_v1 = vpop.f32.mrb[36].mxu0 }
 0xb8d   : > { %v7084_v54 = vadd.f32 %v7083_v1, %v7012_v30  ;;  %v8568_v39 = vpop.f32.mrb[37].mxu0 }
 0xb8f   : > { %v7088_v4 = vmul.f32 %v7087_v31, %v7084_v54  ;;  %7095 = vst.msk [vmem:[%s525_s19] sm:$0x1] %vm7089_vm11, %v7084_v54 }
 0xb91   : > { %v7090_v19 = vsel %vm7089_vm11, %v7088_v4, 0.0 }
 0xb92   : > { %7091 = vadd.xlane.f32.xlu1 %v7090_v19 }
 0xc1f   : > { %v7092_v6 = vpop.xlane.xlu1 %7091 }
 0xc20   : > { %v7094_v40 = vadd.f32 %v7093_v5, %v7092_v6 }
 0xc22   : > { %7097 = vst.msk [vmem:[%s528_s22] sm:$0x1] %vm7096_vm12, %v7094_v40 }
 0xc23 PF: > { %s29_s23 = sadd.s32 1, %s9548_s23  }
 0xc24   : > { %p26_p4 = scmp.ge.s32.totalorder %s29_s23, 6  }
 0xc26   :  { %28 = sbr.rel (!%p26_p4) target bundleno = 3 (0x3), region = 145 }

</bundles_post_ra>
